<compile_context>
chip_gen: v7x
topology: tpu7x:2x2x1
jax: 0.10.0
libtpu: 0.0.40
codegen_flags: <defaults>
</compile_context>

<pallas_src>
import functools

import jax
import jax.numpy as jnp
from jax.experimental import pallas as pl
from jax.experimental.pallas import tpu as pltpu


VMEM_LIMIT = 32 * 1024 * 1024     # < v7x's 64 MiB physical VMEM, > default scoped limits

FC1_K = 16 * 53 * 53              # 44944 features entering fc1
FC1_TK = 11264                    # fc1 K tile -> 4 reduction steps, ~5.8 MB bf16 / block
FC1_KPAD = -(-FC1_K // FC1_TK) * FC1_TK   # 45056 (112 zero-padded rows)


# ----------------------------------------------------------------------------
# Kernel 1: fused conv (valid, stride 1) + PReLU + 2x2/2 max-pool, per image
# ----------------------------------------------------------------------------
def _conv_prelu_pool_kernel(x_ref, w_ref, b_ref, sel_ref, alpha_ref, o_ref,
                            slab_ref, *, KH, KW, C, Wo, Wp, tp, n_src):
    """One grid step = `tp` pooled output rows of one image.

    x_ref    : (H, C, W)            activation, channel-before-width layout
    w_ref    : (KH, Cout, KW*C)     weights; slab order (dw, c)
    b_ref    : (Cout, 1)            bias
    sel_ref  : (Wo, 2*Wp)           [even | odd] column selectors (width pool)
    alpha_ref: SMEM (1,)            PReLU slope
    o_ref    : (tp, Cout, Wp)       pooled rows written by this step
    slab_ref : VMEM (n_src, KW*C, Wo)  per-source-row dw-shifted patch slabs
    """
    i = pl.program_id(1)
    alpha = alpha_ref[0]
    row0 = i * (2 * tp)

    # Phase 1: build each source row's KW shifted copies exactly once.
    def build(ls, carry):
        src = x_ref[row0 + ls]                                      # (C, W)
        slab_ref[ls] = jnp.concatenate(
            [src[:, dw:dw + Wo] for dw in range(KW)], axis=0)       # (KW*C, Wo)
        return carry

    jax.lax.fori_loop(0, n_src, build, 0)

    bias = b_ref[...]                                               # (Cout, 1)
    sel = sel_ref[...]                                              # (Wo, 2*Wp)

    # Phase 2: each pooled row = 2 conv rows (KH accumulated matmuls each),
    # PReLU, H-pool (max of the pair), W-pool (selector matmul + max halves).
    def body(j, carry):
        base = 2 * j

        def conv_row(off):
            acc = jnp.zeros((w_ref.shape[1], Wo), jnp.float32)
            for dh in range(KH):
                acc += jnp.dot(w_ref[dh], slab_ref[base + off + dh],
                               preferred_element_type=jnp.float32)
            y = acc + bias
            return jnp.where(y >= 0.0, y, alpha * y)                # PReLU

        hm = jnp.maximum(conv_row(0), conv_row(1))                  # H-direction pool
        pw = jnp.dot(hm, sel, preferred_element_type=jnp.float32)   # (Cout, 2*Wp)
        o_ref[j] = jnp.maximum(pw[:, :Wp], pw[:, Wp:])              # W-direction pool
        return carry

    jax.lax.fori_loop(0, tp, body, 0)


def conv_prelu_pool(x, wk, bias, alpha, sel, *, KH, KW, tp):
    """x: (B, H, C, W) f32 -> (B, (H-KH+1)//2, Cout, (W-KW+1)//2) f32."""
    B, H, C, W = x.shape
    KHw, Cout, KWC = wk.shape
    assert KHw == KH and KWC == KW * C, (wk.shape, KH, KW, C)
    Ho, Wo = H - KH + 1, W - KW + 1
    Hp, Wp = Ho // 2, Wo // 2
    assert Hp % tp == 0, (Hp, tp)
    n_src = 2 * tp + KH - 1

    kernel = functools.partial(_conv_prelu_pool_kernel, KH=KH, KW=KW, C=C,
                               Wo=Wo, Wp=Wp, tp=tp, n_src=n_src)

    return pl.pallas_call(
        kernel,
        out_shape=jax.ShapeDtypeStruct((B, Hp, Cout, Wp), jnp.float32),
        grid_spec=pltpu.PrefetchScalarGridSpec(
            num_scalar_prefetch=0,
            grid=(B, Hp // tp),
            in_specs=[
                pl.BlockSpec((None, H, C, W), lambda b, i: (b, 0, 0, 0)),
                pl.BlockSpec((KH, Cout, KWC), lambda b, i: (0, 0, 0)),
                pl.BlockSpec((Cout, 1), lambda b, i: (0, 0)),
                pl.BlockSpec((Wo, 2 * Wp), lambda b, i: (0, 0)),
                pl.BlockSpec(memory_space=pltpu.MemorySpace.SMEM),
            ],
            out_specs=pl.BlockSpec((None, tp, Cout, Wp),
                                   lambda b, i: (b, i, 0, 0)),
            scratch_shapes=[pltpu.VMEM((n_src, KW * C, Wo), jnp.float32)],
        ),
        compiler_params=pltpu.CompilerParams(
            dimension_semantics=("parallel", "parallel"),
            vmem_limit_bytes=VMEM_LIMIT),
    )(x, wk, bias, sel, alpha)


# ----------------------------------------------------------------------------
# Kernel 2: whole fc head in one call
#   fc1 (bf16 K-streamed, f32 acc) + PReLU + fc2 + PReLU + fc3 in the epilogue
# ----------------------------------------------------------------------------
def _fc_stack_kernel(a_ref, w1_ref, b1_ref, w2_ref, b2_ref, w3_ref, b3_ref,
                     alpha_ref, o_ref, acc_ref):
    k = pl.program_id(0)

    @pl.when(k == 0)
    def _():
        acc_ref[...] = jnp.zeros_like(acc_ref)

    # fc1 partial product: bf16 x bf16 streamed weight, f32 accumulation.
    acc_ref[...] += jnp.dot(a_ref[...], w1_ref[...],
                            preferred_element_type=jnp.float32)

    @pl.when(k == pl.num_programs(0) - 1)
    def _():
        y = acc_ref[...] + b1_ref[...]
        y = jnp.where(y >= 0.0, y, alpha_ref[0] * y)                 # PReLU 3
        y = jnp.dot(y, w2_ref[...], preferred_element_type=jnp.float32) + b2_ref[...]
        y = jnp.where(y >= 0.0, y, alpha_ref[1] * y)                 # PReLU 4
        y = jnp.dot(y, w3_ref[...], preferred_element_type=jnp.float32) + b3_ref[...]
        o_ref[...] = y


def fc_stack(feat, kp):
    """feat: (B, FC1_KPAD) bf16 -> (B, 128) f32. Whole fc head in one call."""
    B, Kp = feat.shape
    assert Kp == FC1_KPAD and Kp % FC1_TK == 0, (Kp, FC1_TK)
    n_out = kp["wf3"].shape[1]

    return pl.pallas_call(
        _fc_stack_kernel,
        out_shape=jax.ShapeDtypeStruct((B, n_out), jnp.float32),
        grid_spec=pltpu.PrefetchScalarGridSpec(
            num_scalar_prefetch=0,
            grid=(Kp // FC1_TK,),
            in_specs=[
                pl.BlockSpec((B, FC1_TK), lambda k: (0, k)),
                pl.BlockSpec((FC1_TK, 256), lambda k: (k, 0)),
                pl.BlockSpec((1, 256), lambda k: (0, 0)),
                pl.BlockSpec((256, 256), lambda k: (0, 0)),
                pl.BlockSpec((1, 256), lambda k: (0, 0)),
                pl.BlockSpec((256, n_out), lambda k: (0, 0)),
                pl.BlockSpec((1, n_out), lambda k: (0, 0)),
                pl.BlockSpec(memory_space=pltpu.MemorySpace.SMEM),
            ],
            out_specs=pl.BlockSpec((B, n_out), lambda k: (0, 0)),
            scratch_shapes=[pltpu.VMEM((B, 256), jnp.float32)],
        ),
        compiler_params=pltpu.CompilerParams(
            dimension_semantics=("arbitrary",),
            vmem_limit_bytes=VMEM_LIMIT),
    )(feat, kp["wf1"], kp["bf1"], kp["wf2"], kp["bf2"], kp["wf3"], kp["bf3"],
      kp["afc"])


# ----------------------------------------------------------------------------
# Full forward pass (matches the PyTorch module)
# ----------------------------------------------------------------------------
def embedding_net_forward(x_nchw, kp):
    x = x_nchw.astype(jnp.float32)
    B, C, H, W = x.shape
    # pad channels to a full sublane (3 -> 8) and relayout NCHW -> (B, H, C, W);
    # lane dim stays W, every im2col slab store becomes sublane-aligned.
    x = jnp.pad(x, ((0, 0), (0, 8 - C), (0, 0), (0, 0)))
    x = jnp.transpose(x, (0, 2, 1, 3))
    x = conv_prelu_pool(x, kp["w1"], kp["b1"], kp["a1"], kp["sel1"],
                        KH=5, KW=5, tp=55)                           # (B,110,32,110)
    x = conv_prelu_pool(x, kp["w2"], kp["b2"], kp["a2"], kp["sel2"],
                        KH=5, KW=5, tp=53)                           # (B,53,16,53)
    # flatten in (h, c, w) order; fc1's weight rows were permuted once to match
    # torch's NCHW output.view(B, -1). bf16 stream, K zero-padded for tiling.
    feat = x.reshape(B, -1)
    feat = jnp.pad(feat, ((0, 0), (0, FC1_KPAD - FC1_K))).astype(jnp.bfloat16)
    return fc_stack(feat, kp)                                        # (B, 128)


# ----------------------------------------------------------------------------
# Parameters: PyTorch layouts -> kernel layouts (done once, not per forward)
# ----------------------------------------------------------------------------
def init_torch_params(key):
    ks = jax.random.split(key, 10)

    def rnd(k, shape, scale):
        return scale * jax.random.normal(k, shape, jnp.float32)

    return {
        # PyTorch layouts: conv (Cout, Cin, KH, KW), linear (out, in)
        "conv1_w": rnd(ks[0], (32, 3, 5, 5), 0.05), "conv1_b": rnd(ks[1], (32,), 0.05),
        "prelu1_a": 0.25,
        "conv2_w": rnd(ks[2], (16, 32, 5, 5), 0.03), "conv2_b": rnd(ks[3], (16,), 0.03),
        "prelu2_a": 0.25,
        "fc1_w": rnd(ks[4], (256, FC1_K), 0.005), "fc1_b": rnd(ks[5], (256,), 0.01),
        "prelu3_a": 0.25,
        "fc2_w": rnd(ks[6], (256, 256), 0.05), "fc2_b": rnd(ks[7], (256,), 0.05),
        "prelu4_a": 0.25,
        "fc3_w": rnd(ks[8], (128, 256), 0.05), "fc3_b": rnd(ks[9], (128,), 0.05),
    }


def prepare_params(p):
    def conv_weight(w, cpad):
        # (Cout, Cin, KH, KW) -> (KH, Cout, KW*cpad); slab order (dw, c),
        # channels zero-padded to the sublane-aligned input channel count.
        cout, cin, kh, kw = w.shape
        wk = jnp.zeros((kh, cout, kw, cpad), jnp.float32)
        wk = wk.at[..., :cin].set(jnp.transpose(w, (2, 0, 3, 1)))
        return wk.reshape(kh, cout, kw * cpad)

    def pool_selector(wo):
        # fused [even | odd] column selector for the width-direction max-pool
        wp = wo // 2
        rr = jnp.arange(wo)[:, None]
        cc = jnp.arange(wp)[None, :]
        even = (rr == 2 * cc).astype(jnp.float32)
        odd = (rr == 2 * cc + 1).astype(jnp.float32)
        return jnp.concatenate([even, odd], axis=1)                  # (Wo, 2*Wp)

    # fc1 rows are (c, h, w) in torch's flatten; our feature map flattens (h, c, w).
    # Permute the rows once, pad K for the tiling, and store the stream in bf16.
    c2, hp2, wp2 = 16, 53, 53
    wf1 = p["fc1_w"].reshape(256, c2, hp2, wp2)
    wf1 = jnp.transpose(wf1, (2, 1, 3, 0)).reshape(c2 * hp2 * wp2, 256)
    wf1 = jnp.pad(wf1, ((0, FC1_KPAD - FC1_K), (0, 0))).astype(jnp.bfloat16)

    return {
        "w1": conv_weight(p["conv1_w"], 8),
        "b1": p["conv1_b"].reshape(-1, 1).astype(jnp.float32),
        "a1": jnp.full((1,), p["prelu1_a"], jnp.float32),
        "w2": conv_weight(p["conv2_w"], 32),
        "b2": p["conv2_b"].reshape(-1, 1).astype(jnp.float32),
        "a2": jnp.full((1,), p["prelu2_a"], jnp.float32),
        "sel1": pool_selector(220), "sel2": pool_selector(106),
        "wf1": wf1,
        "bf1": p["fc1_b"].reshape(1, 256).astype(jnp.float32),
        "wf2": jnp.transpose(p["fc2_w"]).astype(jnp.float32),
        "bf2": p["fc2_b"].reshape(1, 256).astype(jnp.float32),
        "wf3": jnp.transpose(p["fc3_w"]).astype(jnp.float32),
        "bf3": p["fc3_b"].reshape(1, 128).astype(jnp.float32),
        "afc": jnp.array([p["prelu3_a"], p["prelu4_a"]], jnp.float32),
    }


# ----------------------------------------------------------------------------
# Pure-JAX reference (f32) for a tolerance check (fc1 stream is bf16 in-kernel)
# ----------------------------------------------------------------------------
def reference_forward(x, p):
    x = x.astype(jnp.float32)

    def prelu(v, a):
        return jnp.where(v >= 0.0, v, a * v)

    def block(v, w, b, a):
        v = jax.lax.conv_general_dilated(
            v, w, (1, 1), "VALID", dimension_numbers=("NCHW", "OIHW", "NCHW"))
        v = prelu(v + b[None, :, None, None], a)
        return jax.lax.reduce_window(v, -jnp.inf, jax.lax.max,
                                     (1, 1, 2, 2), (1, 1, 2, 2), "VALID")

    v = block(x, p["conv1_w"], p["conv1_b"], p["prelu1_a"])
    v = block(v, p["conv2_w"], p["conv2_b"], p["prelu2_a"])
    f = v.reshape(v.shape[0], -1)
    f = prelu(f @ p["fc1_w"].T + p["fc1_b"], p["prelu3_a"])
    f = prelu(f @ p["fc2_w"].T + p["fc2_b"], p["prelu4_a"])
    return f @ p["fc3_w"].T + p["fc3_b"]


if __name__ == "__main__":
    key = jax.random.PRNGKey(0)
    pkey, xkey = jax.random.split(key)
    torch_params = init_torch_params(pkey)
    params = prepare_params(torch_params)
    # batch=2; spatial must be 224x224 so the hard-coded Linear(16*53*53, .) matches.
    x = jax.random.normal(xkey, (2, 3, 224, 224), jnp.float32)

    fwd = jax.jit(embedding_net_forward)
    out = jax.block_until_ready(fwd(x, params))

    assert out.shape == (2, 128), out.shape
    assert bool(jnp.all(jnp.isfinite(out)))

    ref = jax.jit(reference_forward)(x, torch_params)
    err = float(jnp.max(jnp.abs(out - ref)))
    scale = float(jnp.max(jnp.abs(ref)))
    # fc1 streams its weight/activation in bf16 (f32 accumulation): tolerance check.
    assert err <= 5e-2 * scale + 5e-2, (err, scale)

    print("KERNEL_OK")
</pallas_src>

<mosaic_0001>
module attributes {stable_mosaic.version = 11 : i64} {
  func.func @_conv_prelu_pool_kernel(%arg0: i32, %arg1: i32, %arg2: memref<1x224x8x224xf32, #tpu.memory_space<vmem>>, %arg3: memref<5x32x40xf32, #tpu.memory_space<vmem>>, %arg4: memref<32x1xf32, #tpu.memory_space<vmem>>, %arg5: memref<220x220xf32, #tpu.memory_space<vmem>>, %arg6: memref<1xf32, #tpu.memory_space<smem>>, %arg7: memref<1x55x32x110xf32, #tpu.memory_space<vmem>>, %arg8: memref<114x40x220xf32, #tpu.memory_space<vmem>>) attributes {dimension_semantics = [#tpu.dimension_semantics<parallel>, #tpu.dimension_semantics<parallel>], iteration_bounds = array<i64: 2, 2>, scalar_prefetch = 0 : i64, scratch_operands = 1 : i64, tpu.core_type = #tpu.core_type<tc>, window_params = [{transform_indices = @transform_0, window_bounds = array<i64: 1, 224, 8, 224>}, {pipeline_mode = #tpu.pipeline_mode<synchronous>, transform_indices = @transform_1, window_bounds = array<i64: 5, 32, 40>}, {pipeline_mode = #tpu.pipeline_mode<synchronous>, transform_indices = @transform_2, window_bounds = array<i64: 32, 1>}, {pipeline_mode = #tpu.pipeline_mode<synchronous>, transform_indices = @transform_3, window_bounds = array<i64: 220, 220>}, {transform_indices = @transform_4, window_bounds = array<i64: 1>}, {transform_indices = @transform_5, window_bounds = array<i64: 1, 55, 32, 110>}]} {
    %c0 = arith.constant 0 : index
    %0 = memref.load %arg6[%c0] : memref<1xf32, #tpu.memory_space<smem>>
    %c110_i32 = arith.constant 110 : i32
    %1 = arith.muli %arg1, %c110_i32 : i32
    %c0_i32 = arith.constant 0 : i32
    %c114_i32 = arith.constant 114 : i32
    %2 = arith.addi %c0_i32, %c114_i32 : i32
    %c1_i32 = arith.constant 1 : i32
    scf.for %arg9 = %c0_i32 to %2 step %c1_i32  : i32 {
      %6 = arith.addi %1, %arg9 : i32
      %c0_8 = arith.constant 0 : index
      %7 = arith.index_cast %6 : i32 to index
      %c0_9 = arith.constant 0 : index
      %c0_10 = arith.constant 0 : index
      %8 = vector.load %arg2[%c0_8, %7, %c0_9, %c0_10] : memref<1x224x8x224xf32, #tpu.memory_space<vmem>>, vector<1x1x8x224xf32>
      %9 = vector.shape_cast %8 : vector<1x1x8x224xf32> to vector<8x224xf32>
      %10 = vector.extract_strided_slice %9 {offsets = [0, 0], sizes = [8, 220], strides = [1, 1]} : vector<8x224xf32> to vector<8x220xf32>
      %11 = vector.extract_strided_slice %9 {offsets = [0, 1], sizes = [8, 220], strides = [1, 1]} : vector<8x224xf32> to vector<8x220xf32>
      %12 = vector.extract_strided_slice %9 {offsets = [0, 2], sizes = [8, 220], strides = [1, 1]} : vector<8x224xf32> to vector<8x220xf32>
      %13 = vector.extract_strided_slice %9 {offsets = [0, 3], sizes = [8, 220], strides = [1, 1]} : vector<8x224xf32> to vector<8x220xf32>
      %14 = vector.extract_strided_slice %9 {offsets = [0, 4], sizes = [8, 220], strides = [1, 1]} : vector<8x224xf32> to vector<8x220xf32>
      %15 = tpu.concatenate %10, %11, %12, %13, %14 in 0 : vector<8x220xf32>, vector<8x220xf32>, vector<8x220xf32>, vector<8x220xf32>, vector<8x220xf32> -> vector<40x220xf32>
      %16 = arith.index_cast %arg9 : i32 to index
      %c0_11 = arith.constant 0 : index
      %c0_12 = arith.constant 0 : index
      %17 = vector.load %arg8[%16, %c0_11, %c0_12] : memref<114x40x220xf32, #tpu.memory_space<vmem>>, vector<1x40x220xf32>
      %18 = vector.shape_cast %17 : vector<1x40x220xf32> to vector<40x220xf32>
      %19 = vector.shape_cast %15 : vector<40x220xf32> to vector<1x40x220xf32>
      tpu.vector_store %arg8[%16, %c0_11, %c0_12], %19 {strides = array<i32>} : memref<114x40x220xf32, #tpu.memory_space<vmem>>, vector<1x40x220xf32>,
    }
    %c114_i32_0 = arith.constant 114 : i32
    %c0_1 = arith.constant 0 : index
    %c0_2 = arith.constant 0 : index
    %3 = vector.load %arg4[%c0_1, %c0_2] : memref<32x1xf32, #tpu.memory_space<vmem>>, vector<32x1xf32>
    %c0_3 = arith.constant 0 : index
    %c0_4 = arith.constant 0 : index
    %4 = vector.load %arg5[%c0_3, %c0_4] : memref<220x220xf32, #tpu.memory_space<vmem>>, vector<220x220xf32>
    %c0_i32_5 = arith.constant 0 : i32
    %c55_i32 = arith.constant 55 : i32
    %5 = arith.addi %c0_i32_5, %c55_i32 : i32
    %c1_i32_6 = arith.constant 1 : i32
    scf.for %arg9 = %c0_i32_5 to %5 step %c1_i32_6  : i32 {
      %c2_i32 = arith.constant 2 : i32
      %6 = arith.muli %c2_i32, %arg9 : i32
      %cst = arith.constant 0.000000e+00 : f32
      %7 = vector.broadcast %cst : f32 to vector<32x220xf32>
      %c0_8 = arith.constant 0 : index
      %c0_9 = arith.constant 0 : index
      %c0_10 = arith.constant 0 : index
      %8 = vector.load %arg3[%c0_8, %c0_9, %c0_10] : memref<5x32x40xf32, #tpu.memory_space<vmem>>, vector<1x32x40xf32>
      %9 = vector.shape_cast %8 : vector<1x32x40xf32> to vector<32x40xf32>
      %c0_i32_11 = arith.constant 0 : i32
      %10 = arith.addi %6, %c0_i32_11 : i32
      %c0_i32_12 = arith.constant 0 : i32
      %11 = arith.addi %10, %c0_i32_12 : i32
      %12 = arith.index_cast %11 : i32 to index
      %c0_13 = arith.constant 0 : index
      %c0_14 = arith.constant 0 : index
      %13 = vector.load %arg8[%12, %c0_13, %c0_14] : memref<114x40x220xf32, #tpu.memory_space<vmem>>, vector<1x40x220xf32>
      %14 = vector.shape_cast %13 : vector<1x40x220xf32> to vector<40x220xf32>
      %cst_15 = arith.constant dense<0.000000e+00> : vector<32x220xf32>
      %15 = tpu.matmul %9, %14, %cst_15 {dimension_numbers = #tpu.dot_dimension_numbers<[1], [0], [0], [1], [0, 0, 1, 1], [], []>} : vector<32x40xf32>, vector<40x220xf32>, vector<32x220xf32> -> vector<32x220xf32>
      %16 = arith.addf %7, %15 : vector<32x220xf32>
      %c1 = arith.constant 1 : index
      %c0_16 = arith.constant 0 : index
      %c0_17 = arith.constant 0 : index
      %17 = vector.load %arg3[%c1, %c0_16, %c0_17] : memref<5x32x40xf32, #tpu.memory_space<vmem>>, vector<1x32x40xf32>
      %18 = vector.shape_cast %17 : vector<1x32x40xf32> to vector<32x40xf32>
      %c0_i32_18 = arith.constant 0 : i32
      %19 = arith.addi %6, %c0_i32_18 : i32
      %c1_i32_19 = arith.constant 1 : i32
      %20 = arith.addi %19, %c1_i32_19 : i32
      %21 = arith.index_cast %20 : i32 to index
      %c0_20 = arith.constant 0 : index
      %c0_21 = arith.constant 0 : index
      %22 = vector.load %arg8[%21, %c0_20, %c0_21] : memref<114x40x220xf32, #tpu.memory_space<vmem>>, vector<1x40x220xf32>
      %23 = vector.shape_cast %22 : vector<1x40x220xf32> to vector<40x220xf32>
      %cst_22 = arith.constant dense<0.000000e+00> : vector<32x220xf32>
      %24 = tpu.matmul %18, %23, %cst_22 {dimension_numbers = #tpu.dot_dimension_numbers<[1], [0], [0], [1], [0, 0, 1, 1], [], []>} : vector<32x40xf32>, vector<40x220xf32>, vector<32x220xf32> -> vector<32x220xf32>
      %25 = arith.addf %16, %24 : vector<32x220xf32>
      %c2 = arith.constant 2 : index
      %c0_23 = arith.constant 0 : index
      %c0_24 = arith.constant 0 : index
      %26 = vector.load %arg3[%c2, %c0_23, %c0_24] : memref<5x32x40xf32, #tpu.memory_space<vmem>>, vector<1x32x40xf32>
      %27 = vector.shape_cast %26 : vector<1x32x40xf32> to vector<32x40xf32>
      %c0_i32_25 = arith.constant 0 : i32
      %28 = arith.addi %6, %c0_i32_25 : i32
      %c2_i32_26 = arith.constant 2 : i32
      %29 = arith.addi %28, %c2_i32_26 : i32
      %30 = arith.index_cast %29 : i32 to index
      %c0_27 = arith.constant 0 : index
      %c0_28 = arith.constant 0 : index
      %31 = vector.load %arg8[%30, %c0_27, %c0_28] : memref<114x40x220xf32, #tpu.memory_space<vmem>>, vector<1x40x220xf32>
      %32 = vector.shape_cast %31 : vector<1x40x220xf32> to vector<40x220xf32>
      %cst_29 = arith.constant dense<0.000000e+00> : vector<32x220xf32>
      %33 = tpu.matmul %27, %32, %cst_29 {dimension_numbers = #tpu.dot_dimension_numbers<[1], [0], [0], [1], [0, 0, 1, 1], [], []>} : vector<32x40xf32>, vector<40x220xf32>, vector<32x220xf32> -> vector<32x220xf32>
      %34 = arith.addf %25, %33 : vector<32x220xf32>
      %c3 = arith.constant 3 : index
      %c0_30 = arith.constant 0 : index
      %c0_31 = arith.constant 0 : index
      %35 = vector.load %arg3[%c3, %c0_30, %c0_31] : memref<5x32x40xf32, #tpu.memory_space<vmem>>, vector<1x32x40xf32>
      %36 = vector.shape_cast %35 : vector<1x32x40xf32> to vector<32x40xf32>
      %c0_i32_32 = arith.constant 0 : i32
      %37 = arith.addi %6, %c0_i32_32 : i32
      %c3_i32 = arith.constant 3 : i32
      %38 = arith.addi %37, %c3_i32 : i32
      %39 = arith.index_cast %38 : i32 to index
      %c0_33 = arith.constant 0 : index
      %c0_34 = arith.constant 0 : index
      %40 = vector.load %arg8[%39, %c0_33, %c0_34] : memref<114x40x220xf32, #tpu.memory_space<vmem>>, vector<1x40x220xf32>
      %41 = vector.shape_cast %40 : vector<1x40x220xf32> to vector<40x220xf32>
      %cst_35 = arith.constant dense<0.000000e+00> : vector<32x220xf32>
      %42 = tpu.matmul %36, %41, %cst_35 {dimension_numbers = #tpu.dot_dimension_numbers<[1], [0], [0], [1], [0, 0, 1, 1], [], []>} : vector<32x40xf32>, vector<40x220xf32>, vector<32x220xf32> -> vector<32x220xf32>
      %43 = arith.addf %34, %42 : vector<32x220xf32>
      %c4 = arith.constant 4 : index
      %c0_36 = arith.constant 0 : index
      %c0_37 = arith.constant 0 : index
      %44 = vector.load %arg3[%c4, %c0_36, %c0_37] : memref<5x32x40xf32, #tpu.memory_space<vmem>>, vector<1x32x40xf32>
      %45 = vector.shape_cast %44 : vector<1x32x40xf32> to vector<32x40xf32>
      %c0_i32_38 = arith.constant 0 : i32
      %46 = arith.addi %6, %c0_i32_38 : i32
      %c4_i32 = arith.constant 4 : i32
      %47 = arith.addi %46, %c4_i32 : i32
      %48 = arith.index_cast %47 : i32 to index
      %c0_39 = arith.constant 0 : index
      %c0_40 = arith.constant 0 : index
      %49 = vector.load %arg8[%48, %c0_39, %c0_40] : memref<114x40x220xf32, #tpu.memory_space<vmem>>, vector<1x40x220xf32>
      %50 = vector.shape_cast %49 : vector<1x40x220xf32> to vector<40x220xf32>
      %cst_41 = arith.constant dense<0.000000e+00> : vector<32x220xf32>
      %51 = tpu.matmul %45, %50, %cst_41 {dimension_numbers = #tpu.dot_dimension_numbers<[1], [0], [0], [1], [0, 0, 1, 1], [], []>} : vector<32x40xf32>, vector<40x220xf32>, vector<32x220xf32> -> vector<32x220xf32>
      %52 = arith.addf %43, %51 : vector<32x220xf32>
      %53 = vector.broadcast %3 : vector<32x1xf32> to vector<32x220xf32>
      %54 = arith.addf %52, %53 : vector<32x220xf32>
      %cst_42 = arith.constant 0.000000e+00 : f32
      %55 = vector.broadcast %cst_42 : f32 to vector<32x220xf32>
      %56 = arith.cmpf oge, %54, %55 : vector<32x220xf32>
      %57 = vector.broadcast %0 : f32 to vector<32x220xf32>
      %58 = arith.mulf %57, %54 : vector<32x220xf32>
      %59 = arith.select %56, %54, %58 : vector<32x220xi1>, vector<32x220xf32>
      %cst_43 = arith.constant 0.000000e+00 : f32
      %60 = vector.broadcast %cst_43 : f32 to vector<32x220xf32>
      %c0_44 = arith.constant 0 : index
      %c0_45 = arith.constant 0 : index
      %c0_46 = arith.constant 0 : index
      %61 = vector.load %arg3[%c0_44, %c0_45, %c0_46] : memref<5x32x40xf32, #tpu.memory_space<vmem>>, vector<1x32x40xf32>
      %62 = vector.shape_cast %61 : vector<1x32x40xf32> to vector<32x40xf32>
      %c1_i32_47 = arith.constant 1 : i32
      %63 = arith.addi %6, %c1_i32_47 : i32
      %c0_i32_48 = arith.constant 0 : i32
      %64 = arith.addi %63, %c0_i32_48 : i32
      %65 = arith.index_cast %64 : i32 to index
      %c0_49 = arith.constant 0 : index
      %c0_50 = arith.constant 0 : index
      %66 = vector.load %arg8[%65, %c0_49, %c0_50] : memref<114x40x220xf32, #tpu.memory_space<vmem>>, vector<1x40x220xf32>
      %67 = vector.shape_cast %66 : vector<1x40x220xf32> to vector<40x220xf32>
      %cst_51 = arith.constant dense<0.000000e+00> : vector<32x220xf32>
      %68 = tpu.matmul %62, %67, %cst_51 {dimension_numbers = #tpu.dot_dimension_numbers<[1], [0], [0], [1], [0, 0, 1, 1], [], []>} : vector<32x40xf32>, vector<40x220xf32>, vector<32x220xf32> -> vector<32x220xf32>
      %69 = arith.addf %60, %68 : vector<32x220xf32>
      %c1_52 = arith.constant 1 : index
      %c0_53 = arith.constant 0 : index
      %c0_54 = arith.constant 0 : index
      %70 = vector.load %arg3[%c1_52, %c0_53, %c0_54] : memref<5x32x40xf32, #tpu.memory_space<vmem>>, vector<1x32x40xf32>
      %71 = vector.shape_cast %70 : vector<1x32x40xf32> to vector<32x40xf32>
      %c1_i32_55 = arith.constant 1 : i32
      %72 = arith.addi %6, %c1_i32_55 : i32
      %c1_i32_56 = arith.constant 1 : i32
      %73 = arith.addi %72, %c1_i32_56 : i32
      %74 = arith.index_cast %73 : i32 to index
      %c0_57 = arith.constant 0 : index
      %c0_58 = arith.constant 0 : index
      %75 = vector.load %arg8[%74, %c0_57, %c0_58] : memref<114x40x220xf32, #tpu.memory_space<vmem>>, vector<1x40x220xf32>
      %76 = vector.shape_cast %75 : vector<1x40x220xf32> to vector<40x220xf32>
      %cst_59 = arith.constant dense<0.000000e+00> : vector<32x220xf32>
      %77 = tpu.matmul %71, %76, %cst_59 {dimension_numbers = #tpu.dot_dimension_numbers<[1], [0], [0], [1], [0, 0, 1, 1], [], []>} : vector<32x40xf32>, vector<40x220xf32>, vector<32x220xf32> -> vector<32x220xf32>
      %78 = arith.addf %69, %77 : vector<32x220xf32>
      %c2_60 = arith.constant 2 : index
      %c0_61 = arith.constant 0 : index
      %c0_62 = arith.constant 0 : index
      %79 = vector.load %arg3[%c2_60, %c0_61, %c0_62] : memref<5x32x40xf32, #tpu.memory_space<vmem>>, vector<1x32x40xf32>
      %80 = vector.shape_cast %79 : vector<1x32x40xf32> to vector<32x40xf32>
      %c1_i32_63 = arith.constant 1 : i32
      %81 = arith.addi %6, %c1_i32_63 : i32
      %c2_i32_64 = arith.constant 2 : i32
      %82 = arith.addi %81, %c2_i32_64 : i32
      %83 = arith.index_cast %82 : i32 to index
      %c0_65 = arith.constant 0 : index
      %c0_66 = arith.constant 0 : index
      %84 = vector.load %arg8[%83, %c0_65, %c0_66] : memref<114x40x220xf32, #tpu.memory_space<vmem>>, vector<1x40x220xf32>
      %85 = vector.shape_cast %84 : vector<1x40x220xf32> to vector<40x220xf32>
      %cst_67 = arith.constant dense<0.000000e+00> : vector<32x220xf32>
      %86 = tpu.matmul %80, %85, %cst_67 {dimension_numbers = #tpu.dot_dimension_numbers<[1], [0], [0], [1], [0, 0, 1, 1], [], []>} : vector<32x40xf32>, vector<40x220xf32>, vector<32x220xf32> -> vector<32x220xf32>
      %87 = arith.addf %78, %86 : vector<32x220xf32>
      %c3_68 = arith.constant 3 : index
      %c0_69 = arith.constant 0 : index
      %c0_70 = arith.constant 0 : index
      %88 = vector.load %arg3[%c3_68, %c0_69, %c0_70] : memref<5x32x40xf32, #tpu.memory_space<vmem>>, vector<1x32x40xf32>
      %89 = vector.shape_cast %88 : vector<1x32x40xf32> to vector<32x40xf32>
      %c1_i32_71 = arith.constant 1 : i32
      %90 = arith.addi %6, %c1_i32_71 : i32
      %c3_i32_72 = arith.constant 3 : i32
      %91 = arith.addi %90, %c3_i32_72 : i32
      %92 = arith.index_cast %91 : i32 to index
      %c0_73 = arith.constant 0 : index
      %c0_74 = arith.constant 0 : index
      %93 = vector.load %arg8[%92, %c0_73, %c0_74] : memref<114x40x220xf32, #tpu.memory_space<vmem>>, vector<1x40x220xf32>
      %94 = vector.shape_cast %93 : vector<1x40x220xf32> to vector<40x220xf32>
      %cst_75 = arith.constant dense<0.000000e+00> : vector<32x220xf32>
      %95 = tpu.matmul %89, %94, %cst_75 {dimension_numbers = #tpu.dot_dimension_numbers<[1], [0], [0], [1], [0, 0, 1, 1], [], []>} : vector<32x40xf32>, vector<40x220xf32>, vector<32x220xf32> -> vector<32x220xf32>
      %96 = arith.addf %87, %95 : vector<32x220xf32>
      %c4_76 = arith.constant 4 : index
      %c0_77 = arith.constant 0 : index
      %c0_78 = arith.constant 0 : index
      %97 = vector.load %arg3[%c4_76, %c0_77, %c0_78] : memref<5x32x40xf32, #tpu.memory_space<vmem>>, vector<1x32x40xf32>
      %98 = vector.shape_cast %97 : vector<1x32x40xf32> to vector<32x40xf32>
      %c1_i32_79 = arith.constant 1 : i32
      %99 = arith.addi %6, %c1_i32_79 : i32
      %c4_i32_80 = arith.constant 4 : i32
      %100 = arith.addi %99, %c4_i32_80 : i32
      %101 = arith.index_cast %100 : i32 to index
      %c0_81 = arith.constant 0 : index
      %c0_82 = arith.constant 0 : index
      %102 = vector.load %arg8[%101, %c0_81, %c0_82] : memref<114x40x220xf32, #tpu.memory_space<vmem>>, vector<1x40x220xf32>
      %103 = vector.shape_cast %102 : vector<1x40x220xf32> to vector<40x220xf32>
      %cst_83 = arith.constant dense<0.000000e+00> : vector<32x220xf32>
      %104 = tpu.matmul %98, %103, %cst_83 {dimension_numbers = #tpu.dot_dimension_numbers<[1], [0], [0], [1], [0, 0, 1, 1], [], []>} : vector<32x40xf32>, vector<40x220xf32>, vector<32x220xf32> -> vector<32x220xf32>
      %105 = arith.addf %96, %104 : vector<32x220xf32>
      %106 = vector.broadcast %3 : vector<32x1xf32> to vector<32x220xf32>
      %107 = arith.addf %105, %106 : vector<32x220xf32>
      %cst_84 = arith.constant 0.000000e+00 : f32
      %108 = vector.broadcast %cst_84 : f32 to vector<32x220xf32>
      %109 = arith.cmpf oge, %107, %108 : vector<32x220xf32>
      %110 = vector.broadcast %0 : f32 to vector<32x220xf32>
      %111 = arith.mulf %110, %107 : vector<32x220xf32>
      %112 = arith.select %109, %107, %111 : vector<32x220xi1>, vector<32x220xf32>
      %113 = arith.maximumf %59, %112 : vector<32x220xf32>
      %cst_85 = arith.constant dense<0.000000e+00> : vector<32x220xf32>
      %114 = tpu.matmul %113, %4, %cst_85 {dimension_numbers = #tpu.dot_dimension_numbers<[1], [0], [0], [1], [0, 0, 1, 1], [], []>} : vector<32x220xf32>, vector<220x220xf32>, vector<32x220xf32> -> vector<32x220xf32>
      %115 = vector.extract_strided_slice %114 {offsets = [0, 0], sizes = [32, 110], strides = [1, 1]} : vector<32x220xf32> to vector<32x110xf32>
      %116 = vector.extract_strided_slice %114 {offsets = [0, 110], sizes = [32, 110], strides = [1, 1]} : vector<32x220xf32> to vector<32x110xf32>
      %117 = arith.maximumf %115, %116 : vector<32x110xf32>
      %c0_86 = arith.constant 0 : index
      %118 = arith.index_cast %arg9 : i32 to index
      %c0_87 = arith.constant 0 : index
      %c0_88 = arith.constant 0 : index
      %119 = vector.load %arg7[%c0_86, %118, %c0_87, %c0_88] : memref<1x55x32x110xf32, #tpu.memory_space<vmem>>, vector<1x1x32x110xf32>
      %120 = vector.shape_cast %119 : vector<1x1x32x110xf32> to vector<32x110xf32>
      %121 = vector.shape_cast %117 : vector<32x110xf32> to vector<1x1x32x110xf32>
      tpu.vector_store %arg7[%c0_86, %118, %c0_87, %c0_88], %121 {strides = array<i32>} : memref<1x55x32x110xf32, #tpu.memory_space<vmem>>, vector<1x1x32x110xf32>,
    }
    %c55_i32_7 = arith.constant 55 : i32
    return
  }
  func.func @transform_0(%arg0: i32, %arg1: i32) -> (i32, i32, i32, i32) {
    %c0_i32 = arith.constant 0 : i32
    %c0_i32_0 = arith.constant 0 : i32
    %c0_i32_1 = arith.constant 0 : i32
    %c0_i32_2 = arith.constant 0 : i32
    return %arg0, %c0_i32, %c0_i32_0, %c0_i32_1 : i32, i32, i32, i32
  }
  func.func @transform_1(%arg0: i32, %arg1: i32) -> (i32, i32, i32) {
    %c0_i32 = arith.constant 0 : i32
    %c0_i32_0 = arith.constant 0 : i32
    %c0_i32_1 = arith.constant 0 : i32
    %c0_i32_2 = arith.constant 0 : i32
    return %c0_i32, %c0_i32_0, %c0_i32_1 : i32, i32, i32
  }
  func.func @transform_2(%arg0: i32, %arg1: i32) -> (i32, i32) {
    %c0_i32 = arith.constant 0 : i32
    %c0_i32_0 = arith.constant 0 : i32
    %c0_i32_1 = arith.constant 0 : i32
    return %c0_i32, %c0_i32_0 : i32, i32
  }
  func.func @transform_3(%arg0: i32, %arg1: i32) -> (i32, i32) {
    %c0_i32 = arith.constant 0 : i32
    %c0_i32_0 = arith.constant 0 : i32
    %c0_i32_1 = arith.constant 0 : i32
    return %c0_i32, %c0_i32_0 : i32, i32
  }
  func.func @transform_4(%arg0: i32, %arg1: i32) -> i32 {
    %c0_i32 = arith.constant 0 : i32
    %c0_i32_0 = arith.constant 0 : i32
    return %c0_i32 : i32
  }
  func.func @transform_5(%arg0: i32, %arg1: i32) -> (i32, i32, i32, i32) {
    %c0_i32 = arith.constant 0 : i32
    %c0_i32_0 = arith.constant 0 : i32
    %c0_i32_1 = arith.constant 0 : i32
    return %arg0, %arg1, %c0_i32, %c0_i32_0 : i32, i32, i32, i32
  }
}

module attributes {stable_mosaic.version = 11 : i64} {
  func.func @_conv_prelu_pool_kernel(%arg0: i32, %arg1: i32, %arg2: memref<1x110x32x110xf32, #tpu.memory_space<vmem>>, %arg3: memref<5x16x160xf32, #tpu.memory_space<vmem>>, %arg4: memref<16x1xf32, #tpu.memory_space<vmem>>, %arg5: memref<106x106xf32, #tpu.memory_space<vmem>>, %arg6: memref<1xf32, #tpu.memory_space<smem>>, %arg7: memref<1x53x16x53xf32, #tpu.memory_space<vmem>>, %arg8: memref<110x160x106xf32, #tpu.memory_space<vmem>>) attributes {dimension_semantics = [#tpu.dimension_semantics<parallel>, #tpu.dimension_semantics<parallel>], iteration_bounds = array<i64: 2, 1>, scalar_prefetch = 0 : i64, scratch_operands = 1 : i64, tpu.core_type = #tpu.core_type<tc>, window_params = [{transform_indices = @transform_0, window_bounds = array<i64: 1, 110, 32, 110>}, {pipeline_mode = #tpu.pipeline_mode<synchronous>, transform_indices = @transform_1, window_bounds = array<i64: 5, 16, 160>}, {pipeline_mode = #tpu.pipeline_mode<synchronous>, transform_indices = @transform_2, window_bounds = array<i64: 16, 1>}, {pipeline_mode = #tpu.pipeline_mode<synchronous>, transform_indices = @transform_3, window_bounds = array<i64: 106, 106>}, {transform_indices = @transform_4, window_bounds = array<i64: 1>}, {transform_indices = @transform_5, window_bounds = array<i64: 1, 53, 16, 53>}]} {
    %c0 = arith.constant 0 : index
    %0 = memref.load %arg6[%c0] : memref<1xf32, #tpu.memory_space<smem>>
    %c106_i32 = arith.constant 106 : i32
    %1 = arith.muli %arg1, %c106_i32 : i32
    %c0_i32 = arith.constant 0 : i32
    %c110_i32 = arith.constant 110 : i32
    %2 = arith.addi %c0_i32, %c110_i32 : i32
    %c1_i32 = arith.constant 1 : i32
    scf.for %arg9 = %c0_i32 to %2 step %c1_i32  : i32 {
      %6 = arith.addi %1, %arg9 : i32
      %c0_8 = arith.constant 0 : index
      %7 = arith.index_cast %6 : i32 to index
      %c0_9 = arith.constant 0 : index
      %c0_10 = arith.constant 0 : index
      %8 = vector.load %arg2[%c0_8, %7, %c0_9, %c0_10] : memref<1x110x32x110xf32, #tpu.memory_space<vmem>>, vector<1x1x32x110xf32>
      %9 = vector.shape_cast %8 : vector<1x1x32x110xf32> to vector<32x110xf32>
      %10 = vector.extract_strided_slice %9 {offsets = [0, 0], sizes = [32, 106], strides = [1, 1]} : vector<32x110xf32> to vector<32x106xf32>
      %11 = vector.extract_strided_slice %9 {offsets = [0, 1], sizes = [32, 106], strides = [1, 1]} : vector<32x110xf32> to vector<32x106xf32>
      %12 = vector.extract_strided_slice %9 {offsets = [0, 2], sizes = [32, 106], strides = [1, 1]} : vector<32x110xf32> to vector<32x106xf32>
      %13 = vector.extract_strided_slice %9 {offsets = [0, 3], sizes = [32, 106], strides = [1, 1]} : vector<32x110xf32> to vector<32x106xf32>
      %14 = vector.extract_strided_slice %9 {offsets = [0, 4], sizes = [32, 106], strides = [1, 1]} : vector<32x110xf32> to vector<32x106xf32>
      %15 = tpu.concatenate %10, %11, %12, %13, %14 in 0 : vector<32x106xf32>, vector<32x106xf32>, vector<32x106xf32>, vector<32x106xf32>, vector<32x106xf32> -> vector<160x106xf32>
      %16 = arith.index_cast %arg9 : i32 to index
      %c0_11 = arith.constant 0 : index
      %c0_12 = arith.constant 0 : index
      %17 = vector.load %arg8[%16, %c0_11, %c0_12] : memref<110x160x106xf32, #tpu.memory_space<vmem>>, vector<1x160x106xf32>
      %18 = vector.shape_cast %17 : vector<1x160x106xf32> to vector<160x106xf32>
      %19 = vector.shape_cast %15 : vector<160x106xf32> to vector<1x160x106xf32>
      tpu.vector_store %arg8[%16, %c0_11, %c0_12], %19 {strides = array<i32>} : memref<110x160x106xf32, #tpu.memory_space<vmem>>, vector<1x160x106xf32>,
    }
    %c110_i32_0 = arith.constant 110 : i32
    %c0_1 = arith.constant 0 : index
    %c0_2 = arith.constant 0 : index
    %3 = vector.load %arg4[%c0_1, %c0_2] : memref<16x1xf32, #tpu.memory_space<vmem>>, vector<16x1xf32>
    %c0_3 = arith.constant 0 : index
    %c0_4 = arith.constant 0 : index
    %4 = vector.load %arg5[%c0_3, %c0_4] : memref<106x106xf32, #tpu.memory_space<vmem>>, vector<106x106xf32>
    %c0_i32_5 = arith.constant 0 : i32
    %c53_i32 = arith.constant 53 : i32
    %5 = arith.addi %c0_i32_5, %c53_i32 : i32
    %c1_i32_6 = arith.constant 1 : i32
    scf.for %arg9 = %c0_i32_5 to %5 step %c1_i32_6  : i32 {
      %c2_i32 = arith.constant 2 : i32
      %6 = arith.muli %c2_i32, %arg9 : i32
      %cst = arith.constant 0.000000e+00 : f32
      %7 = vector.broadcast %cst : f32 to vector<16x106xf32>
      %c0_8 = arith.constant 0 : index
      %c0_9 = arith.constant 0 : index
      %c0_10 = arith.constant 0 : index
      %8 = vector.load %arg3[%c0_8, %c0_9, %c0_10] : memref<5x16x160xf32, #tpu.memory_space<vmem>>, vector<1x16x160xf32>
      %9 = vector.shape_cast %8 : vector<1x16x160xf32> to vector<16x160xf32>
      %c0_i32_11 = arith.constant 0 : i32
      %10 = arith.addi %6, %c0_i32_11 : i32
      %c0_i32_12 = arith.constant 0 : i32
      %11 = arith.addi %10, %c0_i32_12 : i32
      %12 = arith.index_cast %11 : i32 to index
      %c0_13 = arith.constant 0 : index
      %c0_14 = arith.constant 0 : index
      %13 = vector.load %arg8[%12, %c0_13, %c0_14] : memref<110x160x106xf32, #tpu.memory_space<vmem>>, vector<1x160x106xf32>
      %14 = vector.shape_cast %13 : vector<1x160x106xf32> to vector<160x106xf32>
      %cst_15 = arith.constant dense<0.000000e+00> : vector<16x106xf32>
      %15 = tpu.matmul %9, %14, %cst_15 {dimension_numbers = #tpu.dot_dimension_numbers<[1], [0], [0], [1], [0, 0, 1, 1], [], []>} : vector<16x160xf32>, vector<160x106xf32>, vector<16x106xf32> -> vector<16x106xf32>
      %16 = arith.addf %7, %15 : vector<16x106xf32>
      %c1 = arith.constant 1 : index
      %c0_16 = arith.constant 0 : index
      %c0_17 = arith.constant 0 : index
      %17 = vector.load %arg3[%c1, %c0_16, %c0_17] : memref<5x16x160xf32, #tpu.memory_space<vmem>>, vector<1x16x160xf32>
      %18 = vector.shape_cast %17 : vector<1x16x160xf32> to vector<16x160xf32>
      %c0_i32_18 = arith.constant 0 : i32
      %19 = arith.addi %6, %c0_i32_18 : i32
      %c1_i32_19 = arith.constant 1 : i32
      %20 = arith.addi %19, %c1_i32_19 : i32
      %21 = arith.index_cast %20 : i32 to index
      %c0_20 = arith.constant 0 : index
      %c0_21 = arith.constant 0 : index
      %22 = vector.load %arg8[%21, %c0_20, %c0_21] : memref<110x160x106xf32, #tpu.memory_space<vmem>>, vector<1x160x106xf32>
      %23 = vector.shape_cast %22 : vector<1x160x106xf32> to vector<160x106xf32>
      %cst_22 = arith.constant dense<0.000000e+00> : vector<16x106xf32>
      %24 = tpu.matmul %18, %23, %cst_22 {dimension_numbers = #tpu.dot_dimension_numbers<[1], [0], [0], [1], [0, 0, 1, 1], [], []>} : vector<16x160xf32>, vector<160x106xf32>, vector<16x106xf32> -> vector<16x106xf32>
      %25 = arith.addf %16, %24 : vector<16x106xf32>
      %c2 = arith.constant 2 : index
      %c0_23 = arith.constant 0 : index
      %c0_24 = arith.constant 0 : index
      %26 = vector.load %arg3[%c2, %c0_23, %c0_24] : memref<5x16x160xf32, #tpu.memory_space<vmem>>, vector<1x16x160xf32>
      %27 = vector.shape_cast %26 : vector<1x16x160xf32> to vector<16x160xf32>
      %c0_i32_25 = arith.constant 0 : i32
      %28 = arith.addi %6, %c0_i32_25 : i32
      %c2_i32_26 = arith.constant 2 : i32
      %29 = arith.addi %28, %c2_i32_26 : i32
      %30 = arith.index_cast %29 : i32 to index
      %c0_27 = arith.constant 0 : index
      %c0_28 = arith.constant 0 : index
      %31 = vector.load %arg8[%30, %c0_27, %c0_28] : memref<110x160x106xf32, #tpu.memory_space<vmem>>, vector<1x160x106xf32>
      %32 = vector.shape_cast %31 : vector<1x160x106xf32> to vector<160x106xf32>
      %cst_29 = arith.constant dense<0.000000e+00> : vector<16x106xf32>
      %33 = tpu.matmul %27, %32, %cst_29 {dimension_numbers = #tpu.dot_dimension_numbers<[1], [0], [0], [1], [0, 0, 1, 1], [], []>} : vector<16x160xf32>, vector<160x106xf32>, vector<16x106xf32> -> vector<16x106xf32>
      %34 = arith.addf %25, %33 : vector<16x106xf32>
      %c3 = arith.constant 3 : index
      %c0_30 = arith.constant 0 : index
      %c0_31 = arith.constant 0 : index
      %35 = vector.load %arg3[%c3, %c0_30, %c0_31] : memref<5x16x160xf32, #tpu.memory_space<vmem>>, vector<1x16x160xf32>
      %36 = vector.shape_cast %35 : vector<1x16x160xf32> to vector<16x160xf32>
      %c0_i32_32 = arith.constant 0 : i32
      %37 = arith.addi %6, %c0_i32_32 : i32
      %c3_i32 = arith.constant 3 : i32
      %38 = arith.addi %37, %c3_i32 : i32
      %39 = arith.index_cast %38 : i32 to index
      %c0_33 = arith.constant 0 : index
      %c0_34 = arith.constant 0 : index
      %40 = vector.load %arg8[%39, %c0_33, %c0_34] : memref<110x160x106xf32, #tpu.memory_space<vmem>>, vector<1x160x106xf32>
      %41 = vector.shape_cast %40 : vector<1x160x106xf32> to vector<160x106xf32>
      %cst_35 = arith.constant dense<0.000000e+00> : vector<16x106xf32>
      %42 = tpu.matmul %36, %41, %cst_35 {dimension_numbers = #tpu.dot_dimension_numbers<[1], [0], [0], [1], [0, 0, 1, 1], [], []>} : vector<16x160xf32>, vector<160x106xf32>, vector<16x106xf32> -> vector<16x106xf32>
      %43 = arith.addf %34, %42 : vector<16x106xf32>
      %c4 = arith.constant 4 : index
      %c0_36 = arith.constant 0 : index
      %c0_37 = arith.constant 0 : index
      %44 = vector.load %arg3[%c4, %c0_36, %c0_37] : memref<5x16x160xf32, #tpu.memory_space<vmem>>, vector<1x16x160xf32>
      %45 = vector.shape_cast %44 : vector<1x16x160xf32> to vector<16x160xf32>
      %c0_i32_38 = arith.constant 0 : i32
      %46 = arith.addi %6, %c0_i32_38 : i32
      %c4_i32 = arith.constant 4 : i32
      %47 = arith.addi %46, %c4_i32 : i32
      %48 = arith.index_cast %47 : i32 to index
      %c0_39 = arith.constant 0 : index
      %c0_40 = arith.constant 0 : index
      %49 = vector.load %arg8[%48, %c0_39, %c0_40] : memref<110x160x106xf32, #tpu.memory_space<vmem>>, vector<1x160x106xf32>
      %50 = vector.shape_cast %49 : vector<1x160x106xf32> to vector<160x106xf32>
      %cst_41 = arith.constant dense<0.000000e+00> : vector<16x106xf32>
      %51 = tpu.matmul %45, %50, %cst_41 {dimension_numbers = #tpu.dot_dimension_numbers<[1], [0], [0], [1], [0, 0, 1, 1], [], []>} : vector<16x160xf32>, vector<160x106xf32>, vector<16x106xf32> -> vector<16x106xf32>
      %52 = arith.addf %43, %51 : vector<16x106xf32>
      %53 = vector.broadcast %3 : vector<16x1xf32> to vector<16x106xf32>
      %54 = arith.addf %52, %53 : vector<16x106xf32>
      %cst_42 = arith.constant 0.000000e+00 : f32
      %55 = vector.broadcast %cst_42 : f32 to vector<16x106xf32>
      %56 = arith.cmpf oge, %54, %55 : vector<16x106xf32>
      %57 = vector.broadcast %0 : f32 to vector<16x106xf32>
      %58 = arith.mulf %57, %54 : vector<16x106xf32>
      %59 = arith.select %56, %54, %58 : vector<16x106xi1>, vector<16x106xf32>
      %cst_43 = arith.constant 0.000000e+00 : f32
      %60 = vector.broadcast %cst_43 : f32 to vector<16x106xf32>
      %c0_44 = arith.constant 0 : index
      %c0_45 = arith.constant 0 : index
      %c0_46 = arith.constant 0 : index
      %61 = vector.load %arg3[%c0_44, %c0_45, %c0_46] : memref<5x16x160xf32, #tpu.memory_space<vmem>>, vector<1x16x160xf32>
      %62 = vector.shape_cast %61 : vector<1x16x160xf32> to vector<16x160xf32>
      %c1_i32_47 = arith.constant 1 : i32
      %63 = arith.addi %6, %c1_i32_47 : i32
      %c0_i32_48 = arith.constant 0 : i32
      %64 = arith.addi %63, %c0_i32_48 : i32
      %65 = arith.index_cast %64 : i32 to index
      %c0_49 = arith.constant 0 : index
      %c0_50 = arith.constant 0 : index
      %66 = vector.load %arg8[%65, %c0_49, %c0_50] : memref<110x160x106xf32, #tpu.memory_space<vmem>>, vector<1x160x106xf32>
      %67 = vector.shape_cast %66 : vector<1x160x106xf32> to vector<160x106xf32>
      %cst_51 = arith.constant dense<0.000000e+00> : vector<16x106xf32>
      %68 = tpu.matmul %62, %67, %cst_51 {dimension_numbers = #tpu.dot_dimension_numbers<[1], [0], [0], [1], [0, 0, 1, 1], [], []>} : vector<16x160xf32>, vector<160x106xf32>, vector<16x106xf32> -> vector<16x106xf32>
      %69 = arith.addf %60, %68 : vector<16x106xf32>
      %c1_52 = arith.constant 1 : index
      %c0_53 = arith.constant 0 : index
      %c0_54 = arith.constant 0 : index
      %70 = vector.load %arg3[%c1_52, %c0_53, %c0_54] : memref<5x16x160xf32, #tpu.memory_space<vmem>>, vector<1x16x160xf32>
      %71 = vector.shape_cast %70 : vector<1x16x160xf32> to vector<16x160xf32>
      %c1_i32_55 = arith.constant 1 : i32
      %72 = arith.addi %6, %c1_i32_55 : i32
      %c1_i32_56 = arith.constant 1 : i32
      %73 = arith.addi %72, %c1_i32_56 : i32
      %74 = arith.index_cast %73 : i32 to index
      %c0_57 = arith.constant 0 : index
      %c0_58 = arith.constant 0 : index
      %75 = vector.load %arg8[%74, %c0_57, %c0_58] : memref<110x160x106xf32, #tpu.memory_space<vmem>>, vector<1x160x106xf32>
      %76 = vector.shape_cast %75 : vector<1x160x106xf32> to vector<160x106xf32>
      %cst_59 = arith.constant dense<0.000000e+00> : vector<16x106xf32>
      %77 = tpu.matmul %71, %76, %cst_59 {dimension_numbers = #tpu.dot_dimension_numbers<[1], [0], [0], [1], [0, 0, 1, 1], [], []>} : vector<16x160xf32>, vector<160x106xf32>, vector<16x106xf32> -> vector<16x106xf32>
      %78 = arith.addf %69, %77 : vector<16x106xf32>
      %c2_60 = arith.constant 2 : index
      %c0_61 = arith.constant 0 : index
      %c0_62 = arith.constant 0 : index
      %79 = vector.load %arg3[%c2_60, %c0_61, %c0_62] : memref<5x16x160xf32, #tpu.memory_space<vmem>>, vector<1x16x160xf32>
      %80 = vector.shape_cast %79 : vector<1x16x160xf32> to vector<16x160xf32>
      %c1_i32_63 = arith.constant 1 : i32
      %81 = arith.addi %6, %c1_i32_63 : i32
      %c2_i32_64 = arith.constant 2 : i32
      %82 = arith.addi %81, %c2_i32_64 : i32
      %83 = arith.index_cast %82 : i32 to index
      %c0_65 = arith.constant 0 : index
      %c0_66 = arith.constant 0 : index
      %84 = vector.load %arg8[%83, %c0_65, %c0_66] : memref<110x160x106xf32, #tpu.memory_space<vmem>>, vector<1x160x106xf32>
      %85 = vector.shape_cast %84 : vector<1x160x106xf32> to vector<160x106xf32>
      %cst_67 = arith.constant dense<0.000000e+00> : vector<16x106xf32>
      %86 = tpu.matmul %80, %85, %cst_67 {dimension_numbers = #tpu.dot_dimension_numbers<[1], [0], [0], [1], [0, 0, 1, 1], [], []>} : vector<16x160xf32>, vector<160x106xf32>, vector<16x106xf32> -> vector<16x106xf32>
      %87 = arith.addf %78, %86 : vector<16x106xf32>
      %c3_68 = arith.constant 3 : index
      %c0_69 = arith.constant 0 : index
      %c0_70 = arith.constant 0 : index
      %88 = vector.load %arg3[%c3_68, %c0_69, %c0_70] : memref<5x16x160xf32, #tpu.memory_space<vmem>>, vector<1x16x160xf32>
      %89 = vector.shape_cast %88 : vector<1x16x160xf32> to vector<16x160xf32>
      %c1_i32_71 = arith.constant 1 : i32
      %90 = arith.addi %6, %c1_i32_71 : i32
      %c3_i32_72 = arith.constant 3 : i32
      %91 = arith.addi %90, %c3_i32_72 : i32
      %92 = arith.index_cast %91 : i32 to index
      %c0_73 = arith.constant 0 : index
      %c0_74 = arith.constant 0 : index
      %93 = vector.load %arg8[%92, %c0_73, %c0_74] : memref<110x160x106xf32, #tpu.memory_space<vmem>>, vector<1x160x106xf32>
      %94 = vector.shape_cast %93 : vector<1x160x106xf32> to vector<160x106xf32>
      %cst_75 = arith.constant dense<0.000000e+00> : vector<16x106xf32>
      %95 = tpu.matmul %89, %94, %cst_75 {dimension_numbers = #tpu.dot_dimension_numbers<[1], [0], [0], [1], [0, 0, 1, 1], [], []>} : vector<16x160xf32>, vector<160x106xf32>, vector<16x106xf32> -> vector<16x106xf32>
      %96 = arith.addf %87, %95 : vector<16x106xf32>
      %c4_76 = arith.constant 4 : index
      %c0_77 = arith.constant 0 : index
      %c0_78 = arith.constant 0 : index
      %97 = vector.load %arg3[%c4_76, %c0_77, %c0_78] : memref<5x16x160xf32, #tpu.memory_space<vmem>>, vector<1x16x160xf32>
      %98 = vector.shape_cast %97 : vector<1x16x160xf32> to vector<16x160xf32>
      %c1_i32_79 = arith.constant 1 : i32
      %99 = arith.addi %6, %c1_i32_79 : i32
      %c4_i32_80 = arith.constant 4 : i32
      %100 = arith.addi %99, %c4_i32_80 : i32
      %101 = arith.index_cast %100 : i32 to index
      %c0_81 = arith.constant 0 : index
      %c0_82 = arith.constant 0 : index
      %102 = vector.load %arg8[%101, %c0_81, %c0_82] : memref<110x160x106xf32, #tpu.memory_space<vmem>>, vector<1x160x106xf32>
      %103 = vector.shape_cast %102 : vector<1x160x106xf32> to vector<160x106xf32>
      %cst_83 = arith.constant dense<0.000000e+00> : vector<16x106xf32>
      %104 = tpu.matmul %98, %103, %cst_83 {dimension_numbers = #tpu.dot_dimension_numbers<[1], [0], [0], [1], [0, 0, 1, 1], [], []>} : vector<16x160xf32>, vector<160x106xf32>, vector<16x106xf32> -> vector<16x106xf32>
      %105 = arith.addf %96, %104 : vector<16x106xf32>
      %106 = vector.broadcast %3 : vector<16x1xf32> to vector<16x106xf32>
      %107 = arith.addf %105, %106 : vector<16x106xf32>
      %cst_84 = arith.constant 0.000000e+00 : f32
      %108 = vector.broadcast %cst_84 : f32 to vector<16x106xf32>
      %109 = arith.cmpf oge, %107, %108 : vector<16x106xf32>
      %110 = vector.broadcast %0 : f32 to vector<16x106xf32>
      %111 = arith.mulf %110, %107 : vector<16x106xf32>
      %112 = arith.select %109, %107, %111 : vector<16x106xi1>, vector<16x106xf32>
      %113 = arith.maximumf %59, %112 : vector<16x106xf32>
      %cst_85 = arith.constant dense<0.000000e+00> : vector<16x106xf32>
      %114 = tpu.matmul %113, %4, %cst_85 {dimension_numbers = #tpu.dot_dimension_numbers<[1], [0], [0], [1], [0, 0, 1, 1], [], []>} : vector<16x106xf32>, vector<106x106xf32>, vector<16x106xf32> -> vector<16x106xf32>
      %115 = vector.extract_strided_slice %114 {offsets = [0, 0], sizes = [16, 53], strides = [1, 1]} : vector<16x106xf32> to vector<16x53xf32>
      %116 = vector.extract_strided_slice %114 {offsets = [0, 53], sizes = [16, 53], strides = [1, 1]} : vector<16x106xf32> to vector<16x53xf32>
      %117 = arith.maximumf %115, %116 : vector<16x53xf32>
      %c0_86 = arith.constant 0 : index
      %118 = arith.index_cast %arg9 : i32 to index
      %c0_87 = arith.constant 0 : index
      %c0_88 = arith.constant 0 : index
      %119 = vector.load %arg7[%c0_86, %118, %c0_87, %c0_88] : memref<1x53x16x53xf32, #tpu.memory_space<vmem>>, vector<1x1x16x53xf32>
      %120 = vector.shape_cast %119 : vector<1x1x16x53xf32> to vector<16x53xf32>
      %121 = vector.shape_cast %117 : vector<16x53xf32> to vector<1x1x16x53xf32>
      tpu.vector_store %arg7[%c0_86, %118, %c0_87, %c0_88], %121 {strides = array<i32>} : memref<1x53x16x53xf32, #tpu.memory_space<vmem>>, vector<1x1x16x53xf32>,
    }
    %c53_i32_7 = arith.constant 53 : i32
    return
  }
  func.func @transform_0(%arg0: i32, %arg1: i32) -> (i32, i32, i32, i32) {
    %c0_i32 = arith.constant 0 : i32
    %c0_i32_0 = arith.constant 0 : i32
    %c0_i32_1 = arith.constant 0 : i32
    %c0_i32_2 = arith.constant 0 : i32
    return %arg0, %c0_i32, %c0_i32_0, %c0_i32_1 : i32, i32, i32, i32
  }
  func.func @transform_1(%arg0: i32, %arg1: i32) -> (i32, i32, i32) {
    %c0_i32 = arith.constant 0 : i32
    %c0_i32_0 = arith.constant 0 : i32
    %c0_i32_1 = arith.constant 0 : i32
    %c0_i32_2 = arith.constant 0 : i32
    return %c0_i32, %c0_i32_0, %c0_i32_1 : i32, i32, i32
  }
  func.func @transform_2(%arg0: i32, %arg1: i32) -> (i32, i32) {
    %c0_i32 = arith.constant 0 : i32
    %c0_i32_0 = arith.constant 0 : i32
    %c0_i32_1 = arith.constant 0 : i32
    return %c0_i32, %c0_i32_0 : i32, i32
  }
  func.func @transform_3(%arg0: i32, %arg1: i32) -> (i32, i32) {
    %c0_i32 = arith.constant 0 : i32
    %c0_i32_0 = arith.constant 0 : i32
    %c0_i32_1 = arith.constant 0 : i32
    return %c0_i32, %c0_i32_0 : i32, i32
  }
  func.func @transform_4(%arg0: i32, %arg1: i32) -> i32 {
    %c0_i32 = arith.constant 0 : i32
    %c0_i32_0 = arith.constant 0 : i32
    return %c0_i32 : i32
  }
  func.func @transform_5(%arg0: i32, %arg1: i32) -> (i32, i32, i32, i32) {
    %c0_i32 = arith.constant 0 : i32
    %c0_i32_0 = arith.constant 0 : i32
    %c0_i32_1 = arith.constant 0 : i32
    return %arg0, %arg1, %c0_i32, %c0_i32_0 : i32, i32, i32, i32
  }
}

module attributes {stable_mosaic.version = 11 : i64} {
  func.func @_fc_stack_kernel(%arg0: i32, %arg1: memref<2x11264xbf16, #tpu.memory_space<vmem>>, %arg2: memref<11264x256xbf16, #tpu.memory_space<vmem>>, %arg3: memref<1x256xf32, #tpu.memory_space<vmem>>, %arg4: memref<256x256xf32, #tpu.memory_space<vmem>>, %arg5: memref<1x256xf32, #tpu.memory_space<vmem>>, %arg6: memref<256x128xf32, #tpu.memory_space<vmem>>, %arg7: memref<1x128xf32, #tpu.memory_space<vmem>>, %arg8: memref<2xf32, #tpu.memory_space<smem>>, %arg9: memref<2x128xf32, #tpu.memory_space<vmem>>, %arg10: memref<2x256xf32, #tpu.memory_space<vmem>>) attributes {dimension_semantics = [#tpu.dimension_semantics<arbitrary>], iteration_bounds = array<i64: 4>, scalar_prefetch = 0 : i64, scratch_operands = 1 : i64, tpu.core_type = #tpu.core_type<tc>, window_params = [{transform_indices = @transform_0, window_bounds = array<i64: 2, 11264>}, {transform_indices = @transform_1, window_bounds = array<i64: 11264, 256>}, {pipeline_mode = #tpu.pipeline_mode<synchronous>, transform_indices = @transform_2, window_bounds = array<i64: 1, 256>}, {pipeline_mode = #tpu.pipeline_mode<synchronous>, transform_indices = @transform_3, window_bounds = array<i64: 256, 256>}, {pipeline_mode = #tpu.pipeline_mode<synchronous>, transform_indices = @transform_4, window_bounds = array<i64: 1, 256>}, {pipeline_mode = #tpu.pipeline_mode<synchronous>, transform_indices = @transform_5, window_bounds = array<i64: 256, 128>}, {pipeline_mode = #tpu.pipeline_mode<synchronous>, transform_indices = @transform_6, window_bounds = array<i64: 1, 128>}, {transform_indices = @transform_7, window_bounds = array<i64: 2>}, {pipeline_mode = #tpu.pipeline_mode<synchronous>, transform_indices = @transform_8, window_bounds = array<i64: 2, 128>}]} {
    %c0_i32 = arith.constant 0 : i32
    %0 = arith.cmpi eq, %arg0, %c0_i32 : i32
    %1 = arith.extui %0 : i1 to i32
    %c0_i32_0 = arith.constant 0 : i32
    %2 = arith.cmpi ne, %1, %c0_i32_0 : i32
    scf.if %2 {
      %cst_9 = arith.constant 0.000000e+00 : f32
      %12 = vector.broadcast %cst_9 : f32 to vector<2x256xf32>
      %c0_10 = arith.constant 0 : index
      %c0_11 = arith.constant 0 : index
      %13 = vector.load %arg10[%c0_10, %c0_11] : memref<2x256xf32, #tpu.memory_space<vmem>>, vector<2x256xf32>
      tpu.vector_store %arg10[%c0_10, %c0_11], %12 {strides = array<i32>} : memref<2x256xf32, #tpu.memory_space<vmem>>, vector<2x256xf32>,
    } else {
    }
    %c0 = arith.constant 0 : index
    %c0_1 = arith.constant 0 : index
    %3 = vector.load %arg10[%c0, %c0_1] : memref<2x256xf32, #tpu.memory_space<vmem>>, vector<2x256xf32>
    %c0_2 = arith.constant 0 : index
    %c0_3 = arith.constant 0 : index
    %4 = vector.load %arg1[%c0_2, %c0_3] : memref<2x11264xbf16, #tpu.memory_space<vmem>>, vector<2x11264xbf16>
    %c0_4 = arith.constant 0 : index
    %c0_5 = arith.constant 0 : index
    %5 = vector.load %arg2[%c0_4, %c0_5] : memref<11264x256xbf16, #tpu.memory_space<vmem>>, vector<11264x256xbf16>
    %cst = arith.constant dense<0.000000e+00> : vector<2x256xf32>
    %6 = tpu.matmul %4, %5, %cst {dimension_numbers = #tpu.dot_dimension_numbers<[1], [0], [0], [1], [0, 0, 1, 1], [], []>} : vector<2x11264xbf16>, vector<11264x256xbf16>, vector<2x256xf32> -> vector<2x256xf32>
    %7 = arith.addf %3, %6 : vector<2x256xf32>
    %c0_6 = arith.constant 0 : index
    %c0_7 = arith.constant 0 : index
    %8 = vector.load %arg10[%c0_6, %c0_7] : memref<2x256xf32, #tpu.memory_space<vmem>>, vector<2x256xf32>
    tpu.vector_store %arg10[%c0_6, %c0_7], %7 {strides = array<i32>} : memref<2x256xf32, #tpu.memory_space<vmem>>, vector<2x256xf32>,
    %c3_i32 = arith.constant 3 : i32
    %9 = arith.cmpi eq, %arg0, %c3_i32 : i32
    %10 = arith.extui %9 : i1 to i32
    %c0_i32_8 = arith.constant 0 : i32
    %11 = arith.cmpi ne, %10, %c0_i32_8 : i32
    scf.if %11 {
      %c0_9 = arith.constant 0 : index
      %c0_10 = arith.constant 0 : index
      %12 = vector.load %arg10[%c0_9, %c0_10] : memref<2x256xf32, #tpu.memory_space<vmem>>, vector<2x256xf32>
      %c0_11 = arith.constant 0 : index
      %c0_12 = arith.constant 0 : index
      %13 = vector.load %arg3[%c0_11, %c0_12] : memref<1x256xf32, #tpu.memory_space<vmem>>, vector<1x256xf32>
      %14 = vector.broadcast %13 : vector<1x256xf32> to vector<2x256xf32>
      %15 = arith.addf %12, %14 : vector<2x256xf32>
      %cst_13 = arith.constant 0.000000e+00 : f32
      %16 = vector.broadcast %cst_13 : f32 to vector<2x256xf32>
      %17 = arith.cmpf oge, %15, %16 : vector<2x256xf32>
      %c0_14 = arith.constant 0 : index
      %18 = memref.load %arg8[%c0_14] : memref<2xf32, #tpu.memory_space<smem>>
      %19 = vector.broadcast %18 : f32 to vector<2x256xf32>
      %20 = arith.mulf %19, %15 : vector<2x256xf32>
      %21 = arith.select %17, %15, %20 : vector<2x256xi1>, vector<2x256xf32>
      %c0_15 = arith.constant 0 : index
      %c0_16 = arith.constant 0 : index
      %22 = vector.load %arg4[%c0_15, %c0_16] : memref<256x256xf32, #tpu.memory_space<vmem>>, vector<256x256xf32>
      %cst_17 = arith.constant dense<0.000000e+00> : vector<2x256xf32>
      %23 = tpu.matmul %21, %22, %cst_17 {dimension_numbers = #tpu.dot_dimension_numbers<[1], [0], [0], [1], [0, 0, 1, 1], [], []>} : vector<2x256xf32>, vector<256x256xf32>, vector<2x256xf32> -> vector<2x256xf32>
      %c0_18 = arith.constant 0 : index
      %c0_19 = arith.constant 0 : index
      %24 = vector.load %arg5[%c0_18, %c0_19] : memref<1x256xf32, #tpu.memory_space<vmem>>, vector<1x256xf32>
      %25 = vector.broadcast %24 : vector<1x256xf32> to vector<2x256xf32>
      %26 = arith.addf %23, %25 : vector<2x256xf32>
      %cst_20 = arith.constant 0.000000e+00 : f32
      %27 = vector.broadcast %cst_20 : f32 to vector<2x256xf32>
      %28 = arith.cmpf oge, %26, %27 : vector<2x256xf32>
      %c1 = arith.constant 1 : index
      %29 = memref.load %arg8[%c1] : memref<2xf32, #tpu.memory_space<smem>>
      %30 = vector.broadcast %29 : f32 to vector<2x256xf32>
      %31 = arith.mulf %30, %26 : vector<2x256xf32>
      %32 = arith.select %28, %26, %31 : vector<2x256xi1>, vector<2x256xf32>
      %c0_21 = arith.constant 0 : index
      %c0_22 = arith.constant 0 : index
      %33 = vector.load %arg6[%c0_21, %c0_22] : memref<256x128xf32, #tpu.memory_space<vmem>>, vector<256x128xf32>
      %cst_23 = arith.constant dense<0.000000e+00> : vector<2x128xf32>
      %34 = tpu.matmul %32, %33, %cst_23 {dimension_numbers = #tpu.dot_dimension_numbers<[1], [0], [0], [1], [0, 0, 1, 1], [], []>} : vector<2x256xf32>, vector<256x128xf32>, vector<2x128xf32> -> vector<2x128xf32>
      %c0_24 = arith.constant 0 : index
      %c0_25 = arith.constant 0 : index
      %35 = vector.load %arg7[%c0_24, %c0_25] : memref<1x128xf32, #tpu.memory_space<vmem>>, vector<1x128xf32>
      %36 = vector.broadcast %35 : vector<1x128xf32> to vector<2x128xf32>
      %37 = arith.addf %34, %36 : vector<2x128xf32>
      %c0_26 = arith.constant 0 : index
      %c0_27 = arith.constant 0 : index
      %38 = vector.load %arg9[%c0_26, %c0_27] : memref<2x128xf32, #tpu.memory_space<vmem>>, vector<2x128xf32>
      tpu.vector_store %arg9[%c0_26, %c0_27], %37 {strides = array<i32>} : memref<2x128xf32, #tpu.memory_space<vmem>>, vector<2x128xf32>,
    } else {
    }
    return
  }
  func.func @transform_0(%arg0: i32) -> (i32, i32) {
    %c0_i32 = arith.constant 0 : i32
    %c0_i32_0 = arith.constant 0 : i32
    return %c0_i32, %arg0 : i32, i32
  }
  func.func @transform_1(%arg0: i32) -> (i32, i32) {
    %c0_i32 = arith.constant 0 : i32
    %c0_i32_0 = arith.constant 0 : i32
    return %arg0, %c0_i32 : i32, i32
  }
  func.func @transform_2(%arg0: i32) -> (i32, i32) {
    %c0_i32 = arith.constant 0 : i32
    %c0_i32_0 = arith.constant 0 : i32
    %c0_i32_1 = arith.constant 0 : i32
    return %c0_i32, %c0_i32_0 : i32, i32
  }
  func.func @transform_3(%arg0: i32) -> (i32, i32) {
    %c0_i32 = arith.constant 0 : i32
    %c0_i32_0 = arith.constant 0 : i32
    %c0_i32_1 = arith.constant 0 : i32
    return %c0_i32, %c0_i32_0 : i32, i32
  }
  func.func @transform_4(%arg0: i32) -> (i32, i32) {
    %c0_i32 = arith.constant 0 : i32
    %c0_i32_0 = arith.constant 0 : i32
    %c0_i32_1 = arith.constant 0 : i32
    return %c0_i32, %c0_i32_0 : i32, i32
  }
  func.func @transform_5(%arg0: i32) -> (i32, i32) {
    %c0_i32 = arith.constant 0 : i32
    %c0_i32_0 = arith.constant 0 : i32
    %c0_i32_1 = arith.constant 0 : i32
    return %c0_i32, %c0_i32_0 : i32, i32
  }
  func.func @transform_6(%arg0: i32) -> (i32, i32) {
    %c0_i32 = arith.constant 0 : i32
    %c0_i32_0 = arith.constant 0 : i32
    %c0_i32_1 = arith.constant 0 : i32
    return %c0_i32, %c0_i32_0 : i32, i32
  }
  func.func @transform_7(%arg0: i32) -> i32 {
    %c0_i32 = arith.constant 0 : i32
    %c0_i32_0 = arith.constant 0 : i32
    return %c0_i32 : i32
  }
  func.func @transform_8(%arg0: i32) -> (i32, i32) {
    %c0_i32 = arith.constant 0 : i32
    %c0_i32_0 = arith.constant 0 : i32
    %c0_i32_1 = arith.constant 0 : i32
    return %c0_i32, %c0_i32_0 : i32, i32
  }
}

</mosaic_0001>

<bundles_post_ra>
// kernel: embedding_net_forward.3
= control target key start
LH: loop header
LB: loop body
LE: loop exit
PB: predicated region body
PF: predicated region fallthrough
CT: control target
= control target key end

     0   :  { %s3211_s0 = inlined_call_operand.vmem [shape: f32[2,224,8,224], index: 0, kind: input, shape index: {}]   ;;  %s3212_s1 = inlined_call_operand.hbm [shape: f32[5,32,40], index: 1, kind: input, shape index: {}]   ;;  %s3213_s2 = inlined_call_operand.vmem [shape: f32[32,1], index: 2, kind: input, shape index: {}]   ;;  %s3214_s3 = inlined_call_operand.hbm [shape: f32[220,220], index: 3, kind: input, shape index: {}]   ;;  %s3215_s4 = inlined_call_operand.<no memory space> [shape: f32[1], index: 4, kind: input, shape index: {}]   ;;  %s3216_s5 = inlined_call_operand.vmem [shape: f32[2,110,32,110], index: 5, kind: output, shape index: {}]  }
   0x1   :  { %10 = sst [smem:[#allocation3]] %s3215_s4 }
   0x2   :  { %11 = vsyncpa [#allocation5], 0 }
   0x3   :  { %12 = vsyncpa [#allocation7], 0  ;;  %s2506_s20 = smov 0   ;;  %s2508_s21 = smov 0  }
   0x4   :  { %s2510_s22 = smov 0   ;;  %s2512_s23 = smov 0  }
   0x5   :  { %s2514_s24 = smov 0  }
   0x6 LB: > { %s1914_s4 = sadd.s32 4294967295, %s2449_s24   ;;  %s27_s25 = sadd.s32 1, %s2441_s22  ;;  %s2449_s24 = sphi %s2514_s24, %s18_s24   ;;  %s2445_s23 = sphi %s2512_s23, %s3299_s23   ;;  %s2441_s22 = sphi %s2510_s22, %s3298_s22   ;;  %s2437_s21 = sphi %s2508_s21, %s3297_s21   ;;  %s2433_s20 = sphi %s2506_s20, %s3296_s20  }
   0x7   : > { %p28_p0 = scmp.ge.s32.totalorder %s27_s25, 2  ;;  %s30_s26 = sadd.s32 1, %s2445_s23 }
   0x8   : > { %p1916_p1 = scmp.ge.s32.totalorder %s2449_s24, 1  ;;  %p173_p2 = scmp.lt.s32.totalorder %s2449_s24, 5 }
   0x9   : > { %s3301_s25 = smov (%p28_p0, %s27_s25), 0  ;;  %s3303_s26 = smov (!%p28_p0, %s30_s26), %s2445_s23 }
   0xa   : > { %p2539_p3 = pnand %p1916_p1, %p173_p2  ;;  %p32_p4 = scmp.ge.s32.totalorder %s3303_s26, 2 }
   0xb   : > { %p2543_p5 = scmp.eq.s32.totalorder %s1914_s4, 0  ;;  %s2459_s29 = smov [#allocation4]  }
   0xc   : > { %s3222_s27 = scalar_select %p2539_p3, 1, 0 }
   0xd   : > { %s3223_s28 = scalar_select %p2543_p5, 1, 0 }
   0xe   : > { %p2256_p6 = pneg %p2539_p3  ;;  %s3305_s26 = smov (%p32_p4, %s3303_s26), 0 }
   0xf   : > { %s185_s30 = sshll.u32 %s2459_s29, 4  ;;  %s2339_s9 = scalar_lea.hbm %s3212_s1, 2560  ;;  %s186_s30 = int_to_ptr.vmem [resolvable:$true] %s185_s30 }
  0x10   : > { %p2553_p7 = pnand %p2543_p5, %p2256_p6  ;;  %p2340_p8 = scmp.ne.s32.totalorder %s3212_s1, %s2339_s9 }
  0x11   : > { %p2346_p12 = scmp.lt.u32.totalorder %s2339_s9, %s3212_s1 }
  0x12   : > { %p2341_p9 = pneg %p2553_p7 }
  0x14   : > { %p2342_p10 = pnand %p2341_p9, %p2340_p8 }
  0x16   : > { %p2343_p11 = pneg %p2342_p10 }
  0x18   : > { %p2348_p13 = pnand %p2346_p12, %p2343_p11 }
  0x1a   : > { %2351 = shalt.err (!%p2348_p13)
}
  0x1b   : > { %s2352_s14 = scalar_lea.vmem %s186_s30, 2560  ;;  %p2360_p4 = scmp.lt.s32.totalorder %s186_s30, %s186_s30 }
  0x1c   : > { %p2353_p0 = scmp.ne.s32.totalorder %s186_s30, %s2352_s14  ;;  %p2361_p6 = scmp.lt.s32.totalorder %s2352_s14, %s2352_s14 }
  0x1e   : > { %p2355_p1 = pnand %p2353_p0, %p2341_p9  ;;  %p2362_p5 = por %p2361_p6, %p2360_p4 }
  0x20   : > { %p2356_p2 = pneg %p2355_p1 }
  0x22   : > { %p2363_p3 = pnand %p2362_p5, %p2356_p2 }
  0x24   : > { %2366 = shalt.err (!%p2363_p3)
}
  0x25   : > { %s2460_s15 = smov 128   ;;  %s2461_s16 = smov 8  }
  0x26   : > { %2259 = dma.hbm_to_vmem [thread:$0]  (!%p2553_p7), %s3212_s1, 2560, %s186_s30, [#allocation5], %s2460_s15, %s2460_s15, %s2461_s16  }
  0x27   : > { %s2462_s19 = smov [#allocation6]   ;;  %s2367_s8 = scalar_lea.hbm %s3214_s3, 7168 }
  0x28   : > { %s201_s4 = sshll.u32 %s2462_s19, 4  ;;  %p2368_p3 = scmp.ne.s32.totalorder %s3214_s3, %s2367_s8  ;;  %s202_s4 = int_to_ptr.vmem [resolvable:$true] %s201_s4 }
  0x29   : > { %p2374_p10 = scmp.lt.u32.totalorder %s2367_s8, %s3214_s3 }
  0x2a   : > { %p2370_p5 = pnand %p2368_p3, %p2341_p9 }
  0x2c   : > { %p2371_p8 = pneg %p2370_p5 }
  0x2e   : > { %p2376_p11 = pnand %p2374_p10, %p2371_p8 }
  0x30   : > { %2379 = shalt.err (!%p2376_p11)
}
  0x31   : > { %s2380_s30 = scalar_lea.vmem %s202_s4, 7168  ;;  %p2388_p1 = scmp.lt.s32.totalorder %s202_s4, %s202_s4 }
  0x32   : > { %p2381_p12 = scmp.ne.s32.totalorder %s202_s4, %s2380_s30  ;;  %p2389_p2 = scmp.lt.s32.totalorder %s2380_s30, %s2380_s30 }
  0x34   : > { %p2383_p13 = pnand %p2381_p12, %p2341_p9  ;;  %p2390_p4 = por %p2389_p2, %p2388_p1 }
  0x36   : > { %p2384_p0 = pneg %p2383_p13 }
  0x38   : > { %p2391_p6 = pnand %p2390_p4, %p2384_p0 }
  0x3a   : > { %2394 = shalt.err (!%p2391_p6)
}
  0x3b   : > { %s2463_s13 = smov 256   ;;  %s2464_s14 = smov 16  }
  0x3c   : > { %2262 = dma.hbm_to_vmem [thread:$0]  (!%p2553_p7), %s3214_s3, 7168, %s202_s4, [#allocation7], %s2463_s13, %s2463_s13, %s2464_s14  }
  0x3d   : > { %p3225_p3 = scmp.ne.s32.totalorder %s3222_s27, 0 }
  0x3e   : > { %p3226_p5 = scmp.ne.s32.totalorder (!%p3225_p3), %s3223_s28, 0 }
  0x3f   : > { %228 = sbr.rel (%p3225_p3) target bundleno = 895 (0x37f), region = 40 }
  0x46   : > { %2424 = dma.done.wait (%p3226_p5), [#allocation5], 2560  }
  0x47   : > { %2426 = vsyncadd (%p3226_p5), [#allocation5], 4294964736 }
  0x48   : > { %2428 = dma.done.wait (%p3226_p5), [#allocation7], 7168  }
  0x49   : > { %2430 = vsyncadd (%p3226_p5), [#allocation7], 4294960128  ;;  %p265_p7 = scmp.lt.s32.totalorder %s2437_s21, 1  ;;  %s270_s6 = smul.u32 55, %s2433_s20 }
  0x4a   : > { %s2611_s27 = sld [smem:[#allocation3]]  ;;  %s282_s17 = smul.u32 110, %s2433_s20 }
  0x4b   : > { %s3307_s21 = smov (!%p265_p7, %s2437_s21), 1  ;;  %p273_p9 = scmp.lt.s32.totalorder %s270_s6, 109 }
  0x4c   : > { %s2246_s18 = smul.u32 3584, %s3307_s21  ;;  %s2625_s30 = smov 0  }
  0x4d   : > { %s3309_s6 = smov (!%p273_p9, %s270_s6), 109  ;;  %s2247_s28 = smul.u32 440, %s3307_s21 }
  0x4e   : > { %s2618_s29 = scalar_lea.vmem %s3211_s0, %s2246_s18  ;;  %s1924_s7 = sshll.u32 %s3309_s6, 2 }
  0x4f   : > { %s277_s8 = sadd.s32 %s2247_s28, %s1924_s7 }
  0x50   : > { %s1925_s9 = sshll.u32 %s277_s8, 3 }
  0x51   : > { %s2623_s12 = scalar_lea.vmem %s3216_s5, %s1925_s9 }
  0x52 LB: >> { %s289_s21 = sadd.s32 %s2453_s30, %s282_s17  ;;  %s2042_s13 = smul.u32 80, %s2453_s30  ;;  %vm333_vm0 = vcmask 752640   ;;  %vm309_vm1 = vcmask 1031168   ;;  %vm301_vm2 = vcmask 1039360   ;;  %vm317_vm3 = vcmask 1022976   ;;  %s2453_s30 = sphi %s2625_s30, %s288_s30  }
  0x53   : >> { %s2041_s14 = sshll.u32 %s289_s21, 4  ;;  %s2465_s16 = smov 126   ;;  %vm325_vm4 = vcmask 1014784  }
  0x54   : >> { %s292_s15 = scalar_lea.vmem %s2618_s29, %s2041_s14  ;;  %s2635_s6 = scalar_lea.vmem [#allocation2], %s2042_s13 }
  0x55   : >> { %v293_v0 = vld [vmem:[%s292_s15] sm:$0xff]  ;;  %v294_v1 = vld [vmem:[%s292_s15 + $0x8] sm:$0xff]  ;;  %s2466_s18 = smov 127   ;;  %s2467_s19 = smov 125  }
  0x56   : >> { %305 = vrot.lane.b32.xlu1 %v293_v0, %s2465_s16  ;;  %332 = vst [vmem:[%s2635_s6] sm:$0xff] %v293_v0  ;;  %297 = vrot.lane.b32.xlu0 %v293_v0, %s2466_s18  ;;  %334 = vst.msk [vmem:[%s2635_s6 + $0x8] sm:$0xff] %vm333_vm0, %v294_v1  ;;  %s2468_s4 = smov 124   ;;  %s288_s30 = sadd.s32 1, %s2453_s30  }
  0x57   : >> { %p285_p8 = scmp.ge.s32.totalorder %s288_s30, 114  }
  0x58   : > { %v2658_v14 = vld [vmem:[%s3213_s2] sm:$0xff] (%p285_p8)  ;;  %v2663_v15 = vld [vmem:[%s3213_s2 + $0x8] sm:$0xff] (%p285_p8)  ;;  %v2668_v16 = vld [vmem:[%s3213_s2 + $0x10] sm:$0xff] (%p285_p8)  ;;  %s2787_s20 = smov (%p285_p8), 0  }
  0x59   : > { %3227 = vst [vmem:[#allocation10_spill] sm:$0xff] (%p285_p8), %v2658_v14  ;;  %3228 = vst [vmem:[#allocation11_spill] sm:$0xff] (%p285_p8), %v2663_v15  ;;  %v2673_v17 = vld [vmem:[%s3213_s2 + $0x18] sm:$0xff] (%p285_p8)  ;;  %v2675_v18 = vld [vmem:[#allocation6] sm:$0xff] (%p285_p8) }
  0x5a   : >> { %307 = vrot.lane.b32.xlu1 %v294_v1, %s2465_s16  ;;  %299 = vrot.lane.b32.xlu0 %v294_v1, %s2466_s18  ;;  %3229 = vst [vmem:[#allocation12_spill] sm:$0xff] (%p285_p8), %v2668_v16  ;;  %3230 = vst [vmem:[#allocation13_spill] sm:$0xff] (%p285_p8), %v2673_v17  ;;  %v2677_v19 = vld [vmem:[#allocation6 + $0x8] sm:$0xff] (%p285_p8)  ;;  %v2679_v20 = vld [vmem:[#allocation6 + $0x10] sm:$0xff] (%p285_p8) }
  0x5b   : > { %v2681_v21 = vld [vmem:[#allocation6 + $0x18] sm:$0xff] (%p285_p8)  ;;  %v2683_v22 = vld [vmem:[#allocation6 + $0x20] sm:$0xff] (%p285_p8)  ;;  %v2685_v23 = vld [vmem:[#allocation6 + $0x28] sm:$0xff] (%p285_p8) }
  0x5c   : > { %v2687_v24 = vld [vmem:[#allocation6 + $0x30] sm:$0xff] (%p285_p8)  ;;  %v2689_v25 = vld [vmem:[#allocation6 + $0x38] sm:$0xff] (%p285_p8)  ;;  %v2691_v26 = vld [vmem:[#allocation6 + $0x40] sm:$0xff] (%p285_p8) }
  0x5d   : > { %v2693_v27 = vld [vmem:[#allocation6 + $0x48] sm:$0xff] (%p285_p8)  ;;  %v2695_v28 = vld [vmem:[#allocation6 + $0x50] sm:$0xff] (%p285_p8)  ;;  %v2697_v29 = vld [vmem:[#allocation6 + $0x58] sm:$0xff] (%p285_p8) }
  0x5e   : >> { %315 = vrot.lane.b32.xlu1 %v294_v1, %s2467_s19  ;;  %313 = vrot.lane.b32.xlu0 %v293_v0, %s2467_s19  ;;  %v2699_v30 = vld [vmem:[#allocation6 + $0x60] sm:$0xff] (%p285_p8)  ;;  %v2701_v31 = vld [vmem:[#allocation6 + $0x68] sm:$0xff] (%p285_p8)  ;;  %v2703_v32 = vld [vmem:[#allocation6 + $0x70] sm:$0xff] (%p285_p8) }
  0x5f   : > { %v2705_v33 = vld [vmem:[#allocation6 + $0x78] sm:$0xff] (%p285_p8)  ;;  %v2707_v34 = vld [vmem:[#allocation6 + $0x80] sm:$0xff] (%p285_p8)  ;;  %v2709_v35 = vld [vmem:[#allocation6 + $0x88] sm:$0xff] (%p285_p8) }
  0x60   : > { %v2711_v36 = vld [vmem:[#allocation6 + $0x90] sm:$0xff] (%p285_p8)  ;;  %v2713_v37 = vld [vmem:[#allocation6 + $0x98] sm:$0xff] (%p285_p8)  ;;  %v2715_v38 = vld [vmem:[#allocation6 + $0xa0] sm:$0xff] (%p285_p8) }
  0x61   : > { %v2717_v39 = vld [vmem:[#allocation6 + $0xa8] sm:$0xff] (%p285_p8)  ;;  %v2719_v40 = vld [vmem:[#allocation6 + $0xb0] sm:$0xff] (%p285_p8)  ;;  %v2721_v41 = vld [vmem:[#allocation6 + $0xb8] sm:$0xff] (%p285_p8) }
  0x62   : >> { %323 = vrot.lane.b32.xlu1 %v294_v1, %s2468_s4  ;;  %321 = vrot.lane.b32.xlu0 %v293_v0, %s2468_s4  ;;  %v2723_v42 = vld [vmem:[#allocation6 + $0xc0] sm:$0xff] (%p285_p8)  ;;  %v2725_v43 = vld [vmem:[#allocation6 + $0xc8] sm:$0xff] (%p285_p8)  ;;  %v2727_v44 = vld [vmem:[#allocation6 + $0xd0] sm:$0xff] (%p285_p8) }
  0x63   : > { %3231 = vst [vmem:[#allocation14_spill] sm:$0xff] (%p285_p8), %v2723_v42  ;;  %3232 = vst [vmem:[#allocation15_spill] sm:$0xff] (%p285_p8), %v2727_v44  ;;  %v2729_v45 = vld [vmem:[#allocation6 + $0xd8] sm:$0xff] (%p285_p8)  ;;  %v2731_v46 = vld [vmem:[#allocation6 + $0xe0] sm:$0xff] (%p285_p8) }
  0x64   : > { %3233 = vst [vmem:[#allocation16_spill] sm:$0xff] (%p285_p8), %v2731_v46  ;;  %v2733_v47 = vld [vmem:[#allocation6 + $0xe8] sm:$0xff] (%p285_p8)  ;;  %v2735_v48 = vld [vmem:[#allocation6 + $0xf0] sm:$0xff] (%p285_p8)  ;;  %v2737_v49 = vld [vmem:[#allocation6 + $0xf8] sm:$0xff] (%p285_p8) }
  0x65   : > { %3234 = vst [vmem:[#allocation17_spill] sm:$0xff] (%p285_p8), %v2733_v47  ;;  %3235 = vst [vmem:[#allocation18_spill] sm:$0xff] (%p285_p8), %v2735_v48  ;;  %v2739_v50 = vld [vmem:[#allocation6 + $0x100] sm:$0xff] (%p285_p8)  ;;  %v2741_v51 = vld [vmem:[#allocation6 + $0x108] sm:$0xff] (%p285_p8) }
  0x66   : > { %3236 = vst [vmem:[#allocation19_spill] sm:$0xff] (%p285_p8), %v2737_v49  ;;  %3237 = vst [vmem:[#allocation20_spill] sm:$0xff] (%p285_p8), %v2739_v50  ;;  %v2743_v52 = vld [vmem:[#allocation6 + $0x110] sm:$0xff] (%p285_p8)  ;;  %v2745_v53 = vld [vmem:[#allocation6 + $0x118] sm:$0xff] (%p285_p8) }
  0x67   : > { %3238 = vst [vmem:[#allocation21_spill] sm:$0xff] (%p285_p8), %v2741_v51  ;;  %3239 = vst [vmem:[#allocation22_spill] sm:$0xff] (%p285_p8), %v2743_v52  ;;  %v2747_v54 = vld [vmem:[#allocation6 + $0x120] sm:$0xff] (%p285_p8)  ;;  %v2749_v55 = vld [vmem:[#allocation6 + $0x128] sm:$0xff] (%p285_p8) }
  0x68   : > { %3240 = vst [vmem:[#allocation23_spill] sm:$0xff] (%p285_p8), %v2745_v53  ;;  %3241 = vst [vmem:[#allocation24_spill] sm:$0xff] (%p285_p8), %v2747_v54  ;;  %v2751_v56 = vld [vmem:[#allocation6 + $0x130] sm:$0xff] (%p285_p8)  ;;  %v2753_v57 = vld [vmem:[#allocation6 + $0x138] sm:$0xff] (%p285_p8) }
  0x69   : > { %3242 = vst [vmem:[#allocation25_spill] sm:$0xff] (%p285_p8), %v2749_v55  ;;  %3243 = vst [vmem:[#allocation26_spill] sm:$0xff] (%p285_p8), %v2751_v56  ;;  %v2755_v58 = vld [vmem:[#allocation6 + $0x140] sm:$0xff] (%p285_p8)  ;;  %v2757_v59 = vld [vmem:[#allocation6 + $0x148] sm:$0xff] (%p285_p8) }
  0x6a   : > { %3244 = vst [vmem:[#allocation27_spill] sm:$0xff] (%p285_p8), %v2753_v57  ;;  %3245 = vst [vmem:[#allocation28_spill] sm:$0xff] (%p285_p8), %v2755_v58  ;;  %v2759_v60 = vld [vmem:[#allocation6 + $0x150] sm:$0xff] (%p285_p8)  ;;  %v2761_v61 = vld [vmem:[#allocation6 + $0x158] sm:$0xff] (%p285_p8) }
  0x6b   : > { %3246 = vst [vmem:[#allocation29_spill] sm:$0xff] (%p285_p8), %v2757_v59  ;;  %3247 = vst [vmem:[#allocation30_spill] sm:$0xff] (%p285_p8), %v2759_v60  ;;  %v2763_v62 = vld [vmem:[#allocation6 + $0x160] sm:$0xff] (%p285_p8)  ;;  %v2765_v63 = vld [vmem:[#allocation6 + $0x168] sm:$0xff] (%p285_p8) }
  0x6c   : > { %3248 = vst [vmem:[#allocation31_spill] sm:$0xff] (%p285_p8), %v2761_v61  ;;  %3249 = vst [vmem:[#allocation32_spill] sm:$0xff] (%p285_p8), %v2763_v62  ;;  %v2767_v0 = vld [vmem:[#allocation6 + $0x170] sm:$0xff] (%p285_p8)  ;;  %v2769_v1 = vld [vmem:[#allocation6 + $0x178] sm:$0xff] (%p285_p8) }
  0x6d   : > { %3250 = vst [vmem:[#allocation33_spill] sm:$0xff] (%p285_p8), %v2765_v63  ;;  %3251 = vst [vmem:[#allocation34_spill] sm:$0xff] (%p285_p8), %v2767_v0 }
  0x6e   : > { %3252 = vst [vmem:[#allocation35_spill] sm:$0xff] (%p285_p8), %v2769_v1 }
  0xc8   : >> { %v306_v2 = vpop.permute.xlu1 %305  ;;  %v298_v3 = vpop.permute.xlu0 %297 }
  0xcc   : >> { %v308_v4 = vpop.permute.xlu1 %307  ;;  %v300_v5 = vpop.permute.xlu0 %299 }
  0xcd   : >> { %v310_v6 = vsel %vm309_vm1, %v306_v2, %v308_v4  ;;  %338 = vst.msk [vmem:[%s2635_s6 + $0x28] sm:$0xff] %vm333_vm0, %v308_v4  ;;  %v302_v7 = vsel %vm301_vm2, %v298_v3, %v300_v5  ;;  %336 = vst.msk [vmem:[%s2635_s6 + $0x18] sm:$0xff] %vm333_vm0, %v300_v5  ;;  %v2771_v2 = vld [vmem:[#allocation6 + $0x180] sm:$0xff] (%p285_p8)  ;;  %v2773_v3 = vld [vmem:[#allocation6 + $0x188] sm:$0xff] (%p285_p8) }
  0xce   : >> { %337 = vst [vmem:[%s2635_s6 + $0x20] sm:$0xff] %v310_v6  ;;  %335 = vst [vmem:[%s2635_s6 + $0x10] sm:$0xff] %v302_v7  ;;  %v2775_v4 = vld [vmem:[#allocation6 + $0x190] sm:$0xff] (%p285_p8)  ;;  %v2777_v5 = vld [vmem:[#allocation6 + $0x198] sm:$0xff] (%p285_p8) }
  0xcf   : > { %3253 = vst [vmem:[#allocation36_spill] sm:$0xff] (%p285_p8), %v2771_v2  ;;  %3254 = vst [vmem:[#allocation37_spill] sm:$0xff] (%p285_p8), %v2773_v3  ;;  %v2779_v6 = vld [vmem:[#allocation6 + $0x1a0] sm:$0xff] (%p285_p8)  ;;  %v2781_v7 = vld [vmem:[#allocation6 + $0x1a8] sm:$0xff] (%p285_p8) }
  0xd0   : >> { %v316_v8 = vpop.permute.xlu1 %315  ;;  %v314_v9 = vpop.permute.xlu0 %313  ;;  %287 = sbr.rel (!%p285_p8) target bundleno = 82 (0x52), region = 106  ;;  %3255 = vst [vmem:[#allocation38_spill] sm:$0xff] (%p285_p8), %v2775_v4  ;;  %3256 = vst [vmem:[#allocation39_spill] sm:$0xff] (%p285_p8), %v2777_v5 }
  0xd1   : >> { %340 = vst.msk [vmem:[%s2635_s6 + $0x38] sm:$0xff] %vm333_vm0, %v316_v8  ;;  %v318_v10 = vsel %vm317_vm3, %v314_v9, %v316_v8  ;;  %3257 = vst [vmem:[#allocation40_spill] sm:$0xff] (%p285_p8), %v2779_v6  ;;  %v2783_v8 = vld [vmem:[#allocation6 + $0x1b0] sm:$0xf] (%p285_p8)  ;;  %v2785_v9 = vld [vmem:[#allocation6 + $0x1b8] sm:$0xf] (%p285_p8) }
  0xd2   : >> { %339 = vst [vmem:[%s2635_s6 + $0x30] sm:$0xff] %v318_v10  ;;  %3258 = vst [vmem:[#allocation41_spill] sm:$0xff] (%p285_p8), %v2781_v7 }
  0xd3   : > { %3259 = vst [vmem:[#allocation42_spill] sm:$0xff] (%p285_p8), %v2783_v8  ;;  %3260 = vst [vmem:[#allocation43_spill] sm:$0xff] (%p285_p8), %v2785_v9 }
  0xd4   : >> { %v324_v11 = vpop.permute.xlu1 %323  ;;  %v322_v12 = vpop.permute.xlu0 %321 }
  0xd5   : >> { %342 = vst.msk [vmem:[%s2635_s6 + $0x48] sm:$0xff] %vm333_vm0, %v324_v11  ;;  %v326_v13 = vsel %vm325_vm4, %v322_v12, %v324_v11 }
  0xd6   : >> { %341 = vst [vmem:[%s2635_s6 + $0x40] sm:$0xff] %v326_v13 }
  0xd7 LB: >> { %v3220_v10 = vmov 0.0   ;;  %s2043_s17 = smul.u32 160, %s2457_s20  ;;  %v2470_v11 = vmov 0   ;;  %v3261_v14 = vld [vmem:[#allocation10_spill] sm:$0xff]  ;;  %v3262_v16 = vld [vmem:[#allocation12_spill] sm:$0xff]  ;;  %v3263_v15 = vld [vmem:[#allocation11_spill] sm:$0xff]  ;;  %s2457_s20 = sphi %s2787_s20, %s408_s20  }
  0xd8   : >> { %523 = vmatprep.mubr.f32.mxu1 %v3220_v10  ;;  %744 = vmatprep.mubr.f32.mxu0 %v3220_v10  ;;  %v3264_v17 = vld [vmem:[#allocation13_spill] sm:$0xff]  ;;  %vm446_vm5 = vcmask 326656   ;;  %v2865_v61 = vld [vmem:[#allocation4 + $0x40] sm:$0xff]  ;;  %v2884_v52 = vld [vmem:[#allocation4 + $0x48] sm:$0xff]  ;;  %vm1622_vm6 = vcmask 1043456   ;;  %vm2471_vm7 = vmmov 1  }
  0xd9   : >> { %2337 = vset.pattern.permute.xlu0 %v2470_v11  ;;  %2338 = vset.pattern.permute.xlu1 %v2470_v11  ;;  %s2797_s29 = scalar_lea.vmem [#allocation2], %s2043_s17  ;;  %v2945_v49 = vld [vmem:[#allocation4 + $0x60] sm:$0xff]  ;;  %v411_v42 = vld [vmem:[#allocation4 + $0x8] sm:$0xff]  ;;  %vm2177_vm8 = vmpackc.low %vm1622_vm6, %vm2471_vm7  ;;  %s2472_s30 = smov 18  }
  0xda   : >> { %1035 = vperm.xlu0 %2337, %v3261_v14   ;;  %1045 = vperm.xlu1 %2338, %v3262_v16   ;;  %s2038_s14 = sshll.u32 %s2457_s20, 5  ;;  %s408_s20 = sadd.s32 1, %s2457_s20  }
  0xdb   : >> { %s1756_s15 = scalar_lea.vmem %s2623_s12, %s2038_s14  ;;  %p405_p10 = scmp.ge.s32.totalorder %s408_s20, 55  }
  0xdd   : >> { %v1935_v12 = vld [vmem:[%s2797_s29 + $0x58] sm:$0xff]  ;;  %v1937_v13 = vld [vmem:[%s2797_s29 + $0x68] sm:$0xff]  ;;  %v1934_v16 = vld [vmem:[%s2797_s29 + $0x50] sm:$0xff] }
  0xde   : >> { %v1955_v11 = vld [vmem:[%s2797_s29 + $0xa8] sm:$0xff]  ;;  %v2802_v10 = vpack.c.bf16 %v1937_v13, %v1935_v12  ;;  %v1957_v14 = vld [vmem:[%s2797_s29 + $0xb8] sm:$0xff]  ;;  %v1936_v8 = vld [vmem:[%s2797_s29 + $0x60] sm:$0xff]  ;;  %1040 = vperm.xlu0 %2337, %v3263_v15   ;;  %1050 = vperm.xlu1 %2338, %v3264_v17  }
  0xdf   : >> { %v2807_v6 = vpack.c.bf16 %v1957_v14, %v1955_v11  ;;  %v2809_v9 = vpack.c.bf16 %v1936_v8, %v1934_v16  ;;  %v1954_v7 = vld [vmem:[%s2797_s29 + $0xa0] sm:$0xff]  ;;  %v1956_v4 = vld [vmem:[%s2797_s29 + $0xb0] sm:$0xff]  ;;  %v1939_v2 = vld [vmem:[%s2797_s29 + $0x78] sm:$0xff] }
  0xe0   : >> { %2045 = vmatprep.subr.bf16.mxu1 %v2802_v10  ;;  %v2817_v12 = vpack.c.bf16 %v1956_v4, %v1954_v7  ;;  %v1941_v13 = vld [vmem:[%s2797_s29 + $0x88] sm:$0xff]  ;;  %v1961_v16 = vld [vmem:[%s2797_s29 + $0xd8] sm:$0xff]  ;;  %v1938_v15 = vld [vmem:[%s2797_s29 + $0x70] sm:$0xff] }
  0xe1   : >> { %v1959_v14 = vld [vmem:[%s2797_s29 + $0xc8] sm:$0xff]  ;;  %2061 = vmatprep.subr.bf16.mxu0 %v2807_v6  ;;  %2047 = vmatpush1.bf16.msra.mxu1 %v2809_v9  ;;  %v2824_v8 = vpack.c.bf16 %v1941_v13, %v1939_v2  ;;  %v1940_v4 = vld [vmem:[%s2797_s29 + $0x80] sm:$0xff]  ;;  %v1960_v5 = vld [vmem:[%s2797_s29 + $0xd0] sm:$0xff] }
  0xe2   : >> { %v2826_v11 = vpack.c.bf16 %v1961_v16, %v1959_v14  ;;  %v1958_v7 = vld [vmem:[%s2797_s29 + $0xc0] sm:$0xff]  ;;  %2063 = vmatpush1.bf16.msra.mxu0 %v2817_v12  ;;  %v2832_v17 = vpack.c.bf16 %v1940_v4, %v1938_v15  ;;  %v2840_v13 = vld [vmem:[%s2797_s29 + $0x98] sm:$0xff]  ;;  %v2843_v14 = vld [vmem:[%s2797_s29 + $0xe8] sm:$0xff] }
  0xe3   : >> { %2049 = vmatprep.subr.bf16.mxu1 %v2824_v8  ;;  %v2837_v2 = vpack.c.bf16 %v1960_v5, %v1958_v7  ;;  %v418_v16 = vld [vmem:[%s2797_s29 + $0x8] sm:$0xff]  ;;  %v420_v3 = vld [vmem:[%s2797_s29 + $0x18] sm:$0xff]  ;;  %v2848_v15 = vld [vmem:[#allocation4 + $0x20] sm:$0xff] }
  0xe4   : >> { %2065 = vmatprep.subr.bf16.mxu0 %v2826_v11  ;;  %v417_v4 = vld [vmem:[%s2797_s29] sm:$0xff]  ;;  %v419_v0 = vld [vmem:[%s2797_s29 + $0x10] sm:$0xff]  ;;  %v422_v7 = vld [vmem:[%s2797_s29 + $0x28] sm:$0xff]  ;;  %v2052_v63 = vpack.c.bf16 %v420_v3, %v418_v16 }
  0xe5   : >> { %2051 = vmatpush1.bf16.msra.mxu1 %v2832_v17  ;;  %v2855_v5 = vld [vmem:[%s2797_s29 + $0x90] sm:$0xff]  ;;  %v424_v62 = vld [vmem:[%s2797_s29 + $0x38] sm:$0xff]  ;;  %v2861_v1 = vld [vmem:[%s2797_s29 + $0xe0] sm:$0xff]  ;;  %v2054_v59 = vpack.c.bf16 %v419_v0, %v417_v4 }
  0xe6   : >> { %2067 = vmatpush1.bf16.msra.mxu0 %v2837_v2  ;;  %467 = vmatprep.subr.mxu1 %v2840_v13  ;;  %v1971_v60 = vld [vmem:[%s2797_s29 + $0xf8] sm:$0xff]  ;;  %v1973_v58 = vld [vmem:[%s2797_s29 + $0x108] sm:$0xff]  ;;  %v2056_v56 = vpack.c.bf16 %v424_v62, %v422_v7  ;;  %v421_v54 = vld [vmem:[%s2797_s29 + $0x20] sm:$0xff]  ;;  %v3265_v7 = vmov 0.0  }
  0xe7   : >> { %688 = vmatprep.subr.mxu0 %v2843_v14  ;;  %v423_v57 = vld [vmem:[%s2797_s29 + $0x30] sm:$0xff]  ;;  %v2873_v55 = vpack.c.bf16 %v1973_v58, %v1971_v60  ;;  %v1972_v16 = vld [vmem:[%s2797_s29 + $0x100] sm:$0xff]  ;;  %v2879_v0 = vld [vmem:[#allocation4 + $0x28] sm:$0xff] }
  0xe8   : >> { %v1970_v3 = vld [vmem:[%s2797_s29 + $0xf0] sm:$0xff]  ;;  %v1975_v62 = vld [vmem:[%s2797_s29 + $0x118] sm:$0xff]  ;;  %v1977_v4 = vld [vmem:[%s2797_s29 + $0x128] sm:$0xff]  ;;  %v2058_v58 = vpack.c.bf16 %v423_v57, %v421_v54 }
  0xe9   : >> { %468 = vmatpush1.msra.mxu1 %v2855_v5  ;;  %v2887_v60 = vpack.c.bf16 %v1972_v16, %v1970_v3  ;;  %v426_v50 = vld [vmem:[%s2797_s29 + $0x48] sm:$0xff]  ;;  %v1976_v53 = vld [vmem:[%s2797_s29 + $0x120] sm:$0xff]  ;;  %v2900_v54 = vld [vmem:[#allocation4 + $0x30] sm:$0xff] }
  0xea   : >> { %689 = vmatpush1.msra.mxu0 %v2861_v1  ;;  %1944 = vmatmul.mubr.msk.f32.vlgmr.msra.gmra.mrb[0].mxu1 %vm446_vm5, %v2848_v15  ;;  %v425_v3 = vld [vmem:[%s2797_s29 + $0x40] sm:$0xff]  ;;  %v2912_v16 = vld [vmem:[#allocation4 + $0x38] sm:$0xff]  ;;  %v1988_v48 = vld [vmem:[%s2797_s29 + $0x150] sm:$0xff] }
  0xeb   : >> { %2053 = vmatprep.subr.bf16.mxu1 %v2052_v63  ;;  %1964 = vmatmul.mubr.msk.f32.vlgmr.msra.gmra.mrb[0].mxu0 %vm446_vm5, %v2865_v61  ;;  %v2892_v63 = vpack.c.bf16 %v1977_v4, %v1975_v62  ;;  %v2918_v62 = vld [vmem:[%s2797_s29 + $0x138] sm:$0xff]  ;;  %v1986_v51 = vld [vmem:[%s2797_s29 + $0x140] sm:$0xff]  ;;  %v1992_v44 = vld [vmem:[%s2797_s29 + $0x170] sm:$0xff] }
  0xec   : >> { %2055 = vmatpush1.bf16.msra.mxu1 %v2054_v59  ;;  %529 = vmatprep.mubr.f32.mxu1 %v3265_v7  ;;  %v1974_v59 = vld [vmem:[%s2797_s29 + $0x110] sm:$0xff]  ;;  %v2923_v4 = vld [vmem:[#allocation4 + $0x58] sm:$0xff]  ;;  %v1990_v47 = vld [vmem:[%s2797_s29 + $0x160] sm:$0xff] }
  0xed   : >> { %750 = vmatprep.mubr.f32.mxu0 %v3265_v7  ;;  %2057 = vmatprep.subr.bf16.mxu1 %v2056_v56  ;;  %v2903_v56 = vld [vmem:[#allocation4 + $0x50] sm:$0xff]  ;;  %v2906_v57 = vpack.c.bf16 %v1976_v53, %v1974_v59  ;;  %v1989_v53 = vld [vmem:[%s2797_s29 + $0x158] sm:$0xff] }
  0xee   : >> { %1945 = vmatmul.mubr.msk.f32.gmra.mrb[2].mxu1 %vm446_vm5, %v2879_v0  ;;  %2069 = vmatprep.subr.bf16.mxu0 %v2873_v55  ;;  %v1993_v46 = vld [vmem:[%s2797_s29 + $0x178] sm:$0xff] }
  0xef   : >> { %1965 = vmatmul.mubr.msk.f32.gmra.mrb[2].mxu0 %vm446_vm5, %v2884_v52  ;;  %535 = vmatprep.mubr.f32.mxu1 %v3265_v7 }
  0xf0   : >> { %2059 = vmatpush1.bf16.msra.mxu1 %v2058_v58  ;;  %756 = vmatprep.mubr.f32.mxu0 %v3265_v7  ;;  %v2931_v58 = vld [vmem:[%s2797_s29 + $0x130] sm:$0xff] }
  0xf1   : >> { %2071 = vmatpush1.bf16.msra.mxu0 %v2887_v60  ;;  %568 = vmatprep.subr.mxu1 %v426_v50  ;;  %v1987_v50 = vld [vmem:[%s2797_s29 + $0x148] sm:$0xff] }
  0xf2   : >> { %1946 = vmatmul.mubr.msk.f32.gmra.mrb[4].mxu1 %vm446_vm5, %v2900_v54  ;;  %2073 = vmatprep.subr.bf16.mxu0 %v2892_v63  ;;  %v2933_v59 = vpack.c.bf16 %v1989_v53, %v1987_v50  ;;  %v2948_v50 = vpack.c.bf16 %v1988_v48, %v1986_v51  ;;  %v2962_v48 = vld [vmem:[#allocation4 + $0x68] sm:$0xff]  ;;  %v412_v51 = vld [vmem:[#allocation4 + $0x10] sm:$0xff] }
  0xf3   : >> { %1966 = vmatmul.mubr.msk.f32.gmra.mrb[4].mxu0 %vm446_vm5, %v2903_v56  ;;  %541 = vmatprep.mubr.f32.mxu1 %v3265_v7 }
  0xf4   : >> { %762 = vmatprep.mubr.f32.mxu0 %v3265_v7  ;;  %569 = vmatpush1.msra.mxu1 %v425_v3  ;;  %v2940_v3 = vld [vmem:[#allocation4] sm:$0xff] }
  0xf5   : >> { %2075 = vmatpush1.bf16.msra.mxu0 %v2906_v57  ;;  %2085 = vmatprep.subr.bf16.mxu1 %v2807_v6  ;;  %v1991_v6 = vld [vmem:[%s2797_s29 + $0x168] sm:$0xff] }
  0xf6   : >> { %1947 = vmatmul.mubr.msk.f32.gmra.mrb[6].mxu1 %vm446_vm5, %v2912_v16  ;;  %816 = vmatprep.subr.mxu0 %v2918_v62  ;;  %v2953_v53 = vpack.c.bf16 %v1993_v46, %v1991_v6  ;;  %v2966_v46 = vpack.c.bf16 %v1992_v44, %v1990_v47  ;;  %v2985_v44 = vld [vmem:[%s2797_s29 + $0x180] sm:$0xff]  ;;  %v413_v47 = vld [vmem:[#allocation4 + $0x18] sm:$0xff]  ;;  %v2142_v6 = vpack.c.bf16 %v2711_v36, %v2707_v34 }
  0xf7   : >> { %1967 = vmatmul.mubr.msk.f32.gmra.mrb[6].mxu0 %vm446_vm5, %v2923_v4  ;;  %624 = vmatprep.mubr.f32.mxu1 %v3265_v7 }
  0xf8   : >> { %872 = vmatprep.mubr.f32.mxu0 %v3265_v7 }
  0xf9   : >> { %817 = vmatpush1.msra.mxu0 %v2931_v58 }
  0xfa   : >> { %1948 = vmatmul.mubr.msk.f32.vlgmr.msra.gmra.mrb[0].mxu1 %vm446_vm5, %v2940_v3  ;;  %2077 = vmatprep.subr.bf16.mxu0 %v2933_v59 }
  0xfb   : >> { %1980 = vmatmul.mubr.msk.f32.vlgmr.msra.gmra.mrb[0].mxu0 %vm446_vm5, %v2945_v49  ;;  %2087 = vmatpush1.bf16.msra.mxu1 %v2817_v12  ;;  %v2974_v12 = vld [vmem:[%s2797_s29 + $0x188] sm:$0xff] }
  0xfc   : >> { %630 = vmatprep.mubr.f32.mxu1 %v3265_v7  ;;  %878 = vmatprep.mubr.f32.mxu0 %v3265_v7 }
  0xfd   : >> { %2089 = vmatprep.subr.bf16.mxu1 %v2826_v11  ;;  %2079 = vmatpush1.bf16.msra.mxu0 %v2948_v50  ;;  %v2978_v11 = vld [vmem:[#allocation4 + $0x70] sm:$0xff] }
  0xfe   : >> { %1949 = vmatmul.mubr.msk.f32.gmra.mrb[2].mxu1 %vm446_vm5, %v411_v42  ;;  %2081 = vmatprep.subr.bf16.mxu0 %v2953_v53 }
  0xff   : >> { %1981 = vmatmul.mubr.msk.f32.gmra.mrb[2].mxu0 %vm446_vm5, %v2962_v48  ;;  %636 = vmatprep.mubr.f32.mxu1 %v3265_v7 }
 0x100   : >> { %884 = vmatprep.mubr.f32.mxu0 %v3265_v7  ;;  %2091 = vmatpush1.bf16.msra.mxu1 %v2837_v2  ;;  %v2991_v2 = vld [vmem:[#allocation4 + $0x78] sm:$0xff] }
 0x101   : >> { %2083 = vmatpush1.bf16.msra.mxu0 %v2966_v46  ;;  %1094 = vmatprep.subr.mxu1 %v2843_v14  ;;  %v3001_v14 = vld [vmem:[#allocation4 + $0x80] sm:$0xff] }
 0x102   : >> { %1950 = vmatmul.mubr.msk.f32.gmra.mrb[4].mxu1 %vm446_vm5, %v412_v51  ;;  %944 = vmatprep.subr.mxu0 %v2974_v12 }
 0x103   : >> { %1982 = vmatmul.mubr.msk.f32.gmra.mrb[4].mxu0 %vm446_vm5, %v2978_v11  ;;  %642 = vmatprep.mubr.f32.mxu1 %v3265_v7 }
 0x104   : >> { %890 = vmatprep.mubr.f32.mxu0 %v3265_v7  ;;  %1095 = vmatpush1.msra.mxu1 %v2861_v1  ;;  %v3010_v1 = vld [vmem:[#allocation4 + $0x88] sm:$0xff] }
 0x105   : >> { %945 = vmatpush1.msra.mxu0 %v2985_v44  ;;  %2093 = vmatprep.subr.bf16.mxu1 %v2802_v10  ;;  %v3029_v10 = vld [vmem:[#allocation4 + $0x98] sm:$0xff] }
 0x106   : >> { %1951 = vmatmul.mubr.msk.f32.gmra.mrb[6].mxu1 %vm446_vm5, %v413_v47 }
 0x107   : >> { %1983 = vmatmul.mubr.msk.f32.gmra.mrb[6].mxu0 %vm446_vm5, %v2991_v2  ;;  %1150 = vmatprep.mubr.f32.mxu1 %v3265_v7 }
 0x108   : >> { %1000 = vmatprep.mubr.f32.mxu0 %v3265_v7 }
 0x10a   : >> { %2000 = vmatmul.mubr.msk.f32.vlgmr.msra.gmra.mrb[8].mxu1 %vm446_vm5, %v2848_v15 }
 0x10b   : >> { %1996 = vmatmul.mubr.msk.f32.vlgmr.msra.gmra.mrb[0].mxu0 %vm446_vm5, %v3001_v14  ;;  %2095 = vmatpush1.bf16.msra.mxu1 %v2809_v9  ;;  %v3020_v9 = vld [vmem:[#allocation4 + $0x90] sm:$0xff] }
 0x10c   : >> { %1006 = vmatprep.mubr.f32.mxu0 %v3265_v7  ;;  %1156 = vmatprep.mubr.f32.mxu1 %v3265_v7 }
 0x10d   : >> { %2097 = vmatprep.subr.bf16.mxu1 %v2824_v8  ;;  %v2023_v8 = vld [vmem:[%s2797_s29 + $0x1b8] sm:$0xff] }
 0x10e   : >> { %2001 = vmatmul.mubr.msk.f32.gmra.mrb[10].mxu1 %vm446_vm5, %v2879_v0  ;;  %v2022_v0 = vld [vmem:[%s2797_s29 + $0x1b0] sm:$0xff] }
 0x10f   : >> { %1997 = vmatmul.mubr.msk.f32.gmra.mrb[2].mxu0 %vm446_vm5, %v3010_v1  ;;  %1162 = vmatprep.mubr.f32.mxu1 %v3265_v7 }
 0x110   : >> { %1012 = vmatprep.mubr.f32.mxu0 %v3265_v7  ;;  %2099 = vmatpush1.bf16.msra.mxu1 %v2832_v17  ;;  %v2019_v17 = vld [vmem:[%s2797_s29 + $0x198] sm:$0xff] }
 0x111   : >> { %1183 = vmatprep.subr.mxu1 %v2840_v13  ;;  %v2025_v13 = vld [vmem:[%s2797_s29 + $0x1c8] sm:$0xff] }
 0x112   : >> { %2002 = vmatmul.mubr.msk.f32.gmra.mrb[12].mxu1 %vm446_vm5, %v2900_v54  ;;  %v2027_v54 = vld [vmem:[%s2797_s29 + $0x1d8] sm:$0xff] }
 0x113   : >> { %1998 = vmatmul.mubr.msk.f32.gmra.mrb[4].mxu0 %vm446_vm5, %v3020_v9  ;;  %1168 = vmatprep.mubr.f32.mxu1 %v3265_v7 }
 0x114   : >> { %1018 = vmatprep.mubr.f32.mxu0 %v3265_v7  ;;  %1184 = vmatpush1.msra.mxu1 %v2855_v5  ;;  %v2120_v5 = vpack.c.bf16 %v2025_v13, %v2023_v8  ;;  %v3277_v8 = vld [vmem:[#allocation27_spill] sm:$0xff] }
 0x115   : >> { %2101 = vmatprep.subr.bf16.mxu1 %v2873_v55 }
 0x116   : >> { %2003 = vmatmul.mubr.msk.f32.gmra.mrb[14].mxu1 %vm446_vm5, %v2912_v16  ;;  %v2128_v16 = vpack.c.bf16 %v2689_v25, %v2685_v23 }
 0x117   : >> { %1999 = vmatmul.mubr.msk.f32.gmra.mrb[6].mxu0 %vm446_vm5, %v3029_v10  ;;  %1239 = vmatprep.mubr.f32.mxu1 %v3265_v7 }
 0x11a   : >> { %2004 = vmatmul.mubr.msk.f32.vlgmr.msra.gmra.mrb[8].mxu1 %vm446_vm5, %v2940_v3  ;;  %v2140_v3 = vpack.c.bf16 %v2713_v37, %v2709_v35 }
 0x11b   : >> { %2103 = vmatpush1.bf16.msra.mxu1 %v2887_v60  ;;  %1245 = vmatprep.mubr.f32.mxu1 %v3265_v7  ;;  %v2024_v60 = vld [vmem:[%s2797_s29 + $0x1c0] sm:$0xff] }
 0x11c   : >> { %2105 = vmatprep.subr.bf16.mxu1 %v2892_v63  ;;  %v2122_v63 = vpack.c.bf16 %v2024_v60, %v2022_v0  ;;  %v3280_v60 = vld [vmem:[#allocation29_spill] sm:$0xff] }
 0x11e   : >> { %2005 = vmatmul.mubr.msk.f32.gmra.mrb[10].mxu1 %vm446_vm5, %v411_v42  ;;  %v2021_v42 = vld [vmem:[%s2797_s29 + $0x1a8] sm:$0xff] }
 0x11f   : >> { %1251 = vmatprep.mubr.f32.mxu1 %v3265_v7  ;;  %2107 = vmatpush1.bf16.msra.mxu1 %v2906_v57  ;;  %v2116_v55 = vpack.c.bf16 %v2021_v42, %v2019_v17  ;;  %v2126_v57 = vpack.c.bf16 %v2679_v20, %v2675_v18  ;;  %v3274_v42 = vld [vmem:[#allocation20_spill] sm:$0xff] }
 0x120   : >> { %1272 = vmatprep.subr.mxu1 %v2918_v62  ;;  %v2130_v62 = vpack.c.bf16 %v2687_v24, %v2683_v22 }
 0x122   : >> { %2006 = vmatmul.mubr.msk.f32.gmra.mrb[12].mxu1 %vm446_vm5, %v412_v51  ;;  %v3267_v51 = vld [vmem:[#allocation15_spill] sm:$0xff] }
 0x123   : >> { %1257 = vmatprep.mubr.f32.mxu1 %v3265_v7  ;;  %1273 = vmatpush1.msra.mxu1 %v2931_v58  ;;  %v2136_v58 = vpack.c.bf16 %v2705_v33, %v2701_v31 }
 0x124   : >> { %2109 = vmatprep.subr.bf16.mxu1 %v2933_v59  ;;  %v2138_v59 = vpack.c.bf16 %v2703_v32, %v2699_v30 }
 0x126   : >> { %2007 = vmatmul.mubr.msk.f32.gmra.mrb[14].mxu1 %vm446_vm5, %v413_v47 }
 0x127   : >> { %1328 = vmatprep.mubr.f32.mxu1 %v3265_v7 }
 0x12a   : >> { %2008 = vmatmul.mubr.msk.f32.vlgmr.msra.gmra.mrb[8].mxu1 %vm446_vm5, %v2865_v61  ;;  %v2018_v61 = vld [vmem:[%s2797_s29 + $0x190] sm:$0xff] }
 0x12b   : >> { %2111 = vmatpush1.bf16.msra.mxu1 %v2948_v50  ;;  %1334 = vmatprep.mubr.f32.mxu1 %v3265_v7  ;;  %v2144_v50 = vpack.c.bf16 %v2721_v41, %v2717_v39 }
 0x12c   : >> { %2113 = vmatprep.subr.bf16.mxu1 %v2953_v53  ;;  %v2146_v53 = vpack.c.bf16 %v2719_v40, %v2715_v38 }
 0x12e   : >> { %2009 = vmatmul.mubr.msk.f32.gmra.mrb[10].mxu1 %vm446_vm5, %v2884_v52  ;;  %v2020_v52 = vld [vmem:[%s2797_s29 + $0x1a0] sm:$0xff] }
 0x12f   : >> { %1340 = vmatprep.mubr.f32.mxu1 %v3265_v7  ;;  %2115 = vmatpush1.bf16.msra.mxu1 %v2966_v46  ;;  %v2118_v15 = vpack.c.bf16 %v2020_v52, %v2018_v61  ;;  %v3266_v46 = vld [vmem:[#allocation14_spill] sm:$0xff]  ;;  %v3276_v52 = vld [vmem:[#allocation25_spill] sm:$0xff] }
 0x130   : >> { %1369 = vmatprep.subr.mxu1 %v2974_v12  ;;  %v2150_v12 = vpack.c.bf16 %v3267_v51, %v3266_v46  ;;  %v2160_v13 = vpack.c.bf16 %v3277_v8, %v3276_v52  ;;  %v3292_v51 = vld [vmem:[#allocation41_spill] sm:$0xff] }
 0x132   : >> { %2010 = vmatmul.mubr.msk.f32.gmra.mrb[12].mxu1 %vm446_vm5, %v2903_v56  ;;  %v2026_v56 = vld [vmem:[%s2797_s29 + $0x1d0] sm:$0xff] }
 0x133   : >> { %1346 = vmatprep.mubr.f32.mxu1 %v3265_v7  ;;  %1370 = vmatpush1.msra.mxu1 %v2985_v44  ;;  %v3269_v44 = vld [vmem:[#allocation19_spill] sm:$0xff] }
 0x134   : >> { %2117 = vmatprep.subr.bf16.mxu1 %v2116_v55  ;;  %v3275_v55 = vld [vmem:[#allocation22_spill] sm:$0xff] }
 0x135   : >> { %v2158_v61 = vpack.c.bf16 %v3275_v55, %v3274_v42 }
 0x136   : >> { %2011 = vmatmul.mubr.msk.f32.gmra.mrb[14].mxu1 %vm446_vm5, %v2923_v4  ;;  %v2134_v4 = vpack.c.bf16 %v2695_v28, %v2691_v26 }
 0x137   : >> { %1425 = vmatprep.mubr.f32.mxu1 %v3265_v7 }
 0x13a   : >> { %2012 = vmatmul.mubr.msk.f32.vlgmr.msra.gmra.mrb[8].mxu1 %vm446_vm5, %v2945_v49  ;;  %v2124_v49 = vpack.c.bf16 %v2681_v21, %v2677_v19 }
 0x13b   : >> { %2119 = vmatpush1.bf16.msra.mxu1 %v2118_v15  ;;  %1431 = vmatprep.mubr.f32.mxu1 %v3265_v7  ;;  %v3278_v15 = vld [vmem:[#allocation24_spill] sm:$0xff] }
 0x13c   : >> { %2121 = vmatprep.subr.bf16.mxu1 %v2120_v5  ;;  %2125 = vmatprep.subr.bf16.mxu0 %v2124_v49  ;;  %v3279_v5 = vld [vmem:[#allocation26_spill] sm:$0xff] }
 0x13d   : >> { %2127 = vmatpush1.bf16.msra.mxu0 %v2126_v57  ;;  %v2162_v0 = vpack.c.bf16 %v3279_v5, %v3278_v15  ;;  %v3283_v49 = vld [vmem:[#allocation30_spill] sm:$0xff] }
 0x13e   : >> { %2013 = vmatmul.mubr.msk.f32.gmra.mrb[10].mxu1 %vm446_vm5, %v2962_v48  ;;  %2129 = vmatprep.subr.bf16.mxu0 %v2128_v16  ;;  %v2148_v48 = vpack.c.bf16 %v2729_v45, %v2725_v43  ;;  %v3284_v16 = vld [vmem:[#allocation33_spill] sm:$0xff] }
 0x13f   : >> { %1437 = vmatprep.mubr.f32.mxu1 %v3265_v7  ;;  %2123 = vmatpush1.bf16.msra.mxu1 %v2122_v63  ;;  %v3281_v63 = vld [vmem:[#allocation31_spill] sm:$0xff] }
 0x140   : >> { %1480 = vmatprep.subr.mxu1 %v2027_v54  ;;  %v2164_v54 = vpack.c.bf16 %v3281_v63, %v3280_v60 }
 0x141   : >> { %2131 = vmatpush1.bf16.msra.mxu0 %v2130_v62  ;;  %v3285_v62 = vld [vmem:[#allocation35_spill] sm:$0xff] }
 0x142   : >> { %2014 = vmatmul.mubr.msk.f32.gmra.mrb[12].mxu1 %vm446_vm5, %v2978_v11  ;;  %v3268_v11 = vld [vmem:[#allocation17_spill] sm:$0xff] }
 0x143   : >> { %1443 = vmatprep.mubr.f32.mxu1 %v3265_v7  ;;  %1481 = vmatpush1.msra.mxu1 %v2026_v56  ;;  %v2152_v47 = vpack.c.bf16 %v3269_v44, %v3268_v11  ;;  %v3282_v56 = vld [vmem:[#allocation28_spill] sm:$0xff] }
 0x144   : >> { %v2166_v57 = vpack.c.bf16 %v3283_v49, %v3282_v56  ;;  %v3294_v44 = vld [vmem:[#allocation40_spill] sm:$0xff] }
 0x146   : >> { %2015 = vmatmul.mubr.msk.f32.gmra.mrb[14].mxu1 %vm446_vm5, %v2991_v2  ;;  %v3270_v2 = vld [vmem:[#allocation16_spill] sm:$0xff] }
 0x147   : >> { %1536 = vmatprep.mubr.f32.mxu1 %v3265_v7 }
 0x14a   : >> { %2028 = vmatmul.mubr.msk.f32.vlgmr.msra.gmra.mrb[8].mxu1 %vm446_vm5, %v3001_v14  ;;  %v3271_v14 = vld [vmem:[#allocation18_spill] sm:$0xff] }
 0x14b   : >> { %1542 = vmatprep.mubr.f32.mxu1 %v3265_v7 }
 0x14e   : >> { %2029 = vmatmul.mubr.msk.f32.gmra.mrb[10].mxu1 %vm446_vm5, %v3010_v1  ;;  %v2154_v1 = vpack.c.bf16 %v3271_v14, %v3270_v2 }
 0x14f   : >> { %1548 = vmatprep.mubr.f32.mxu1 %v3265_v7 }
 0x152   : >> { %2030 = vmatmul.mubr.msk.f32.gmra.mrb[12].mxu1 %vm446_vm5, %v3020_v9  ;;  %v3272_v9 = vld [vmem:[#allocation21_spill] sm:$0xff] }
 0x153   : >> { %1554 = vmatprep.mubr.f32.mxu1 %v3265_v7  ;;  %v2132_v7 = vpack.c.bf16 %v2697_v29, %v2693_v27 }
 0x155   : >> { %2133 = vmatprep.subr.bf16.mxu0 %v2132_v7  ;;  %v2168_v7 = vpack.c.bf16 %v3285_v62, %v3284_v16 }
 0x156   : >> { %2031 = vmatmul.mubr.msk.f32.gmra.mrb[14].mxu1 %vm446_vm5, %v3029_v10  ;;  %2135 = vmatpush1.bf16.msra.mxu0 %v2134_v4  ;;  %v3273_v10 = vld [vmem:[#allocation23_spill] sm:$0xff]  ;;  %v3286_v4 = vld [vmem:[#allocation32_spill] sm:$0xff] }
 0x157   : >> { %2137 = vmatprep.subr.bf16.mxu0 %v2136_v58  ;;  %v2156_v17 = vpack.c.bf16 %v3273_v10, %v3272_v9  ;;  %v3287_v58 = vld [vmem:[#allocation34_spill] sm:$0xff] }
 0x15a   : >> { %2139 = vmatpush1.bf16.msra.mxu0 %v2138_v59  ;;  %v2170_v59 = vpack.c.bf16 %v3287_v58, %v3286_v4  ;;  %v1036_v58 = vpop.permute.xlu0 %1035 }
 0x15b   : >> { %2141 = vmatprep.subr.bf16.mxu0 %v2140_v3  ;;  %v3288_v3 = vld [vmem:[#allocation37_spill] sm:$0xff] }
 0x15e   : >> { %2143 = vmatpush1.bf16.msra.mxu0 %v2142_v6  ;;  %v3289_v6 = vld [vmem:[#allocation39_spill] sm:$0xff] }
 0x15f   : >> { %2145 = vmatprep.subr.bf16.mxu0 %v2144_v50  ;;  %v2172_v50 = vpack.c.bf16 %v3289_v6, %v3288_v3  ;;  %v3160_v6 = vstv %s2611_s27 }
 0x162   : >> { %2147 = vmatpush1.bf16.msra.mxu0 %v2146_v53  ;;  %v3290_v53 = vld [vmem:[#allocation36_spill] sm:$0xff] }
 0x163   : >> { %2149 = vmatprep.subr.bf16.mxu0 %v2148_v48  ;;  %v3291_v48 = vld [vmem:[#allocation38_spill] sm:$0xff] }
 0x164   : >> { %v2174_v46 = vpack.c.bf16 %v3291_v48, %v3290_v53 }
 0x166   : >> { %2151 = vmatpush1.bf16.msra.mxu0 %v2150_v12  ;;  %v3293_v12 = vld [vmem:[#allocation43_spill] sm:$0xff] }
 0x167   : >> { %2153 = vmatprep.subr.bf16.mxu0 %v2152_v47  ;;  %v2176_v11 = vpack.c.bf16 %v3293_v12, %v3292_v51  ;;  %v3295_v47 = vld [vmem:[#allocation42_spill] sm:$0xff]  ;;  %v1046_v51 = vpop.permute.xlu1 %1045 }
 0x168   : >> { %v2179_v2 = vpack.c.bf16 %v3295_v47, %v3294_v44 }
 0x16a   : >> { %2155 = vmatpush1.bf16.msra.mxu0 %v2154_v1 }
 0x16b   : >> { %2157 = vmatprep.subr.bf16.mxu0 %v2156_v17 }
 0x16e   : >> { %2159 = vmatpush1.bf16.msra.mxu0 %v2158_v61 }
 0x16f   : >> { %2161 = vmatprep.subr.bf16.mxu0 %v2160_v13 }
 0x172   : >> { %2163 = vmatpush1.bf16.msra.mxu0 %v2162_v0 }
 0x173   : >> { %2165 = vmatprep.subr.bf16.mxu0 %v2164_v54 }
 0x176   : >> { %2167 = vmatpush1.bf16.msra.mxu0 %v2166_v57 }
 0x177   : >> { %2169 = vmatprep.subr.bf16.mxu0 %v2168_v7 }
 0x17a   : >> { %2171 = vmatpush1.bf16.msra.mxu0 %v2170_v59  ;;  %v1041_v59 = vpop.permute.xlu0 %1040 }
 0x17b   : >> { %2173 = vmatprep.subr.bf16.mxu0 %v2172_v50 }
 0x17e   : >> { %2175 = vmatpush1.bf16.msra.mxu0 %v2174_v46 }
 0x17f   : >> { %2178 = vmatprep.subr.msk.bf16.mxu0 %vm2177_vm8, %v2176_v11 }
 0x182   : >> { %2181 = vmatpush1.bf16.msk.msra.mxu0 %vm2177_vm8, %v2179_v2 }
 0x1cd   : >> { %v626_v14 = vpop.f32.mrb[0].mxu1 }
 0x1ce   : >> { %v628_v1 = vpop.f32.mrb[1].mxu1 }
 0x1d1   : >> { %v632_v9 = vpop.f32.mrb[2].mxu1 }
 0x1d2   : >> { %v634_v10 = vpop.f32.mrb[3].mxu1 }
 0x1d5   : >> { %v638_v17 = vpop.f32.mrb[4].mxu1 }
 0x1d6   : >> { %v640_v42 = vpop.f32.mrb[5].mxu1 }
 0x1d9   : >> { %v644_v55 = vpop.f32.mrb[6].mxu1 }
 0x1da   : >> { %v646_v61 = vpop.f32.mrb[7].mxu1 }
 0x1de   : >> { %v1002_v52 = vpop.f32.mrb[0].mxu0 }
 0x1df   : >> { %v2182_v8 = vadd.f32 %v1002_v52, %v626_v14  ;;  %v1004_v13 = vpop.f32.mrb[1].mxu0 }
 0x1e0   : >> { %v2183_v15 = vadd.f32 %v1004_v13, %v628_v1 }
 0x1e1   : >> { %v1053_v3 = vadd.f32 %v2182_v8, %v1036_v58 }
 0x1e2   : >> { %v1008_v5 = vpop.f32.mrb[2].mxu0  ;;  %v1054_v50 = vadd.f32 %v2183_v15, %v1036_v58 }
 0x1e3   : >> { %v2184_v0 = vadd.f32 %v1008_v5, %v632_v9  ;;  %v1010_v60 = vpop.f32.mrb[3].mxu0  ;;  %v1070_v46 = vmul.f32 %v3160_v6, %v1053_v3  ;;  %vm1061_vm9 = vcmp.ge.f32.partialorder %v1053_v3, 0.0 }
 0x1e4   : >> { %v2185_v63 = vadd.f32 %v1010_v60, %v634_v10  ;;  %v1071_v47 = vmul.f32 %v3160_v6, %v1054_v50  ;;  %vm1062_vm10 = vcmp.ge.f32.partialorder %v1054_v50, 0.0 }
 0x1e5   : >> { %v1055_v53 = vadd.f32 %v2184_v0, %v1041_v59  ;;  %v1051_v0 = vpop.permute.xlu1 %1050 }
 0x1e6   : >> { %v1014_v54 = vpop.f32.mrb[4].mxu0  ;;  %v1056_v48 = vadd.f32 %v2185_v63, %v1041_v59  ;;  %v1079_v15 = vsel %vm1062_vm10, %v1054_v50, %v1071_v47  ;;  %vm1742_vm10 = vcmask 146432  }
 0x1e7   : >> { %v2186_v56 = vadd.f32 %v1014_v54, %v638_v17  ;;  %v1016_v49 = vpop.f32.mrb[5].mxu0  ;;  %v1072_v2 = vmul.f32 %v3160_v6, %v1055_v53  ;;  %vm1063_vm11 = vcmp.ge.f32.partialorder %v1055_v53, 0.0 }
 0x1e8   : >> { %v2187_v57 = vadd.f32 %v1016_v49, %v640_v42  ;;  %v1073_v1 = vmul.f32 %v3160_v6, %v1056_v48  ;;  %vm1064_vm13 = vcmp.ge.f32.partialorder %v1056_v48, 0.0  ;;  %v1078_v42 = vsel %vm1061_vm9, %v1053_v3, %v1070_v46 }
 0x1e9   : >> { %v1057_v9 = vadd.f32 %v2186_v56, %v1046_v51  ;;  %v1080_v5 = vsel %vm1063_vm11, %v1055_v53, %v1072_v2  ;;  %vm1757_vm11 = vcmask 900096  }
 0x1ea   : >> { %v1020_v16 = vpop.f32.mrb[6].mxu0  ;;  %v1058_v17 = vadd.f32 %v2187_v57, %v1046_v51  ;;  %v1081_v56 = vsel %vm1064_vm13, %v1056_v48, %v1073_v1 }
 0x1eb   : >> { %v2188_v62 = vadd.f32 %v1020_v16, %v644_v55  ;;  %v1022_v7 = vpop.f32.mrb[7].mxu0  ;;  %vm1065_vm1 = vcmp.ge.f32.partialorder %v1057_v9, 0.0  ;;  %v1074_v3 = vmul.f32 %v3160_v6, %v1057_v9 }
 0x1ec   : >> { %v2189_v4 = vadd.f32 %v1022_v7, %v646_v61  ;;  %vm1066_vm3 = vcmp.ge.f32.partialorder %v1058_v17, 0.0 }
 0x1ed   : >> { %v1059_v50 = vadd.f32 %v2188_v62, %v1051_v0 }
 0x1ee   : >> { %v1060_v48 = vadd.f32 %v2189_v4, %v1051_v0 }
 0x1ef   : >> { %vm1067_vm6 = vcmp.ge.f32.partialorder %v1059_v50, 0.0 }
 0x1f0   : >> { %vm1068_vm8 = vcmp.ge.f32.partialorder %v1060_v48, 0.0 }
 0x21d   : >> { %v1538_v12 = vpop.f32.mrb[8].mxu1 }
 0x21e   : >> { %v1569_v11 = vadd.f32 %v1538_v12, %v1036_v58  ;;  %v1540_v44 = vpop.f32.mrb[9].mxu1 }
 0x21f   : >> { %v1570_v14 = vadd.f32 %v1540_v44, %v1036_v58  ;;  %v1075_v58 = vmul.f32 %v3160_v6, %v1058_v17 }
 0x220   : >> { %vm1577_vm12 = vcmp.ge.f32.partialorder %v1569_v11, 0.0  ;;  %v1585_v10 = vmul.f32 %v1569_v11, %v3160_v6 }
 0x221   : >> { %vm1578_vm14 = vcmp.ge.f32.partialorder %v1570_v14, 0.0  ;;  %v1586_v55 = vmul.f32 %v1570_v14, %v3160_v6  ;;  %v1544_v61 = vpop.f32.mrb[10].mxu1  ;;  %v1083_v62 = vsel %vm1066_vm3, %v1058_v17, %v1075_v58 }
 0x222   : >> { %v1593_v52 = vsel %vm1577_vm12, %v1569_v11, %v1585_v10  ;;  %v1571_v8 = vadd.f32 %v1544_v61, %v1041_v59  ;;  %v1546_v13 = vpop.f32.mrb[11].mxu1  ;;  %v1082_v10 = vsel %vm1065_vm1, %v1057_v9, %v1074_v3 }
 0x223   : >> { %v1601_v60 = vmax.f32 %v1078_v42, %v1593_v52  ;;  %v1572_v63 = vadd.f32 %v1546_v13, %v1041_v59  ;;  %v1594_v54 = vsel %vm1578_vm14, %v1570_v14, %v1586_v55  ;;  %v1077_v13 = vmul.f32 %v3160_v6, %v1060_v48 }
 0x224   : >> { %vm1579_vm15 = vcmp.ge.f32.partialorder %v1571_v8, 0.0  ;;  %v1587_v49 = vmul.f32 %v1571_v8, %v3160_v6  ;;  %v1602_v16 = vmax.f32 %v1079_v15, %v1594_v54 }
 0x225   : >> { %vm1580_vm2 = vcmp.ge.f32.partialorder %v1572_v63, 0.0  ;;  %v1588_v57 = vmul.f32 %v1572_v63, %v3160_v6  ;;  %v1550_v7 = vpop.f32.mrb[12].mxu1 }
 0x226   : >> { %v1573_v53 = vadd.f32 %v1550_v7, %v1046_v51  ;;  %v1552_v46 = vpop.f32.mrb[13].mxu1  ;;  %2034 = vmatprep.mubr.msk.f32.mxu0 %vm333_vm0, %v1602_v16  ;;  %v1595_v59 = vsel %vm1579_vm15, %v1571_v8, %v1587_v49 }
 0x227   : >> { %v1574_v12 = vadd.f32 %v1552_v46, %v1046_v51  ;;  %1694 = vmatmul.mubr.f32.vlgmr.msra.gmra.mrb[8].mxu0 %v1601_v60  ;;  %v1596_v11 = vsel %vm1580_vm2, %v1572_v63, %v1588_v57  ;;  %v1603_v44 = vmax.f32 %v1080_v5, %v1595_v59  ;;  %v1076_v51 = vmul.f32 %v3160_v6, %v1059_v50 }
 0x228   : >> { %vm1581_vm4 = vcmp.ge.f32.partialorder %v1573_v53, 0.0  ;;  %v1589_v47 = vmul.f32 %v1573_v53, %v3160_v6  ;;  %v1604_v2 = vmax.f32 %v1081_v56, %v1596_v11  ;;  %v1085_v63 = vsel %vm1068_vm8, %v1060_v48, %v1077_v13 }
 0x229   : >> { %vm1582_vm5 = vcmp.ge.f32.partialorder %v1574_v12, 0.0  ;;  %v1590_v14 = vmul.f32 %v1574_v12, %v3160_v6  ;;  %v1556_v1 = vpop.f32.mrb[14].mxu1  ;;  %v1084_v5 = vsel %vm1067_vm6, %v1059_v50, %v1076_v51 }
 0x22a   : >> { %v1575_v42 = vadd.f32 %v1556_v1, %v1051_v0  ;;  %v1558_v55 = vpop.f32.mrb[15].mxu1  ;;  %2035 = vmatprep.mubr.msk.f32.mxu0 %vm333_vm0, %v1604_v2  ;;  %v1597_v4 = vsel %vm1581_vm4, %v1573_v53, %v1589_v47 }
 0x22b   : >> { %v1576_v61 = vadd.f32 %v1558_v55, %v1051_v0  ;;  %1700 = vmatmul.mubr.f32.gmra.mrb[10].mxu0 %v1603_v44  ;;  %v1598_v52 = vsel %vm1582_vm5, %v1574_v12, %v1590_v14  ;;  %v1605_v8 = vmax.f32 %v1082_v10, %v1597_v4 }
 0x22c   : >> { %vm1583_vm7 = vcmp.ge.f32.partialorder %v1575_v42, 0.0  ;;  %v1591_v15 = vmul.f32 %v1575_v42, %v3160_v6  ;;  %v1606_v17 = vmax.f32 %v1083_v62, %v1598_v52 }
 0x22d   : >> { %vm1584_vm9 = vcmp.ge.f32.partialorder %v1576_v61, 0.0  ;;  %v1592_v9 = vmul.f32 %v1576_v61, %v3160_v6 }
 0x22e   : >> { %2036 = vmatprep.mubr.msk.f32.mxu0 %vm333_vm0, %v1606_v17  ;;  %v1599_v60 = vsel %vm1583_vm7, %v1575_v42, %v1591_v15 }
 0x22f   : >> { %1706 = vmatmul.mubr.f32.gmra.mrb[12].mxu0 %v1605_v8  ;;  %v1600_v0 = vsel %vm1584_vm9, %v1576_v61, %v1592_v9  ;;  %v1607_v54 = vmax.f32 %v1084_v5, %v1599_v60 }
 0x230   : >> { %v1608_v56 = vmax.f32 %v1085_v63, %v1600_v0 }
 0x232   : >> { %2037 = vmatprep.mubr.msk.f32.mxu0 %vm333_vm0, %v1608_v56 }
 0x233   : >> { %1712 = vmatmul.mubr.f32.gmra.mrb[14].mxu0 %v1607_v54 }
 0x2fa   : >> { %v1695_v49 = vpop.f32.mrb[8].mxu0 }
 0x2fb   : >> { %1726 = vrot.lane.b32.xlu0 %v1695_v49, %s2472_s30  ;;  %v1697_v16 = vpop.f32.mrb[9].mxu0 }
 0x2fc   : >> { %1728 = vrot.lane.b32.xlu1 %v1697_v16, %s2472_s30 }
 0x2fe   : >> { %v1701_v57 = vpop.f32.mrb[10].mxu0 }
 0x2ff   : >> { %1730 = vrot.lane.b32.xlu0 %v1701_v57, %s2472_s30  ;;  %v1703_v6 = vpop.f32.mrb[11].mxu0 }
 0x300   : >> { %1732 = vrot.lane.b32.xlu1 %v1703_v6, %s2472_s30 }
 0x302   : >> { %v1707_v7 = vpop.f32.mrb[12].mxu0 }
 0x303   : >> { %1734 = vrot.lane.b32.xlu0 %v1707_v7, %s2472_s30  ;;  %v1709_v58 = vpop.f32.mrb[13].mxu0 }
 0x304   : >> { %1736 = vrot.lane.b32.xlu1 %v1709_v58, %s2472_s30 }
 0x306   : >> { %v1713_v3 = vpop.f32.mrb[14].mxu0 }
 0x307   : >> { %1738 = vrot.lane.b32.xlu0 %v1713_v3, %s2472_s30  ;;  %v1715_v50 = vpop.f32.mrb[15].mxu0 }
 0x308   : >> { %1740 = vrot.lane.b32.xlu1 %v1715_v50, %s2472_s30 }
 0x36d   : >> { %v1727_v53 = vpop.permute.xlu0 %1726 }
 0x36e   : >> { %v1729_v46 = vpop.permute.xlu1 %1728 }
 0x36f   : >> { %v1743_v59 = vsel %vm1742_vm10, %v1727_v53, %v1729_v46 }
 0x370   : >> { %v1751_v48 = vmax.f32 %v1695_v49, %v1743_v59 }
 0x371   : >> { %v1731_v12 = vpop.permute.xlu0 %1730 }
 0x372   : >> { %1758 = vst.msk [vmem:[%s1756_s15] sm:$0xff] %vm1757_vm11, %v1751_v48  ;;  %v1733_v11 = vpop.permute.xlu1 %1732 }
 0x373   : >> { %v1744_v44 = vsel %vm1742_vm10, %v1731_v12, %v1733_v11 }
 0x374   : >> { %v1752_v47 = vmax.f32 %v1701_v57, %v1744_v44 }
 0x375   : >> { %v1735_v2 = vpop.permute.xlu0 %1734 }
 0x376   : >> { %1759 = vst.msk [vmem:[%s1756_s15 + $0x8] sm:$0xff] %vm1757_vm11, %v1752_v47  ;;  %v1737_v14 = vpop.permute.xlu1 %1736 }
 0x377   : >> { %v1745_v1 = vsel %vm1742_vm10, %v1735_v2, %v1737_v14 }
 0x378   : >> { %v1753_v62 = vmax.f32 %v1707_v7, %v1745_v1  ;;  %407 = sbr.rel (!%p405_p10) target bundleno = 215 (0xd7), region = 117 }
 0x379   : >> { %v1739_v10 = vpop.permute.xlu0 %1738 }
 0x37a   : >> { %1760 = vst.msk [vmem:[%s1756_s15 + $0x10] sm:$0xff] %vm1757_vm11, %v1753_v62  ;;  %v1741_v42 = vpop.permute.xlu1 %1740 }
 0x37b   : >> { %v1746_v55 = vsel %vm1742_vm10, %v1739_v10, %v1741_v42 }
 0x37c   : >> { %v1754_v4 = vmax.f32 %v1713_v3, %v1746_v55 }
 0x37e   : >> { %1761 = vst.msk [vmem:[%s1756_s15 + $0x18] sm:$0xff] %vm1757_vm11, %v1754_v4 }
 0x37f PF: > { %s18_s24 = sadd.s32 1, %s2449_s24   ;;  %s3296_s20 = smov %s2441_s22 }
 0x380   : > { %p15_p11 = scmp.ge.s32.totalorder %s18_s24, 6   ;;  %s3297_s21 = smov %s2445_s23 }
 0x381   : > { %s3298_s22 = smov %s3301_s25  ;;  %s3299_s23 = smov %s3305_s26 }
 0x382   :  { %17 = sbr.rel (!%p15_p11) target bundleno = 6 (0x6), region = 128 }
 0x389   :  { %1794 = vsyncpa [#allocation5], 1 }
 0x38a   :  { %1796 = vsyncpa [#allocation5 + $0x1], 1 }
 0x38b   :  { %1797 = vsyncpa [#allocation7], 1 }

// kernel: embedding_net_forward.4
= control target key start
LH: loop header
LB: loop body
LE: loop exit
PB: predicated region body
PF: predicated region fallthrough
CT: control target
= control target key end

     0   :  { %s3103_s0 = inlined_call_operand.vmem [shape: f32[2,110,32,110], index: 0, kind: input, shape index: {}]   ;;  %s3104_s1 = inlined_call_operand.hbm [shape: f32[5,16,160], index: 1, kind: input, shape index: {}]   ;;  %s3105_s2 = inlined_call_operand.vmem [shape: f32[16,1], index: 2, kind: input, shape index: {}]   ;;  %s3106_s3 = inlined_call_operand.hbm [shape: f32[106,106], index: 3, kind: input, shape index: {}]   ;;  %s3107_s4 = inlined_call_operand.<no memory space> [shape: f32[1], index: 4, kind: input, shape index: {}]   ;;  %s3108_s5 = inlined_call_operand.vmem [shape: f32[2,53,16,53], index: 5, kind: output, shape index: {}]  }
   0x1   :  { %10 = sst [smem:[#allocation3]] %s3107_s4 }
   0x2   :  { %11 = vsyncpa [#allocation5], 0 }
   0x3   :  { %12 = vsyncpa [#allocation7], 0  ;;  %s2381_s20 = smov 0   ;;  %s2383_s21 = smov 0  }
   0x4   :  { %s2385_s22 = smov 0  }
   0x5 LB: > { %s1627_s4 = sadd.s32 4294967295, %s2324_s22   ;;  %s30_s23 = sadd.s32 1, %s2320_s21  ;;  %s2324_s22 = sphi %s2385_s22, %s18_s22   ;;  %s2320_s21 = sphi %s2383_s21, %s3137_s21   ;;  %s2316_s20 = sphi %s2381_s20, %s3136_s20  }
   0x6   : > { %p32_p0 = scmp.ge.s32.totalorder %s30_s23, 2  ;;  %p1629_p1 = scmp.ge.s32.totalorder %s2324_s22, 1 }
   0x7   : > { %p173_p2 = scmp.lt.s32.totalorder %s2324_s22, 3  ;;  %p2406_p4 = scmp.eq.s32.totalorder %s1627_s4, 0 }
   0x8   : > { %s3139_s23 = smov (%p32_p0, %s30_s23), 0  ;;  %s2334_s26 = smov [#allocation4]  }
   0x9   : > { %p2402_p3 = pnand %p1629_p1, %p173_p2  ;;  %s185_s27 = sshll.u32 %s2334_s26, 4  ;;  %s186_s27 = int_to_ptr.vmem [resolvable:$true] %s185_s27 }
   0xa   : > { %s3115_s25 = scalar_select %p2406_p4, 1, 0 }
   0xb   : > { %s3114_s24 = scalar_select %p2402_p3, 1, 0 }
   0xc   : > { %p2164_p5 = pneg %p2402_p3  ;;  %s2335_s29 = smov [#allocation6]  }
   0xd   : > { %s201_s30 = sshll.u32 %s2335_s29, 4  ;;  %s2230_s8 = scalar_lea.hbm %s3104_s1, 2560  ;;  %s2418_s30 = int_to_ptr.vmem [resolvable:$true] %s201_s30 }
   0xe   : > { %p2414_p6 = pnand %p2406_p4, %p2164_p5  ;;  %p2231_p7 = scmp.ne.s32.totalorder %s3104_s1, %s2230_s8 }
   0xf   : > { %p2237_p11 = scmp.lt.u32.totalorder %s2230_s8, %s3104_s1 }
  0x10   : > { %p2232_p8 = pneg %p2414_p6 }
  0x12   : > { %p2233_p9 = pnand %p2232_p8, %p2231_p7 }
  0x14   : > { %p2234_p10 = pneg %p2233_p9 }
  0x16   : > { %p2239_p12 = pnand %p2237_p11, %p2234_p10 }
  0x18   : > { %2242 = shalt.err (!%p2239_p12)
}
  0x19   : > { %s2243_s13 = scalar_lea.vmem %s186_s27, 2560  ;;  %p2251_p2 = scmp.lt.s32.totalorder %s186_s27, %s186_s27 }
  0x1a   : > { %p2244_p13 = scmp.ne.s32.totalorder %s186_s27, %s2243_s13  ;;  %p2252_p5 = scmp.lt.s32.totalorder %s2243_s13, %s2243_s13 }
  0x1c   : > { %p2246_p0 = pnand %p2244_p13, %p2232_p8  ;;  %p2253_p4 = por %p2252_p5, %p2251_p2 }
  0x1e   : > { %p2247_p1 = pneg %p2246_p0 }
  0x20   : > { %p2254_p3 = pnand %p2253_p4, %p2247_p1 }
  0x22   : > { %2257 = shalt.err (!%p2254_p3)
}
  0x23   : > { %s2336_s14 = smov 256   ;;  %s2337_s15 = smov 16  }
  0x24   : > { %2167 = dma.hbm_to_vmem [thread:$0]  (!%p2414_p6), %s3104_s1, 2560, %s186_s27, [#allocation5], %s2336_s14, %s2336_s14, %s2337_s15  }
  0x25   : > { %s2258_s4 = scalar_lea.hbm %s3106_s3, 1792 }
  0x26   : > { %p2259_p7 = scmp.ne.s32.totalorder %s3106_s3, %s2258_s4  ;;  %p2265_p9 = scmp.lt.u32.totalorder %s2258_s4, %s3106_s3 }
  0x28   : > { %p2261_p3 = pnand %p2259_p7, %p2232_p8 }
  0x2a   : > { %p2262_p4 = pneg %p2261_p3 }
  0x2c   : > { %p2267_p10 = pnand %p2265_p9, %p2262_p4 }
  0x2e   : > { %2270 = shalt.err (!%p2267_p10)
}
  0x2f   : > { %s2271_s27 = scalar_lea.vmem %s2418_s30, 1792  ;;  %p2279_p0 = scmp.lt.s32.totalorder %s2418_s30, %s2418_s30 }
  0x30   : > { %p2272_p11 = scmp.ne.s32.totalorder %s2418_s30, %s2271_s27  ;;  %p2280_p1 = scmp.lt.s32.totalorder %s2271_s27, %s2271_s27 }
  0x32   : > { %p2274_p12 = pnand %p2272_p11, %p2232_p8  ;;  %p2281_p2 = por %p2280_p1, %p2279_p0 }
  0x34   : > { %p2275_p13 = pneg %p2274_p12 }
  0x36   : > { %p2282_p5 = pnand %p2281_p2, %p2275_p13 }
  0x38   : > { %2285 = shalt.err (!%p2282_p5)
}
  0x39   : > { %s2338_s8 = smov 128   ;;  %s2339_s9 = smov 8  }
  0x3a   : > { %2170 = dma.hbm_to_vmem [thread:$0]  (!%p2414_p6), %s3106_s3, 1792, %s2418_s30, [#allocation7], %s2338_s8, %s2338_s8, %s2339_s9  }
  0x3b   : > { %p3117_p7 = scmp.ne.s32.totalorder %s3114_s24, 0 }
  0x3c   : > { %p3118_p8 = scmp.ne.s32.totalorder (!%p3117_p7), %s3115_s25, 0 }
  0x3d   : > { %228 = sbr.rel (%p3117_p7) target bundleno = 995 (0x3e3), region = 40 }
  0x44   : > { %2307 = dma.done.wait (%p3118_p8), [#allocation5], 2560  }
  0x45   : > { %2309 = vsyncadd (%p3118_p8), [#allocation5], 4294964736 }
  0x46   : > { %2311 = dma.done.wait (%p3118_p8), [#allocation7], 1792  }
  0x47   : > { %2313 = vsyncadd (%p3118_p8), [#allocation7], 4294965504  ;;  %p265_p3 = scmp.lt.s32.totalorder %s2316_s20, 1  ;;  %s2478_s28 = sld [smem:[#allocation3]] }
  0x48   : > { %s2491_s25 = smov 0  }
  0x49   : > { %s3141_s20 = smov (!%p265_p3, %s2316_s20), 1 }
  0x4a   : > { %s2154_s24 = smul.u32 3520, %s3141_s20 }
  0x4b   : > { %s2155_s30 = smul.u32 848, %s3141_s20 }
  0x4c   : > { %s2484_s14 = scalar_lea.vmem %s3103_s0, %s2154_s24 }
  0x4d   : > { %s2489_s17 = scalar_lea.vmem %s3108_s5, %s2155_s30 }
  0x4e LB: >> { %s1638_s20 = sshll.u32 %s2328_s25, 5  ;;  %s348_s18 = smul.u32 160, %s2328_s25  ;;  %vm350_vm0 = vcmask 867328   ;;  %s2328_s25 = sphi %s2491_s25, %s288_s25  }
  0x4f   : >> { %s291_s19 = scalar_lea.vmem %s2484_s14, %s1638_s20  ;;  %s2340_s4 = smov 127  }
  0x50   : >> { %v294_v0 = vld [vmem:[%s291_s19 + $0x10] sm:$0xff]  ;;  %v292_v1 = vld [vmem:[%s291_s19] sm:$0xff]  ;;  %v295_v2 = vld [vmem:[%s291_s19 + $0x18] sm:$0xff]  ;;  %s2499_s26 = scalar_lea.vmem [#allocation2], %s348_s18  ;;  %s2341_s29 = smov 126  }
  0x51   : >> { %304 = vrot.lane.b32.xlu1 %v294_v0, %s2340_s4  ;;  %353 = vst.msk [vmem:[%s2499_s26 + $0x10] sm:$0xff] %vm350_vm0, %v294_v0  ;;  %300 = vrot.lane.b32.xlu0 %v292_v1, %s2340_s4  ;;  %351 = vst.msk [vmem:[%s2499_s26] sm:$0xff] %vm350_vm0, %v292_v1  ;;  %s2342_s6 = smov 125   ;;  %s2343_s7 = smov 124  }
  0x52   : >> { %354 = vst.msk [vmem:[%s2499_s26 + $0x18] sm:$0xff] %vm350_vm0, %v295_v2  ;;  %v293_v3 = vld [vmem:[%s291_s19 + $0x8] sm:$0xff]  ;;  %s288_s25 = sadd.s32 1, %s2328_s25  }
  0x53   : >> { %352 = vst.msk [vmem:[%s2499_s26 + $0x8] sm:$0xff] %vm350_vm0, %v293_v3  ;;  %p285_p6 = scmp.ge.s32.totalorder %s288_s25, 110  }
  0x54   : > { %v2547_v20 = vld [vmem:[%s3105_s2] sm:$0xff] (%p285_p6)  ;;  %v2552_v21 = vld [vmem:[%s3105_s2 + $0x8] sm:$0xff] (%p285_p6)  ;;  %v2558_v24 = vld [vmem:[#allocation6 + $0x10] sm:$0xff] (%p285_p6)  ;;  %s2582_s11 = smov (%p285_p6), 0  }
  0x55   : >> { %306 = vrot.lane.b32.xlu1 %v295_v2, %s2340_s4  ;;  %302 = vrot.lane.b32.xlu0 %v293_v3, %s2340_s4  ;;  %3119 = vst [vmem:[#allocation10_spill] sm:$0xff] (%p285_p6), %v2547_v20  ;;  %3120 = vst [vmem:[#allocation11_spill] sm:$0xff] (%p285_p6), %v2552_v21  ;;  %v2554_v22 = vld [vmem:[#allocation6] sm:$0xff] (%p285_p6)  ;;  %v2556_v23 = vld [vmem:[#allocation6 + $0x8] sm:$0xff] (%p285_p6) }
  0x56   : > { %v2560_v25 = vld [vmem:[#allocation6 + $0x18] sm:$0xff] (%p285_p6)  ;;  %v2562_v26 = vld [vmem:[#allocation6 + $0x20] sm:$0xff] (%p285_p6)  ;;  %v2564_v27 = vld [vmem:[#allocation6 + $0x28] sm:$0xff] (%p285_p6) }
  0x57   : > { %v2566_v28 = vld [vmem:[#allocation6 + $0x30] sm:$0xff] (%p285_p6)  ;;  %v2568_v29 = vld [vmem:[#allocation6 + $0x38] sm:$0xff] (%p285_p6)  ;;  %v2570_v30 = vld [vmem:[#allocation6 + $0x40] sm:$0xff] (%p285_p6) }
  0x58   : > { %3121 = vst [vmem:[#allocation12_spill] sm:$0xff] (%p285_p6), %v2570_v30  ;;  %v2572_v31 = vld [vmem:[#allocation6 + $0x48] sm:$0xff] (%p285_p6)  ;;  %v2574_v32 = vld [vmem:[#allocation6 + $0x50] sm:$0xff] (%p285_p6)  ;;  %v2576_v33 = vld [vmem:[#allocation6 + $0x58] sm:$0xff] (%p285_p6) }
  0x59   : >> { %314 = vrot.lane.b32.xlu1 %v293_v3, %s2341_s29  ;;  %312 = vrot.lane.b32.xlu0 %v292_v1, %s2341_s29  ;;  %3122 = vst [vmem:[#allocation13_spill] sm:$0xff] (%p285_p6), %v2572_v31  ;;  %3123 = vst [vmem:[#allocation14_spill] sm:$0xff] (%p285_p6), %v2574_v32  ;;  %v2578_v34 = vld [vmem:[#allocation6 + $0x60] sm:$0xff] (%p285_p6)  ;;  %v2580_v35 = vld [vmem:[#allocation6 + $0x68] sm:$0x3] (%p285_p6) }
  0x5a   : > { %3124 = vst [vmem:[#allocation15_spill] sm:$0xff] (%p285_p6), %v2576_v33  ;;  %3125 = vst [vmem:[#allocation16_spill] sm:$0xff] (%p285_p6), %v2578_v34 }
  0x5b   : > { %3126 = vst [vmem:[#allocation17_spill] sm:$0xff] (%p285_p6), %v2580_v35 }
  0x5d   : >> { %318 = vrot.lane.b32.xlu1 %v295_v2, %s2341_s29  ;;  %316 = vrot.lane.b32.xlu0 %v294_v0, %s2341_s29 }
  0x61   : >> { %326 = vrot.lane.b32.xlu1 %v293_v3, %s2342_s6  ;;  %324 = vrot.lane.b32.xlu0 %v292_v1, %s2342_s6 }
  0x65   : >> { %330 = vrot.lane.b32.xlu1 %v295_v2, %s2342_s6  ;;  %328 = vrot.lane.b32.xlu0 %v294_v0, %s2342_s6 }
  0x69   : >> { %338 = vrot.lane.b32.xlu1 %v293_v3, %s2343_s7  ;;  %336 = vrot.lane.b32.xlu0 %v292_v1, %s2343_s7 }
  0x6d   : >> { %342 = vrot.lane.b32.xlu1 %v295_v2, %s2343_s7  ;;  %340 = vrot.lane.b32.xlu0 %v294_v0, %s2343_s7 }
  0xc3   : >> { %v305_v4 = vpop.permute.xlu1 %304  ;;  %v301_v5 = vpop.permute.xlu0 %300 }
  0xc4   : >> { %357 = vst.msk [vmem:[%s2499_s26 + $0x30] sm:$0xff] %vm350_vm0, %v305_v4  ;;  %355 = vst.msk [vmem:[%s2499_s26 + $0x20] sm:$0xff] %vm350_vm0, %v301_v5 }
  0xc7   : >> { %v307_v6 = vpop.permute.xlu1 %306  ;;  %v303_v7 = vpop.permute.xlu0 %302 }
  0xc8   : >> { %358 = vst.msk [vmem:[%s2499_s26 + $0x38] sm:$0xff] %vm350_vm0, %v307_v6  ;;  %356 = vst.msk [vmem:[%s2499_s26 + $0x28] sm:$0xff] %vm350_vm0, %v303_v7 }
  0xcb   : >> { %v315_v8 = vpop.permute.xlu1 %314  ;;  %v313_v9 = vpop.permute.xlu0 %312 }
  0xcc   : >> { %360 = vst.msk [vmem:[%s2499_s26 + $0x48] sm:$0xff] %vm350_vm0, %v315_v8  ;;  %359 = vst.msk [vmem:[%s2499_s26 + $0x40] sm:$0xff] %vm350_vm0, %v313_v9 }
  0xcf   : >> { %v319_v10 = vpop.permute.xlu1 %318  ;;  %v317_v11 = vpop.permute.xlu0 %316 }
  0xd0   : >> { %362 = vst.msk [vmem:[%s2499_s26 + $0x58] sm:$0xff] %vm350_vm0, %v319_v10  ;;  %361 = vst.msk [vmem:[%s2499_s26 + $0x50] sm:$0xff] %vm350_vm0, %v317_v11 }
  0xd3   : >> { %v327_v12 = vpop.permute.xlu1 %326  ;;  %v325_v13 = vpop.permute.xlu0 %324 }
  0xd4   : >> { %364 = vst.msk [vmem:[%s2499_s26 + $0x68] sm:$0xff] %vm350_vm0, %v327_v12  ;;  %363 = vst.msk [vmem:[%s2499_s26 + $0x60] sm:$0xff] %vm350_vm0, %v325_v13 }
  0xd7   : >> { %v331_v14 = vpop.permute.xlu1 %330  ;;  %v329_v15 = vpop.permute.xlu0 %328 }
  0xd8   : >> { %366 = vst.msk [vmem:[%s2499_s26 + $0x78] sm:$0xff] %vm350_vm0, %v331_v14  ;;  %365 = vst.msk [vmem:[%s2499_s26 + $0x70] sm:$0xff] %vm350_vm0, %v329_v15 }
  0xda   : > { %287 = sbr.rel (!%p285_p6) target bundleno = 78 (0x4e), region = 106 }
  0xdb   : >> { %v339_v16 = vpop.permute.xlu1 %338  ;;  %v337_v17 = vpop.permute.xlu0 %336 }
  0xdc   : >> { %368 = vst.msk [vmem:[%s2499_s26 + $0x88] sm:$0xff] %vm350_vm0, %v339_v16  ;;  %367 = vst.msk [vmem:[%s2499_s26 + $0x80] sm:$0xff] %vm350_vm0, %v337_v17 }
  0xdf   : >> { %v343_v18 = vpop.permute.xlu1 %342  ;;  %v341_v19 = vpop.permute.xlu0 %340 }
  0xe0   : >> { %370 = vst.msk [vmem:[%s2499_s26 + $0x98] sm:$0xff] %vm350_vm0, %v343_v18  ;;  %369 = vst.msk [vmem:[%s2499_s26 + $0x90] sm:$0xff] %vm350_vm0, %v341_v19 }
  0xe1 LB: >> { %v2587_v36 = vld [vmem:[#allocation4 + $0x28] sm:$0xff]  ;;  %vm448_vm1 = vcmask 261120   ;;  %v3112_v38 = vmov 0.0|0.0   ;;  %s1640_s24 = smul.u32 320, %s2332_s11  ;;  %v2345_v34 = vmov 0   ;;  %v3127_v20 = vld [vmem:[#allocation10_spill] sm:$0xff]  ;;  %s2332_s11 = sphi %s2582_s11, %s392_s11  }
  0xe2   : >> { %v2589_v37 = vld [vmem:[#allocation4 + $0x8] sm:$0xff]  ;;  %1824 = vmatprep.subr.bf16.mxu0 %v3112_v38  ;;  %1854 = vmatprep.subr.bf16.mxu1 %v3112_v38  ;;  %v3128_v32 = vmov 0.0|0.0   ;;  %v3129_v21 = vld [vmem:[#allocation11_spill] sm:$0xff]  ;;  %vm1384_vm2 = vcmask 1041408   ;;  %vm2346_vm3 = vmmov 1   ;;  %s2347_s12 = smov 75  }
  0xe3   : >> { %1663 = vmatprep.mubr.msk.f32.mxu0 %vm448_vm1, %v2587_v36  ;;  %1665 = vmatprep.mubr.msk.f32.mxu1 %vm448_vm1, %v2589_v37  ;;  %s2598_s30 = scalar_lea.vmem [#allocation2], %s1640_s24  ;;  %vm2149_vm4 = vmpackc.low %vm1384_vm2, %vm2346_vm3  ;;  %s1774_s13 = sshll.u32 %s2332_s11, 4  ;;  %vm1475_vm9 = vcmask 433152  }
  0xe4   : >> { %2229 = vset.pattern.permute.xlu0 %v2345_v34  ;;  %v2856_v34 = vld [vmem:[#allocation4 + $0x50] sm:$0xff]  ;;  %s1474_s14 = scalar_lea.vmem %s2489_s17, %s1774_s13  ;;  %s392_s11 = sadd.s32 1, %s2332_s11  }
  0xe5   : >> { %946 = vperm.xlu0 %2229, %v3127_v20   ;;  %p389_p4 = scmp.ge.s32.totalorder %s392_s11, 53  }
  0xe7   : >> { %v1643_v39 = vld [vmem:[%s2598_s30 + $0xa0] sm:$0xff]  ;;  %v1644_v40 = vld [vmem:[%s2598_s30 + $0xa8] sm:$0xff]  ;;  %v1645_v44 = vld [vmem:[%s2598_s30 + $0xb0] sm:$0xff] }
  0xe8   : >> { %v400_v41 = vld [vmem:[%s2598_s30] sm:$0xff]  ;;  %v2603_v42 = vpack.c.bf16 %v1644_v40, %v1643_v39  ;;  %v401_v43 = vld [vmem:[%s2598_s30 + $0x8] sm:$0xff]  ;;  %v1646_v45 = vld [vmem:[%s2598_s30 + $0xb8] sm:$0xff] }
  0xe9   : >> { %v1855_v46 = vpack.c.bf16 %v401_v43, %v400_v41  ;;  %v402_v47 = vld [vmem:[%s2598_s30 + $0x10] sm:$0xff]  ;;  %v403_v48 = vld [vmem:[%s2598_s30 + $0x18] sm:$0xff]  ;;  %v2611_v49 = vpack.c.bf16 %v1646_v45, %v1645_v44  ;;  %v1647_v51 = vld [vmem:[%s2598_s30 + $0xc0] sm:$0xff]  ;;  %951 = vperm.xlu0 %2229, %v3129_v21  }
  0xea   : >> { %1826 = vmatpush1.bf16.msra.mxu0 %v2603_v42  ;;  %v1858_v50 = vpack.c.bf16 %v403_v48, %v402_v47  ;;  %v1648_v52 = vld [vmem:[%s2598_s30 + $0xc8] sm:$0xff]  ;;  %v404_v53 = vld [vmem:[%s2598_s30 + $0x20] sm:$0xff]  ;;  %v1649_v57 = vld [vmem:[%s2598_s30 + $0xd0] sm:$0xff] }
  0xeb   : >> { %1856 = vmatpush1.bf16.msra.mxu1 %v1855_v46  ;;  %1827 = vmatprep.subr.bf16.mxu0 %v3112_v38  ;;  %v405_v54 = vld [vmem:[%s2598_s30 + $0x28] sm:$0xff]  ;;  %v2620_v55 = vpack.c.bf16 %v1648_v52, %v1647_v51  ;;  %v1650_v58 = vld [vmem:[%s2598_s30 + $0xd8] sm:$0xff]  ;;  %v406_v59 = vld [vmem:[%s2598_s30 + $0x30] sm:$0xff] }
  0xec   : >> { %1857 = vmatprep.subr.bf16.mxu1 %v3112_v38  ;;  %v1861_v56 = vpack.c.bf16 %v405_v54, %v404_v53  ;;  %v407_v60 = vld [vmem:[%s2598_s30 + $0x38] sm:$0xff]  ;;  %v2629_v61 = vpack.c.bf16 %v1650_v58, %v1649_v57  ;;  %v1651_v63 = vld [vmem:[%s2598_s30 + $0xe0] sm:$0xff]  ;;  %v1652_v0 = vld [vmem:[%s2598_s30 + $0xe8] sm:$0xff] }
  0xed   : >> { %v1864_v62 = vpack.c.bf16 %v407_v60, %v406_v59  ;;  %v408_v1 = vld [vmem:[%s2598_s30 + $0x40] sm:$0xff]  ;;  %v409_v2 = vld [vmem:[%s2598_s30 + $0x48] sm:$0xff]  ;;  %v2638_v3 = vpack.c.bf16 %v1652_v0, %v1651_v63  ;;  %v1653_v5 = vld [vmem:[%s2598_s30 + $0xf0] sm:$0xff] }
  0xee   : >> { %1829 = vmatpush1.bf16.msra.mxu0 %v2611_v49  ;;  %v1867_v4 = vpack.c.bf16 %v409_v2, %v408_v1  ;;  %v1654_v6 = vld [vmem:[%s2598_s30 + $0xf8] sm:$0xff]  ;;  %v410_v7 = vld [vmem:[%s2598_s30 + $0x50] sm:$0xff]  ;;  %v1655_v11 = vld [vmem:[%s2598_s30 + $0x100] sm:$0xff] }
  0xef   : >> { %1859 = vmatpush1.bf16.msra.mxu1 %v1858_v50  ;;  %1830 = vmatprep.subr.bf16.mxu0 %v3112_v38  ;;  %v411_v8 = vld [vmem:[%s2598_s30 + $0x58] sm:$0xff]  ;;  %v2647_v9 = vpack.c.bf16 %v1654_v6, %v1653_v5  ;;  %v1656_v12 = vld [vmem:[%s2598_s30 + $0x108] sm:$0xff]  ;;  %v412_v13 = vld [vmem:[%s2598_s30 + $0x60] sm:$0xff] }
  0xf0   : >> { %1860 = vmatprep.subr.bf16.mxu1 %v3112_v38  ;;  %v1870_v10 = vpack.c.bf16 %v411_v8, %v410_v7  ;;  %v413_v14 = vld [vmem:[%s2598_s30 + $0x68] sm:$0xff]  ;;  %v2656_v15 = vpack.c.bf16 %v1656_v12, %v1655_v11  ;;  %v1657_v17 = vld [vmem:[%s2598_s30 + $0x110] sm:$0xff]  ;;  %v1658_v18 = vld [vmem:[%s2598_s30 + $0x118] sm:$0xff] }
  0xf1   : >> { %v1873_v16 = vpack.c.bf16 %v413_v14, %v412_v13  ;;  %v414_v19 = vld [vmem:[%s2598_s30 + $0x70] sm:$0xff]  ;;  %v415_v39 = vld [vmem:[%s2598_s30 + $0x78] sm:$0xff]  ;;  %v2665_v40 = vpack.c.bf16 %v1658_v18, %v1657_v17  ;;  %v1659_v43 = vld [vmem:[%s2598_s30 + $0x120] sm:$0xff] }
  0xf2   : >> { %1832 = vmatpush1.bf16.msra.mxu0 %v2620_v55  ;;  %v1876_v41 = vpack.c.bf16 %v415_v39, %v414_v19  ;;  %v1660_v44 = vld [vmem:[%s2598_s30 + $0x128] sm:$0xff]  ;;  %v416_v45 = vld [vmem:[%s2598_s30 + $0x80] sm:$0xff]  ;;  %v1661_v50 = vld [vmem:[%s2598_s30 + $0x130] sm:$0xff] }
  0xf3   : >> { %1862 = vmatpush1.bf16.msra.mxu1 %v1861_v56  ;;  %1833 = vmatprep.subr.bf16.mxu0 %v3112_v38  ;;  %v417_v46 = vld [vmem:[%s2598_s30 + $0x88] sm:$0xff]  ;;  %v2674_v47 = vpack.c.bf16 %v1660_v44, %v1659_v43  ;;  %v1662_v51 = vld [vmem:[%s2598_s30 + $0x138] sm:$0xff]  ;;  %v418_v52 = vld [vmem:[%s2598_s30 + $0x90] sm:$0xff] }
  0xf4   : >> { %1863 = vmatprep.subr.bf16.mxu1 %v3112_v38  ;;  %v1879_v48 = vpack.c.bf16 %v417_v46, %v416_v45  ;;  %v419_v53 = vld [vmem:[%s2598_s30 + $0x98] sm:$0xff]  ;;  %v2683_v54 = vpack.c.bf16 %v1662_v51, %v1661_v50  ;;  %v1669_v57 = vld [vmem:[%s2598_s30 + $0x140] sm:$0xff]  ;;  %v1670_v58 = vld [vmem:[%s2598_s30 + $0x148] sm:$0xff] }
  0xf5   : >> { %v1882_v56 = vpack.c.bf16 %v419_v53, %v418_v52  ;;  %v1693_v59 = vld [vmem:[%s2598_s30 + $0x1e0] sm:$0xff]  ;;  %v1694_v60 = vld [vmem:[%s2598_s30 + $0x1e8] sm:$0xff]  ;;  %v2694_v63 = vpack.c.bf16 %v1670_v58, %v1669_v57  ;;  %v1671_v2 = vld [vmem:[%s2598_s30 + $0x150] sm:$0xff] }
  0xf6   : >> { %1835 = vmatpush1.bf16.msra.mxu0 %v2629_v61  ;;  %v2697_v0 = vld [vmem:[#allocation4] sm:$0xff]  ;;  %v2699_v1 = vpack.c.bf16 %v1694_v60, %v1693_v59  ;;  %v1695_v5 = vld [vmem:[%s2598_s30 + $0x1f0] sm:$0xff]  ;;  %v1696_v6 = vld [vmem:[%s2598_s30 + $0x1f8] sm:$0xff] }
  0xf7   : >> { %1865 = vmatpush1.bf16.msra.mxu1 %v1864_v62  ;;  %1836 = vmatprep.subr.bf16.mxu0 %v3112_v38  ;;  %v2692_v62 = vld [vmem:[#allocation4 + $0x20] sm:$0xff]  ;;  %v2707_v7 = vld [vmem:[#allocation4 + $0x38] sm:$0xff]  ;;  %v2719_v12 = vpack.c.bf16 %v1696_v6, %v1695_v5  ;;  %v1674_v14 = vld [vmem:[%s2598_s30 + $0x168] sm:$0xff] }
  0xf8   : >> { %1866 = vmatprep.subr.bf16.mxu1 %v3112_v38  ;;  %v2715_v11 = vld [vmem:[#allocation4 + $0x18] sm:$0xff]  ;;  %v1673_v13 = vld [vmem:[%s2598_s30 + $0x160] sm:$0xff]  ;;  %v1698_v18 = vld [vmem:[%s2598_s30 + $0x208] sm:$0xff] }
  0xf9   : >> { %v1697_v17 = vld [vmem:[%s2598_s30 + $0x200] sm:$0xff]  ;;  %v2733_v19 = vld [vmem:[#allocation4 + $0x48] sm:$0xff]  ;;  %v2736_v39 = vpack.c.bf16 %v1674_v14, %v1673_v13  ;;  %v1675_v44 = vld [vmem:[%s2598_s30 + $0x170] sm:$0xff] }
  0xfa   : >> { %1838 = vmatpush1.bf16.msra.mxu0 %v2638_v3  ;;  %v2743_v43 = vpack.c.bf16 %v1698_v18, %v1697_v17  ;;  %v1676_v45 = vld [vmem:[%s2598_s30 + $0x178] sm:$0xff]  ;;  %v1699_v46 = vld [vmem:[%s2598_s30 + $0x210] sm:$0xff]  ;;  %v1677_v52 = vld [vmem:[%s2598_s30 + $0x180] sm:$0xff] }
  0xfb   : >> { %1868 = vmatpush1.bf16.msra.mxu1 %v1867_v4  ;;  %1839 = vmatprep.subr.bf16.mxu0 %v3112_v38  ;;  %v1672_v4 = vld [vmem:[%s2598_s30 + $0x158] sm:$0xff]  ;;  %v2755_v50 = vpack.c.bf16 %v1676_v45, %v1675_v44  ;;  %v1678_v53 = vld [vmem:[%s2598_s30 + $0x188] sm:$0xff]  ;;  %v1679_v60 = vld [vmem:[%s2598_s30 + $0x190] sm:$0xff] }
  0xfc   : >> { %1869 = vmatprep.subr.bf16.mxu1 %v3112_v38  ;;  %v2711_v8 = vpack.c.bf16 %v1672_v4, %v1671_v2  ;;  %v1702_v57 = vld [vmem:[%s2598_s30 + $0x228] sm:$0xff]  ;;  %v2767_v58 = vpack.c.bf16 %v1678_v53, %v1677_v52  ;;  %v1680_v2 = vld [vmem:[%s2598_s30 + $0x198] sm:$0xff]  ;;  %v1703_v4 = vld [vmem:[%s2598_s30 + $0x230] sm:$0xff] }
  0xfd   : >> { %v1704_v5 = vld [vmem:[%s2598_s30 + $0x238] sm:$0xff]  ;;  %v2779_v6 = vpack.c.bf16 %v1680_v2, %v1679_v60  ;;  %v1681_v14 = vld [vmem:[%s2598_s30 + $0x1a0] sm:$0xff]  ;;  %v1682_v17 = vld [vmem:[%s2598_s30 + $0x1a8] sm:$0xff] }
  0xfe   : >> { %1841 = vmatpush1.bf16.msra.mxu0 %v2647_v9  ;;  %v2783_v13 = vpack.c.bf16 %v1704_v5, %v1703_v4  ;;  %v1705_v18 = vld [vmem:[%s2598_s30 + $0x240] sm:$0xff]  ;;  %v1706_v44 = vld [vmem:[%s2598_s30 + $0x248] sm:$0xff]  ;;  %v2791_v45 = vpack.c.bf16 %v1682_v17, %v1681_v14  ;;  %v1684_v52 = vld [vmem:[%s2598_s30 + $0x1b8] sm:$0xff] }
  0xff   : >> { %1871 = vmatpush1.bf16.msra.mxu1 %v1870_v10  ;;  %1842 = vmatprep.subr.bf16.mxu0 %v3112_v38  ;;  %v2713_v10 = vld [vmem:[#allocation4 + $0x30] sm:$0xff]  ;;  %v1685_v2 = vld [vmem:[%s2598_s30 + $0x1c0] sm:$0xff]  ;;  %v1686_v4 = vld [vmem:[%s2598_s30 + $0x1c8] sm:$0xff] }
 0x100   : >> { %1872 = vmatprep.subr.bf16.mxu1 %v3112_v38  ;;  %v1707_v53 = vld [vmem:[%s2598_s30 + $0x250] sm:$0xff]  ;;  %v1709_v5 = vld [vmem:[%s2598_s30 + $0x260] sm:$0xff]  ;;  %v1710_v14 = vld [vmem:[%s2598_s30 + $0x268] sm:$0xff]  ;;  %v2815_v17 = vpack.c.bf16 %v1686_v4, %v1685_v2 }
 0x101   : >> { %v1717_v4 = vld [vmem:[%s2598_s30 + $0x280] sm:$0xff]  ;;  %v1722_v33 = vld [vmem:[%s2598_s30 + $0x2a8] sm:$0xff]  ;;  %v1724_v31 = vld [vmem:[%s2598_s30 + $0x2b8] sm:$0xff] }
 0x102   : >> { %1844 = vmatpush1.bf16.msra.mxu0 %v2656_v15  ;;  %v1721_v20 = vld [vmem:[%s2598_s30 + $0x2a0] sm:$0xff]  ;;  %v1736_v21 = vld [vmem:[%s2598_s30 + $0x318] sm:$0xff] }
 0x103   : >> { %1874 = vmatpush1.bf16.msra.mxu1 %v1873_v16  ;;  %1845 = vmatprep.subr.bf16.mxu0 %v3112_v38  ;;  %v2723_v16 = vld [vmem:[#allocation4 + $0x10] sm:$0xff] }
 0x104   : >> { %1875 = vmatprep.subr.bf16.mxu1 %v3112_v38 }
 0x106   : >> { %1847 = vmatpush1.bf16.msra.mxu0 %v2665_v40 }
 0x107   : >> { %1877 = vmatpush1.bf16.msra.mxu1 %v1876_v41  ;;  %1848 = vmatprep.subr.bf16.mxu0 %v3112_v38  ;;  %v2739_v41 = vld [vmem:[#allocation4 + $0x68] sm:$0xff] }
 0x108   : >> { %1878 = vmatprep.subr.bf16.mxu1 %v3112_v38 }
 0x10a   : >> { %1850 = vmatpush1.bf16.msra.mxu0 %v2674_v47 }
 0x10b   : >> { %1880 = vmatpush1.bf16.msra.mxu1 %v1879_v48  ;;  %1851 = vmatprep.subr.bf16.mxu0 %v3112_v38  ;;  %v1700_v48 = vld [vmem:[%s2598_s30 + $0x218] sm:$0xff] }
 0x10c   : >> { %1881 = vmatprep.subr.bf16.mxu1 %v3112_v38  ;;  %v2759_v51 = vpack.c.bf16 %v1700_v48, %v1699_v46  ;;  %v2795_v46 = vpack.c.bf16 %v1706_v44, %v1705_v18  ;;  %v1683_v48 = vld [vmem:[%s2598_s30 + $0x1b0] sm:$0xff]  ;;  %v2819_v18 = vpack.c.bf16 %v1710_v14, %v1709_v5  ;;  %v1718_v5 = vld [vmem:[%s2598_s30 + $0x288] sm:$0xff]  ;;  %v2837_v14 = vld [vmem:[#allocation4 + $0x40] sm:$0xff] }
 0x10d   : >> { %v1687_v44 = vld [vmem:[%s2598_s30 + $0x1d0] sm:$0xff]  ;;  %v2839_v35 = vpack.c.bf16 %v1718_v5, %v1717_v4  ;;  %v2852_v4 = vld [vmem:[#allocation4 + $0x78] sm:$0xff] }
 0x10e   : >> { %1853 = vmatpush1.bf16.msra.mxu0 %v2683_v54 }
 0x10f   : >> { %1883 = vmatpush1.bf16.msra.mxu1 %v1882_v56  ;;  %1884 = vmatprep.subr.bf16.mxu0 %v3112_v38  ;;  %v1701_v56 = vld [vmem:[%s2598_s30 + $0x220] sm:$0xff] }
 0x110   : >> { %1914 = vmatprep.subr.bf16.mxu1 %v3112_v38  ;;  %v2771_v59 = vpack.c.bf16 %v1702_v57, %v1701_v56  ;;  %v1708_v56 = vld [vmem:[%s2598_s30 + $0x258] sm:$0xff]  ;;  %v2803_v57 = vpack.c.bf16 %v1684_v52, %v1683_v48  ;;  %v1711_v52 = vld [vmem:[%s2598_s30 + $0x270] sm:$0xff] }
 0x111   : >> { %520 = vmatmul.mubr.f32.vlgmr.msra.gmra.mrb[0].mxu0 %v2692_v62  ;;  %v2807_v60 = vpack.c.bf16 %v1708_v56, %v1707_v53  ;;  %v1688_v48 = vld [vmem:[%s2598_s30 + $0x1d8] sm:$0xff] }
 0x112   : >> { %601 = vmatmul.mubr.f32.vlgmr.msra.gmra.mrb[0].mxu1 %v2697_v0  ;;  %1886 = vmatpush1.bf16.msra.mxu0 %v2694_v63  ;;  %v1712_v53 = vld [vmem:[%s2598_s30 + $0x278] sm:$0xff]  ;;  %v2827_v56 = vpack.c.bf16 %v1688_v48, %v1687_v44  ;;  %v2843_v44 = vld [vmem:[#allocation4 + $0x60] sm:$0xff]  ;;  %v1719_v48 = vld [vmem:[%s2598_s30 + $0x290] sm:$0xff] }
 0x113   : >> { %1916 = vmatpush1.bf16.msra.mxu1 %v2699_v1  ;;  %1887 = vmatprep.subr.bf16.mxu0 %v3112_v38  ;;  %v2831_v2 = vpack.c.bf16 %v1712_v53, %v1711_v52  ;;  %v1720_v52 = vld [vmem:[%s2598_s30 + $0x298] sm:$0xff] }
 0x114   : >> { %1917 = vmatprep.subr.bf16.mxu1 %v3112_v38  ;;  %1664 = vmatprep.mubr.msk.f32.mxu0 %vm448_vm1, %v2707_v7  ;;  %v2848_v53 = vld [vmem:[#allocation4 + $0x58] sm:$0xff]  ;;  %v2858_v5 = vpack.c.bf16 %v1720_v52, %v1719_v48  ;;  %v2872_v48 = vld [vmem:[#allocation4 + $0x88] sm:$0xff]  ;;  %v1723_v52 = vld [vmem:[%s2598_s30 + $0x2b0] sm:$0xff] }
 0x115   : >> { %525 = vmatmul.mubr.f32.gmra.mrb[2].mxu0 %v2713_v10  ;;  %1666 = vmatprep.mubr.msk.f32.mxu1 %vm448_vm1, %v2715_v11 }
 0x116   : >> { %1889 = vmatpush1.bf16.msra.mxu0 %v2711_v8  ;;  %606 = vmatmul.mubr.f32.gmra.mrb[2].mxu1 %v2723_v16 }
 0x117   : >> { %1919 = vmatpush1.bf16.msra.mxu1 %v2719_v12  ;;  %1890 = vmatprep.subr.bf16.mxu0 %v3112_v38 }
 0x118   : >> { %1920 = vmatprep.subr.bf16.mxu1 %v3112_v38  ;;  %1689 = vmatprep.mubr.msk.f32.mxu0 %vm448_vm1, %v2733_v19 }
 0x119   : >> { %1713 = vmatprep.mubr.msk.f32.mxu1 %vm448_vm1, %v2739_v41 }
 0x11a   : >> { %1892 = vmatpush1.bf16.msra.mxu0 %v2736_v39 }
 0x11b   : >> { %1922 = vmatpush1.bf16.msra.mxu1 %v2743_v43  ;;  %1893 = vmatprep.subr.bf16.mxu0 %v3112_v38 }
 0x11c   : >> { %1923 = vmatprep.subr.bf16.mxu1 %v3112_v38 }
 0x11e   : >> { %1895 = vmatpush1.bf16.msra.mxu0 %v2755_v50 }
 0x11f   : >> { %1925 = vmatpush1.bf16.msra.mxu1 %v2759_v51  ;;  %1896 = vmatprep.subr.bf16.mxu0 %v3112_v38 }
 0x120   : >> { %1926 = vmatprep.subr.bf16.mxu1 %v3112_v38 }
 0x122   : >> { %1898 = vmatpush1.bf16.msra.mxu0 %v2767_v58 }
 0x123   : >> { %1928 = vmatpush1.bf16.msra.mxu1 %v2771_v59  ;;  %1899 = vmatprep.subr.bf16.mxu0 %v3112_v38 }
 0x124   : >> { %1929 = vmatprep.subr.bf16.mxu1 %v3112_v38 }
 0x126   : >> { %1901 = vmatpush1.bf16.msra.mxu0 %v2779_v6 }
 0x127   : >> { %1931 = vmatpush1.bf16.msra.mxu1 %v2783_v13  ;;  %1902 = vmatprep.subr.bf16.mxu0 %v3112_v38 }
 0x128   : >> { %1932 = vmatprep.subr.bf16.mxu1 %v3112_v38 }
 0x12a   : >> { %1904 = vmatpush1.bf16.msra.mxu0 %v2791_v45 }
 0x12b   : >> { %1934 = vmatpush1.bf16.msra.mxu1 %v2795_v46  ;;  %1905 = vmatprep.subr.bf16.mxu0 %v3112_v38 }
 0x12c   : >> { %1935 = vmatprep.subr.bf16.mxu1 %v3112_v38 }
 0x12e   : >> { %1907 = vmatpush1.bf16.msra.mxu0 %v2803_v57 }
 0x12f   : >> { %1937 = vmatpush1.bf16.msra.mxu1 %v2807_v60  ;;  %1908 = vmatprep.subr.bf16.mxu0 %v3112_v38 }
 0x130   : >> { %1938 = vmatprep.subr.bf16.mxu1 %v3112_v38 }
 0x132   : >> { %1910 = vmatpush1.bf16.msra.mxu0 %v2815_v17 }
 0x133   : >> { %1940 = vmatpush1.bf16.msra.mxu1 %v2819_v18  ;;  %1911 = vmatprep.subr.bf16.mxu0 %v3112_v38 }
 0x134   : >> { %1941 = vmatprep.subr.bf16.mxu1 %v3112_v38 }
 0x136   : >> { %1913 = vmatpush1.bf16.msra.mxu0 %v2827_v56 }
 0x137   : >> { %1943 = vmatpush1.bf16.msra.mxu1 %v2831_v2  ;;  %1944 = vmatprep.subr.bf16.mxu0 %v3112_v38 }
 0x138   : >> { %1974 = vmatprep.subr.bf16.mxu1 %v3112_v38  ;;  %v2863_v38 = vld [vmem:[#allocation4 + $0x70] sm:$0xff] }
 0x139   : >> { %710 = vmatmul.mubr.f32.vlgmr.msra.gmra.mrb[4].mxu0 %v2837_v14 }
 0x13a   : >> { %1946 = vmatpush1.bf16.msra.mxu0 %v2839_v35  ;;  %821 = vmatmul.mubr.f32.vlgmr.msra.gmra.mrb[4].mxu1 %v2843_v44 }
 0x13b   : >> { %1976 = vmatpush1.bf16.msra.mxu1 %v2694_v63  ;;  %1690 = vmatprep.mubr.msk.f32.mxu0 %vm448_vm1, %v2848_v53  ;;  %v2876_v63 = vpack.c.bf16 %v1722_v33, %v1721_v20  ;;  %v2889_v20 = vpack.c.bf16 %v1724_v31, %v1723_v52  ;;  %v1725_v33 = vld [vmem:[%s2598_s30 + $0x2c0] sm:$0xff]  ;;  %v1727_v31 = vld [vmem:[%s2598_s30 + $0x2d0] sm:$0xff] }
 0x13c   : >> { %1947 = vmatprep.subr.bf16.mxu0 %v3128_v32  ;;  %1714 = vmatprep.mubr.msk.f32.mxu1 %vm448_vm1, %v2852_v4  ;;  %v1729_v52 = vld [vmem:[%s2598_s30 + $0x2e0] sm:$0xff] }
 0x13d   : >> { %715 = vmatmul.mubr.f32.gmra.mrb[6].mxu0 %v2856_v34  ;;  %1977 = vmatprep.subr.bf16.mxu1 %v3128_v32 }
 0x13e   : >> { %1949 = vmatpush1.bf16.msra.mxu0 %v2858_v5  ;;  %826 = vmatmul.mubr.f32.gmra.mrb[6].mxu1 %v2863_v38 }
 0x13f   : >> { %1979 = vmatpush1.bf16.msra.mxu1 %v2711_v8  ;;  %1950 = vmatprep.subr.bf16.mxu0 %v3128_v32  ;;  %v1726_v8 = vld [vmem:[%s2598_s30 + $0x2c8] sm:$0xff] }
 0x140   : >> { %1980 = vmatprep.subr.bf16.mxu1 %v3128_v32  ;;  %1737 = vmatprep.mubr.msk.f32.mxu0 %vm448_vm1, %v2872_v48  ;;  %v2897_v30 = vpack.c.bf16 %v1726_v8, %v1725_v33  ;;  %v1731_v8 = vld [vmem:[%s2598_s30 + $0x2f0] sm:$0xff] }
 0x141   : >> { %1739 = vmatprep.mubr.msk.f32.mxu1 %vm448_vm1, %v2587_v36  ;;  %v1728_v36 = vld [vmem:[%s2598_s30 + $0x2d8] sm:$0xff] }
 0x142   : >> { %1952 = vmatpush1.bf16.msra.mxu0 %v2876_v63 }
 0x143   : >> { %1982 = vmatpush1.bf16.msra.mxu1 %v2736_v39  ;;  %1953 = vmatprep.subr.bf16.mxu0 %v3128_v32  ;;  %v2905_v39 = vpack.c.bf16 %v1728_v36, %v1727_v31  ;;  %v1733_v36 = vld [vmem:[%s2598_s30 + $0x300] sm:$0xff] }
 0x144   : >> { %1983 = vmatprep.subr.bf16.mxu1 %v3128_v32 }
 0x146   : >> { %1955 = vmatpush1.bf16.msra.mxu0 %v2889_v20 }
 0x147   : >> { %1985 = vmatpush1.bf16.msra.mxu1 %v2755_v50  ;;  %1956 = vmatprep.subr.bf16.mxu0 %v3128_v32  ;;  %v1730_v50 = vld [vmem:[%s2598_s30 + $0x2e8] sm:$0xff] }
 0x148   : >> { %1986 = vmatprep.subr.bf16.mxu1 %v3128_v32  ;;  %v2913_v33 = vpack.c.bf16 %v1730_v50, %v1729_v52  ;;  %v1734_v52 = vld [vmem:[%s2598_s30 + $0x308] sm:$0xff]  ;;  %v1735_v50 = vld [vmem:[%s2598_s30 + $0x310] sm:$0xff] }
 0x14a   : >> { %1958 = vmatpush1.bf16.msra.mxu0 %v2897_v30 }
 0x14b   : >> { %1988 = vmatpush1.bf16.msra.mxu1 %v2767_v58  ;;  %1959 = vmatprep.subr.bf16.mxu0 %v3128_v32  ;;  %v1732_v58 = vld [vmem:[%s2598_s30 + $0x2f8] sm:$0xff] }
 0x14c   : >> { %1989 = vmatprep.subr.bf16.mxu1 %v3128_v32  ;;  %v2921_v31 = vpack.c.bf16 %v1732_v58, %v1731_v8  ;;  %v2943_v8 = vld [vmem:[#allocation4 + $0x80] sm:$0xff] }
 0x14e   : >> { %1961 = vmatpush1.bf16.msra.mxu0 %v2905_v39 }
 0x14f   : >> { %1991 = vmatpush1.bf16.msra.mxu1 %v2779_v6  ;;  %1962 = vmatprep.subr.bf16.mxu0 %v3128_v32  ;;  %v2929_v6 = vpack.c.bf16 %v1734_v52, %v1733_v36  ;;  %v3133_v36 = vld [vmem:[#allocation15_spill] sm:$0xff] }
 0x150   : >> { %1992 = vmatprep.subr.bf16.mxu1 %v3128_v32 }
 0x152   : >> { %1964 = vmatpush1.bf16.msra.mxu0 %v2913_v33 }
 0x153   : >> { %1994 = vmatpush1.bf16.msra.mxu1 %v2791_v45  ;;  %1965 = vmatprep.subr.bf16.mxu0 %v3128_v32  ;;  %v2937_v45 = vpack.c.bf16 %v1736_v21, %v1735_v50  ;;  %v2953_v21 = vld [vmem:[#allocation4 + $0x90] sm:$0xff] }
 0x154   : >> { %1995 = vmatprep.subr.bf16.mxu1 %v3128_v32 }
 0x156   : >> { %1967 = vmatpush1.bf16.msra.mxu0 %v2921_v31 }
 0x157   : >> { %1997 = vmatpush1.bf16.msra.mxu1 %v2803_v57  ;;  %1968 = vmatprep.subr.bf16.mxu0 %v3128_v32  ;;  %v2948_v57 = vld [vmem:[#allocation4 + $0x98] sm:$0xff] }
 0x158   : >> { %1998 = vmatprep.subr.bf16.mxu1 %v3128_v32 }
 0x15a   : >> { %1970 = vmatpush1.bf16.msra.mxu0 %v2929_v6 }
 0x15b   : >> { %2000 = vmatpush1.bf16.msra.mxu1 %v2815_v17  ;;  %1971 = vmatprep.subr.bf16.mxu0 %v3128_v32 }
 0x15c   : >> { %2001 = vmatprep.subr.bf16.mxu1 %v3128_v32 }
 0x15e   : >> { %1973 = vmatpush1.bf16.msra.mxu0 %v2937_v45 }
 0x15f   : >> { %2003 = vmatpush1.bf16.msra.mxu1 %v2827_v56  ;;  %2004 = vmatprep.subr.bf16.mxu0 %v3128_v32 }
 0x160   : >> { %2034 = vmatprep.subr.bf16.mxu1 %v3128_v32 }
 0x161   : >> { %932 = vmatmul.mubr.f32.vlgmr.msra.gmra.mrb[8].mxu0 %v2943_v8 }
 0x162   : >> { %2006 = vmatpush1.bf16.msra.mxu0 %v2603_v42  ;;  %1028 = vmatmul.mubr.f32.vlgmr.msra.gmra.mrb[8].mxu1 %v2692_v62  ;;  %v1750_v42 = vld [vmem:[%s2598_s30 + $0x328] sm:$0xff]  ;;  %v1757_v62 = vld [vmem:[%s2598_s30 + $0x360] sm:$0xff] }
 0x163   : >> { %2036 = vmatpush1.bf16.msra.mxu1 %v2699_v1  ;;  %1738 = vmatprep.mubr.msk.f32.mxu0 %vm448_vm1, %v2948_v57 }
 0x164   : >> { %2007 = vmatprep.subr.bf16.mxu0 %v3128_v32  ;;  %2037 = vmatprep.subr.bf16.mxu1 %v3128_v32 }
 0x165   : >> { %937 = vmatmul.mubr.f32.gmra.mrb[10].mxu0 %v2953_v21  ;;  %1740 = vmatprep.mubr.msk.f32.mxu1 %vm448_vm1, %v2707_v7  ;;  %v1759_v7 = vld [vmem:[%s2598_s30 + $0x370] sm:$0xff] }
 0x166   : >> { %2009 = vmatpush1.bf16.msra.mxu0 %v2611_v49  ;;  %1033 = vmatmul.mubr.f32.gmra.mrb[10].mxu1 %v2713_v10  ;;  %v1760_v10 = vld [vmem:[%s2598_s30 + $0x378] sm:$0xff] }
 0x167   : >> { %2039 = vmatpush1.bf16.msra.mxu1 %v2719_v12  ;;  %2010 = vmatprep.subr.bf16.mxu0 %v3128_v32  ;;  %v1761_v12 = vld [vmem:[%s2598_s30 + $0x380] sm:$0xff] }
 0x168   : >> { %2040 = vmatprep.subr.bf16.mxu1 %v3128_v32  ;;  %1741 = vmatprep.mubr.msk.f32.mxu0 %vm448_vm1, %v2589_v37  ;;  %v1749_v37 = vld [vmem:[%s2598_s30 + $0x320] sm:$0xff] }
 0x169   : >> { %1743 = vmatprep.mubr.msk.f32.mxu1 %vm448_vm1, %v2733_v19  ;;  %v2095_v49 = vpack.c.bf16 %v1750_v42, %v1749_v37  ;;  %v3135_v37 = vld [vmem:[#allocation17_spill] sm:$0xff] }
 0x16a   : >> { %2012 = vmatpush1.bf16.msra.mxu0 %v2620_v55  ;;  %v1751_v55 = vld [vmem:[%s2598_s30 + $0x330] sm:$0xff] }
 0x16b   : >> { %2042 = vmatpush1.bf16.msra.mxu1 %v2743_v43  ;;  %2013 = vmatprep.subr.bf16.mxu0 %v3128_v32 }
 0x16c   : >> { %2043 = vmatprep.subr.bf16.mxu1 %v3128_v32 }
 0x16e   : >> { %2015 = vmatpush1.bf16.msra.mxu0 %v2629_v61  ;;  %v1752_v61 = vld [vmem:[%s2598_s30 + $0x338] sm:$0xff] }
 0x16f   : >> { %2045 = vmatpush1.bf16.msra.mxu1 %v2759_v51  ;;  %2016 = vmatprep.subr.bf16.mxu0 %v3128_v32  ;;  %v1765_v51 = vld [vmem:[%s2598_s30 + $0x3a0] sm:$0xff] }
 0x170   : >> { %2046 = vmatprep.subr.bf16.mxu1 %v3128_v32 }
 0x172   : >> { %2018 = vmatpush1.bf16.msra.mxu0 %v2638_v3  ;;  %v2098_v3 = vpack.c.bf16 %v1752_v61, %v1751_v55 }
 0x173   : >> { %2048 = vmatpush1.bf16.msra.mxu1 %v2771_v59  ;;  %2019 = vmatprep.subr.bf16.mxu0 %v3128_v32  ;;  %v1766_v59 = vld [vmem:[%s2598_s30 + $0x3a8] sm:$0xff] }
 0x174   : >> { %2049 = vmatprep.subr.bf16.mxu1 %v3128_v32 }
 0x176   : >> { %2021 = vmatpush1.bf16.msra.mxu0 %v2647_v9  ;;  %v1753_v9 = vld [vmem:[%s2598_s30 + $0x340] sm:$0xff] }
 0x177   : >> { %2051 = vmatpush1.bf16.msra.mxu1 %v2783_v13  ;;  %2022 = vmatprep.subr.bf16.mxu0 %v3128_v32  ;;  %v2119_v13 = vpack.c.bf16 %v1766_v59, %v1765_v51 }
 0x178   : >> { %2052 = vmatprep.subr.bf16.mxu1 %v3128_v32 }
 0x17a   : >> { %2024 = vmatpush1.bf16.msra.mxu0 %v2656_v15  ;;  %v1754_v15 = vld [vmem:[%s2598_s30 + $0x348] sm:$0xff] }
 0x17b   : >> { %2054 = vmatpush1.bf16.msra.mxu1 %v2795_v46  ;;  %2025 = vmatprep.subr.bf16.mxu0 %v3128_v32  ;;  %v1767_v46 = vld [vmem:[%s2598_s30 + $0x3b0] sm:$0xff] }
 0x17c   : >> { %2055 = vmatprep.subr.bf16.mxu1 %v3128_v32 }
 0x17e   : >> { %2027 = vmatpush1.bf16.msra.mxu0 %v2665_v40  ;;  %v1755_v40 = vld [vmem:[%s2598_s30 + $0x350] sm:$0xff] }
 0x17f   : >> { %2057 = vmatpush1.bf16.msra.mxu1 %v2807_v60  ;;  %2028 = vmatprep.subr.bf16.mxu0 %v3128_v32  ;;  %v1768_v60 = vld [vmem:[%s2598_s30 + $0x3b8] sm:$0xff] }
 0x180   : >> { %2058 = vmatprep.subr.bf16.mxu1 %v3128_v32  ;;  %v2122_v17 = vpack.c.bf16 %v1768_v60, %v1767_v46 }
 0x182   : >> { %2030 = vmatpush1.bf16.msra.mxu0 %v2674_v47  ;;  %v1756_v47 = vld [vmem:[%s2598_s30 + $0x358] sm:$0xff] }
 0x183   : >> { %2060 = vmatpush1.bf16.msra.mxu1 %v2819_v18  ;;  %2031 = vmatprep.subr.bf16.mxu0 %v3128_v32  ;;  %v2128_v18 = vpack.c.bf16 %v2560_v25, %v2558_v24 }
 0x184   : >> { %2061 = vmatprep.subr.bf16.mxu1 %v3128_v32 }
 0x186   : >> { %2033 = vmatpush1.bf16.msra.mxu0 %v2683_v54  ;;  %v2104_v54 = vpack.c.bf16 %v1756_v47, %v1755_v40 }
 0x187   : >> { %2063 = vmatpush1.bf16.msra.mxu1 %v2831_v2  ;;  %2064 = vmatprep.subr.bf16.mxu0 %v3128_v32 }
 0x188   : >> { %2094 = vmatprep.subr.bf16.mxu1 %v3128_v32 }
 0x189   : >> { %1103 = vmatmul.mubr.f32.vlgmr.msra.gmra.mrb[12].mxu0 %v2697_v0  ;;  %v1758_v0 = vld [vmem:[%s2598_s30 + $0x368] sm:$0xff] }
 0x18a   : >> { %2066 = vmatpush1.bf16.msra.mxu0 %v2839_v35  ;;  %1178 = vmatmul.mubr.f32.vlgmr.msra.gmra.mrb[12].mxu1 %v2837_v14  ;;  %v2101_v35 = vpack.c.bf16 %v1754_v15, %v1753_v9  ;;  %v2107_v1 = vpack.c.bf16 %v1758_v0, %v1757_v62 }
 0x18b   : >> { %2096 = vmatpush1.bf16.msra.mxu1 %v2095_v49  ;;  %1742 = vmatprep.mubr.msk.f32.mxu0 %vm448_vm1, %v2715_v11  ;;  %v2110_v11 = vpack.c.bf16 %v1760_v10, %v1759_v7 }
 0x18c   : >> { %2067 = vmatprep.subr.bf16.mxu0 %v3128_v32  ;;  %1744 = vmatprep.mubr.msk.f32.mxu1 %vm448_vm1, %v2848_v53 }
 0x18d   : >> { %1108 = vmatmul.mubr.f32.gmra.mrb[14].mxu0 %v2723_v16  ;;  %2097 = vmatprep.subr.bf16.mxu1 %v3128_v32  ;;  %v1762_v16 = vld [vmem:[%s2598_s30 + $0x388] sm:$0xff] }
 0x18e   : >> { %2069 = vmatpush1.bf16.msra.mxu0 %v2858_v5  ;;  %1183 = vmatmul.mubr.f32.gmra.mrb[14].mxu1 %v2856_v34  ;;  %v2113_v19 = vpack.c.bf16 %v1762_v16, %v1761_v12 }
 0x18f   : >> { %2099 = vmatpush1.bf16.msra.mxu1 %v2098_v3  ;;  %2070 = vmatprep.subr.bf16.mxu0 %v3128_v32 }
 0x190   : >> { %2100 = vmatprep.subr.bf16.mxu1 %v3128_v32  ;;  %1745 = vmatprep.mubr.msk.f32.mxu0 %vm448_vm1, %v2739_v41  ;;  %v1764_v41 = vld [vmem:[%s2598_s30 + $0x398] sm:$0xff] }
 0x191   : >> { %1769 = vmatprep.mubr.msk.f32.mxu1 %vm448_vm1, %v2872_v48 }
 0x192   : >> { %2072 = vmatpush1.bf16.msra.mxu0 %v2876_v63 }
 0x193   : >> { %2102 = vmatpush1.bf16.msra.mxu1 %v2101_v35  ;;  %2073 = vmatprep.subr.bf16.mxu0 %v3128_v32 }
 0x194   : >> { %2103 = vmatprep.subr.bf16.mxu1 %v3128_v32 }
 0x196   : >> { %2075 = vmatpush1.bf16.msra.mxu0 %v2889_v20  ;;  %v2136_v20 = vpack.c.bf16 %v2568_v29, %v2566_v28 }
 0x197   : >> { %2105 = vmatpush1.bf16.msra.mxu1 %v2104_v54  ;;  %2076 = vmatprep.subr.bf16.mxu0 %v3128_v32 }
 0x198   : >> { %2106 = vmatprep.subr.bf16.mxu1 %v3128_v32 }
 0x19a   : >> { %2078 = vmatpush1.bf16.msra.mxu0 %v2897_v30  ;;  %v1763_v30 = vld [vmem:[%s2598_s30 + $0x390] sm:$0xff] }
 0x19b   : >> { %2108 = vmatpush1.bf16.msra.mxu1 %v2107_v1  ;;  %2079 = vmatprep.subr.bf16.mxu0 %v3128_v32  ;;  %v2116_v43 = vpack.c.bf16 %v1764_v41, %v1763_v30 }
 0x19c   : >> { %2109 = vmatprep.subr.bf16.mxu1 %v3128_v32 }
 0x19e   : >> { %2081 = vmatpush1.bf16.msra.mxu0 %v2905_v39  ;;  %v3130_v39 = vld [vmem:[#allocation12_spill] sm:$0xff] }
 0x19f   : >> { %2111 = vmatpush1.bf16.msra.mxu1 %v2110_v11  ;;  %2082 = vmatprep.subr.bf16.mxu0 %v3128_v32 }
 0x1a0   : >> { %2112 = vmatprep.subr.bf16.mxu1 %v3128_v32 }
 0x1a2   : >> { %2084 = vmatpush1.bf16.msra.mxu0 %v2913_v33  ;;  %v3131_v33 = vld [vmem:[#allocation13_spill] sm:$0xff] }
 0x1a3   : >> { %2114 = vmatpush1.bf16.msra.mxu1 %v2113_v19  ;;  %2085 = vmatprep.subr.bf16.mxu0 %v3128_v32  ;;  %v2140_v58 = vpack.c.bf16 %v3131_v33, %v3130_v39 }
 0x1a4   : >> { %2115 = vmatprep.subr.bf16.mxu1 %v3128_v32 }
 0x1a6   : >> { %2087 = vmatpush1.bf16.msra.mxu0 %v2921_v31  ;;  %v3132_v31 = vld [vmem:[#allocation14_spill] sm:$0xff] }
 0x1a7   : >> { %2117 = vmatpush1.bf16.msra.mxu1 %v2116_v43  ;;  %2088 = vmatprep.subr.bf16.mxu0 %v3128_v32  ;;  %v2144_v52 = vpack.c.bf16 %v3133_v36, %v3132_v31 }
 0x1a8   : >> { %2118 = vmatprep.subr.bf16.mxu1 %v3128_v32 }
 0x1aa   : >> { %2090 = vmatpush1.bf16.msra.mxu0 %v2929_v6 }
 0x1ab   : >> { %2120 = vmatpush1.bf16.msra.mxu1 %v2119_v13  ;;  %2091 = vmatprep.subr.bf16.mxu0 %v3128_v32 }
 0x1ac   : >> { %2121 = vmatprep.subr.bf16.mxu1 %v3128_v32  ;;  %v2124_v32 = vpack.c.bf16 %v2556_v23, %v2554_v22 }
 0x1ae   : >> { %2093 = vmatpush1.bf16.msra.mxu0 %v2937_v45 }
 0x1af   : >> { %2123 = vmatpush1.bf16.msra.mxu1 %v2122_v17  ;;  %2125 = vmatprep.subr.bf16.mxu0 %v2124_v32 }
 0x1b1   : >> { %1255 = vmatmul.mubr.f32.vlgmr.msra.gmra.mrb[16].mxu0 %v2843_v44 }
 0x1b2   : >> { %1355 = vmatmul.mubr.f32.vlgmr.msra.gmra.mrb[16].mxu1 %v2943_v8  ;;  %1746 = vmatprep.mubr.msk.f32.mxu0 %vm448_vm1, %v2852_v4  ;;  %v2132_v4 = vpack.c.bf16 %v2564_v27, %v2562_v26 }
 0x1b3   : >> { %1770 = vmatprep.mubr.msk.f32.mxu1 %vm448_vm1, %v2948_v57  ;;  %2127 = vmatpush3.bf16.msra.mxu0 %v2124_v32 }
 0x1b4   : >> { %2129 = vmatprep.subr.bf16.mxu0 %v2128_v18 }
 0x1b5   : >> { %1260 = vmatmul.mubr.f32.gmra.mrb[18].mxu0 %v2863_v38 }
 0x1b6   : >> { %1360 = vmatmul.mubr.f32.gmra.mrb[18].mxu1 %v2953_v21  ;;  %v3134_v21 = vld [vmem:[#allocation16_spill] sm:$0xff] }
 0x1b7   : >> { %2131 = vmatpush3.bf16.msra.mxu0 %v2128_v18  ;;  %v2148_v42 = vpack.c.bf16 %v3135_v37, %v3134_v21  ;;  %v947_v18 = vpop.permute.xlu0 %946 }
 0x1b8   : >> { %2133 = vmatprep.subr.bf16.mxu0 %v2132_v4 }
 0x1bb   : >> { %2135 = vmatpush3.bf16.msra.mxu0 %v2132_v4  ;;  %v958_v4 = vstv %s2478_s28 }
 0x1bc   : >> { %2137 = vmatprep.subr.bf16.mxu0 %v2136_v20 }
 0x1bf   : >> { %2139 = vmatpush3.bf16.msra.mxu0 %v2136_v20 }
 0x1c0   : >> { %2141 = vmatprep.subr.bf16.mxu0 %v2140_v58 }
 0x1c3   : >> { %2143 = vmatpush3.bf16.msra.mxu0 %v2140_v58 }
 0x1c4   : >> { %2145 = vmatprep.subr.bf16.mxu0 %v2144_v52 }
 0x1c7   : >> { %2147 = vmatpush3.bf16.msra.mxu0 %v2144_v52 }
 0x1c8   : >> { %2150 = vmatprep.subr.msk.bf16.mxu0 %vm2149_vm4, %v2148_v42 }
 0x1cb   : >> { %2153 = vmatpush3.bf16.msk.msra.mxu0 %vm2149_vm4, %v2148_v42 }
 0x1e4   : >> { %v521_v56 = vpop.f32.mrb[0].mxu0 }
 0x1e5   : >> { %v523_v2 = vpop.f32.mrb[1].mxu0  ;;  %v602_v14 = vpop.f32.mrb[0].mxu1 }
 0x1e6   : >> { %v603_v44 = vadd.f32 %v602_v14, %v521_v56  ;;  %v604_v53 = vpop.f32.mrb[1].mxu1 }
 0x1e8   : >> { %v526_v38 = vpop.f32.mrb[2].mxu0 }
 0x1e9   : >> { %v528_v34 = vpop.f32.mrb[3].mxu0  ;;  %v607_v5 = vpop.f32.mrb[2].mxu1 }
 0x1ea   : >> { %v608_v48 = vadd.f32 %v607_v5, %v526_v38  ;;  %v609_v63 = vpop.f32.mrb[3].mxu1  ;;  %v952_v38 = vpop.permute.xlu0 %951 }
 0x20c   : >> { %v711_v6 = vpop.f32.mrb[4].mxu0 }
 0x20d   : >> { %v720_v50 = vadd.f32 %v711_v6, %v603_v44  ;;  %v713_v45 = vpop.f32.mrb[5].mxu0  ;;  %v822_v8 = vpop.f32.mrb[4].mxu1 }
 0x20e   : >> { %v824_v57 = vpop.f32.mrb[5].mxu1 }
 0x20f   : >> { %v831_v49 = vadd.f32 %v822_v8, %v720_v50 }
 0x210   : >> { %v716_v55 = vpop.f32.mrb[6].mxu0 }
 0x211   : >> { %v721_v61 = vadd.f32 %v716_v55, %v608_v48  ;;  %v827_v3 = vpop.f32.mrb[6].mxu1  ;;  %v718_v9 = vpop.f32.mrb[7].mxu0 }
 0x212   : >> { %v829_v15 = vpop.f32.mrb[7].mxu1 }
 0x213   : >> { %v832_v35 = vadd.f32 %v827_v3, %v721_v61 }
 0x234   : >> { %v933_v40 = vpop.f32.mrb[8].mxu0 }
 0x235   : >> { %v942_v47 = vadd.f32 %v933_v40, %v831_v49  ;;  %v935_v54 = vpop.f32.mrb[9].mxu0  ;;  %v1029_v62 = vpop.f32.mrb[8].mxu1 }
 0x236   : >> { %v1031_v0 = vpop.f32.mrb[9].mxu1 }
 0x237   : >> { %v954_v2 = vadd.f32 %v947_v18, %v942_v47 }
 0x238   : >> { %v938_v1 = vpop.f32.mrb[10].mxu0 }
 0x239   : >> { %v943_v7 = vadd.f32 %v938_v1, %v832_v35  ;;  %v940_v10 = vpop.f32.mrb[11].mxu0  ;;  %v1034_v11 = vpop.f32.mrb[10].mxu1  ;;  %v959_v63 = vmul.f32 %v958_v4, %v954_v2  ;;  %vm956_vm5 = vcmp.ge.f32.partialorder %v954_v2, 0.0 }
 0x23a   : >> { %v1036_v12 = vpop.f32.mrb[11].mxu1 }
 0x23b   : >> { %v955_v20 = vadd.f32 %v952_v38, %v943_v7  ;;  %v961_v8 = vsel %vm956_vm5, %v954_v2, %v959_v63 }
 0x23d   : >> { %v960_v50 = vmul.f32 %v958_v4, %v955_v20  ;;  %vm957_vm7 = vcmp.ge.f32.partialorder %v955_v20, 0.0 }
 0x23f   : >> { %v962_v42 = vsel %vm957_vm7, %v955_v20, %v960_v50 }
 0x25c   : >> { %v1104_v16 = vpop.f32.mrb[12].mxu0 }
 0x25d   : >> { %v1105_v19 = vadd.f32 %v1104_v16, %v1029_v62  ;;  %v1106_v30 = vpop.f32.mrb[13].mxu0  ;;  %v1179_v41 = vpop.f32.mrb[12].mxu1 }
 0x25e   : >> { %v1181_v43 = vpop.f32.mrb[13].mxu1 }
 0x25f   : >> { %v1188_v51 = vadd.f32 %v1179_v41, %v1105_v19 }
 0x260   : >> { %v1109_v59 = vpop.f32.mrb[14].mxu0 }
 0x261   : >> { %v1110_v13 = vadd.f32 %v1109_v59, %v1034_v11  ;;  %v1184_v46 = vpop.f32.mrb[14].mxu1  ;;  %v1111_v60 = vpop.f32.mrb[15].mxu0 }
 0x262   : >> { %v1186_v17 = vpop.f32.mrb[15].mxu1 }
 0x263   : >> { %v1189_v32 = vadd.f32 %v1184_v46, %v1110_v13 }
 0x284   : >> { %v1256_v56 = vpop.f32.mrb[16].mxu0 }
 0x285   : >> { %v1265_v14 = vadd.f32 %v1256_v56, %v1188_v51  ;;  %v1258_v44 = vpop.f32.mrb[17].mxu0  ;;  %v1356_v53 = vpop.f32.mrb[16].mxu1 }
 0x286   : >> { %v1358_v34 = vpop.f32.mrb[17].mxu1 }
 0x287   : >> { %v1365_v5 = vadd.f32 %v1356_v53, %v1265_v14 }
 0x288   : >> { %v1261_v48 = vpop.f32.mrb[18].mxu0 }
 0x289   : >> { %v1367_v39 = vadd.f32 %v1365_v5, %v947_v18  ;;  %v1266_v33 = vadd.f32 %v1261_v48, %v1189_v32  ;;  %v1263_v58 = vpop.f32.mrb[19].mxu0  ;;  %v1361_v31 = vpop.f32.mrb[18].mxu1 }
 0x28a   : >> { %v1363_v36 = vpop.f32.mrb[19].mxu1 }
 0x28b   : >> { %vm1369_vm6 = vcmp.ge.f32.partialorder %v1367_v39, 0.0  ;;  %v1371_v52 = vmul.f32 %v1367_v39, %v958_v4  ;;  %v1366_v6 = vadd.f32 %v1361_v31, %v1266_v33 }
 0x28d   : >> { %v1368_v45 = vadd.f32 %v1366_v6, %v952_v38  ;;  %v1373_v57 = vsel %vm1369_vm6, %v1367_v39, %v1371_v52 }
 0x28e   : >> { %v1375_v21 = vmax.f32 %v961_v8, %v1373_v57 }
 0x28f   : >> { %vm1370_vm8 = vcmp.ge.f32.partialorder %v1368_v45, 0.0  ;;  %v1372_v37 = vmul.f32 %v1368_v45, %v958_v4 }
 0x290   : >> { %1821 = vmatprep.mubr.msk.f32.mxu0 %vm350_vm0, %v1375_v21 }
 0x291   : >> { %v1374_v49 = vsel %vm1370_vm8, %v1368_v45, %v1372_v37 }
 0x292   : >> { %v1376_v55 = vmax.f32 %v962_v42, %v1374_v49 }
 0x294   : >> { %1822 = vmatmul.mubr.msk.f32.vlgmr.msra.gmra.mrb[20].mxu0 %vm350_vm0, %v1376_v55 }
 0x367   : >> { %v1823_v61 = vpop.f32.mrb[20].mxu0 }
 0x368   : >> { %v1454_v3 = vpop.f32.mrb[21].mxu0 }
 0x369   : >> { %1465 = vrot.lane.b32.xlu1 %v1454_v3, %s2347_s12 }
 0x36d   : >> { %1467 = vrot.lane.b32.xlu1 %v1823_v61, %s2347_s12 }
 0x3db   : >> { %v1466_v9 = vpop.permute.xlu1 %1465 }
 0x3dc   : >> { %v1471_v15 = vmax.f32 %v1454_v3, %v1466_v9  ;;  %391 = sbr.rel (!%p389_p4) target bundleno = 225 (0xe1), region = 117 }
 0x3de   : >> { %1476 = vst.msk [vmem:[%s1474_s14] sm:$0xff] %vm1475_vm9, %v1471_v15 }
 0x3df   : >> { %v1468_v35 = vpop.permute.xlu1 %1467 }
 0x3e0   : >> { %v1472_v40 = vmax.f32 %v1823_v61, %v1468_v35 }
 0x3e2   : >> { %1477 = vst.msk [vmem:[%s1474_s14 + $0x8] sm:$0xff] %vm1475_vm9, %v1472_v40 }
 0x3e3 PF: > { %s18_s22 = sadd.s32 1, %s2324_s22   ;;  %s3136_s20 = smov %s2320_s21 }
 0x3e4   : > { %p15_p9 = scmp.ge.s32.totalorder %s18_s22, 4   ;;  %s3137_s21 = smov %s3139_s23 }
 0x3e6   :  { %17 = sbr.rel (!%p15_p9) target bundleno = 5 (0x5), region = 128 }
 0x3ed   :  { %1510 = vsyncpa [#allocation5], 1 }
 0x3ee   :  { %1512 = vsyncpa [#allocation5 + $0x1], 1 }
 0x3ef   :  { %1513 = vsyncpa [#allocation7], 1 }

// kernel: embedding_net_forward.5
= control target key start
LH: loop header
LB: loop body
LE: loop exit
PB: predicated region body
PF: predicated region fallthrough
CT: control target
= control target key end

     0   :  { %13 = vsyncpa [#allocation4], 0  ;;  %s17765_s0 = inlined_call_operand.vmem [shape: bf16[2,45056], index: 0, kind: input, shape index: {}]   ;;  %s17766_s1 = inlined_call_operand.vmem [shape: bf16[45056,256], index: 1, kind: input, shape index: {}]   ;;  %s17767_s2 = inlined_call_operand.vmem [shape: f32[1,256], index: 2, kind: input, shape index: {}]   ;;  %s17768_s3 = inlined_call_operand.hbm [shape: f32[256,256], index: 3, kind: input, shape index: {}]   ;;  %s17769_s4 = inlined_call_operand.vmem [shape: f32[1,256], index: 4, kind: input, shape index: {}]   ;;  %s17770_s5 = inlined_call_operand.vmem [shape: f32[256,128], index: 5, kind: input, shape index: {}]   ;;  %s17771_s6 = inlined_call_operand.vmem [shape: f32[1,128], index: 6, kind: input, shape index: {}]   ;;  %s17772_s7 = inlined_call_operand.vmem [shape: f32[2], index: 7, kind: input, shape index: {}]   ;;  %s17773_s8 = inlined_call_operand.hbm [shape: f32[2,128], index: 8, kind: output, shape index: {}]  }
   0x1   :  { %14 = vsyncpa [#allocation6], 0 }
   0x2   :  { %15 = vsyncpa [#allocation5], 0  ;;  %s15694_s27 = smov 0  }
   0x3 LB: > { %s15700_s28 = sadd.s32 4294967295, %s15639_s27   ;;  %p11651_p0 = scmp.ge.s32.totalorder %s15639_s27, 1  ;;  %s15639_s27 = sphi %s15694_s27, %s21_s27  }
   0x4   : > { %p225_p1 = scmp.lt.s32.totalorder %s15639_s27, 5  ;;  %s15641_s29 = smov [#allocation3]  }
   0x5   : > { %s240_s30 = sshll.u32 %s15641_s29, 4  ;;  %p17774_p4 = scmp.eq.s32.totalorder %s15700_s28, 0  ;;  %s241_s30 = int_to_ptr.vmem [resolvable:$true] %s240_s30 }
   0x6   : > { %p15705_p3 = pnand %p11651_p0, %p225_p1  ;;  %s263_s12 = sshll.u32 %s17772_s7, 4  ;;  %s15721_s12 = int_to_ptr.vmem [resolvable:$true] %s263_s12 }
   0x7   : > { %s15552_s16 = scalar_lea.hbm %s17768_s3, 8192 }
   0x8   : > { %s17776_s9 = scalar_select %p15705_p3, 1, 0 }
   0x9   : > { %p13390_p5 = pneg %p15705_p3  ;;  %p15553_p7 = scmp.ne.s32.totalorder %s17768_s3, %s15552_s16 }
   0xa   : > { %p15559_p11 = scmp.lt.u32.totalorder %s15552_s16, %s17768_s3 }
   0xb   : > { %p15717_p6 = pnand %p17774_p4, %p13390_p5 }
   0xd   : > { %p15554_p8 = pneg %p15717_p6 }
   0xf   : > { %p15555_p9 = pnand %p15554_p8, %p15553_p7 }
  0x11   : > { %p15556_p10 = pneg %p15555_p9 }
  0x13   : > { %p15561_p12 = pnand %p15559_p11, %p15556_p10 }
  0x15   : > { %15564 = shalt.err (!%p15561_p12)
}
  0x16   : > { %s15565_s21 = scalar_lea.vmem %s241_s30, 8192  ;;  %p15573_p5 = scmp.lt.s32.totalorder %s241_s30, %s241_s30 }
  0x17   : > { %p15566_p13 = scmp.ne.s32.totalorder %s241_s30, %s15565_s21  ;;  %p15574_p2 = scmp.lt.s32.totalorder %s15565_s21, %s15565_s21 }
  0x19   : > { %p15568_p0 = pnand %p15566_p13, %p15554_p8  ;;  %p15575_p4 = por %p15574_p2, %p15573_p5 }
  0x1b   : > { %p15569_p1 = pneg %p15568_p0 }
  0x1d   : > { %p15576_p3 = pnand %p15575_p4, %p15569_p1 }
  0x1f   : > { %15579 = shalt.err (!%p15576_p3)
}
  0x20   : > { %s15642_s22 = smov 256   ;;  %s15643_s23 = smov 16  }
  0x21   : > { %13393 = dma.hbm_to_vmem [thread:$0]  (!%p15717_p6), %s17768_s3, 8192, %s241_s30, [#allocation4], %s15642_s22, %s15642_s22, %s15643_s23  }
  0x22   : > { %s15580_s26 = scalar_lea.vmem %s15721_s12, 16  ;;  %p15588_p3 = scmp.lt.s32.totalorder %s15721_s12, %s15721_s12 }
  0x23   : > { %p15581_p7 = scmp.ne.s32.totalorder %s15721_s12, %s15580_s26  ;;  %p15589_p4 = scmp.lt.s32.totalorder %s15580_s26, %s15580_s26 }
  0x25   : > { %p15583_p9 = pnand %p15581_p7, %p15554_p8  ;;  %p15590_p10 = por %p15589_p4, %p15588_p3 }
  0x27   : > { %p15584_p2 = pneg %p15583_p9 }
  0x29   : > { %p15591_p11 = pnand %p15590_p10, %p15584_p2 }
  0x2b   : > { %15594 = shalt.err (!%p15591_p11)
}
  0x2c   : > { %s15644_s29 = smov [#allocation7]   ;;  %p17778_p12 = scmp.ne.s32.totalorder %s17776_s9, 0 }
  0x2d   : > { %13396 = dma.vmem_to_smem (!%p15717_p6), %s15721_s12, 16, %s15644_s29, [#allocation6]  }
  0x2e   : > { %294 = sbr.rel (%p17778_p12) target bundleno = 2205 (0x89d), region = 52  ;;  %p17779_p13 = scmp.eq.s32.totalorder (!%p17778_p12), %s15700_s28, 0 }
  0x35   : > { %15626 = dma.done.wait (%p17779_p13), [#allocation4], 8192   ;;  %p17780_p8 = pmov %p17779_p13 }
  0x37   : > { %15628 = vsyncadd (%p17780_p8), [#allocation4], 4294959104  ;;  %p17781_p0 = pmov %p17780_p8 }
  0x39   : > { %15630 = dma.done.wait (%p17781_p0), [#allocation6], 16   ;;  %p17782_p1 = pmov %p17781_p0 }
  0x3b   : > { %15632 = vsyncadd (%p17782_p1), [#allocation6], 4294967280 }
  0x3c   : > { %304 = sfence }
  0x3d   : > { %s333_s30 = smul.u32 88, %s15700_s28  ;;  %p17783_p7 = scmp.ne.s32.totalorder %s15700_s28, 0 }
  0x3e   : > { %s338_s10 = smul.u32 1408, %s15700_s28  ;;  %v15645_v0 = vmov (!%p17783_p7), 0.0  }
  0x3f   : > { %p334_p6 = scmp.lt.s32.totalorder %s333_s30, 351  ;;  %348 = sbr.rel (%p17783_p7) target bundleno = 70 (0x46), region = 64  ;;  %349 = vst [vmem:[#allocation2] sm:$0xf] (!%p17783_p7), %v15645_v0 }
  0x40   : > { %p339_p5 = scmp.lt.s32.totalorder %s338_s10, 5631 }
  0x41   : > { %s17785_s30 = smov (!%p334_p6, %s333_s30), 351 }
  0x42   : > { %s17787_s10 = smov (!%p339_p5, %s338_s10), 5631  ;;  %s15770_s12 = scalar_lea.vmem %s17765_s0, %s17785_s30 }
  0x43   : > { %s13076_s13 = sshll.u32 %s17787_s10, 3 }
  0x44   : > { %s15775_s16 = scalar_lea.vmem %s17766_s1, %s13076_s13 }
  0x46 PF: > { %v13419_v1 = vld [vmem:[%s15775_s16 + $0x4] ss:$8 sps:$4 sm:$0xff]   ;;  %v13423_v3 = vld [vmem:[%s15775_s16] ss:$8 sps:$4 sm:$0xff]   ;;  %v13425_v5 = vld [vmem:[%s15775_s16 + $0x14] ss:$8 sps:$4 sm:$0xff]   ;;  %v1785_v39 = vlaneseq }
  0x47   : > { %v13421_v2 = vld [vmem:[%s15775_s16 + $0x1604] ss:$8 sps:$4 sm:$0xff]   ;;  %9448 = vmatprep.subr.bf16.mxu1 %v13419_v1  ;;  %v13424_v4 = vld [vmem:[%s15775_s16 + $0x1600] ss:$8 sps:$4 sm:$0xff]   ;;  %v13427_v6 = vld [vmem:[%s15775_s16 + $0x1614] ss:$8 sps:$4 sm:$0xff]  }
  0x48   : > { %10350 = vmatprep.subr.bf16.mxu0 %v13421_v2  ;;  %9449 = vmatpush1.bf16.msra.mxu1 %v13423_v3  ;;  %v13429_v7 = vld [vmem:[%s15775_s16 + $0x10] ss:$8 sps:$4 sm:$0xff]   ;;  %v13431_v9 = vld [vmem:[%s15775_s16 + $0x24] ss:$8 sps:$4 sm:$0xff]   ;;  %v13435_v11 = vld [vmem:[%s15775_s16 + $0x20] ss:$8 sps:$4 sm:$0xff]  }
  0x49   : > { %10351 = vmatpush1.bf16.msra.mxu0 %v13424_v4  ;;  %9450 = vmatprep.subr.bf16.mxu1 %v13425_v5  ;;  %v13430_v8 = vld [vmem:[%s15775_s16 + $0x1610] ss:$8 sps:$4 sm:$0xff]   ;;  %v13433_v10 = vld [vmem:[%s15775_s16 + $0x1624] ss:$8 sps:$4 sm:$0xff]   ;;  %v13436_v12 = vld [vmem:[%s15775_s16 + $0x1620] ss:$8 sps:$4 sm:$0xff]  }
  0x4a   : > { %10352 = vmatprep.subr.bf16.mxu0 %v13427_v6  ;;  %v13437_v13 = vld [vmem:[%s15775_s16 + $0x34] ss:$8 sps:$4 sm:$0xff]   ;;  %v13441_v15 = vld [vmem:[%s15775_s16 + $0x30] ss:$8 sps:$4 sm:$0xff]   ;;  %v13443_v17 = vld [vmem:[%s15775_s16 + $0x44] ss:$8 sps:$4 sm:$0xff]  }
  0x4b   : > { %v13439_v14 = vld [vmem:[%s15775_s16 + $0x1634] ss:$8 sps:$4 sm:$0xff]   ;;  %v13442_v16 = vld [vmem:[%s15775_s16 + $0x1630] ss:$8 sps:$4 sm:$0xff]   ;;  %v13445_v18 = vld [vmem:[%s15775_s16 + $0x1644] ss:$8 sps:$4 sm:$0xff]  }
  0x4c   : > { %9451 = vmatpush1.bf16.msra.mxu1 %v13429_v7  ;;  %v13447_v19 = vld [vmem:[%s15775_s16 + $0x40] ss:$8 sps:$4 sm:$0xff]   ;;  %v13449_v21 = vld [vmem:[%s15775_s16 + $0x54] ss:$8 sps:$4 sm:$0xff]   ;;  %v13453_v23 = vld [vmem:[%s15775_s16 + $0x50] ss:$8 sps:$4 sm:$0xff]  }
  0x4d   : > { %10353 = vmatpush1.bf16.msra.mxu0 %v13430_v8  ;;  %9452 = vmatprep.subr.bf16.mxu1 %v13431_v9  ;;  %v13448_v20 = vld [vmem:[%s15775_s16 + $0x1640] ss:$8 sps:$4 sm:$0xff]   ;;  %v13451_v22 = vld [vmem:[%s15775_s16 + $0x1654] ss:$8 sps:$4 sm:$0xff]   ;;  %v13454_v24 = vld [vmem:[%s15775_s16 + $0x1650] ss:$8 sps:$4 sm:$0xff]  }
  0x4e   : > { %10354 = vmatprep.subr.bf16.mxu0 %v13433_v10  ;;  %v13455_v25 = vld [vmem:[%s15775_s16 + $0x64] ss:$8 sps:$4 sm:$0xff]   ;;  %v13459_v27 = vld [vmem:[%s15775_s16 + $0x60] ss:$8 sps:$4 sm:$0xff]   ;;  %v13461_v29 = vld [vmem:[%s15775_s16 + $0x74] ss:$8 sps:$4 sm:$0xff]  }
  0x4f   : > { %v13457_v26 = vld [vmem:[%s15775_s16 + $0x1664] ss:$8 sps:$4 sm:$0xff]   ;;  %v13460_v28 = vld [vmem:[%s15775_s16 + $0x1660] ss:$8 sps:$4 sm:$0xff]   ;;  %v13463_v30 = vld [vmem:[%s15775_s16 + $0x1674] ss:$8 sps:$4 sm:$0xff]  }
  0x50   : > { %9453 = vmatpush1.bf16.msra.mxu1 %v13435_v11  ;;  %v13465_v31 = vld [vmem:[%s15775_s16 + $0x70] ss:$8 sps:$4 sm:$0xff]   ;;  %v13467_v33 = vld [vmem:[%s15775_s16 + $0x84] ss:$8 sps:$4 sm:$0xff]   ;;  %v13471_v35 = vld [vmem:[%s15775_s16 + $0x80] ss:$8 sps:$4 sm:$0xff]  }
  0x51   : > { %10355 = vmatpush1.bf16.msra.mxu0 %v13436_v12  ;;  %9454 = vmatprep.subr.bf16.mxu1 %v13437_v13  ;;  %v13466_v32 = vld [vmem:[%s15775_s16 + $0x1670] ss:$8 sps:$4 sm:$0xff]   ;;  %v13469_v34 = vld [vmem:[%s15775_s16 + $0x1684] ss:$8 sps:$4 sm:$0xff]   ;;  %v13472_v36 = vld [vmem:[%s15775_s16 + $0x1680] ss:$8 sps:$4 sm:$0xff]  }
  0x52   : > { %10356 = vmatprep.subr.bf16.mxu0 %v13439_v14  ;;  %v15646_v37 = vmov 1966171168   ;;  %v13473_v40 = vld [vmem:[%s15775_s16 + $0x94] ss:$8 sps:$4 sm:$0xff]   ;;  %v13477_v42 = vld [vmem:[%s15775_s16 + $0x90] ss:$8 sps:$4 sm:$0xff]  }
  0x53   : > { %v1783_v38 = vunpack.c.l.s4 %v15646_v37  ;;  %v13475_v41 = vld [vmem:[%s15775_s16 + $0x1694] ss:$8 sps:$4 sm:$0xff]   ;;  %v15818_v44 = vshrl.u32 %v1785_v39, 7  ;;  %v13478_v45 = vld [vmem:[%s15775_s16 + $0x1690] ss:$8 sps:$4 sm:$0xff]   ;;  %v15831_v53 = vld [vmem:[%s15770_s12] sm:$0xff] }
  0x54   : > { %9455 = vmatpush1.bf16.msra.mxu1 %v13441_v15  ;;  %v13479_v46 = vld [vmem:[%s15775_s16 + $0xa4] ss:$8 sps:$4 sm:$0xff]   ;;  %v13483_v48 = vld [vmem:[%s15775_s16 + $0xa0] ss:$8 sps:$4 sm:$0xff]   ;;  %v13485_v51 = vld [vmem:[%s15775_s16 + $0xb4] ss:$8 sps:$4 sm:$0xff]  }
  0x55   : > { %10357 = vmatpush1.bf16.msra.mxu0 %v13442_v16  ;;  %9456 = vmatprep.subr.bf16.mxu1 %v13443_v17  ;;  %v1784_v43 = vunpack.c.0.s8 %v1783_v38  ;;  %v13481_v47 = vld [vmem:[%s15775_s16 + $0x16a4] ss:$8 sps:$4 sm:$0xff]   ;;  %v13484_v49 = vld [vmem:[%s15775_s16 + $0x16a0] ss:$8 sps:$4 sm:$0xff]   ;;  %v13487_v52 = vld [vmem:[%s15775_s16 + $0x16b4] ss:$8 sps:$4 sm:$0xff]  }
  0x56   : > { %10358 = vmatprep.subr.bf16.mxu0 %v13445_v18  ;;  %v13489_v54 = vld [vmem:[%s15775_s16 + $0xb0] ss:$8 sps:$4 sm:$0xff]   ;;  %v356_v57 = vld [vmem:[%s15770_s12 + $0x28] sm:$0xff]  ;;  %v13497_v2 = vld [vmem:[%s15775_s16 + $0xd4] ss:$8 sps:$4 sm:$0xff]   ;;  %p13069_p9 = scmp.ne.s32.totalorder %s15700_s28, 3 }
  0x57   : > { %v15826_v50 = vsub.s32 %v1784_v43, %v15818_v44  ;;  %v13490_v56 = vld [vmem:[%s15775_s16 + $0x16b0] ss:$8 sps:$4 sm:$0xff]   ;;  %v13491_v58 = vld [vmem:[%s15775_s16 + $0xc4] ss:$8 sps:$4 sm:$0xff]   ;;  %v2026_v61 = vcombine.high %v356_v57, %v356_v57  ;;  %v13495_v0 = vld [vmem:[%s15775_s16 + $0xc0] ss:$8 sps:$4 sm:$0xff]  }
  0x58   : > { %9457 = vmatpush1.bf16.msra.mxu1 %v13447_v19  ;;  %v13493_v59 = vld [vmem:[%s15775_s16 + $0x16c4] ss:$8 sps:$4 sm:$0xff]   ;;  %v13496_v1 = vld [vmem:[%s15775_s16 + $0x16c0] ss:$8 sps:$4 sm:$0xff]   ;;  %v13499_v3 = vld [vmem:[%s15775_s16 + $0x16d4] ss:$8 sps:$4 sm:$0xff]  }
  0x59   : > { %10359 = vmatpush1.bf16.msra.mxu0 %v13448_v20  ;;  %9458 = vmatprep.subr.bf16.mxu1 %v13449_v21  ;;  %v1788_v55 = vrot.slane %v15831_v53, %v15826_v50  ;;  %v2040_v63 = vrot.slane %v2026_v61, %v15826_v50  ;;  %v13501_v6 = vld [vmem:[%s15775_s16 + $0xd0] ss:$8 sps:$4 sm:$0xff]   ;;  %v13503_v8 = vld [vmem:[%s15775_s16 + $0xe4] ss:$8 sps:$4 sm:$0xff]   ;;  %v13507_v10 = vld [vmem:[%s15775_s16 + $0xe0] ss:$8 sps:$4 sm:$0xff]  }
  0x5a   : > { %10360 = vmatprep.subr.bf16.mxu0 %v13451_v22  ;;  %v13502_v7 = vld [vmem:[%s15775_s16 + $0x16d0] ss:$8 sps:$4 sm:$0xff]   ;;  %v13505_v9 = vld [vmem:[%s15775_s16 + $0x16e4] ss:$8 sps:$4 sm:$0xff]   ;;  %v13508_v11 = vld [vmem:[%s15775_s16 + $0x16e0] ss:$8 sps:$4 sm:$0xff]  }
  0x5b   : > { %v1796_v60 = vcombine.high %v1788_v55, %v1788_v55  ;;  %v2042_v4 = vcombine.high %v2040_v63, %v2040_v63  ;;  %v13509_v12 = vld [vmem:[%s15775_s16 + $0xf4] ss:$8 sps:$4 sm:$0xff]   ;;  %v13513_v14 = vld [vmem:[%s15775_s16 + $0xf0] ss:$8 sps:$4 sm:$0xff]   ;;  %v13518_v16 = vld [vmem:[%s15775_s16 + $0x104] ss:$8 sps:$4 sm:$0xff]   ;;  %v15860_v18 = vrot.slane %v1788_v55, %v15826_v50  ;;  %v15863_v19 = vrot.slane %v2040_v63, %v15826_v50 }
  0x5c   : > { %9459 = vmatpush1.bf16.msra.mxu1 %v13453_v23  ;;  %v13511_v13 = vld [vmem:[%s15775_s16 + $0x16f4] ss:$8 sps:$4 sm:$0xff]   ;;  %v13514_v15 = vld [vmem:[%s15775_s16 + $0x16f0] ss:$8 sps:$4 sm:$0xff]   ;;  %v13522_v17 = vld [vmem:[%s15775_s16 + $0x1704] ss:$8 sps:$4 sm:$0xff]  }
  0x5d   : > { %10361 = vmatpush1.bf16.msra.mxu0 %v13454_v24  ;;  %9460 = vmatprep.subr.bf16.mxu1 %v13455_v25  ;;  %v1818_v62 = vrot.slane %v1796_v60, %v15826_v50  ;;  %v2070_v5 = vrot.slane %v2042_v4, %v15826_v50  ;;  %v13516_v20 = vld [vmem:[%s15775_s16 + $0x100] ss:$8 sps:$4 sm:$0xff]   ;;  %v13525_v22 = vld [vmem:[%s15775_s16 + $0x114] ss:$8 sps:$4 sm:$0xff]   ;;  %v13546_v37 = vld [vmem:[%s15775_s16 + $0x1744] ss:$8 sps:$4 sm:$0xff]  }
  0x5e   : > { %10362 = vmatprep.subr.bf16.mxu0 %v13457_v26  ;;  %v13520_v21 = vld [vmem:[%s15775_s16 + $0x1700] ss:$8 sps:$4 sm:$0xff]   ;;  %v13528_v23 = vld [vmem:[%s15775_s16 + $0x1714] ss:$8 sps:$4 sm:$0xff]   ;;  %v13523_v26 = vld [vmem:[%s15775_s16 + $0x110] ss:$8 sps:$4 sm:$0xff]  }
  0x5f   : > { %9480 = vmatprep.mubr.bf16.mxu1 %v1818_v62  ;;  %10382 = vmatprep.mubr.bf16.mxu0 %v2070_v5  ;;  %v1828_v24 = vcombine.high %v1818_v62, %v1818_v62  ;;  %v2074_v25 = vcombine.high %v2070_v5, %v2070_v5  ;;  %v13541_v38 = vld [vmem:[%s15775_s16 + $0x140] ss:$8 sps:$4 sm:$0xff]   ;;  %v13550_v43 = vld [vmem:[%s15775_s16 + $0x1750] ss:$8 sps:$4 sm:$0xff]   ;;  %v13567_v55 = vld [vmem:[%s15775_s16 + $0x184] ss:$8 sps:$4 sm:$0xff]  }
  0x60   : > { %9461 = vmatpush1.bf16.msra.mxu1 %v13459_v27  ;;  %v13526_v27 = vld [vmem:[%s15775_s16 + $0x1710] ss:$8 sps:$4 sm:$0xff]   ;;  %v13544_v39 = vld [vmem:[%s15775_s16 + $0x1740] ss:$8 sps:$4 sm:$0xff]   ;;  %v13576_v60 = vld [vmem:[%s15775_s16 + $0x1794] ss:$8 sps:$4 sm:$0xff]  }
  0x61   : > { %10363 = vmatpush1.bf16.msra.mxu0 %v13460_v28  ;;  %9462 = vmatprep.subr.bf16.mxu1 %v13461_v29  ;;  %v13531_v28 = vld [vmem:[%s15775_s16 + $0x124] ss:$8 sps:$4 sm:$0xff]   ;;  %v13565_v57 = vld [vmem:[%s15775_s16 + $0x180] ss:$8 sps:$4 sm:$0xff]   ;;  %v13571_v61 = vld [vmem:[%s15775_s16 + $0x190] ss:$8 sps:$4 sm:$0xff]  }
  0x62   : > { %10364 = vmatprep.subr.bf16.mxu0 %v13463_v30  ;;  %v13534_v29 = vld [vmem:[%s15775_s16 + $0x1724] ss:$8 sps:$4 sm:$0xff]   ;;  %v13529_v30 = vld [vmem:[%s15775_s16 + $0x120] ss:$8 sps:$4 sm:$0xff]   ;;  %v13574_v62 = vld [vmem:[%s15775_s16 + $0x1790] ss:$8 sps:$4 sm:$0xff]  }
  0x63   : > { %v13579_v63 = vld [vmem:[%s15775_s16 + $0x1a4] ss:$8 sps:$4 sm:$0xff]   ;;  %v13588_v4 = vld [vmem:[%s15775_s16 + $0x17b4] ss:$8 sps:$4 sm:$0xff]   ;;  %v13583_v5 = vld [vmem:[%s15775_s16 + $0x1b0] ss:$8 sps:$4 sm:$0xff]  }
  0x64   : > { %9463 = vmatpush1.bf16.msra.mxu1 %v13465_v31  ;;  %v13532_v31 = vld [vmem:[%s15775_s16 + $0x1720] ss:$8 sps:$4 sm:$0xff]   ;;  %s17616_s17 = sld [smem:[#allocation7]] (!%p13069_p9)  ;;  %s13070_s25 = sld [smem:[#allocation7 + $0x1]] (!%p13069_p9) }
  0x65   : > { %10365 = vmatpush1.bf16.msra.mxu0 %v13466_v32  ;;  %9464 = vmatprep.subr.bf16.mxu1 %v13467_v33  ;;  %v13537_v32 = vld [vmem:[%s15775_s16 + $0x134] ss:$8 sps:$4 sm:$0xff]  }
  0x66   : > { %10366 = vmatprep.subr.bf16.mxu0 %v13469_v34  ;;  %v13540_v33 = vld [vmem:[%s15775_s16 + $0x1734] ss:$8 sps:$4 sm:$0xff]   ;;  %v13535_v34 = vld [vmem:[%s15775_s16 + $0x130] ss:$8 sps:$4 sm:$0xff]  }
  0x68   : > { %9465 = vmatpush1.bf16.msra.mxu1 %v13471_v35  ;;  %v13538_v35 = vld [vmem:[%s15775_s16 + $0x1730] ss:$8 sps:$4 sm:$0xff]  }
  0x69   : > { %10367 = vmatpush1.bf16.msra.mxu0 %v13472_v36  ;;  %9466 = vmatprep.subr.bf16.mxu1 %v13473_v40  ;;  %v13543_v36 = vld [vmem:[%s15775_s16 + $0x144] ss:$8 sps:$4 sm:$0xff]   ;;  %v13549_v40 = vld [vmem:[%s15775_s16 + $0x154] ss:$8 sps:$4 sm:$0xff]  }
  0x6a   : > { %10368 = vmatprep.subr.bf16.mxu0 %v13475_v41  ;;  %v13552_v41 = vld [vmem:[%s15775_s16 + $0x1754] ss:$8 sps:$4 sm:$0xff]  }
  0x6c   : > { %9467 = vmatpush1.bf16.msra.mxu1 %v13477_v42  ;;  %v13547_v42 = vld [vmem:[%s15775_s16 + $0x150] ss:$8 sps:$4 sm:$0xff]  }
  0x6d   : > { %10369 = vmatpush1.bf16.msra.mxu0 %v13478_v45  ;;  %9468 = vmatprep.subr.bf16.mxu1 %v13479_v46  ;;  %v13555_v45 = vld [vmem:[%s15775_s16 + $0x164] ss:$8 sps:$4 sm:$0xff]  }
  0x6e   : > { %10370 = vmatprep.subr.bf16.mxu0 %v13481_v47  ;;  %v13558_v46 = vld [vmem:[%s15775_s16 + $0x1764] ss:$8 sps:$4 sm:$0xff]   ;;  %v13553_v47 = vld [vmem:[%s15775_s16 + $0x160] ss:$8 sps:$4 sm:$0xff]  }
  0x70   : > { %9469 = vmatpush1.bf16.msra.mxu1 %v13483_v48  ;;  %v13556_v48 = vld [vmem:[%s15775_s16 + $0x1760] ss:$8 sps:$4 sm:$0xff]  }
  0x71   : > { %10371 = vmatpush1.bf16.msra.mxu0 %v13484_v49  ;;  %9470 = vmatprep.subr.bf16.mxu1 %v13485_v51  ;;  %v13561_v49 = vld [vmem:[%s15775_s16 + $0x174] ss:$8 sps:$4 sm:$0xff]  }
  0x72   : > { %10372 = vmatprep.subr.bf16.mxu0 %v13487_v52  ;;  %v13564_v51 = vld [vmem:[%s15775_s16 + $0x1774] ss:$8 sps:$4 sm:$0xff]   ;;  %v13559_v52 = vld [vmem:[%s15775_s16 + $0x170] ss:$8 sps:$4 sm:$0xff]  }
  0x74   : > { %9471 = vmatpush1.bf16.msra.mxu1 %v13489_v54  ;;  %v13562_v54 = vld [vmem:[%s15775_s16 + $0x1770] ss:$8 sps:$4 sm:$0xff]  }
  0x75   : > { %10373 = vmatpush1.bf16.msra.mxu0 %v13490_v56  ;;  %9472 = vmatprep.subr.bf16.mxu1 %v13491_v58  ;;  %v13570_v56 = vld [vmem:[%s15775_s16 + $0x1784] ss:$8 sps:$4 sm:$0xff]   ;;  %v13568_v58 = vld [vmem:[%s15775_s16 + $0x1780] ss:$8 sps:$4 sm:$0xff]  }
  0x76   : > { %10374 = vmatprep.subr.bf16.mxu0 %v13493_v59  ;;  %v13573_v59 = vld [vmem:[%s15775_s16 + $0x194] ss:$8 sps:$4 sm:$0xff]  }
  0x78   : > { %9473 = vmatpush1.bf16.msra.mxu1 %v13495_v0  ;;  %v13582_v0 = vld [vmem:[%s15775_s16 + $0x17a4] ss:$8 sps:$4 sm:$0xff]  }
  0x79   : > { %10375 = vmatpush1.bf16.msra.mxu0 %v13496_v1  ;;  %9474 = vmatprep.subr.bf16.mxu1 %v13497_v2  ;;  %v13577_v1 = vld [vmem:[%s15775_s16 + $0x1a0] ss:$8 sps:$4 sm:$0xff]  }
  0x7a   : > { %10376 = vmatprep.subr.bf16.mxu0 %v13499_v3  ;;  %v13580_v2 = vld [vmem:[%s15775_s16 + $0x17a0] ss:$8 sps:$4 sm:$0xff]   ;;  %v13585_v3 = vld [vmem:[%s15775_s16 + $0x1b4] ss:$8 sps:$4 sm:$0xff]  }
  0x7c   : > { %9475 = vmatpush1.bf16.msra.mxu1 %v13501_v6  ;;  %v13586_v6 = vld [vmem:[%s15775_s16 + $0x17b0] ss:$8 sps:$4 sm:$0xff]  }
  0x7d   : > { %10377 = vmatpush1.bf16.msra.mxu0 %v13502_v7  ;;  %9476 = vmatprep.subr.bf16.mxu1 %v13503_v8  ;;  %v13591_v7 = vld [vmem:[%s15775_s16 + $0x1c4] ss:$8 sps:$4 sm:$0xff]  }
  0x7e   : > { %10378 = vmatprep.subr.bf16.mxu0 %v13505_v9  ;;  %v13594_v8 = vld [vmem:[%s15775_s16 + $0x17c4] ss:$8 sps:$4 sm:$0xff]   ;;  %v13589_v9 = vld [vmem:[%s15775_s16 + $0x1c0] ss:$8 sps:$4 sm:$0xff]  }
  0x80   : > { %9477 = vmatpush1.bf16.msra.mxu1 %v13507_v10  ;;  %v13592_v10 = vld [vmem:[%s15775_s16 + $0x17c0] ss:$8 sps:$4 sm:$0xff]  }
  0x81   : > { %10379 = vmatpush1.bf16.msra.mxu0 %v13508_v11  ;;  %9478 = vmatprep.subr.bf16.mxu1 %v13509_v12  ;;  %v13597_v11 = vld [vmem:[%s15775_s16 + $0x1d4] ss:$8 sps:$4 sm:$0xff]  }
  0x82   : > { %10380 = vmatprep.subr.bf16.mxu0 %v13511_v13  ;;  %v13600_v12 = vld [vmem:[%s15775_s16 + $0x17d4] ss:$8 sps:$4 sm:$0xff]   ;;  %v13595_v13 = vld [vmem:[%s15775_s16 + $0x1d0] ss:$8 sps:$4 sm:$0xff]  }
  0x84   : > { %9479 = vmatpush1.bf16.msra.mxu1 %v13513_v14  ;;  %v13598_v14 = vld [vmem:[%s15775_s16 + $0x17d0] ss:$8 sps:$4 sm:$0xff]  }
  0x85   : > { %10381 = vmatpush1.bf16.msra.mxu0 %v13514_v15  ;;  %9489 = vmatprep.subr.bf16.mxu1 %v13518_v16  ;;  %v13603_v15 = vld [vmem:[%s15775_s16 + $0x1e4] ss:$8 sps:$4 sm:$0xff]  }
  0x86   : > { %10391 = vmatprep.subr.bf16.mxu0 %v13522_v17  ;;  %v13606_v16 = vld [vmem:[%s15775_s16 + $0x17e4] ss:$8 sps:$4 sm:$0xff]   ;;  %v1781_v17 = vcombine.high %v15831_v53, %v15831_v53  ;;  %v13610_v53 = vld [vmem:[%s15775_s16 + $0x17f0] ss:$8 sps:$4 sm:$0xff]  }
  0x87   : > { %9481 = vmatmul.mubr.bf16.vlgmr.msra.gmra.mrb[0].mxu1 %v15860_v18 }
  0x88   : > { %10383 = vmatmul.mubr.bf16.vlgmr.msra.gmra.mrb[0].mxu0 %v15863_v19  ;;  %9490 = vmatpush1.bf16.msra.mxu1 %v13516_v20  ;;  %v13601_v20 = vld [vmem:[%s15775_s16 + $0x1e0] ss:$8 sps:$4 sm:$0xff]  }
  0x89   : > { %10392 = vmatpush1.bf16.msra.mxu0 %v13520_v21  ;;  %9491 = vmatprep.subr.bf16.mxu1 %v13525_v22  ;;  %v13604_v21 = vld [vmem:[%s15775_s16 + $0x17e0] ss:$8 sps:$4 sm:$0xff]   ;;  %v13609_v22 = vld [vmem:[%s15775_s16 + $0x1f4] ss:$8 sps:$4 sm:$0xff]  }
  0x8a   : > { %10393 = vmatprep.subr.bf16.mxu0 %v13528_v23  ;;  %9521 = vmatprep.mubr.bf16.mxu1 %v1828_v24  ;;  %v13612_v23 = vld [vmem:[%s15775_s16 + $0x17f4] ss:$8 sps:$4 sm:$0xff]   ;;  %v15930_v24 = vrot.slane %v1781_v17, %v15826_v50  ;;  %v13679_v17 = vld [vmem:[%s15775_s16 + $0x2b0] ss:$8 sps:$4 sm:$0xff]  }
  0x8b   : > { %10423 = vmatprep.mubr.bf16.mxu0 %v2074_v25  ;;  %v13607_v25 = vld [vmem:[%s15775_s16 + $0x1f0] ss:$8 sps:$4 sm:$0xff]  }
  0x8c   : > { %9492 = vmatpush1.bf16.msra.mxu1 %v13523_v26  ;;  %v13615_v26 = vld [vmem:[%s15775_s16 + $0x204] ss:$8 sps:$4 sm:$0xff]  }
  0x8d   : > { %10394 = vmatpush1.bf16.msra.mxu0 %v13526_v27  ;;  %9493 = vmatprep.subr.bf16.mxu1 %v13531_v28  ;;  %v13618_v27 = vld [vmem:[%s15775_s16 + $0x1804] ss:$8 sps:$4 sm:$0xff]   ;;  %v1797_v28 = vcombine.high %v15930_v24, %v15930_v24 }
  0x8e   : > { %10395 = vmatprep.subr.bf16.mxu0 %v13534_v29  ;;  %v1826_v29 = vcombine.high %v15860_v18, %v15860_v18  ;;  %v13619_v18 = vld [vmem:[%s15775_s16 + $0x210] ss:$8 sps:$4 sm:$0xff]  }
  0x90   : > { %9494 = vmatpush1.bf16.msra.mxu1 %v13529_v30  ;;  %v2072_v30 = vcombine.high %v15863_v19, %v15863_v19 }
  0x91   : > { %10396 = vmatpush1.bf16.msra.mxu0 %v13532_v31  ;;  %9495 = vmatprep.subr.bf16.mxu1 %v13537_v32  ;;  %v13613_v31 = vld [vmem:[%s15775_s16 + $0x200] ss:$8 sps:$4 sm:$0xff]  }
  0x92   : > { %10397 = vmatprep.subr.bf16.mxu0 %v13540_v33  ;;  %v13616_v32 = vld [vmem:[%s15775_s16 + $0x1800] ss:$8 sps:$4 sm:$0xff]   ;;  %v13621_v33 = vld [vmem:[%s15775_s16 + $0x214] ss:$8 sps:$4 sm:$0xff]  }
  0x94   : > { %9496 = vmatpush1.bf16.msra.mxu1 %v13535_v34  ;;  %v13624_v34 = vld [vmem:[%s15775_s16 + $0x1814] ss:$8 sps:$4 sm:$0xff]  }
  0x95   : > { %10398 = vmatpush1.bf16.msra.mxu0 %v13538_v35  ;;  %9497 = vmatprep.subr.bf16.mxu1 %v13543_v36  ;;  %v15947_v35 = vrot.slane %v1797_v28, %v15826_v50  ;;  %v15950_v36 = vld [vmem:[%s15770_s12 + $0x30] sm:$0xff] }
  0x96   : > { %10399 = vmatprep.subr.bf16.mxu0 %v13546_v37  ;;  %v15955_v19 = vrot.slane %v15950_v36, %v15826_v50  ;;  %v13622_v37 = vld [vmem:[%s15775_s16 + $0x1810] ss:$8 sps:$4 sm:$0xff]  }
  0x97   : > { %v13694_v28 = vld [vmem:[%s15775_s16 + $0x18d0] ss:$8 sps:$4 sm:$0xff]  }
  0x98   : > { %9498 = vmatpush1.bf16.msra.mxu1 %v13541_v38  ;;  %v13627_v38 = vld [vmem:[%s15775_s16 + $0x224] ss:$8 sps:$4 sm:$0xff]  }
  0x99   : > { %10400 = vmatpush1.bf16.msra.mxu0 %v13544_v39  ;;  %9499 = vmatprep.subr.bf16.mxu1 %v13549_v40  ;;  %v13630_v39 = vld [vmem:[%s15775_s16 + $0x1824] ss:$8 sps:$4 sm:$0xff]   ;;  %v2090_v40 = vcombine.high %v15955_v19, %v15955_v19 }
  0x9a   : > { %10401 = vmatprep.subr.bf16.mxu0 %v13552_v41  ;;  %v13625_v41 = vld [vmem:[%s15775_s16 + $0x220] ss:$8 sps:$4 sm:$0xff]  }
  0x9c   : > { %9500 = vmatpush1.bf16.msra.mxu1 %v13547_v42  ;;  %v15965_v42 = vrot.slane %v2090_v40, %v15826_v50  ;;  %v13709_v40 = vld [vmem:[%s15775_s16 + $0x300] ss:$8 sps:$4 sm:$0xff]  }
  0x9d   : > { %10402 = vmatpush1.bf16.msra.mxu0 %v13550_v43  ;;  %9501 = vmatprep.subr.bf16.mxu1 %v13555_v45  ;;  %v13628_v43 = vld [vmem:[%s15775_s16 + $0x1820] ss:$8 sps:$4 sm:$0xff]   ;;  %v13633_v45 = vld [vmem:[%s15775_s16 + $0x234] ss:$8 sps:$4 sm:$0xff]  }
  0x9e   : > { %10403 = vmatprep.subr.bf16.mxu0 %v13558_v46  ;;  %v13636_v46 = vld [vmem:[%s15775_s16 + $0x1834] ss:$8 sps:$4 sm:$0xff]  }
  0xa0   : > { %9502 = vmatpush1.bf16.msra.mxu1 %v13553_v47  ;;  %v13631_v47 = vld [vmem:[%s15775_s16 + $0x230] ss:$8 sps:$4 sm:$0xff]  }
  0xa1   : > { %10404 = vmatpush1.bf16.msra.mxu0 %v13556_v48  ;;  %9503 = vmatprep.subr.bf16.mxu1 %v13561_v49  ;;  %v13634_v48 = vld [vmem:[%s15775_s16 + $0x1830] ss:$8 sps:$4 sm:$0xff]   ;;  %v13639_v49 = vld [vmem:[%s15775_s16 + $0x244] ss:$8 sps:$4 sm:$0xff]  }
  0xa2   : > { %10405 = vmatprep.subr.bf16.mxu0 %v13564_v51  ;;  %v13642_v51 = vld [vmem:[%s15775_s16 + $0x1844] ss:$8 sps:$4 sm:$0xff]  }
  0xa4   : > { %9504 = vmatpush1.bf16.msra.mxu1 %v13559_v52  ;;  %v13637_v52 = vld [vmem:[%s15775_s16 + $0x240] ss:$8 sps:$4 sm:$0xff]  }
  0xa5   : > { %10406 = vmatpush1.bf16.msra.mxu0 %v13562_v54  ;;  %9505 = vmatprep.subr.bf16.mxu1 %v13567_v55  ;;  %v13640_v54 = vld [vmem:[%s15775_s16 + $0x1840] ss:$8 sps:$4 sm:$0xff]   ;;  %v13645_v55 = vld [vmem:[%s15775_s16 + $0x254] ss:$8 sps:$4 sm:$0xff]  }
  0xa6   : > { %10407 = vmatprep.subr.bf16.mxu0 %v13570_v56  ;;  %v13648_v56 = vld [vmem:[%s15775_s16 + $0x1854] ss:$8 sps:$4 sm:$0xff]  }
  0xa8   : > { %9506 = vmatpush1.bf16.msra.mxu1 %v13565_v57  ;;  %v13643_v57 = vld [vmem:[%s15775_s16 + $0x250] ss:$8 sps:$4 sm:$0xff]  }
  0xa9   : > { %10408 = vmatpush1.bf16.msra.mxu0 %v13568_v58  ;;  %9507 = vmatprep.subr.bf16.mxu1 %v13573_v59  ;;  %v13646_v58 = vld [vmem:[%s15775_s16 + $0x1850] ss:$8 sps:$4 sm:$0xff]   ;;  %v13651_v59 = vld [vmem:[%s15775_s16 + $0x264] ss:$8 sps:$4 sm:$0xff]  }
  0xaa   : > { %10409 = vmatprep.subr.bf16.mxu0 %v13576_v60  ;;  %v13654_v60 = vld [vmem:[%s15775_s16 + $0x1864] ss:$8 sps:$4 sm:$0xff]  }
  0xac   : > { %9508 = vmatpush1.bf16.msra.mxu1 %v13571_v61  ;;  %v13649_v61 = vld [vmem:[%s15775_s16 + $0x260] ss:$8 sps:$4 sm:$0xff]  }
  0xad   : > { %10410 = vmatpush1.bf16.msra.mxu0 %v13574_v62  ;;  %9509 = vmatprep.subr.bf16.mxu1 %v13579_v63  ;;  %v13652_v62 = vld [vmem:[%s15775_s16 + $0x1860] ss:$8 sps:$4 sm:$0xff]   ;;  %v13657_v63 = vld [vmem:[%s15775_s16 + $0x274] ss:$8 sps:$4 sm:$0xff]  }
  0xae   : > { %10411 = vmatprep.subr.bf16.mxu0 %v13582_v0  ;;  %v13660_v0 = vld [vmem:[%s15775_s16 + $0x1874] ss:$8 sps:$4 sm:$0xff]  }
  0xb0   : > { %9510 = vmatpush1.bf16.msra.mxu1 %v13577_v1  ;;  %v13655_v1 = vld [vmem:[%s15775_s16 + $0x270] ss:$8 sps:$4 sm:$0xff]  }
  0xb1   : > { %10412 = vmatpush1.bf16.msra.mxu0 %v13580_v2  ;;  %9511 = vmatprep.subr.bf16.mxu1 %v13585_v3  ;;  %v13658_v2 = vld [vmem:[%s15775_s16 + $0x1870] ss:$8 sps:$4 sm:$0xff]   ;;  %v13663_v3 = vld [vmem:[%s15775_s16 + $0x284] ss:$8 sps:$4 sm:$0xff]  }
  0xb2   : > { %10413 = vmatprep.subr.bf16.mxu0 %v13588_v4  ;;  %v13666_v4 = vld [vmem:[%s15775_s16 + $0x1884] ss:$8 sps:$4 sm:$0xff]  }
  0xb4   : > { %9512 = vmatpush1.bf16.msra.mxu1 %v13583_v5  ;;  %v13661_v5 = vld [vmem:[%s15775_s16 + $0x280] ss:$8 sps:$4 sm:$0xff]  }
  0xb5   : > { %10414 = vmatpush1.bf16.msra.mxu0 %v13586_v6  ;;  %9513 = vmatprep.subr.bf16.mxu1 %v13591_v7  ;;  %v13664_v6 = vld [vmem:[%s15775_s16 + $0x1880] ss:$8 sps:$4 sm:$0xff]   ;;  %v13669_v7 = vld [vmem:[%s15775_s16 + $0x294] ss:$8 sps:$4 sm:$0xff]  }
  0xb6   : > { %10415 = vmatprep.subr.bf16.mxu0 %v13594_v8  ;;  %v13672_v8 = vld [vmem:[%s15775_s16 + $0x1894] ss:$8 sps:$4 sm:$0xff]  }
  0xb8   : > { %9514 = vmatpush1.bf16.msra.mxu1 %v13589_v9  ;;  %v13667_v9 = vld [vmem:[%s15775_s16 + $0x290] ss:$8 sps:$4 sm:$0xff]  }
  0xb9   : > { %10416 = vmatpush1.bf16.msra.mxu0 %v13592_v10  ;;  %9515 = vmatprep.subr.bf16.mxu1 %v13597_v11  ;;  %v13670_v10 = vld [vmem:[%s15775_s16 + $0x1890] ss:$8 sps:$4 sm:$0xff]   ;;  %v13675_v11 = vld [vmem:[%s15775_s16 + $0x2a4] ss:$8 sps:$4 sm:$0xff]  }
  0xba   : > { %10417 = vmatprep.subr.bf16.mxu0 %v13600_v12  ;;  %v13678_v12 = vld [vmem:[%s15775_s16 + $0x18a4] ss:$8 sps:$4 sm:$0xff]  }
  0xbc   : > { %9516 = vmatpush1.bf16.msra.mxu1 %v13595_v13  ;;  %v13673_v13 = vld [vmem:[%s15775_s16 + $0x2a0] ss:$8 sps:$4 sm:$0xff]  }
  0xbd   : > { %10418 = vmatpush1.bf16.msra.mxu0 %v13598_v14  ;;  %9517 = vmatprep.subr.bf16.mxu1 %v13603_v15  ;;  %v13676_v14 = vld [vmem:[%s15775_s16 + $0x18a0] ss:$8 sps:$4 sm:$0xff]   ;;  %v13681_v15 = vld [vmem:[%s15775_s16 + $0x2b4] ss:$8 sps:$4 sm:$0xff]  }
  0xbe   : > { %10419 = vmatprep.subr.bf16.mxu0 %v13606_v16  ;;  %v13684_v16 = vld [vmem:[%s15775_s16 + $0x18b4] ss:$8 sps:$4 sm:$0xff]  }
  0xc0   : > { %9518 = vmatpush1.bf16.msra.mxu1 %v13601_v20  ;;  %v13682_v20 = vld [vmem:[%s15775_s16 + $0x18b0] ss:$8 sps:$4 sm:$0xff]  }
  0xc1   : > { %10420 = vmatpush1.bf16.msra.mxu0 %v13604_v21  ;;  %9519 = vmatprep.subr.bf16.mxu1 %v13609_v22  ;;  %v13687_v21 = vld [vmem:[%s15775_s16 + $0x2c4] ss:$8 sps:$4 sm:$0xff]  }
  0xc2   : > { %10421 = vmatprep.subr.bf16.mxu0 %v13612_v23  ;;  %v13690_v22 = vld [vmem:[%s15775_s16 + $0x18c4] ss:$8 sps:$4 sm:$0xff]   ;;  %v13685_v23 = vld [vmem:[%s15775_s16 + $0x2c0] ss:$8 sps:$4 sm:$0xff]  }
  0xc4   : > { %9520 = vmatpush1.bf16.msra.mxu1 %v13607_v25  ;;  %v13688_v25 = vld [vmem:[%s15775_s16 + $0x18c0] ss:$8 sps:$4 sm:$0xff]  }
  0xc5   : > { %10422 = vmatpush1.bf16.msra.mxu0 %v13610_v53  ;;  %9530 = vmatprep.subr.bf16.mxu1 %v13615_v26  ;;  %v13693_v53 = vld [vmem:[%s15775_s16 + $0x2d4] ss:$8 sps:$4 sm:$0xff]  }
  0xc6   : > { %10432 = vmatprep.subr.bf16.mxu0 %v13618_v27  ;;  %v13696_v26 = vld [vmem:[%s15775_s16 + $0x18d4] ss:$8 sps:$4 sm:$0xff]   ;;  %v13691_v27 = vld [vmem:[%s15775_s16 + $0x2d0] ss:$8 sps:$4 sm:$0xff]  }
  0xc7   : > { %9522 = vmatmul.mubr.bf16.vlgmr.msra.gmra.mrb[0].mxu1 %v1826_v29  ;;  %v13699_v29 = vld [vmem:[%s15775_s16 + $0x2e4] ss:$8 sps:$4 sm:$0xff]  }
  0xc8   : > { %10424 = vmatmul.mubr.bf16.vlgmr.msra.gmra.mrb[0].mxu0 %v2072_v30  ;;  %9531 = vmatpush1.bf16.msra.mxu1 %v13613_v31  ;;  %v13702_v30 = vld [vmem:[%s15775_s16 + $0x18e4] ss:$8 sps:$4 sm:$0xff]   ;;  %v13697_v31 = vld [vmem:[%s15775_s16 + $0x2e0] ss:$8 sps:$4 sm:$0xff]  }
  0xc9   : > { %10433 = vmatpush1.bf16.msra.mxu0 %v13616_v32  ;;  %9532 = vmatprep.subr.bf16.mxu1 %v13621_v33  ;;  %v13700_v32 = vld [vmem:[%s15775_s16 + $0x18e0] ss:$8 sps:$4 sm:$0xff]   ;;  %v13705_v33 = vld [vmem:[%s15775_s16 + $0x2f4] ss:$8 sps:$4 sm:$0xff]  }
  0xca   : > { %10434 = vmatprep.subr.bf16.mxu0 %v13624_v34  ;;  %9562 = vmatprep.mubr.bf16.mxu1 %v15947_v35  ;;  %v13708_v34 = vld [vmem:[%s15775_s16 + $0x18f4] ss:$8 sps:$4 sm:$0xff]  }
  0xcb   : > { %10464 = vmatprep.mubr.bf16.mxu0 %v15965_v42 }
  0xcc   : > { %9533 = vmatpush1.bf16.msra.mxu1 %v13619_v18  ;;  %v13703_v18 = vld [vmem:[%s15775_s16 + $0x2f0] ss:$8 sps:$4 sm:$0xff]  }
  0xcd   : > { %10435 = vmatpush1.bf16.msra.mxu0 %v13622_v37  ;;  %9534 = vmatprep.subr.bf16.mxu1 %v13627_v38  ;;  %v13706_v37 = vld [vmem:[%s15775_s16 + $0x18f0] ss:$8 sps:$4 sm:$0xff]   ;;  %v13711_v38 = vld [vmem:[%s15775_s16 + $0x304] ss:$8 sps:$4 sm:$0xff]  }
  0xce   : > { %10436 = vmatprep.subr.bf16.mxu0 %v13630_v39  ;;  %v13714_v39 = vld [vmem:[%s15775_s16 + $0x1904] ss:$8 sps:$4 sm:$0xff]  }
  0xd0   : > { %9535 = vmatpush1.bf16.msra.mxu1 %v13625_v41  ;;  %v16026_v41 = vrot.slane %v15930_v24, %v15826_v50  ;;  %v2122_v24 = vcombine.high %v15965_v42, %v15965_v42  ;;  %v13721_v42 = vld [vmem:[%s15775_s16 + $0x320] ss:$8 sps:$4 sm:$0xff]  }
  0xd1   : > { %10437 = vmatpush1.bf16.msra.mxu0 %v13628_v43  ;;  %9536 = vmatprep.subr.bf16.mxu1 %v13633_v45  ;;  %v16030_v43 = vrot.slane %v15955_v19, %v15826_v50  ;;  %v13712_v45 = vld [vmem:[%s15775_s16 + $0x1900] ss:$8 sps:$4 sm:$0xff]   ;;  %v13715_v19 = vld [vmem:[%s15775_s16 + $0x310] ss:$8 sps:$4 sm:$0xff]  }
  0xd2   : > { %10438 = vmatprep.subr.bf16.mxu0 %v13636_v46  ;;  %v13717_v46 = vld [vmem:[%s15775_s16 + $0x314] ss:$8 sps:$4 sm:$0xff]  }
  0xd4   : > { %9537 = vmatpush1.bf16.msra.mxu1 %v13631_v47  ;;  %v13720_v47 = vld [vmem:[%s15775_s16 + $0x1914] ss:$8 sps:$4 sm:$0xff]  }
  0xd5   : > { %10439 = vmatpush1.bf16.msra.mxu0 %v13634_v48  ;;  %9538 = vmatprep.subr.bf16.mxu1 %v13639_v49  ;;  %v1829_v48 = vcombine.high %v15947_v35, %v15947_v35  ;;  %v13718_v49 = vld [vmem:[%s15775_s16 + $0x1910] ss:$8 sps:$4 sm:$0xff]   ;;  %v13726_v35 = vld [vmem:[%s15775_s16 + $0x1924] ss:$8 sps:$4 sm:$0xff]  }
  0xd6   : > { %10440 = vmatprep.subr.bf16.mxu0 %v13642_v51  ;;  %v13723_v51 = vld [vmem:[%s15775_s16 + $0x324] ss:$8 sps:$4 sm:$0xff]  }
  0xd8   : > { %9539 = vmatpush1.bf16.msra.mxu1 %v13637_v52  ;;  %v13724_v52 = vld [vmem:[%s15775_s16 + $0x1920] ss:$8 sps:$4 sm:$0xff]  }
  0xd9   : > { %10441 = vmatpush1.bf16.msra.mxu0 %v13640_v54  ;;  %9540 = vmatprep.subr.bf16.mxu1 %v13645_v55  ;;  %v13729_v54 = vld [vmem:[%s15775_s16 + $0x334] ss:$8 sps:$4 sm:$0xff]  }
  0xda   : > { %10442 = vmatprep.subr.bf16.mxu0 %v13648_v56  ;;  %v13732_v55 = vld [vmem:[%s15775_s16 + $0x1934] ss:$8 sps:$4 sm:$0xff]   ;;  %v13727_v56 = vld [vmem:[%s15775_s16 + $0x330] ss:$8 sps:$4 sm:$0xff]  }
  0xdc   : > { %9541 = vmatpush1.bf16.msra.mxu1 %v13643_v57  ;;  %v13730_v57 = vld [vmem:[%s15775_s16 + $0x1930] ss:$8 sps:$4 sm:$0xff]  }
  0xdd   : > { %10443 = vmatpush1.bf16.msra.mxu0 %v13646_v58  ;;  %9542 = vmatprep.subr.bf16.mxu1 %v13651_v59  ;;  %v13735_v58 = vld [vmem:[%s15775_s16 + $0x344] ss:$8 sps:$4 sm:$0xff]  }
  0xde   : > { %10444 = vmatprep.subr.bf16.mxu0 %v13654_v60  ;;  %v13738_v59 = vld [vmem:[%s15775_s16 + $0x1944] ss:$8 sps:$4 sm:$0xff]   ;;  %v13733_v60 = vld [vmem:[%s15775_s16 + $0x340] ss:$8 sps:$4 sm:$0xff]  }
  0xe0   : > { %9543 = vmatpush1.bf16.msra.mxu1 %v13649_v61  ;;  %v13736_v61 = vld [vmem:[%s15775_s16 + $0x1940] ss:$8 sps:$4 sm:$0xff]  }
  0xe1   : > { %10445 = vmatpush1.bf16.msra.mxu0 %v13652_v62  ;;  %9544 = vmatprep.subr.bf16.mxu1 %v13657_v63  ;;  %v13741_v62 = vld [vmem:[%s15775_s16 + $0x354] ss:$8 sps:$4 sm:$0xff]  }
  0xe2   : > { %10446 = vmatprep.subr.bf16.mxu0 %v13660_v0  ;;  %v13744_v63 = vld [vmem:[%s15775_s16 + $0x1954] ss:$8 sps:$4 sm:$0xff]   ;;  %v13739_v0 = vld [vmem:[%s15775_s16 + $0x350] ss:$8 sps:$4 sm:$0xff]  }
  0xe4   : > { %9545 = vmatpush1.bf16.msra.mxu1 %v13655_v1  ;;  %v13742_v1 = vld [vmem:[%s15775_s16 + $0x1950] ss:$8 sps:$4 sm:$0xff]  }
  0xe5   : > { %10447 = vmatpush1.bf16.msra.mxu0 %v13658_v2  ;;  %9546 = vmatprep.subr.bf16.mxu1 %v13663_v3  ;;  %v13747_v2 = vld [vmem:[%s15775_s16 + $0x364] ss:$8 sps:$4 sm:$0xff]  }
  0xe6   : > { %10448 = vmatprep.subr.bf16.mxu0 %v13666_v4  ;;  %v13750_v3 = vld [vmem:[%s15775_s16 + $0x1964] ss:$8 sps:$4 sm:$0xff]   ;;  %v13745_v4 = vld [vmem:[%s15775_s16 + $0x360] ss:$8 sps:$4 sm:$0xff]  }
  0xe8   : > { %9547 = vmatpush1.bf16.msra.mxu1 %v13661_v5  ;;  %v13748_v5 = vld [vmem:[%s15775_s16 + $0x1960] ss:$8 sps:$4 sm:$0xff]  }
  0xe9   : > { %10449 = vmatpush1.bf16.msra.mxu0 %v13664_v6  ;;  %9548 = vmatprep.subr.bf16.mxu1 %v13669_v7  ;;  %v13753_v6 = vld [vmem:[%s15775_s16 + $0x374] ss:$8 sps:$4 sm:$0xff]  }
  0xea   : > { %10450 = vmatprep.subr.bf16.mxu0 %v13672_v8  ;;  %v13756_v7 = vld [vmem:[%s15775_s16 + $0x1974] ss:$8 sps:$4 sm:$0xff]   ;;  %v13751_v8 = vld [vmem:[%s15775_s16 + $0x370] ss:$8 sps:$4 sm:$0xff]  }
  0xec   : > { %9549 = vmatpush1.bf16.msra.mxu1 %v13667_v9  ;;  %v13754_v9 = vld [vmem:[%s15775_s16 + $0x1970] ss:$8 sps:$4 sm:$0xff]  }
  0xed   : > { %10451 = vmatpush1.bf16.msra.mxu0 %v13670_v10  ;;  %9550 = vmatprep.subr.bf16.mxu1 %v13675_v11  ;;  %v13759_v10 = vld [vmem:[%s15775_s16 + $0x384] ss:$8 sps:$4 sm:$0xff]  }
  0xee   : > { %10452 = vmatprep.subr.bf16.mxu0 %v13678_v12  ;;  %v13762_v11 = vld [vmem:[%s15775_s16 + $0x1984] ss:$8 sps:$4 sm:$0xff]   ;;  %v13757_v12 = vld [vmem:[%s15775_s16 + $0x380] ss:$8 sps:$4 sm:$0xff]  }
  0xf0   : > { %9551 = vmatpush1.bf16.msra.mxu1 %v13673_v13  ;;  %v13760_v13 = vld [vmem:[%s15775_s16 + $0x1980] ss:$8 sps:$4 sm:$0xff]  }
  0xf1   : > { %10453 = vmatpush1.bf16.msra.mxu0 %v13676_v14  ;;  %9552 = vmatprep.subr.bf16.mxu1 %v13681_v15  ;;  %v13765_v14 = vld [vmem:[%s15775_s16 + $0x394] ss:$8 sps:$4 sm:$0xff]  }
  0xf2   : > { %10454 = vmatprep.subr.bf16.mxu0 %v13684_v16  ;;  %v13768_v15 = vld [vmem:[%s15775_s16 + $0x1994] ss:$8 sps:$4 sm:$0xff]   ;;  %v13763_v16 = vld [vmem:[%s15775_s16 + $0x390] ss:$8 sps:$4 sm:$0xff]  }
  0xf4   : > { %9553 = vmatpush1.bf16.msra.mxu1 %v13679_v17  ;;  %v13766_v17 = vld [vmem:[%s15775_s16 + $0x1990] ss:$8 sps:$4 sm:$0xff]  }
  0xf5   : > { %10455 = vmatpush1.bf16.msra.mxu0 %v13682_v20  ;;  %9554 = vmatprep.subr.bf16.mxu1 %v13687_v21  ;;  %v13771_v20 = vld [vmem:[%s15775_s16 + $0x3a4] ss:$8 sps:$4 sm:$0xff]  }
  0xf6   : > { %10456 = vmatprep.subr.bf16.mxu0 %v13690_v22  ;;  %v13774_v21 = vld [vmem:[%s15775_s16 + $0x19a4] ss:$8 sps:$4 sm:$0xff]   ;;  %v13769_v22 = vld [vmem:[%s15775_s16 + $0x3a0] ss:$8 sps:$4 sm:$0xff]  }
  0xf8   : > { %9555 = vmatpush1.bf16.msra.mxu1 %v13685_v23  ;;  %v13772_v23 = vld [vmem:[%s15775_s16 + $0x19a0] ss:$8 sps:$4 sm:$0xff]  }
  0xf9   : > { %10457 = vmatpush1.bf16.msra.mxu0 %v13688_v25  ;;  %9556 = vmatprep.subr.bf16.mxu1 %v13693_v53  ;;  %v13777_v25 = vld [vmem:[%s15775_s16 + $0x3b4] ss:$8 sps:$4 sm:$0xff]  }
  0xfa   : > { %10458 = vmatprep.subr.bf16.mxu0 %v13696_v26  ;;  %v13780_v53 = vld [vmem:[%s15775_s16 + $0x19b4] ss:$8 sps:$4 sm:$0xff]   ;;  %v13775_v26 = vld [vmem:[%s15775_s16 + $0x3b0] ss:$8 sps:$4 sm:$0xff]  }
  0xfc   : > { %9557 = vmatpush1.bf16.msra.mxu1 %v13691_v27  ;;  %v13778_v27 = vld [vmem:[%s15775_s16 + $0x19b0] ss:$8 sps:$4 sm:$0xff]  }
  0xfd   : > { %10459 = vmatpush1.bf16.msra.mxu0 %v13694_v28  ;;  %9558 = vmatprep.subr.bf16.mxu1 %v13699_v29  ;;  %v13783_v28 = vld [vmem:[%s15775_s16 + $0x3c4] ss:$8 sps:$4 sm:$0xff]  }
  0xfe   : > { %10460 = vmatprep.subr.bf16.mxu0 %v13702_v30  ;;  %v13786_v29 = vld [vmem:[%s15775_s16 + $0x19c4] ss:$8 sps:$4 sm:$0xff]   ;;  %v13781_v30 = vld [vmem:[%s15775_s16 + $0x3c0] ss:$8 sps:$4 sm:$0xff]  }
 0x100   : > { %9559 = vmatpush1.bf16.msra.mxu1 %v13697_v31  ;;  %v13784_v31 = vld [vmem:[%s15775_s16 + $0x19c0] ss:$8 sps:$4 sm:$0xff]  }
 0x101   : > { %10461 = vmatpush1.bf16.msra.mxu0 %v13700_v32  ;;  %9560 = vmatprep.subr.bf16.mxu1 %v13705_v33  ;;  %v13789_v32 = vld [vmem:[%s15775_s16 + $0x3d4] ss:$8 sps:$4 sm:$0xff]  }
 0x102   : > { %10462 = vmatprep.subr.bf16.mxu0 %v13708_v34  ;;  %v13792_v33 = vld [vmem:[%s15775_s16 + $0x19d4] ss:$8 sps:$4 sm:$0xff]   ;;  %v13787_v34 = vld [vmem:[%s15775_s16 + $0x3d0] ss:$8 sps:$4 sm:$0xff]  }
 0x104   : > { %9561 = vmatpush1.bf16.msra.mxu1 %v13703_v18  ;;  %v13790_v18 = vld [vmem:[%s15775_s16 + $0x19d0] ss:$8 sps:$4 sm:$0xff]  }
 0x105   : > { %10463 = vmatpush1.bf16.msra.mxu0 %v13706_v37  ;;  %9571 = vmatprep.subr.bf16.mxu1 %v13711_v38  ;;  %v13795_v37 = vld [vmem:[%s15775_s16 + $0x3e4] ss:$8 sps:$4 sm:$0xff]  }
 0x106   : > { %10473 = vmatprep.subr.bf16.mxu0 %v13714_v39  ;;  %v13798_v38 = vld [vmem:[%s15775_s16 + $0x19e4] ss:$8 sps:$4 sm:$0xff]   ;;  %v13793_v39 = vld [vmem:[%s15775_s16 + $0x3e0] ss:$8 sps:$4 sm:$0xff]  }
 0x107   : > { %9563 = vmatmul.mubr.bf16.vlgmr.msra.gmra.mrb[0].mxu1 %v16026_v41 }
 0x108   : > { %10465 = vmatmul.mubr.bf16.vlgmr.msra.gmra.mrb[0].mxu0 %v16030_v43  ;;  %9572 = vmatpush1.bf16.msra.mxu1 %v13709_v40  ;;  %v2075_v40 = vcombine.high %v15950_v36, %v15950_v36  ;;  %v13807_v36 = vld [vmem:[%s15775_s16 + $0x404] ss:$8 sps:$4 sm:$0xff]  }
 0x109   : > { %10474 = vmatpush1.bf16.msra.mxu0 %v13712_v45  ;;  %9573 = vmatprep.subr.bf16.mxu1 %v13717_v46  ;;  %v13796_v45 = vld [vmem:[%s15775_s16 + $0x19e0] ss:$8 sps:$4 sm:$0xff]  }
 0x10a   : > { %10475 = vmatprep.subr.bf16.mxu0 %v13720_v47  ;;  %9603 = vmatprep.mubr.bf16.mxu1 %v1829_v48  ;;  %v16098_v46 = vld.sshfl [vmem:[%s15770_s12 + $0x8] sm:$0xff pattern:$0x75316420]  ;;  %v13801_v47 = vld [vmem:[%s15775_s16 + $0x3f4] ss:$8 sps:$4 sm:$0xff]  }
 0x10b   : > { %10505 = vmatprep.mubr.bf16.mxu0 %v2122_v24  ;;  %v13804_v48 = vld [vmem:[%s15775_s16 + $0x19f4] ss:$8 sps:$4 sm:$0xff]   ;;  %v16103_v24 = vrot.slane %v2075_v40, %v15826_v50  ;;  %v13879_v40 = vld [vmem:[%s15775_s16 + $0x4c4] ss:$8 sps:$4 sm:$0xff]  }
 0x10c   : > { %9574 = vmatpush1.bf16.msra.mxu1 %v13715_v19  ;;  %v13799_v19 = vld [vmem:[%s15775_s16 + $0x3f0] ss:$8 sps:$4 sm:$0xff]  }
 0x10d   : > { %10476 = vmatpush1.bf16.msra.mxu0 %v13718_v49  ;;  %9575 = vmatprep.subr.bf16.mxu1 %v13723_v51  ;;  %v13802_v49 = vld [vmem:[%s15775_s16 + $0x19f0] ss:$8 sps:$4 sm:$0xff]   ;;  %v13810_v51 = vld [vmem:[%s15775_s16 + $0x1a04] ss:$8 sps:$4 sm:$0xff]  }
 0x10e   : > { %10477 = vmatprep.subr.bf16.mxu0 %v13726_v35  ;;  %v1845_v35 = vcombine.high %v16098_v46, %v16098_v46 }
 0x110   : > { %9576 = vmatpush1.bf16.msra.mxu1 %v13721_v42  ;;  %v2091_v42 = vcombine.high %v16103_v24, %v16103_v24 }
 0x111   : > { %10478 = vmatpush1.bf16.msra.mxu0 %v13724_v52  ;;  %9577 = vmatprep.subr.bf16.mxu1 %v13729_v54  ;;  %v13805_v52 = vld [vmem:[%s15775_s16 + $0x400] ss:$8 sps:$4 sm:$0xff]  }
 0x112   : > { %10479 = vmatprep.subr.bf16.mxu0 %v13732_v55  ;;  %v13808_v54 = vld [vmem:[%s15775_s16 + $0x1a00] ss:$8 sps:$4 sm:$0xff]   ;;  %v1827_v55 = vcombine.high %v16026_v41, %v16026_v41  ;;  %v13811_v41 = vld [vmem:[%s15775_s16 + $0x410] ss:$8 sps:$4 sm:$0xff]  }
 0x114   : > { %9578 = vmatpush1.bf16.msra.mxu1 %v13727_v56  ;;  %v2120_v56 = vcombine.high %v16030_v43, %v16030_v43  ;;  %v13814_v43 = vld [vmem:[%s15775_s16 + $0x1a10] ss:$8 sps:$4 sm:$0xff]  }
 0x115   : > { %10480 = vmatpush1.bf16.msra.mxu0 %v13730_v57  ;;  %9579 = vmatprep.subr.bf16.mxu1 %v13735_v58  ;;  %v13813_v57 = vld [vmem:[%s15775_s16 + $0x414] ss:$8 sps:$4 sm:$0xff]  }
 0x116   : > { %10481 = vmatprep.subr.bf16.mxu0 %v13738_v59  ;;  %v13816_v58 = vld [vmem:[%s15775_s16 + $0x1a14] ss:$8 sps:$4 sm:$0xff]   ;;  %v16122_v59 = vrot.slane %v1845_v35, %v15826_v50  ;;  %v13891_v35 = vld [vmem:[%s15775_s16 + $0x4e4] ss:$8 sps:$4 sm:$0xff]  }
 0x118   : > { %9580 = vmatpush1.bf16.msra.mxu1 %v13733_v60  ;;  %v16125_v60 = vrot.slane %v2091_v42, %v15826_v50  ;;  %v13894_v42 = vld [vmem:[%s15775_s16 + $0x1ae4] ss:$8 sps:$4 sm:$0xff]  }
 0x119   : > { %10482 = vmatpush1.bf16.msra.mxu0 %v13736_v61  ;;  %9581 = vmatprep.subr.bf16.mxu1 %v13741_v62  ;;  %v13819_v61 = vld [vmem:[%s15775_s16 + $0x424] ss:$8 sps:$4 sm:$0xff]  }
 0x11a   : > { %10483 = vmatprep.subr.bf16.mxu0 %v13744_v63  ;;  %v13822_v62 = vld [vmem:[%s15775_s16 + $0x1a24] ss:$8 sps:$4 sm:$0xff]   ;;  %v13817_v63 = vld [vmem:[%s15775_s16 + $0x420] ss:$8 sps:$4 sm:$0xff]  }
 0x11c   : > { %9582 = vmatpush1.bf16.msra.mxu1 %v13739_v0  ;;  %v13820_v0 = vld [vmem:[%s15775_s16 + $0x1a20] ss:$8 sps:$4 sm:$0xff]  }
 0x11d   : > { %10484 = vmatpush1.bf16.msra.mxu0 %v13742_v1  ;;  %9583 = vmatprep.subr.bf16.mxu1 %v13747_v2  ;;  %v13825_v1 = vld [vmem:[%s15775_s16 + $0x434] ss:$8 sps:$4 sm:$0xff]  }
 0x11e   : > { %10485 = vmatprep.subr.bf16.mxu0 %v13750_v3  ;;  %v13828_v2 = vld [vmem:[%s15775_s16 + $0x1a34] ss:$8 sps:$4 sm:$0xff]   ;;  %v13823_v3 = vld [vmem:[%s15775_s16 + $0x430] ss:$8 sps:$4 sm:$0xff]  }
 0x120   : > { %9584 = vmatpush1.bf16.msra.mxu1 %v13745_v4  ;;  %v13826_v4 = vld [vmem:[%s15775_s16 + $0x1a30] ss:$8 sps:$4 sm:$0xff]  }
 0x121   : > { %10486 = vmatpush1.bf16.msra.mxu0 %v13748_v5  ;;  %9585 = vmatprep.subr.bf16.mxu1 %v13753_v6  ;;  %v13831_v5 = vld [vmem:[%s15775_s16 + $0x444] ss:$8 sps:$4 sm:$0xff]  }
 0x122   : > { %10487 = vmatprep.subr.bf16.mxu0 %v13756_v7  ;;  %v13834_v6 = vld [vmem:[%s15775_s16 + $0x1a44] ss:$8 sps:$4 sm:$0xff]   ;;  %v13829_v7 = vld [vmem:[%s15775_s16 + $0x440] ss:$8 sps:$4 sm:$0xff]  }
 0x124   : > { %9586 = vmatpush1.bf16.msra.mxu1 %v13751_v8  ;;  %v13832_v8 = vld [vmem:[%s15775_s16 + $0x1a40] ss:$8 sps:$4 sm:$0xff]  }
 0x125   : > { %10488 = vmatpush1.bf16.msra.mxu0 %v13754_v9  ;;  %9587 = vmatprep.subr.bf16.mxu1 %v13759_v10  ;;  %v13837_v9 = vld [vmem:[%s15775_s16 + $0x454] ss:$8 sps:$4 sm:$0xff]  }
 0x126   : > { %10489 = vmatprep.subr.bf16.mxu0 %v13762_v11  ;;  %v13840_v10 = vld [vmem:[%s15775_s16 + $0x1a54] ss:$8 sps:$4 sm:$0xff]   ;;  %v13835_v11 = vld [vmem:[%s15775_s16 + $0x450] ss:$8 sps:$4 sm:$0xff]  }
 0x128   : > { %9588 = vmatpush1.bf16.msra.mxu1 %v13757_v12  ;;  %v13838_v12 = vld [vmem:[%s15775_s16 + $0x1a50] ss:$8 sps:$4 sm:$0xff]  }
 0x129   : > { %10490 = vmatpush1.bf16.msra.mxu0 %v13760_v13  ;;  %9589 = vmatprep.subr.bf16.mxu1 %v13765_v14  ;;  %v13843_v13 = vld [vmem:[%s15775_s16 + $0x464] ss:$8 sps:$4 sm:$0xff]  }
 0x12a   : > { %10491 = vmatprep.subr.bf16.mxu0 %v13768_v15  ;;  %v13846_v14 = vld [vmem:[%s15775_s16 + $0x1a64] ss:$8 sps:$4 sm:$0xff]   ;;  %v13841_v15 = vld [vmem:[%s15775_s16 + $0x460] ss:$8 sps:$4 sm:$0xff]  }
 0x12c   : > { %9590 = vmatpush1.bf16.msra.mxu1 %v13763_v16  ;;  %v13844_v16 = vld [vmem:[%s15775_s16 + $0x1a60] ss:$8 sps:$4 sm:$0xff]  }
 0x12d   : > { %10492 = vmatpush1.bf16.msra.mxu0 %v13766_v17  ;;  %9591 = vmatprep.subr.bf16.mxu1 %v13771_v20  ;;  %v13849_v17 = vld [vmem:[%s15775_s16 + $0x474] ss:$8 sps:$4 sm:$0xff]  }
 0x12e   : > { %10493 = vmatprep.subr.bf16.mxu0 %v13774_v21  ;;  %v13852_v20 = vld [vmem:[%s15775_s16 + $0x1a74] ss:$8 sps:$4 sm:$0xff]   ;;  %v13847_v21 = vld [vmem:[%s15775_s16 + $0x470] ss:$8 sps:$4 sm:$0xff]  }
 0x130   : > { %9592 = vmatpush1.bf16.msra.mxu1 %v13769_v22  ;;  %v13850_v22 = vld [vmem:[%s15775_s16 + $0x1a70] ss:$8 sps:$4 sm:$0xff]  }
 0x131   : > { %10494 = vmatpush1.bf16.msra.mxu0 %v13772_v23  ;;  %9593 = vmatprep.subr.bf16.mxu1 %v13777_v25  ;;  %v13855_v23 = vld [vmem:[%s15775_s16 + $0x484] ss:$8 sps:$4 sm:$0xff]  }
 0x132   : > { %10495 = vmatprep.subr.bf16.mxu0 %v13780_v53  ;;  %v13858_v25 = vld [vmem:[%s15775_s16 + $0x1a84] ss:$8 sps:$4 sm:$0xff]   ;;  %v13853_v53 = vld [vmem:[%s15775_s16 + $0x480] ss:$8 sps:$4 sm:$0xff]  }
 0x134   : > { %9594 = vmatpush1.bf16.msra.mxu1 %v13775_v26  ;;  %v13856_v26 = vld [vmem:[%s15775_s16 + $0x1a80] ss:$8 sps:$4 sm:$0xff]  }
 0x135   : > { %10496 = vmatpush1.bf16.msra.mxu0 %v13778_v27  ;;  %9595 = vmatprep.subr.bf16.mxu1 %v13783_v28  ;;  %v13861_v27 = vld [vmem:[%s15775_s16 + $0x494] ss:$8 sps:$4 sm:$0xff]  }
 0x136   : > { %10497 = vmatprep.subr.bf16.mxu0 %v13786_v29  ;;  %v13864_v28 = vld [vmem:[%s15775_s16 + $0x1a94] ss:$8 sps:$4 sm:$0xff]   ;;  %v13859_v29 = vld [vmem:[%s15775_s16 + $0x490] ss:$8 sps:$4 sm:$0xff]  }
 0x138   : > { %9596 = vmatpush1.bf16.msra.mxu1 %v13781_v30  ;;  %v13862_v30 = vld [vmem:[%s15775_s16 + $0x1a90] ss:$8 sps:$4 sm:$0xff]  }
 0x139   : > { %10498 = vmatpush1.bf16.msra.mxu0 %v13784_v31  ;;  %9597 = vmatprep.subr.bf16.mxu1 %v13789_v32  ;;  %v13867_v31 = vld [vmem:[%s15775_s16 + $0x4a4] ss:$8 sps:$4 sm:$0xff]  }
 0x13a   : > { %10499 = vmatprep.subr.bf16.mxu0 %v13792_v33  ;;  %v13870_v32 = vld [vmem:[%s15775_s16 + $0x1aa4] ss:$8 sps:$4 sm:$0xff]   ;;  %v13865_v33 = vld [vmem:[%s15775_s16 + $0x4a0] ss:$8 sps:$4 sm:$0xff]  }
 0x13c   : > { %9598 = vmatpush1.bf16.msra.mxu1 %v13787_v34  ;;  %v13868_v34 = vld [vmem:[%s15775_s16 + $0x1aa0] ss:$8 sps:$4 sm:$0xff]  }
 0x13d   : > { %10500 = vmatpush1.bf16.msra.mxu0 %v13790_v18  ;;  %9599 = vmatprep.subr.bf16.mxu1 %v13795_v37  ;;  %v13873_v18 = vld [vmem:[%s15775_s16 + $0x4b4] ss:$8 sps:$4 sm:$0xff]  }
 0x13e   : > { %10501 = vmatprep.subr.bf16.mxu0 %v13798_v38  ;;  %v13876_v37 = vld [vmem:[%s15775_s16 + $0x1ab4] ss:$8 sps:$4 sm:$0xff]   ;;  %v13871_v38 = vld [vmem:[%s15775_s16 + $0x4b0] ss:$8 sps:$4 sm:$0xff]  }
 0x140   : > { %9600 = vmatpush1.bf16.msra.mxu1 %v13793_v39  ;;  %v13874_v39 = vld [vmem:[%s15775_s16 + $0x1ab0] ss:$8 sps:$4 sm:$0xff]  }
 0x141   : > { %10502 = vmatpush1.bf16.msra.mxu0 %v13796_v45  ;;  %9601 = vmatprep.subr.bf16.mxu1 %v13801_v47  ;;  %v13882_v45 = vld [vmem:[%s15775_s16 + $0x1ac4] ss:$8 sps:$4 sm:$0xff]   ;;  %v13877_v47 = vld [vmem:[%s15775_s16 + $0x4c0] ss:$8 sps:$4 sm:$0xff]  }
 0x142   : > { %10503 = vmatprep.subr.bf16.mxu0 %v13804_v48  ;;  %v13880_v48 = vld [vmem:[%s15775_s16 + $0x1ac0] ss:$8 sps:$4 sm:$0xff]  }
 0x144   : > { %9602 = vmatpush1.bf16.msra.mxu1 %v13799_v19  ;;  %v13885_v19 = vld [vmem:[%s15775_s16 + $0x4d4] ss:$8 sps:$4 sm:$0xff]  }
 0x145   : > { %10504 = vmatpush1.bf16.msra.mxu0 %v13802_v49  ;;  %9612 = vmatprep.subr.bf16.mxu1 %v13807_v36  ;;  %v13888_v49 = vld [vmem:[%s15775_s16 + $0x1ad4] ss:$8 sps:$4 sm:$0xff]   ;;  %v13883_v36 = vld [vmem:[%s15775_s16 + $0x4d0] ss:$8 sps:$4 sm:$0xff]  }
 0x146   : > { %10514 = vmatprep.subr.bf16.mxu0 %v13810_v51  ;;  %v13886_v51 = vld [vmem:[%s15775_s16 + $0x1ad0] ss:$8 sps:$4 sm:$0xff]  }
 0x147   : > { %9604 = vmatmul.mubr.bf16.vlgmr.msra.gmra.mrb[0].mxu1 %v1827_v55  ;;  %v13897_v55 = vld [vmem:[%s15775_s16 + $0x4f4] ss:$8 sps:$4 sm:$0xff]  }
 0x148   : > { %10506 = vmatmul.mubr.bf16.vlgmr.msra.gmra.mrb[0].mxu0 %v2120_v56  ;;  %9613 = vmatpush1.bf16.msra.mxu1 %v13805_v52  ;;  %v13889_v52 = vld [vmem:[%s15775_s16 + $0x4e0] ss:$8 sps:$4 sm:$0xff]   ;;  %v13900_v56 = vld [vmem:[%s15775_s16 + $0x1af4] ss:$8 sps:$4 sm:$0xff]  }
 0x149   : > { %10515 = vmatpush1.bf16.msra.mxu0 %v13808_v54  ;;  %9614 = vmatprep.subr.bf16.mxu1 %v13813_v57  ;;  %v13892_v54 = vld [vmem:[%s15775_s16 + $0x1ae0] ss:$8 sps:$4 sm:$0xff]   ;;  %v13895_v57 = vld [vmem:[%s15775_s16 + $0x4f0] ss:$8 sps:$4 sm:$0xff]  }
 0x14a   : > { %10516 = vmatprep.subr.bf16.mxu0 %v13816_v58  ;;  %9644 = vmatprep.mubr.bf16.mxu1 %v16122_v59  ;;  %v13898_v58 = vld [vmem:[%s15775_s16 + $0x1af0] ss:$8 sps:$4 sm:$0xff]  }
 0x14b   : > { %10546 = vmatprep.mubr.bf16.mxu0 %v16125_v60 }
 0x14c   : > { %9615 = vmatpush1.bf16.msra.mxu1 %v13811_v41  ;;  %v13903_v41 = vld [vmem:[%s15775_s16 + $0x504] ss:$8 sps:$4 sm:$0xff]  }
 0x14d   : > { %10517 = vmatpush1.bf16.msra.mxu0 %v13814_v43  ;;  %9616 = vmatprep.subr.bf16.mxu1 %v13819_v61  ;;  %v13907_v43 = vld [vmem:[%s15775_s16 + $0x1b04] ss:$8 sps:$4 sm:$0xff]   ;;  %v16191_v61 = vrot.slane %v16098_v46, %v15826_v50  ;;  %v1877_v46 = vcombine.high %v16122_v59, %v16122_v59 }
 0x14e   : > { %10518 = vmatprep.subr.bf16.mxu0 %v13822_v62  ;;  %v16195_v62 = vrot.slane %v16103_v24, %v15826_v50  ;;  %v13908_v24 = vld [vmem:[%s15775_s16 + $0x510] ss:$8 sps:$4 sm:$0xff]   ;;  %v13916_v59 = vld [vmem:[%s15775_s16 + $0x524] ss:$8 sps:$4 sm:$0xff]  }
 0x150   : > { %9617 = vmatpush1.bf16.msra.mxu1 %v13817_v63  ;;  %v13901_v63 = vld [vmem:[%s15775_s16 + $0x500] ss:$8 sps:$4 sm:$0xff]  }
 0x151   : > { %10519 = vmatpush1.bf16.msra.mxu0 %v13820_v0  ;;  %9618 = vmatprep.subr.bf16.mxu1 %v13825_v1  ;;  %v13905_v0 = vld [vmem:[%s15775_s16 + $0x1b00] ss:$8 sps:$4 sm:$0xff]   ;;  %v13910_v1 = vld [vmem:[%s15775_s16 + $0x514] ss:$8 sps:$4 sm:$0xff]  }
 0x152   : > { %10520 = vmatprep.subr.bf16.mxu0 %v13828_v2  ;;  %v13913_v2 = vld [vmem:[%s15775_s16 + $0x1b14] ss:$8 sps:$4 sm:$0xff]  }
 0x154   : > { %9619 = vmatpush1.bf16.msra.mxu1 %v13823_v3  ;;  %v2123_v3 = vcombine.high %v16125_v60, %v16125_v60  ;;  %v13914_v60 = vld [vmem:[%s15775_s16 + $0x520] ss:$8 sps:$4 sm:$0xff]  }
 0x155   : > { %10521 = vmatpush1.bf16.msra.mxu0 %v13826_v4  ;;  %9620 = vmatprep.subr.bf16.mxu1 %v13831_v5  ;;  %v13911_v4 = vld [vmem:[%s15775_s16 + $0x1b10] ss:$8 sps:$4 sm:$0xff]   ;;  %v13919_v5 = vld [vmem:[%s15775_s16 + $0x1b24] ss:$8 sps:$4 sm:$0xff]  }
 0x156   : > { %10522 = vmatprep.subr.bf16.mxu0 %v13834_v6  ;;  %v13917_v6 = vld [vmem:[%s15775_s16 + $0x1b20] ss:$8 sps:$4 sm:$0xff]  }
 0x158   : > { %9621 = vmatpush1.bf16.msra.mxu1 %v13829_v7  ;;  %v13922_v7 = vld [vmem:[%s15775_s16 + $0x534] ss:$8 sps:$4 sm:$0xff]  }
 0x159   : > { %10523 = vmatpush1.bf16.msra.mxu0 %v13832_v8  ;;  %9622 = vmatprep.subr.bf16.mxu1 %v13837_v9  ;;  %v13925_v8 = vld [vmem:[%s15775_s16 + $0x1b34] ss:$8 sps:$4 sm:$0xff]   ;;  %v13920_v9 = vld [vmem:[%s15775_s16 + $0x530] ss:$8 sps:$4 sm:$0xff]  }
 0x15a   : > { %10524 = vmatprep.subr.bf16.mxu0 %v13840_v10  ;;  %v13923_v10 = vld [vmem:[%s15775_s16 + $0x1b30] ss:$8 sps:$4 sm:$0xff]  }
 0x15c   : > { %9623 = vmatpush1.bf16.msra.mxu1 %v13835_v11  ;;  %v13928_v11 = vld [vmem:[%s15775_s16 + $0x544] ss:$8 sps:$4 sm:$0xff]  }
 0x15d   : > { %10525 = vmatpush1.bf16.msra.mxu0 %v13838_v12  ;;  %9624 = vmatprep.subr.bf16.mxu1 %v13843_v13  ;;  %v13931_v12 = vld [vmem:[%s15775_s16 + $0x1b44] ss:$8 sps:$4 sm:$0xff]   ;;  %v13926_v13 = vld [vmem:[%s15775_s16 + $0x540] ss:$8 sps:$4 sm:$0xff]  }
 0x15e   : > { %10526 = vmatprep.subr.bf16.mxu0 %v13846_v14  ;;  %v13929_v14 = vld [vmem:[%s15775_s16 + $0x1b40] ss:$8 sps:$4 sm:$0xff]  }
 0x160   : > { %9625 = vmatpush1.bf16.msra.mxu1 %v13841_v15  ;;  %v13934_v15 = vld [vmem:[%s15775_s16 + $0x554] ss:$8 sps:$4 sm:$0xff]  }
 0x161   : > { %10527 = vmatpush1.bf16.msra.mxu0 %v13844_v16  ;;  %9626 = vmatprep.subr.bf16.mxu1 %v13849_v17  ;;  %v13937_v16 = vld [vmem:[%s15775_s16 + $0x1b54] ss:$8 sps:$4 sm:$0xff]   ;;  %v13932_v17 = vld [vmem:[%s15775_s16 + $0x550] ss:$8 sps:$4 sm:$0xff]  }
 0x162   : > { %10528 = vmatprep.subr.bf16.mxu0 %v13852_v20  ;;  %v13935_v20 = vld [vmem:[%s15775_s16 + $0x1b50] ss:$8 sps:$4 sm:$0xff]  }
 0x164   : > { %9627 = vmatpush1.bf16.msra.mxu1 %v13847_v21  ;;  %v13940_v21 = vld [vmem:[%s15775_s16 + $0x564] ss:$8 sps:$4 sm:$0xff]  }
 0x165   : > { %10529 = vmatpush1.bf16.msra.mxu0 %v13850_v22  ;;  %9628 = vmatprep.subr.bf16.mxu1 %v13855_v23  ;;  %v13943_v22 = vld [vmem:[%s15775_s16 + $0x1b64] ss:$8 sps:$4 sm:$0xff]   ;;  %v13938_v23 = vld [vmem:[%s15775_s16 + $0x560] ss:$8 sps:$4 sm:$0xff]  }
 0x166   : > { %10530 = vmatprep.subr.bf16.mxu0 %v13858_v25  ;;  %v13941_v25 = vld [vmem:[%s15775_s16 + $0x1b60] ss:$8 sps:$4 sm:$0xff]  }
 0x168   : > { %9629 = vmatpush1.bf16.msra.mxu1 %v13853_v53  ;;  %v13946_v53 = vld [vmem:[%s15775_s16 + $0x574] ss:$8 sps:$4 sm:$0xff]  }
 0x169   : > { %10531 = vmatpush1.bf16.msra.mxu0 %v13856_v26  ;;  %9630 = vmatprep.subr.bf16.mxu1 %v13861_v27  ;;  %v13949_v26 = vld [vmem:[%s15775_s16 + $0x1b74] ss:$8 sps:$4 sm:$0xff]   ;;  %v13944_v27 = vld [vmem:[%s15775_s16 + $0x570] ss:$8 sps:$4 sm:$0xff]  }
 0x16a   : > { %10532 = vmatprep.subr.bf16.mxu0 %v13864_v28  ;;  %v13947_v28 = vld [vmem:[%s15775_s16 + $0x1b70] ss:$8 sps:$4 sm:$0xff]  }
 0x16c   : > { %9631 = vmatpush1.bf16.msra.mxu1 %v13859_v29  ;;  %v13952_v29 = vld [vmem:[%s15775_s16 + $0x584] ss:$8 sps:$4 sm:$0xff]  }
 0x16d   : > { %10533 = vmatpush1.bf16.msra.mxu0 %v13862_v30  ;;  %9632 = vmatprep.subr.bf16.mxu1 %v13867_v31  ;;  %v13955_v30 = vld [vmem:[%s15775_s16 + $0x1b84] ss:$8 sps:$4 sm:$0xff]   ;;  %v13950_v31 = vld [vmem:[%s15775_s16 + $0x580] ss:$8 sps:$4 sm:$0xff]  }
 0x16e   : > { %10534 = vmatprep.subr.bf16.mxu0 %v13870_v32  ;;  %v13953_v32 = vld [vmem:[%s15775_s16 + $0x1b80] ss:$8 sps:$4 sm:$0xff]  }
 0x170   : > { %9633 = vmatpush1.bf16.msra.mxu1 %v13865_v33  ;;  %v13958_v33 = vld [vmem:[%s15775_s16 + $0x594] ss:$8 sps:$4 sm:$0xff]  }
 0x171   : > { %10535 = vmatpush1.bf16.msra.mxu0 %v13868_v34  ;;  %9634 = vmatprep.subr.bf16.mxu1 %v13873_v18  ;;  %v13961_v34 = vld [vmem:[%s15775_s16 + $0x1b94] ss:$8 sps:$4 sm:$0xff]   ;;  %v13956_v18 = vld [vmem:[%s15775_s16 + $0x590] ss:$8 sps:$4 sm:$0xff]  }
 0x172   : > { %10536 = vmatprep.subr.bf16.mxu0 %v13876_v37  ;;  %v13959_v37 = vld [vmem:[%s15775_s16 + $0x1b90] ss:$8 sps:$4 sm:$0xff]  }
 0x174   : > { %9635 = vmatpush1.bf16.msra.mxu1 %v13871_v38  ;;  %v13964_v38 = vld [vmem:[%s15775_s16 + $0x5a4] ss:$8 sps:$4 sm:$0xff]  }
 0x175   : > { %10537 = vmatpush1.bf16.msra.mxu0 %v13874_v39  ;;  %9636 = vmatprep.subr.bf16.mxu1 %v13879_v40  ;;  %v13967_v39 = vld [vmem:[%s15775_s16 + $0x1ba4] ss:$8 sps:$4 sm:$0xff]   ;;  %v13962_v40 = vld [vmem:[%s15775_s16 + $0x5a0] ss:$8 sps:$4 sm:$0xff]  }
 0x176   : > { %10538 = vmatprep.subr.bf16.mxu0 %v13882_v45  ;;  %v13965_v45 = vld [vmem:[%s15775_s16 + $0x1ba0] ss:$8 sps:$4 sm:$0xff]  }
 0x178   : > { %9637 = vmatpush1.bf16.msra.mxu1 %v13877_v47  ;;  %v13970_v47 = vld [vmem:[%s15775_s16 + $0x5b4] ss:$8 sps:$4 sm:$0xff]  }
 0x179   : > { %10539 = vmatpush1.bf16.msra.mxu0 %v13880_v48  ;;  %9638 = vmatprep.subr.bf16.mxu1 %v13885_v19  ;;  %v13973_v48 = vld [vmem:[%s15775_s16 + $0x1bb4] ss:$8 sps:$4 sm:$0xff]   ;;  %v13968_v19 = vld [vmem:[%s15775_s16 + $0x5b0] ss:$8 sps:$4 sm:$0xff]  }
 0x17a   : > { %10540 = vmatprep.subr.bf16.mxu0 %v13888_v49  ;;  %v13971_v49 = vld [vmem:[%s15775_s16 + $0x1bb0] ss:$8 sps:$4 sm:$0xff]  }
 0x17c   : > { %9639 = vmatpush1.bf16.msra.mxu1 %v13883_v36  ;;  %v13976_v36 = vld [vmem:[%s15775_s16 + $0x5c4] ss:$8 sps:$4 sm:$0xff]  }
 0x17d   : > { %10541 = vmatpush1.bf16.msra.mxu0 %v13886_v51  ;;  %9640 = vmatprep.subr.bf16.mxu1 %v13891_v35  ;;  %v13979_v51 = vld [vmem:[%s15775_s16 + $0x1bc4] ss:$8 sps:$4 sm:$0xff]   ;;  %v13974_v35 = vld [vmem:[%s15775_s16 + $0x5c0] ss:$8 sps:$4 sm:$0xff]  }
 0x17e   : > { %10542 = vmatprep.subr.bf16.mxu0 %v13894_v42  ;;  %v13977_v42 = vld [vmem:[%s15775_s16 + $0x1bc0] ss:$8 sps:$4 sm:$0xff]  }
 0x180   : > { %9641 = vmatpush1.bf16.msra.mxu1 %v13889_v52  ;;  %v13982_v52 = vld [vmem:[%s15775_s16 + $0x5d4] ss:$8 sps:$4 sm:$0xff]  }
 0x181   : > { %10543 = vmatpush1.bf16.msra.mxu0 %v13892_v54  ;;  %9642 = vmatprep.subr.bf16.mxu1 %v13897_v55  ;;  %v13985_v54 = vld [vmem:[%s15775_s16 + $0x1bd4] ss:$8 sps:$4 sm:$0xff]   ;;  %v13980_v55 = vld [vmem:[%s15775_s16 + $0x5d0] ss:$8 sps:$4 sm:$0xff]  }
 0x182   : > { %10544 = vmatprep.subr.bf16.mxu0 %v13900_v56  ;;  %v13983_v56 = vld [vmem:[%s15775_s16 + $0x1bd0] ss:$8 sps:$4 sm:$0xff]  }
 0x184   : > { %9643 = vmatpush1.bf16.msra.mxu1 %v13895_v57  ;;  %v13988_v57 = vld [vmem:[%s15775_s16 + $0x5e4] ss:$8 sps:$4 sm:$0xff]  }
 0x185   : > { %10545 = vmatpush1.bf16.msra.mxu0 %v13898_v58  ;;  %9653 = vmatprep.subr.bf16.mxu1 %v13903_v41  ;;  %v13991_v58 = vld [vmem:[%s15775_s16 + $0x1be4] ss:$8 sps:$4 sm:$0xff]   ;;  %v16260_v41 = vld.sshfl [vmem:[%s15770_s12 + $0x38] sm:$0xff pattern:$0x75316420] }
 0x186   : > { %10555 = vmatprep.subr.bf16.mxu0 %v13907_v43  ;;  %v15542_v43 = vld [vmem:[%s15770_s12 + $0x8] sm:$0xff] }
 0x187   : > { %9645 = vmatmul.mubr.bf16.vlgmr.msra.gmra.mrb[0].mxu1 %v16191_v61 }
 0x188   : > { %10547 = vmatmul.mubr.bf16.vlgmr.msra.gmra.mrb[0].mxu0 %v16195_v62  ;;  %9654 = vmatpush1.bf16.msra.mxu1 %v13901_v63  ;;  %v1830_v63 = vcombine.high %v15542_v43, %v15542_v43  ;;  %v14064_v43 = vld [vmem:[%s15775_s16 + $0x6b0] ss:$8 sps:$4 sm:$0xff]  }
 0x189   : > { %10556 = vmatpush1.bf16.msra.mxu0 %v13905_v0  ;;  %9655 = vmatprep.subr.bf16.mxu1 %v13910_v1  ;;  %v13986_v0 = vld [vmem:[%s15775_s16 + $0x5e0] ss:$8 sps:$4 sm:$0xff]  }
 0x18a   : > { %10557 = vmatprep.subr.bf16.mxu0 %v13913_v2  ;;  %9685 = vmatprep.mubr.bf16.mxu1 %v1877_v46  ;;  %v13989_v1 = vld [vmem:[%s15775_s16 + $0x1be0] ss:$8 sps:$4 sm:$0xff]   ;;  %v13994_v2 = vld [vmem:[%s15775_s16 + $0x5f4] ss:$8 sps:$4 sm:$0xff]  }
 0x18b   : > { %10587 = vmatprep.mubr.bf16.mxu0 %v2123_v3  ;;  %v13997_v46 = vld [vmem:[%s15775_s16 + $0x1bf4] ss:$8 sps:$4 sm:$0xff]   ;;  %v16268_v3 = vrot.slane %v1830_v63, %v15826_v50  ;;  %v14067_v63 = vld [vmem:[%s15775_s16 + $0x1cb0] ss:$8 sps:$4 sm:$0xff]  }
 0x18c   : > { %9656 = vmatpush1.bf16.msra.mxu1 %v13908_v24  ;;  %v13992_v24 = vld [vmem:[%s15775_s16 + $0x5f0] ss:$8 sps:$4 sm:$0xff]  }
 0x18d   : > { %10558 = vmatpush1.bf16.msra.mxu0 %v13911_v4  ;;  %9657 = vmatprep.subr.bf16.mxu1 %v13916_v59  ;;  %v13995_v4 = vld [vmem:[%s15775_s16 + $0x1bf0] ss:$8 sps:$4 sm:$0xff]   ;;  %v14000_v59 = vld [vmem:[%s15775_s16 + $0x604] ss:$8 sps:$4 sm:$0xff]  }
 0x18e   : > { %10559 = vmatprep.subr.bf16.mxu0 %v13919_v5  ;;  %v14003_v5 = vld [vmem:[%s15775_s16 + $0x1c04] ss:$8 sps:$4 sm:$0xff]  }
 0x190   : > { %9658 = vmatpush1.bf16.msra.mxu1 %v13914_v60  ;;  %v1846_v60 = vcombine.high %v16268_v3, %v16268_v3 }
 0x191   : > { %10560 = vmatpush1.bf16.msra.mxu0 %v13917_v6  ;;  %9659 = vmatprep.subr.bf16.mxu1 %v13922_v7  ;;  %v2139_v6 = vcombine.high %v16260_v41, %v16260_v41  ;;  %v1875_v7 = vcombine.high %v16191_v61, %v16191_v61 }
 0x192   : > { %10561 = vmatprep.subr.bf16.mxu0 %v13925_v8  ;;  %v2121_v8 = vcombine.high %v16195_v62, %v16195_v62  ;;  %v14004_v62 = vld [vmem:[%s15775_s16 + $0x610] ss:$8 sps:$4 sm:$0xff]  }
 0x193   : > { %v16290_v61 = vrot.slane %v2139_v6, %v15826_v50  ;;  %v14087_v6 = vld [vmem:[%s15775_s16 + $0x1ce4] ss:$8 sps:$4 sm:$0xff]  }
 0x194   : > { %9660 = vmatpush1.bf16.msra.mxu1 %v13920_v9  ;;  %v13998_v9 = vld [vmem:[%s15775_s16 + $0x600] ss:$8 sps:$4 sm:$0xff]  }
 0x195   : > { %10562 = vmatpush1.bf16.msra.mxu0 %v13923_v10  ;;  %9661 = vmatprep.subr.bf16.mxu1 %v13928_v11  ;;  %v14001_v10 = vld [vmem:[%s15775_s16 + $0x1c00] ss:$8 sps:$4 sm:$0xff]   ;;  %v14006_v11 = vld [vmem:[%s15775_s16 + $0x614] ss:$8 sps:$4 sm:$0xff]  }
 0x196   : > { %10563 = vmatprep.subr.bf16.mxu0 %v13931_v12  ;;  %v14009_v12 = vld [vmem:[%s15775_s16 + $0x1c14] ss:$8 sps:$4 sm:$0xff]  }
 0x198   : > { %9662 = vmatpush1.bf16.msra.mxu1 %v13926_v13  ;;  %v16287_v13 = vrot.slane %v1846_v60, %v15826_v50  ;;  %v14084_v60 = vld [vmem:[%s15775_s16 + $0x6e4] ss:$8 sps:$4 sm:$0xff]  }
 0x199   : > { %10564 = vmatpush1.bf16.msra.mxu0 %v13929_v14  ;;  %9663 = vmatprep.subr.bf16.mxu1 %v13934_v15  ;;  %v14007_v14 = vld [vmem:[%s15775_s16 + $0x1c10] ss:$8 sps:$4 sm:$0xff]   ;;  %v14012_v15 = vld [vmem:[%s15775_s16 + $0x624] ss:$8 sps:$4 sm:$0xff]  }
 0x19a   : > { %10565 = vmatprep.subr.bf16.mxu0 %v13937_v16  ;;  %v14015_v16 = vld [vmem:[%s15775_s16 + $0x1c24] ss:$8 sps:$4 sm:$0xff]  }
 0x19c   : > { %9664 = vmatpush1.bf16.msra.mxu1 %v13932_v17  ;;  %v14010_v17 = vld [vmem:[%s15775_s16 + $0x620] ss:$8 sps:$4 sm:$0xff]  }
 0x19d   : > { %10566 = vmatpush1.bf16.msra.mxu0 %v13935_v20  ;;  %9665 = vmatprep.subr.bf16.mxu1 %v13940_v21  ;;  %v14013_v20 = vld [vmem:[%s15775_s16 + $0x1c20] ss:$8 sps:$4 sm:$0xff]   ;;  %v14018_v21 = vld [vmem:[%s15775_s16 + $0x634] ss:$8 sps:$4 sm:$0xff]  }
 0x19e   : > { %10567 = vmatprep.subr.bf16.mxu0 %v13943_v22  ;;  %v14021_v22 = vld [vmem:[%s15775_s16 + $0x1c34] ss:$8 sps:$4 sm:$0xff]  }
 0x1a0   : > { %9666 = vmatpush1.bf16.msra.mxu1 %v13938_v23  ;;  %v14016_v23 = vld [vmem:[%s15775_s16 + $0x630] ss:$8 sps:$4 sm:$0xff]  }
 0x1a1   : > { %10568 = vmatpush1.bf16.msra.mxu0 %v13941_v25  ;;  %9667 = vmatprep.subr.bf16.mxu1 %v13946_v53  ;;  %v14019_v25 = vld [vmem:[%s15775_s16 + $0x1c30] ss:$8 sps:$4 sm:$0xff]   ;;  %v14024_v53 = vld [vmem:[%s15775_s16 + $0x644] ss:$8 sps:$4 sm:$0xff]  }
 0x1a2   : > { %10569 = vmatprep.subr.bf16.mxu0 %v13949_v26  ;;  %v14027_v26 = vld [vmem:[%s15775_s16 + $0x1c44] ss:$8 sps:$4 sm:$0xff]  }
 0x1a4   : > { %9668 = vmatpush1.bf16.msra.mxu1 %v13944_v27  ;;  %v14022_v27 = vld [vmem:[%s15775_s16 + $0x640] ss:$8 sps:$4 sm:$0xff]  }
 0x1a5   : > { %10570 = vmatpush1.bf16.msra.mxu0 %v13947_v28  ;;  %9669 = vmatprep.subr.bf16.mxu1 %v13952_v29  ;;  %v14025_v28 = vld [vmem:[%s15775_s16 + $0x1c40] ss:$8 sps:$4 sm:$0xff]   ;;  %v14030_v29 = vld [vmem:[%s15775_s16 + $0x654] ss:$8 sps:$4 sm:$0xff]  }
 0x1a6   : > { %10571 = vmatprep.subr.bf16.mxu0 %v13955_v30  ;;  %v14033_v30 = vld [vmem:[%s15775_s16 + $0x1c54] ss:$8 sps:$4 sm:$0xff]  }
 0x1a8   : > { %9670 = vmatpush1.bf16.msra.mxu1 %v13950_v31  ;;  %v14028_v31 = vld [vmem:[%s15775_s16 + $0x650] ss:$8 sps:$4 sm:$0xff]  }
 0x1a9   : > { %10572 = vmatpush1.bf16.msra.mxu0 %v13953_v32  ;;  %9671 = vmatprep.subr.bf16.mxu1 %v13958_v33  ;;  %v14031_v32 = vld [vmem:[%s15775_s16 + $0x1c50] ss:$8 sps:$4 sm:$0xff]   ;;  %v14036_v33 = vld [vmem:[%s15775_s16 + $0x664] ss:$8 sps:$4 sm:$0xff]  }
 0x1aa   : > { %10573 = vmatprep.subr.bf16.mxu0 %v13961_v34  ;;  %v14039_v34 = vld [vmem:[%s15775_s16 + $0x1c64] ss:$8 sps:$4 sm:$0xff]  }
 0x1ac   : > { %9672 = vmatpush1.bf16.msra.mxu1 %v13956_v18  ;;  %v14034_v18 = vld [vmem:[%s15775_s16 + $0x660] ss:$8 sps:$4 sm:$0xff]  }
 0x1ad   : > { %10574 = vmatpush1.bf16.msra.mxu0 %v13959_v37  ;;  %9673 = vmatprep.subr.bf16.mxu1 %v13964_v38  ;;  %v14037_v37 = vld [vmem:[%s15775_s16 + $0x1c60] ss:$8 sps:$4 sm:$0xff]   ;;  %v14042_v38 = vld [vmem:[%s15775_s16 + $0x674] ss:$8 sps:$4 sm:$0xff]  }
 0x1ae   : > { %10575 = vmatprep.subr.bf16.mxu0 %v13967_v39  ;;  %v14045_v39 = vld [vmem:[%s15775_s16 + $0x1c74] ss:$8 sps:$4 sm:$0xff]  }
 0x1b0   : > { %9674 = vmatpush1.bf16.msra.mxu1 %v13962_v40  ;;  %v14040_v40 = vld [vmem:[%s15775_s16 + $0x670] ss:$8 sps:$4 sm:$0xff]  }
 0x1b1   : > { %10576 = vmatpush1.bf16.msra.mxu0 %v13965_v45  ;;  %9675 = vmatprep.subr.bf16.mxu1 %v13970_v47  ;;  %v14043_v45 = vld [vmem:[%s15775_s16 + $0x1c70] ss:$8 sps:$4 sm:$0xff]   ;;  %v14048_v47 = vld [vmem:[%s15775_s16 + $0x684] ss:$8 sps:$4 sm:$0xff]  }
 0x1b2   : > { %10577 = vmatprep.subr.bf16.mxu0 %v13973_v48  ;;  %v14051_v48 = vld [vmem:[%s15775_s16 + $0x1c84] ss:$8 sps:$4 sm:$0xff]  }
 0x1b4   : > { %9676 = vmatpush1.bf16.msra.mxu1 %v13968_v19  ;;  %v14046_v19 = vld [vmem:[%s15775_s16 + $0x680] ss:$8 sps:$4 sm:$0xff]  }
 0x1b5   : > { %10578 = vmatpush1.bf16.msra.mxu0 %v13971_v49  ;;  %9677 = vmatprep.subr.bf16.mxu1 %v13976_v36  ;;  %v14049_v49 = vld [vmem:[%s15775_s16 + $0x1c80] ss:$8 sps:$4 sm:$0xff]   ;;  %v14054_v36 = vld [vmem:[%s15775_s16 + $0x694] ss:$8 sps:$4 sm:$0xff]  }
 0x1b6   : > { %10579 = vmatprep.subr.bf16.mxu0 %v13979_v51  ;;  %v14057_v51 = vld [vmem:[%s15775_s16 + $0x1c94] ss:$8 sps:$4 sm:$0xff]  }
 0x1b8   : > { %9678 = vmatpush1.bf16.msra.mxu1 %v13974_v35  ;;  %v14052_v35 = vld [vmem:[%s15775_s16 + $0x690] ss:$8 sps:$4 sm:$0xff]  }
 0x1b9   : > { %10580 = vmatpush1.bf16.msra.mxu0 %v13977_v42  ;;  %9679 = vmatprep.subr.bf16.mxu1 %v13982_v52  ;;  %v14055_v42 = vld [vmem:[%s15775_s16 + $0x1c90] ss:$8 sps:$4 sm:$0xff]   ;;  %v14060_v52 = vld [vmem:[%s15775_s16 + $0x6a4] ss:$8 sps:$4 sm:$0xff]  }
 0x1ba   : > { %10581 = vmatprep.subr.bf16.mxu0 %v13985_v54  ;;  %v14063_v54 = vld [vmem:[%s15775_s16 + $0x1ca4] ss:$8 sps:$4 sm:$0xff]  }
 0x1bc   : > { %9680 = vmatpush1.bf16.msra.mxu1 %v13980_v55  ;;  %v14058_v55 = vld [vmem:[%s15775_s16 + $0x6a0] ss:$8 sps:$4 sm:$0xff]  }
 0x1bd   : > { %10582 = vmatpush1.bf16.msra.mxu0 %v13983_v56  ;;  %9681 = vmatprep.subr.bf16.mxu1 %v13988_v57  ;;  %v14061_v56 = vld [vmem:[%s15775_s16 + $0x1ca0] ss:$8 sps:$4 sm:$0xff]   ;;  %v14066_v57 = vld [vmem:[%s15775_s16 + $0x6b4] ss:$8 sps:$4 sm:$0xff]  }
 0x1be   : > { %10583 = vmatprep.subr.bf16.mxu0 %v13991_v58  ;;  %v14069_v58 = vld [vmem:[%s15775_s16 + $0x1cb4] ss:$8 sps:$4 sm:$0xff]  }
 0x1c0   : > { %9682 = vmatpush1.bf16.msra.mxu1 %v13986_v0  ;;  %v14072_v0 = vld [vmem:[%s15775_s16 + $0x6c4] ss:$8 sps:$4 sm:$0xff]  }
 0x1c1   : > { %10584 = vmatpush1.bf16.msra.mxu0 %v13989_v1  ;;  %9683 = vmatprep.subr.bf16.mxu1 %v13994_v2  ;;  %v14075_v1 = vld [vmem:[%s15775_s16 + $0x1cc4] ss:$8 sps:$4 sm:$0xff]   ;;  %v14070_v2 = vld [vmem:[%s15775_s16 + $0x6c0] ss:$8 sps:$4 sm:$0xff]  }
 0x1c2   : > { %10585 = vmatprep.subr.bf16.mxu0 %v13997_v46  ;;  %v14073_v46 = vld [vmem:[%s15775_s16 + $0x1cc0] ss:$8 sps:$4 sm:$0xff]  }
 0x1c4   : > { %9684 = vmatpush1.bf16.msra.mxu1 %v13992_v24  ;;  %v14078_v24 = vld [vmem:[%s15775_s16 + $0x6d4] ss:$8 sps:$4 sm:$0xff]  }
 0x1c5   : > { %10586 = vmatpush1.bf16.msra.mxu0 %v13995_v4  ;;  %9694 = vmatprep.subr.bf16.mxu1 %v14000_v59  ;;  %v14081_v4 = vld [vmem:[%s15775_s16 + $0x1cd4] ss:$8 sps:$4 sm:$0xff]   ;;  %v14076_v59 = vld [vmem:[%s15775_s16 + $0x6d0] ss:$8 sps:$4 sm:$0xff]  }
 0x1c6   : > { %10596 = vmatprep.subr.bf16.mxu0 %v14003_v5  ;;  %v14079_v5 = vld [vmem:[%s15775_s16 + $0x1cd0] ss:$8 sps:$4 sm:$0xff]  }
 0x1c7   : > { %9686 = vmatmul.mubr.bf16.vlgmr.msra.gmra.mrb[0].mxu1 %v1875_v7  ;;  %v14082_v7 = vld [vmem:[%s15775_s16 + $0x6e0] ss:$8 sps:$4 sm:$0xff]  }
 0x1c8   : > { %10588 = vmatmul.mubr.bf16.vlgmr.msra.gmra.mrb[0].mxu0 %v2121_v8  ;;  %9695 = vmatpush1.bf16.msra.mxu1 %v13998_v9  ;;  %v14085_v8 = vld [vmem:[%s15775_s16 + $0x1ce0] ss:$8 sps:$4 sm:$0xff]   ;;  %v14090_v9 = vld [vmem:[%s15775_s16 + $0x6f4] ss:$8 sps:$4 sm:$0xff]  }
 0x1c9   : > { %10597 = vmatpush1.bf16.msra.mxu0 %v14001_v10  ;;  %9696 = vmatprep.subr.bf16.mxu1 %v14006_v11  ;;  %v14093_v10 = vld [vmem:[%s15775_s16 + $0x1cf4] ss:$8 sps:$4 sm:$0xff]   ;;  %v14088_v11 = vld [vmem:[%s15775_s16 + $0x6f0] ss:$8 sps:$4 sm:$0xff]  }
 0x1ca   : > { %10598 = vmatprep.subr.bf16.mxu0 %v14009_v12  ;;  %9726 = vmatprep.mubr.bf16.mxu1 %v16287_v13  ;;  %v14091_v12 = vld [vmem:[%s15775_s16 + $0x1cf0] ss:$8 sps:$4 sm:$0xff]  }
 0x1cb   : > { %10628 = vmatprep.mubr.bf16.mxu0 %v16290_v61 }
 0x1cc   : > { %9697 = vmatpush1.bf16.msra.mxu1 %v14004_v62  ;;  %v14097_v62 = vld [vmem:[%s15775_s16 + $0x704] ss:$8 sps:$4 sm:$0xff]  }
 0x1cd   : > { %10599 = vmatpush1.bf16.msra.mxu0 %v14007_v14  ;;  %9698 = vmatprep.subr.bf16.mxu1 %v14012_v15  ;;  %v14100_v14 = vld [vmem:[%s15775_s16 + $0x1d04] ss:$8 sps:$4 sm:$0xff]   ;;  %v16356_v15 = vrot.slane %v16268_v3, %v15826_v50  ;;  %v1878_v3 = vcombine.high %v16287_v13, %v16287_v13 }
 0x1ce   : > { %10600 = vmatprep.subr.bf16.mxu0 %v14015_v16  ;;  %v16360_v16 = vrot.slane %v16260_v41, %v15826_v50  ;;  %v14101_v41 = vld [vmem:[%s15775_s16 + $0x710] ss:$8 sps:$4 sm:$0xff]   ;;  %v14109_v13 = vld [vmem:[%s15775_s16 + $0x724] ss:$8 sps:$4 sm:$0xff]  }
 0x1d0   : > { %9699 = vmatpush1.bf16.msra.mxu1 %v14010_v17  ;;  %v14095_v17 = vld [vmem:[%s15775_s16 + $0x700] ss:$8 sps:$4 sm:$0xff]  }
 0x1d1   : > { %10601 = vmatpush1.bf16.msra.mxu0 %v14013_v20  ;;  %9700 = vmatprep.subr.bf16.mxu1 %v14018_v21  ;;  %v14098_v20 = vld [vmem:[%s15775_s16 + $0x1d00] ss:$8 sps:$4 sm:$0xff]   ;;  %v14103_v21 = vld [vmem:[%s15775_s16 + $0x714] ss:$8 sps:$4 sm:$0xff]  }
 0x1d2   : > { %10602 = vmatprep.subr.bf16.mxu0 %v14021_v22  ;;  %v14106_v22 = vld [vmem:[%s15775_s16 + $0x1d14] ss:$8 sps:$4 sm:$0xff]  }
 0x1d4   : > { %9701 = vmatpush1.bf16.msra.mxu1 %v14016_v23  ;;  %v2171_v23 = vcombine.high %v16290_v61, %v16290_v61  ;;  %v14107_v61 = vld [vmem:[%s15775_s16 + $0x720] ss:$8 sps:$4 sm:$0xff]  }
 0x1d5   : > { %10603 = vmatpush1.bf16.msra.mxu0 %v14019_v25  ;;  %9702 = vmatprep.subr.bf16.mxu1 %v14024_v53  ;;  %v14104_v25 = vld [vmem:[%s15775_s16 + $0x1d10] ss:$8 sps:$4 sm:$0xff]   ;;  %v14112_v53 = vld [vmem:[%s15775_s16 + $0x1d24] ss:$8 sps:$4 sm:$0xff]  }
 0x1d6   : > { %10604 = vmatprep.subr.bf16.mxu0 %v14027_v26  ;;  %v14110_v26 = vld [vmem:[%s15775_s16 + $0x1d20] ss:$8 sps:$4 sm:$0xff]  }
 0x1d8   : > { %9703 = vmatpush1.bf16.msra.mxu1 %v14022_v27  ;;  %v14115_v27 = vld [vmem:[%s15775_s16 + $0x734] ss:$8 sps:$4 sm:$0xff]  }
 0x1d9   : > { %10605 = vmatpush1.bf16.msra.mxu0 %v14025_v28  ;;  %9704 = vmatprep.subr.bf16.mxu1 %v14030_v29  ;;  %v14118_v28 = vld [vmem:[%s15775_s16 + $0x1d34] ss:$8 sps:$4 sm:$0xff]   ;;  %v14113_v29 = vld [vmem:[%s15775_s16 + $0x730] ss:$8 sps:$4 sm:$0xff]  }
 0x1da   : > { %10606 = vmatprep.subr.bf16.mxu0 %v14033_v30  ;;  %v14116_v30 = vld [vmem:[%s15775_s16 + $0x1d30] ss:$8 sps:$4 sm:$0xff]  }
 0x1dc   : > { %9705 = vmatpush1.bf16.msra.mxu1 %v14028_v31  ;;  %v14121_v31 = vld [vmem:[%s15775_s16 + $0x744] ss:$8 sps:$4 sm:$0xff]  }
 0x1dd   : > { %10607 = vmatpush1.bf16.msra.mxu0 %v14031_v32  ;;  %9706 = vmatprep.subr.bf16.mxu1 %v14036_v33  ;;  %v14124_v32 = vld [vmem:[%s15775_s16 + $0x1d44] ss:$8 sps:$4 sm:$0xff]   ;;  %v14119_v33 = vld [vmem:[%s15775_s16 + $0x740] ss:$8 sps:$4 sm:$0xff]  }
 0x1de   : > { %10608 = vmatprep.subr.bf16.mxu0 %v14039_v34  ;;  %v14122_v34 = vld [vmem:[%s15775_s16 + $0x1d40] ss:$8 sps:$4 sm:$0xff]  }
 0x1e0   : > { %9707 = vmatpush1.bf16.msra.mxu1 %v14034_v18  ;;  %v14127_v18 = vld [vmem:[%s15775_s16 + $0x754] ss:$8 sps:$4 sm:$0xff]  }
 0x1e1   : > { %10609 = vmatpush1.bf16.msra.mxu0 %v14037_v37  ;;  %9708 = vmatprep.subr.bf16.mxu1 %v14042_v38  ;;  %v14130_v37 = vld [vmem:[%s15775_s16 + $0x1d54] ss:$8 sps:$4 sm:$0xff]   ;;  %v14125_v38 = vld [vmem:[%s15775_s16 + $0x750] ss:$8 sps:$4 sm:$0xff]  }
 0x1e2   : > { %10610 = vmatprep.subr.bf16.mxu0 %v14045_v39  ;;  %v14128_v39 = vld [vmem:[%s15775_s16 + $0x1d50] ss:$8 sps:$4 sm:$0xff]  }
 0x1e4   : > { %9709 = vmatpush1.bf16.msra.mxu1 %v14040_v40  ;;  %v14133_v40 = vld [vmem:[%s15775_s16 + $0x764] ss:$8 sps:$4 sm:$0xff]  }
 0x1e5   : > { %10611 = vmatpush1.bf16.msra.mxu0 %v14043_v45  ;;  %9710 = vmatprep.subr.bf16.mxu1 %v14048_v47  ;;  %v14136_v45 = vld [vmem:[%s15775_s16 + $0x1d64] ss:$8 sps:$4 sm:$0xff]   ;;  %v14131_v47 = vld [vmem:[%s15775_s16 + $0x760] ss:$8 sps:$4 sm:$0xff]  }
 0x1e6   : > { %10612 = vmatprep.subr.bf16.mxu0 %v14051_v48  ;;  %v14134_v48 = vld [vmem:[%s15775_s16 + $0x1d60] ss:$8 sps:$4 sm:$0xff]  }
 0x1e8   : > { %9711 = vmatpush1.bf16.msra.mxu1 %v14046_v19  ;;  %v14139_v19 = vld [vmem:[%s15775_s16 + $0x774] ss:$8 sps:$4 sm:$0xff]  }
 0x1e9   : > { %10613 = vmatpush1.bf16.msra.mxu0 %v14049_v49  ;;  %9712 = vmatprep.subr.bf16.mxu1 %v14054_v36  ;;  %v14142_v49 = vld [vmem:[%s15775_s16 + $0x1d74] ss:$8 sps:$4 sm:$0xff]   ;;  %v14137_v36 = vld [vmem:[%s15775_s16 + $0x770] ss:$8 sps:$4 sm:$0xff]  }
 0x1ea   : > { %10614 = vmatprep.subr.bf16.mxu0 %v14057_v51  ;;  %v14140_v51 = vld [vmem:[%s15775_s16 + $0x1d70] ss:$8 sps:$4 sm:$0xff]  }
 0x1ec   : > { %9713 = vmatpush1.bf16.msra.mxu1 %v14052_v35  ;;  %v14145_v35 = vld [vmem:[%s15775_s16 + $0x784] ss:$8 sps:$4 sm:$0xff]  }
 0x1ed   : > { %10615 = vmatpush1.bf16.msra.mxu0 %v14055_v42  ;;  %9714 = vmatprep.subr.bf16.mxu1 %v14060_v52  ;;  %v14148_v42 = vld [vmem:[%s15775_s16 + $0x1d84] ss:$8 sps:$4 sm:$0xff]   ;;  %v14143_v52 = vld [vmem:[%s15775_s16 + $0x780] ss:$8 sps:$4 sm:$0xff]  }
 0x1ee   : > { %10616 = vmatprep.subr.bf16.mxu0 %v14063_v54  ;;  %v14146_v54 = vld [vmem:[%s15775_s16 + $0x1d80] ss:$8 sps:$4 sm:$0xff]  }
 0x1f0   : > { %9715 = vmatpush1.bf16.msra.mxu1 %v14058_v55  ;;  %v14151_v55 = vld [vmem:[%s15775_s16 + $0x794] ss:$8 sps:$4 sm:$0xff]  }
 0x1f1   : > { %10617 = vmatpush1.bf16.msra.mxu0 %v14061_v56  ;;  %9716 = vmatprep.subr.bf16.mxu1 %v14066_v57  ;;  %v14154_v56 = vld [vmem:[%s15775_s16 + $0x1d94] ss:$8 sps:$4 sm:$0xff]   ;;  %v14149_v57 = vld [vmem:[%s15775_s16 + $0x790] ss:$8 sps:$4 sm:$0xff]  }
 0x1f2   : > { %10618 = vmatprep.subr.bf16.mxu0 %v14069_v58  ;;  %v14152_v58 = vld [vmem:[%s15775_s16 + $0x1d90] ss:$8 sps:$4 sm:$0xff]  }
 0x1f4   : > { %9717 = vmatpush1.bf16.msra.mxu1 %v14064_v43  ;;  %v14157_v43 = vld [vmem:[%s15775_s16 + $0x7a4] ss:$8 sps:$4 sm:$0xff]  }
 0x1f5   : > { %10619 = vmatpush1.bf16.msra.mxu0 %v14067_v63  ;;  %9718 = vmatprep.subr.bf16.mxu1 %v14072_v0  ;;  %v14160_v63 = vld [vmem:[%s15775_s16 + $0x1da4] ss:$8 sps:$4 sm:$0xff]   ;;  %v14155_v0 = vld [vmem:[%s15775_s16 + $0x7a0] ss:$8 sps:$4 sm:$0xff]  }
 0x1f6   : > { %10620 = vmatprep.subr.bf16.mxu0 %v14075_v1  ;;  %v14158_v1 = vld [vmem:[%s15775_s16 + $0x1da0] ss:$8 sps:$4 sm:$0xff]  }
 0x1f8   : > { %9719 = vmatpush1.bf16.msra.mxu1 %v14070_v2  ;;  %v14163_v2 = vld [vmem:[%s15775_s16 + $0x7b4] ss:$8 sps:$4 sm:$0xff]  }
 0x1f9   : > { %10621 = vmatpush1.bf16.msra.mxu0 %v14073_v46  ;;  %9720 = vmatprep.subr.bf16.mxu1 %v14078_v24  ;;  %v14166_v46 = vld [vmem:[%s15775_s16 + $0x1db4] ss:$8 sps:$4 sm:$0xff]   ;;  %v14161_v24 = vld [vmem:[%s15775_s16 + $0x7b0] ss:$8 sps:$4 sm:$0xff]  }
 0x1fa   : > { %10622 = vmatprep.subr.bf16.mxu0 %v14081_v4  ;;  %v14164_v4 = vld [vmem:[%s15775_s16 + $0x1db0] ss:$8 sps:$4 sm:$0xff]  }
 0x1fc   : > { %9721 = vmatpush1.bf16.msra.mxu1 %v14076_v59  ;;  %v14169_v59 = vld [vmem:[%s15775_s16 + $0x7c4] ss:$8 sps:$4 sm:$0xff]  }
 0x1fd   : > { %10623 = vmatpush1.bf16.msra.mxu0 %v14079_v5  ;;  %9722 = vmatprep.subr.bf16.mxu1 %v14084_v60  ;;  %v14172_v5 = vld [vmem:[%s15775_s16 + $0x1dc4] ss:$8 sps:$4 sm:$0xff]   ;;  %v14167_v60 = vld [vmem:[%s15775_s16 + $0x7c0] ss:$8 sps:$4 sm:$0xff]  }
 0x1fe   : > { %10624 = vmatprep.subr.bf16.mxu0 %v14087_v6  ;;  %v14170_v6 = vld [vmem:[%s15775_s16 + $0x1dc0] ss:$8 sps:$4 sm:$0xff]  }
 0x200   : > { %9723 = vmatpush1.bf16.msra.mxu1 %v14082_v7  ;;  %v14175_v7 = vld [vmem:[%s15775_s16 + $0x7d4] ss:$8 sps:$4 sm:$0xff]  }
 0x201   : > { %10625 = vmatpush1.bf16.msra.mxu0 %v14085_v8  ;;  %9724 = vmatprep.subr.bf16.mxu1 %v14090_v9  ;;  %v14178_v8 = vld [vmem:[%s15775_s16 + $0x1dd4] ss:$8 sps:$4 sm:$0xff]   ;;  %v14173_v9 = vld [vmem:[%s15775_s16 + $0x7d0] ss:$8 sps:$4 sm:$0xff]  }
 0x202   : > { %10626 = vmatprep.subr.bf16.mxu0 %v14093_v10  ;;  %v14176_v10 = vld [vmem:[%s15775_s16 + $0x1dd0] ss:$8 sps:$4 sm:$0xff]  }
 0x204   : > { %9725 = vmatpush1.bf16.msra.mxu1 %v14088_v11  ;;  %v14181_v11 = vld [vmem:[%s15775_s16 + $0x7e4] ss:$8 sps:$4 sm:$0xff]  }
 0x205   : > { %10627 = vmatpush1.bf16.msra.mxu0 %v14091_v12  ;;  %9735 = vmatprep.subr.bf16.mxu1 %v14097_v62  ;;  %v14184_v12 = vld [vmem:[%s15775_s16 + $0x1de4] ss:$8 sps:$4 sm:$0xff]   ;;  %v16425_v62 = vld.sshfl [vmem:[%s15770_s12 + $0x10] sm:$0xff pattern:$0x75316420] }
 0x206   : > { %10637 = vmatprep.subr.bf16.mxu0 %v14100_v14  ;;  %v15543_v14 = vld [vmem:[%s15770_s12 + $0x38] sm:$0xff] }
 0x207   : > { %9727 = vmatmul.mubr.bf16.vlgmr.msra.gmra.mrb[0].mxu1 %v16356_v15 }
 0x208   : > { %10629 = vmatmul.mubr.bf16.vlgmr.msra.gmra.mrb[0].mxu0 %v16360_v16  ;;  %9736 = vmatpush1.bf16.msra.mxu1 %v14095_v17  ;;  %v2124_v17 = vcombine.high %v15543_v14, %v15543_v14  ;;  %v14257_v14 = vld [vmem:[%s15775_s16 + $0x8b0] ss:$8 sps:$4 sm:$0xff]  }
 0x209   : > { %10638 = vmatpush1.bf16.msra.mxu0 %v14098_v20  ;;  %9737 = vmatprep.subr.bf16.mxu1 %v14103_v21  ;;  %v14179_v20 = vld [vmem:[%s15775_s16 + $0x7e0] ss:$8 sps:$4 sm:$0xff]  }
 0x20a   : > { %10639 = vmatprep.subr.bf16.mxu0 %v14106_v22  ;;  %9767 = vmatprep.mubr.bf16.mxu1 %v1878_v3  ;;  %v14182_v21 = vld [vmem:[%s15775_s16 + $0x1de0] ss:$8 sps:$4 sm:$0xff]   ;;  %v14187_v22 = vld [vmem:[%s15775_s16 + $0x7f4] ss:$8 sps:$4 sm:$0xff]  }
 0x20b   : > { %10669 = vmatprep.mubr.bf16.mxu0 %v2171_v23  ;;  %v14190_v3 = vld [vmem:[%s15775_s16 + $0x1df4] ss:$8 sps:$4 sm:$0xff]   ;;  %v16433_v23 = vrot.slane %v2124_v17, %v15826_v50  ;;  %v14260_v17 = vld [vmem:[%s15775_s16 + $0x1eb0] ss:$8 sps:$4 sm:$0xff]  }
 0x20c   : > { %9738 = vmatpush1.bf16.msra.mxu1 %v14101_v41  ;;  %v14185_v41 = vld [vmem:[%s15775_s16 + $0x7f0] ss:$8 sps:$4 sm:$0xff]  }
 0x20d   : > { %10640 = vmatpush1.bf16.msra.mxu0 %v14104_v25  ;;  %9739 = vmatprep.subr.bf16.mxu1 %v14109_v13  ;;  %v14188_v25 = vld [vmem:[%s15775_s16 + $0x1df0] ss:$8 sps:$4 sm:$0xff]   ;;  %v14193_v13 = vld [vmem:[%s15775_s16 + $0x804] ss:$8 sps:$4 sm:$0xff]  }
 0x20e   : > { %10641 = vmatprep.subr.bf16.mxu0 %v14112_v53  ;;  %v14196_v53 = vld [vmem:[%s15775_s16 + $0x1e04] ss:$8 sps:$4 sm:$0xff]  }
 0x210   : > { %9740 = vmatpush1.bf16.msra.mxu1 %v14107_v61  ;;  %v1894_v61 = vcombine.high %v16425_v62, %v16425_v62 }
 0x211   : > { %10642 = vmatpush1.bf16.msra.mxu0 %v14110_v26  ;;  %9741 = vmatprep.subr.bf16.mxu1 %v14115_v27  ;;  %v2140_v26 = vcombine.high %v16433_v23, %v16433_v23  ;;  %v1876_v27 = vcombine.high %v16356_v15, %v16356_v15 }
 0x212   : > { %10643 = vmatprep.subr.bf16.mxu0 %v14118_v28  ;;  %v2169_v28 = vcombine.high %v16360_v16, %v16360_v16  ;;  %v14197_v16 = vld [vmem:[%s15775_s16 + $0x810] ss:$8 sps:$4 sm:$0xff]  }
 0x213   : > { %v16455_v15 = vrot.slane %v2140_v26, %v15826_v50  ;;  %v14280_v26 = vld [vmem:[%s15775_s16 + $0x1ee4] ss:$8 sps:$4 sm:$0xff]  }
 0x214   : > { %9742 = vmatpush1.bf16.msra.mxu1 %v14113_v29  ;;  %v14191_v29 = vld [vmem:[%s15775_s16 + $0x800] ss:$8 sps:$4 sm:$0xff]  }
 0x215   : > { %10644 = vmatpush1.bf16.msra.mxu0 %v14116_v30  ;;  %9743 = vmatprep.subr.bf16.mxu1 %v14121_v31  ;;  %v14194_v30 = vld [vmem:[%s15775_s16 + $0x1e00] ss:$8 sps:$4 sm:$0xff]   ;;  %v14199_v31 = vld [vmem:[%s15775_s16 + $0x814] ss:$8 sps:$4 sm:$0xff]  }
 0x216   : > { %10645 = vmatprep.subr.bf16.mxu0 %v14124_v32  ;;  %v14202_v32 = vld [vmem:[%s15775_s16 + $0x1e14] ss:$8 sps:$4 sm:$0xff]  }
 0x218   : > { %9744 = vmatpush1.bf16.msra.mxu1 %v14119_v33  ;;  %v16452_v33 = vrot.slane %v1894_v61, %v15826_v50  ;;  %v14277_v61 = vld [vmem:[%s15775_s16 + $0x8e4] ss:$8 sps:$4 sm:$0xff]  }
 0x219   : > { %10646 = vmatpush1.bf16.msra.mxu0 %v14122_v34  ;;  %9745 = vmatprep.subr.bf16.mxu1 %v14127_v18  ;;  %v14200_v34 = vld [vmem:[%s15775_s16 + $0x1e10] ss:$8 sps:$4 sm:$0xff]   ;;  %v14205_v18 = vld [vmem:[%s15775_s16 + $0x824] ss:$8 sps:$4 sm:$0xff]  }
 0x21a   : > { %10647 = vmatprep.subr.bf16.mxu0 %v14130_v37  ;;  %v14208_v37 = vld [vmem:[%s15775_s16 + $0x1e24] ss:$8 sps:$4 sm:$0xff]  }
 0x21c   : > { %9746 = vmatpush1.bf16.msra.mxu1 %v14125_v38  ;;  %v14203_v38 = vld [vmem:[%s15775_s16 + $0x820] ss:$8 sps:$4 sm:$0xff]  }
 0x21d   : > { %10648 = vmatpush1.bf16.msra.mxu0 %v14128_v39  ;;  %9747 = vmatprep.subr.bf16.mxu1 %v14133_v40  ;;  %v14206_v39 = vld [vmem:[%s15775_s16 + $0x1e20] ss:$8 sps:$4 sm:$0xff]   ;;  %v14211_v40 = vld [vmem:[%s15775_s16 + $0x834] ss:$8 sps:$4 sm:$0xff]  }
 0x21e   : > { %10649 = vmatprep.subr.bf16.mxu0 %v14136_v45  ;;  %v14214_v45 = vld [vmem:[%s15775_s16 + $0x1e34] ss:$8 sps:$4 sm:$0xff]  }
 0x220   : > { %9748 = vmatpush1.bf16.msra.mxu1 %v14131_v47  ;;  %v14209_v47 = vld [vmem:[%s15775_s16 + $0x830] ss:$8 sps:$4 sm:$0xff]  }
 0x221   : > { %10650 = vmatpush1.bf16.msra.mxu0 %v14134_v48  ;;  %9749 = vmatprep.subr.bf16.mxu1 %v14139_v19  ;;  %v14212_v48 = vld [vmem:[%s15775_s16 + $0x1e30] ss:$8 sps:$4 sm:$0xff]   ;;  %v14217_v19 = vld [vmem:[%s15775_s16 + $0x844] ss:$8 sps:$4 sm:$0xff]  }
 0x222   : > { %10651 = vmatprep.subr.bf16.mxu0 %v14142_v49  ;;  %v14220_v49 = vld [vmem:[%s15775_s16 + $0x1e44] ss:$8 sps:$4 sm:$0xff]  }
 0x224   : > { %9750 = vmatpush1.bf16.msra.mxu1 %v14137_v36  ;;  %v14215_v36 = vld [vmem:[%s15775_s16 + $0x840] ss:$8 sps:$4 sm:$0xff]  }
 0x225   : > { %10652 = vmatpush1.bf16.msra.mxu0 %v14140_v51  ;;  %9751 = vmatprep.subr.bf16.mxu1 %v14145_v35  ;;  %v14218_v51 = vld [vmem:[%s15775_s16 + $0x1e40] ss:$8 sps:$4 sm:$0xff]   ;;  %v14223_v35 = vld [vmem:[%s15775_s16 + $0x854] ss:$8 sps:$4 sm:$0xff]  }
 0x226   : > { %10653 = vmatprep.subr.bf16.mxu0 %v14148_v42  ;;  %v14226_v42 = vld [vmem:[%s15775_s16 + $0x1e54] ss:$8 sps:$4 sm:$0xff]  }
 0x228   : > { %9752 = vmatpush1.bf16.msra.mxu1 %v14143_v52  ;;  %v14221_v52 = vld [vmem:[%s15775_s16 + $0x850] ss:$8 sps:$4 sm:$0xff]  }
 0x229   : > { %10654 = vmatpush1.bf16.msra.mxu0 %v14146_v54  ;;  %9753 = vmatprep.subr.bf16.mxu1 %v14151_v55  ;;  %v14224_v54 = vld [vmem:[%s15775_s16 + $0x1e50] ss:$8 sps:$4 sm:$0xff]   ;;  %v14229_v55 = vld [vmem:[%s15775_s16 + $0x864] ss:$8 sps:$4 sm:$0xff]  }
 0x22a   : > { %10655 = vmatprep.subr.bf16.mxu0 %v14154_v56  ;;  %v14232_v56 = vld [vmem:[%s15775_s16 + $0x1e64] ss:$8 sps:$4 sm:$0xff]  }
 0x22c   : > { %9754 = vmatpush1.bf16.msra.mxu1 %v14149_v57  ;;  %v14227_v57 = vld [vmem:[%s15775_s16 + $0x860] ss:$8 sps:$4 sm:$0xff]  }
 0x22d   : > { %10656 = vmatpush1.bf16.msra.mxu0 %v14152_v58  ;;  %9755 = vmatprep.subr.bf16.mxu1 %v14157_v43  ;;  %v14230_v58 = vld [vmem:[%s15775_s16 + $0x1e60] ss:$8 sps:$4 sm:$0xff]   ;;  %v14235_v43 = vld [vmem:[%s15775_s16 + $0x874] ss:$8 sps:$4 sm:$0xff]  }
 0x22e   : > { %10657 = vmatprep.subr.bf16.mxu0 %v14160_v63  ;;  %v14238_v63 = vld [vmem:[%s15775_s16 + $0x1e74] ss:$8 sps:$4 sm:$0xff]  }
 0x230   : > { %9756 = vmatpush1.bf16.msra.mxu1 %v14155_v0  ;;  %v14233_v0 = vld [vmem:[%s15775_s16 + $0x870] ss:$8 sps:$4 sm:$0xff]  }
 0x231   : > { %10658 = vmatpush1.bf16.msra.mxu0 %v14158_v1  ;;  %9757 = vmatprep.subr.bf16.mxu1 %v14163_v2  ;;  %v14236_v1 = vld [vmem:[%s15775_s16 + $0x1e70] ss:$8 sps:$4 sm:$0xff]   ;;  %v14241_v2 = vld [vmem:[%s15775_s16 + $0x884] ss:$8 sps:$4 sm:$0xff]  }
 0x232   : > { %10659 = vmatprep.subr.bf16.mxu0 %v14166_v46  ;;  %v14244_v46 = vld [vmem:[%s15775_s16 + $0x1e84] ss:$8 sps:$4 sm:$0xff]  }
 0x234   : > { %9758 = vmatpush1.bf16.msra.mxu1 %v14161_v24  ;;  %v14239_v24 = vld [vmem:[%s15775_s16 + $0x880] ss:$8 sps:$4 sm:$0xff]  }
 0x235   : > { %10660 = vmatpush1.bf16.msra.mxu0 %v14164_v4  ;;  %9759 = vmatprep.subr.bf16.mxu1 %v14169_v59  ;;  %v14242_v4 = vld [vmem:[%s15775_s16 + $0x1e80] ss:$8 sps:$4 sm:$0xff]   ;;  %v14247_v59 = vld [vmem:[%s15775_s16 + $0x894] ss:$8 sps:$4 sm:$0xff]  }
 0x236   : > { %10661 = vmatprep.subr.bf16.mxu0 %v14172_v5  ;;  %v14250_v5 = vld [vmem:[%s15775_s16 + $0x1e94] ss:$8 sps:$4 sm:$0xff]  }
 0x238   : > { %9760 = vmatpush1.bf16.msra.mxu1 %v14167_v60  ;;  %v14245_v60 = vld [vmem:[%s15775_s16 + $0x890] ss:$8 sps:$4 sm:$0xff]  }
 0x239   : > { %10662 = vmatpush1.bf16.msra.mxu0 %v14170_v6  ;;  %9761 = vmatprep.subr.bf16.mxu1 %v14175_v7  ;;  %v14248_v6 = vld [vmem:[%s15775_s16 + $0x1e90] ss:$8 sps:$4 sm:$0xff]   ;;  %v14253_v7 = vld [vmem:[%s15775_s16 + $0x8a4] ss:$8 sps:$4 sm:$0xff]  }
 0x23a   : > { %10663 = vmatprep.subr.bf16.mxu0 %v14178_v8  ;;  %v14256_v8 = vld [vmem:[%s15775_s16 + $0x1ea4] ss:$8 sps:$4 sm:$0xff]  }
 0x23c   : > { %9762 = vmatpush1.bf16.msra.mxu1 %v14173_v9  ;;  %v14251_v9 = vld [vmem:[%s15775_s16 + $0x8a0] ss:$8 sps:$4 sm:$0xff]  }
 0x23d   : > { %10664 = vmatpush1.bf16.msra.mxu0 %v14176_v10  ;;  %9763 = vmatprep.subr.bf16.mxu1 %v14181_v11  ;;  %v14254_v10 = vld [vmem:[%s15775_s16 + $0x1ea0] ss:$8 sps:$4 sm:$0xff]   ;;  %v14259_v11 = vld [vmem:[%s15775_s16 + $0x8b4] ss:$8 sps:$4 sm:$0xff]  }
 0x23e   : > { %10665 = vmatprep.subr.bf16.mxu0 %v14184_v12  ;;  %v14262_v12 = vld [vmem:[%s15775_s16 + $0x1eb4] ss:$8 sps:$4 sm:$0xff]  }
 0x240   : > { %9764 = vmatpush1.bf16.msra.mxu1 %v14179_v20  ;;  %v14265_v20 = vld [vmem:[%s15775_s16 + $0x8c4] ss:$8 sps:$4 sm:$0xff]  }
 0x241   : > { %10666 = vmatpush1.bf16.msra.mxu0 %v14182_v21  ;;  %9765 = vmatprep.subr.bf16.mxu1 %v14187_v22  ;;  %v14268_v21 = vld [vmem:[%s15775_s16 + $0x1ec4] ss:$8 sps:$4 sm:$0xff]   ;;  %v14263_v22 = vld [vmem:[%s15775_s16 + $0x8c0] ss:$8 sps:$4 sm:$0xff]  }
 0x242   : > { %10667 = vmatprep.subr.bf16.mxu0 %v14190_v3  ;;  %v14266_v3 = vld [vmem:[%s15775_s16 + $0x1ec0] ss:$8 sps:$4 sm:$0xff]  }
 0x244   : > { %9766 = vmatpush1.bf16.msra.mxu1 %v14185_v41  ;;  %v14271_v41 = vld [vmem:[%s15775_s16 + $0x8d4] ss:$8 sps:$4 sm:$0xff]  }
 0x245   : > { %10668 = vmatpush1.bf16.msra.mxu0 %v14188_v25  ;;  %9776 = vmatprep.subr.bf16.mxu1 %v14193_v13  ;;  %v14274_v25 = vld [vmem:[%s15775_s16 + $0x1ed4] ss:$8 sps:$4 sm:$0xff]   ;;  %v14269_v13 = vld [vmem:[%s15775_s16 + $0x8d0] ss:$8 sps:$4 sm:$0xff]  }
 0x246   : > { %10678 = vmatprep.subr.bf16.mxu0 %v14196_v53  ;;  %v14272_v53 = vld [vmem:[%s15775_s16 + $0x1ed0] ss:$8 sps:$4 sm:$0xff]  }
 0x247   : > { %9768 = vmatmul.mubr.bf16.vlgmr.msra.gmra.mrb[0].mxu1 %v1876_v27  ;;  %v14275_v27 = vld [vmem:[%s15775_s16 + $0x8e0] ss:$8 sps:$4 sm:$0xff]  }
 0x248   : > { %10670 = vmatmul.mubr.bf16.vlgmr.msra.gmra.mrb[0].mxu0 %v2169_v28  ;;  %9777 = vmatpush1.bf16.msra.mxu1 %v14191_v29  ;;  %v14278_v28 = vld [vmem:[%s15775_s16 + $0x1ee0] ss:$8 sps:$4 sm:$0xff]   ;;  %v14283_v29 = vld [vmem:[%s15775_s16 + $0x8f4] ss:$8 sps:$4 sm:$0xff]  }
 0x249   : > { %10679 = vmatpush1.bf16.msra.mxu0 %v14194_v30  ;;  %9778 = vmatprep.subr.bf16.mxu1 %v14199_v31  ;;  %v14286_v30 = vld [vmem:[%s15775_s16 + $0x1ef4] ss:$8 sps:$4 sm:$0xff]   ;;  %v14281_v31 = vld [vmem:[%s15775_s16 + $0x8f0] ss:$8 sps:$4 sm:$0xff]  }
 0x24a   : > { %10680 = vmatprep.subr.bf16.mxu0 %v14202_v32  ;;  %9808 = vmatprep.mubr.bf16.mxu1 %v16452_v33  ;;  %v14284_v32 = vld [vmem:[%s15775_s16 + $0x1ef0] ss:$8 sps:$4 sm:$0xff]  }
 0x24b   : > { %10710 = vmatprep.mubr.bf16.mxu0 %v16455_v15 }
 0x24c   : > { %9779 = vmatpush1.bf16.msra.mxu1 %v14197_v16  ;;  %v14289_v16 = vld [vmem:[%s15775_s16 + $0x904] ss:$8 sps:$4 sm:$0xff]  }
 0x24d   : > { %10681 = vmatpush1.bf16.msra.mxu0 %v14200_v34  ;;  %9780 = vmatprep.subr.bf16.mxu1 %v14205_v18  ;;  %v14293_v34 = vld [vmem:[%s15775_s16 + $0x1f04] ss:$8 sps:$4 sm:$0xff]   ;;  %v16521_v18 = vrot.slane %v16425_v62, %v15826_v50  ;;  %v1926_v62 = vcombine.high %v16452_v33, %v16452_v33 }
 0x24e   : > { %10682 = vmatprep.subr.bf16.mxu0 %v14208_v37  ;;  %v16525_v37 = vrot.slane %v16433_v23, %v15826_v50  ;;  %v14294_v23 = vld [vmem:[%s15775_s16 + $0x910] ss:$8 sps:$4 sm:$0xff]   ;;  %v14302_v33 = vld [vmem:[%s15775_s16 + $0x924] ss:$8 sps:$4 sm:$0xff]  }
 0x250   : > { %9781 = vmatpush1.bf16.msra.mxu1 %v14203_v38  ;;  %v14287_v38 = vld [vmem:[%s15775_s16 + $0x900] ss:$8 sps:$4 sm:$0xff]  }
 0x251   : > { %10683 = vmatpush1.bf16.msra.mxu0 %v14206_v39  ;;  %9782 = vmatprep.subr.bf16.mxu1 %v14211_v40  ;;  %v14291_v39 = vld [vmem:[%s15775_s16 + $0x1f00] ss:$8 sps:$4 sm:$0xff]   ;;  %v14296_v40 = vld [vmem:[%s15775_s16 + $0x914] ss:$8 sps:$4 sm:$0xff]  }
 0x252   : > { %10684 = vmatprep.subr.bf16.mxu0 %v14214_v45  ;;  %v14299_v45 = vld [vmem:[%s15775_s16 + $0x1f14] ss:$8 sps:$4 sm:$0xff]  }
 0x254   : > { %9783 = vmatpush1.bf16.msra.mxu1 %v14209_v47  ;;  %v2172_v47 = vcombine.high %v16455_v15, %v16455_v15  ;;  %v14300_v15 = vld [vmem:[%s15775_s16 + $0x920] ss:$8 sps:$4 sm:$0xff]  }
 0x255   : > { %10685 = vmatpush1.bf16.msra.mxu0 %v14212_v48  ;;  %9784 = vmatprep.subr.bf16.mxu1 %v14217_v19  ;;  %v14297_v48 = vld [vmem:[%s15775_s16 + $0x1f10] ss:$8 sps:$4 sm:$0xff]   ;;  %v14305_v19 = vld [vmem:[%s15775_s16 + $0x1f24] ss:$8 sps:$4 sm:$0xff]  }
 0x256   : > { %10686 = vmatprep.subr.bf16.mxu0 %v14220_v49  ;;  %v14303_v49 = vld [vmem:[%s15775_s16 + $0x1f20] ss:$8 sps:$4 sm:$0xff]  }
 0x258   : > { %9785 = vmatpush1.bf16.msra.mxu1 %v14215_v36  ;;  %v14308_v36 = vld [vmem:[%s15775_s16 + $0x934] ss:$8 sps:$4 sm:$0xff]  }
 0x259   : > { %10687 = vmatpush1.bf16.msra.mxu0 %v14218_v51  ;;  %9786 = vmatprep.subr.bf16.mxu1 %v14223_v35  ;;  %v14311_v51 = vld [vmem:[%s15775_s16 + $0x1f34] ss:$8 sps:$4 sm:$0xff]   ;;  %v14306_v35 = vld [vmem:[%s15775_s16 + $0x930] ss:$8 sps:$4 sm:$0xff]  }
 0x25a   : > { %10688 = vmatprep.subr.bf16.mxu0 %v14226_v42  ;;  %v14309_v42 = vld [vmem:[%s15775_s16 + $0x1f30] ss:$8 sps:$4 sm:$0xff]  }
 0x25c   : > { %9787 = vmatpush1.bf16.msra.mxu1 %v14221_v52  ;;  %v14314_v52 = vld [vmem:[%s15775_s16 + $0x944] ss:$8 sps:$4 sm:$0xff]  }
 0x25d   : > { %10689 = vmatpush1.bf16.msra.mxu0 %v14224_v54  ;;  %9788 = vmatprep.subr.bf16.mxu1 %v14229_v55  ;;  %v14317_v54 = vld [vmem:[%s15775_s16 + $0x1f44] ss:$8 sps:$4 sm:$0xff]   ;;  %v14312_v55 = vld [vmem:[%s15775_s16 + $0x940] ss:$8 sps:$4 sm:$0xff]  }
 0x25e   : > { %10690 = vmatprep.subr.bf16.mxu0 %v14232_v56  ;;  %v14315_v56 = vld [vmem:[%s15775_s16 + $0x1f40] ss:$8 sps:$4 sm:$0xff]  }
 0x260   : > { %9789 = vmatpush1.bf16.msra.mxu1 %v14227_v57  ;;  %v14320_v57 = vld [vmem:[%s15775_s16 + $0x954] ss:$8 sps:$4 sm:$0xff]  }
 0x261   : > { %10691 = vmatpush1.bf16.msra.mxu0 %v14230_v58  ;;  %9790 = vmatprep.subr.bf16.mxu1 %v14235_v43  ;;  %v14323_v58 = vld [vmem:[%s15775_s16 + $0x1f54] ss:$8 sps:$4 sm:$0xff]   ;;  %v14318_v43 = vld [vmem:[%s15775_s16 + $0x950] ss:$8 sps:$4 sm:$0xff]  }
 0x262   : > { %10692 = vmatprep.subr.bf16.mxu0 %v14238_v63  ;;  %v14321_v63 = vld [vmem:[%s15775_s16 + $0x1f50] ss:$8 sps:$4 sm:$0xff]  }
 0x264   : > { %9791 = vmatpush1.bf16.msra.mxu1 %v14233_v0  ;;  %v14326_v0 = vld [vmem:[%s15775_s16 + $0x964] ss:$8 sps:$4 sm:$0xff]  }
 0x265   : > { %10693 = vmatpush1.bf16.msra.mxu0 %v14236_v1  ;;  %9792 = vmatprep.subr.bf16.mxu1 %v14241_v2  ;;  %v14329_v1 = vld [vmem:[%s15775_s16 + $0x1f64] ss:$8 sps:$4 sm:$0xff]   ;;  %v14324_v2 = vld [vmem:[%s15775_s16 + $0x960] ss:$8 sps:$4 sm:$0xff]  }
 0x266   : > { %10694 = vmatprep.subr.bf16.mxu0 %v14244_v46  ;;  %v14327_v46 = vld [vmem:[%s15775_s16 + $0x1f60] ss:$8 sps:$4 sm:$0xff]  }
 0x268   : > { %9793 = vmatpush1.bf16.msra.mxu1 %v14239_v24  ;;  %v14332_v24 = vld [vmem:[%s15775_s16 + $0x974] ss:$8 sps:$4 sm:$0xff]  }
 0x269   : > { %10695 = vmatpush1.bf16.msra.mxu0 %v14242_v4  ;;  %9794 = vmatprep.subr.bf16.mxu1 %v14247_v59  ;;  %v14335_v4 = vld [vmem:[%s15775_s16 + $0x1f74] ss:$8 sps:$4 sm:$0xff]   ;;  %v14330_v59 = vld [vmem:[%s15775_s16 + $0x970] ss:$8 sps:$4 sm:$0xff]  }
 0x26a   : > { %10696 = vmatprep.subr.bf16.mxu0 %v14250_v5  ;;  %v14333_v5 = vld [vmem:[%s15775_s16 + $0x1f70] ss:$8 sps:$4 sm:$0xff]  }
 0x26c   : > { %9795 = vmatpush1.bf16.msra.mxu1 %v14245_v60  ;;  %v14338_v60 = vld [vmem:[%s15775_s16 + $0x984] ss:$8 sps:$4 sm:$0xff]  }
 0x26d   : > { %10697 = vmatpush1.bf16.msra.mxu0 %v14248_v6  ;;  %9796 = vmatprep.subr.bf16.mxu1 %v14253_v7  ;;  %v14341_v6 = vld [vmem:[%s15775_s16 + $0x1f84] ss:$8 sps:$4 sm:$0xff]   ;;  %v14336_v7 = vld [vmem:[%s15775_s16 + $0x980] ss:$8 sps:$4 sm:$0xff]  }
 0x26e   : > { %10698 = vmatprep.subr.bf16.mxu0 %v14256_v8  ;;  %v14339_v8 = vld [vmem:[%s15775_s16 + $0x1f80] ss:$8 sps:$4 sm:$0xff]  }
 0x270   : > { %9797 = vmatpush1.bf16.msra.mxu1 %v14251_v9  ;;  %v14344_v9 = vld [vmem:[%s15775_s16 + $0x994] ss:$8 sps:$4 sm:$0xff]  }
 0x271   : > { %10699 = vmatpush1.bf16.msra.mxu0 %v14254_v10  ;;  %9798 = vmatprep.subr.bf16.mxu1 %v14259_v11  ;;  %v14347_v10 = vld [vmem:[%s15775_s16 + $0x1f94] ss:$8 sps:$4 sm:$0xff]   ;;  %v14342_v11 = vld [vmem:[%s15775_s16 + $0x990] ss:$8 sps:$4 sm:$0xff]  }
 0x272   : > { %10700 = vmatprep.subr.bf16.mxu0 %v14262_v12  ;;  %v14345_v12 = vld [vmem:[%s15775_s16 + $0x1f90] ss:$8 sps:$4 sm:$0xff]  }
 0x274   : > { %9799 = vmatpush1.bf16.msra.mxu1 %v14257_v14  ;;  %v14350_v14 = vld [vmem:[%s15775_s16 + $0x9a4] ss:$8 sps:$4 sm:$0xff]  }
 0x275   : > { %10701 = vmatpush1.bf16.msra.mxu0 %v14260_v17  ;;  %9800 = vmatprep.subr.bf16.mxu1 %v14265_v20  ;;  %v14353_v17 = vld [vmem:[%s15775_s16 + $0x1fa4] ss:$8 sps:$4 sm:$0xff]   ;;  %v14348_v20 = vld [vmem:[%s15775_s16 + $0x9a0] ss:$8 sps:$4 sm:$0xff]  }
 0x276   : > { %10702 = vmatprep.subr.bf16.mxu0 %v14268_v21  ;;  %v14351_v21 = vld [vmem:[%s15775_s16 + $0x1fa0] ss:$8 sps:$4 sm:$0xff]  }
 0x278   : > { %9801 = vmatpush1.bf16.msra.mxu1 %v14263_v22  ;;  %v14356_v22 = vld [vmem:[%s15775_s16 + $0x9b4] ss:$8 sps:$4 sm:$0xff]  }
 0x279   : > { %10703 = vmatpush1.bf16.msra.mxu0 %v14266_v3  ;;  %9802 = vmatprep.subr.bf16.mxu1 %v14271_v41  ;;  %v14359_v3 = vld [vmem:[%s15775_s16 + $0x1fb4] ss:$8 sps:$4 sm:$0xff]   ;;  %v14354_v41 = vld [vmem:[%s15775_s16 + $0x9b0] ss:$8 sps:$4 sm:$0xff]  }
 0x27a   : > { %10704 = vmatprep.subr.bf16.mxu0 %v14274_v25  ;;  %v14357_v25 = vld [vmem:[%s15775_s16 + $0x1fb0] ss:$8 sps:$4 sm:$0xff]  }
 0x27c   : > { %9803 = vmatpush1.bf16.msra.mxu1 %v14269_v13  ;;  %v14362_v13 = vld [vmem:[%s15775_s16 + $0x9c4] ss:$8 sps:$4 sm:$0xff]  }
 0x27d   : > { %10705 = vmatpush1.bf16.msra.mxu0 %v14272_v53  ;;  %9804 = vmatprep.subr.bf16.mxu1 %v14277_v61  ;;  %v14365_v53 = vld [vmem:[%s15775_s16 + $0x1fc4] ss:$8 sps:$4 sm:$0xff]   ;;  %v14360_v61 = vld [vmem:[%s15775_s16 + $0x9c0] ss:$8 sps:$4 sm:$0xff]  }
 0x27e   : > { %10706 = vmatprep.subr.bf16.mxu0 %v14280_v26  ;;  %v14363_v26 = vld [vmem:[%s15775_s16 + $0x1fc0] ss:$8 sps:$4 sm:$0xff]  }
 0x280   : > { %9805 = vmatpush1.bf16.msra.mxu1 %v14275_v27  ;;  %v14368_v27 = vld [vmem:[%s15775_s16 + $0x9d4] ss:$8 sps:$4 sm:$0xff]  }
 0x281   : > { %10707 = vmatpush1.bf16.msra.mxu0 %v14278_v28  ;;  %9806 = vmatprep.subr.bf16.mxu1 %v14283_v29  ;;  %v14371_v28 = vld [vmem:[%s15775_s16 + $0x1fd4] ss:$8 sps:$4 sm:$0xff]   ;;  %v14366_v29 = vld [vmem:[%s15775_s16 + $0x9d0] ss:$8 sps:$4 sm:$0xff]  }
 0x282   : > { %10708 = vmatprep.subr.bf16.mxu0 %v14286_v30  ;;  %v14369_v30 = vld [vmem:[%s15775_s16 + $0x1fd0] ss:$8 sps:$4 sm:$0xff]  }
 0x284   : > { %9807 = vmatpush1.bf16.msra.mxu1 %v14281_v31  ;;  %v14374_v31 = vld [vmem:[%s15775_s16 + $0x9e4] ss:$8 sps:$4 sm:$0xff]  }
 0x285   : > { %10709 = vmatpush1.bf16.msra.mxu0 %v14284_v32  ;;  %9817 = vmatprep.subr.bf16.mxu1 %v14289_v16  ;;  %v14377_v32 = vld [vmem:[%s15775_s16 + $0x1fe4] ss:$8 sps:$4 sm:$0xff]  }
 0x286   : > { %10719 = vmatprep.subr.bf16.mxu0 %v14293_v34  ;;  %v16590_v16 = vld.sshfl [vmem:[%s15770_s12 + $0x40] sm:$0xff pattern:$0x75316420]  ;;  %v15544_v34 = vld [vmem:[%s15770_s12 + $0x10] sm:$0xff] }
 0x287   : > { %9809 = vmatmul.mubr.bf16.vlgmr.msra.gmra.mrb[0].mxu1 %v16521_v18 }
 0x288   : > { %10711 = vmatmul.mubr.bf16.vlgmr.msra.gmra.mrb[0].mxu0 %v16525_v37  ;;  %9818 = vmatpush1.bf16.msra.mxu1 %v14287_v38  ;;  %v1879_v38 = vcombine.high %v15544_v34, %v15544_v34  ;;  %v14450_v34 = vld [vmem:[%s15775_s16 + $0xab0] ss:$8 sps:$4 sm:$0xff]  }
 0x289   : > { %10720 = vmatpush1.bf16.msra.mxu0 %v14291_v39  ;;  %9819 = vmatprep.subr.bf16.mxu1 %v14296_v40  ;;  %v14372_v39 = vld [vmem:[%s15775_s16 + $0x9e0] ss:$8 sps:$4 sm:$0xff]  }
 0x28a   : > { %10721 = vmatprep.subr.bf16.mxu0 %v14299_v45  ;;  %9849 = vmatprep.mubr.bf16.mxu1 %v1926_v62  ;;  %v14375_v40 = vld [vmem:[%s15775_s16 + $0x1fe0] ss:$8 sps:$4 sm:$0xff]   ;;  %v14380_v45 = vld [vmem:[%s15775_s16 + $0x9f4] ss:$8 sps:$4 sm:$0xff]  }
 0x28b   : > { %10751 = vmatprep.mubr.bf16.mxu0 %v2172_v47  ;;  %v14383_v62 = vld [vmem:[%s15775_s16 + $0x1ff4] ss:$8 sps:$4 sm:$0xff]   ;;  %v16598_v47 = vrot.slane %v1879_v38, %v15826_v50  ;;  %v14453_v38 = vld [vmem:[%s15775_s16 + $0x20b0] ss:$8 sps:$4 sm:$0xff]  }
 0x28c   : > { %9820 = vmatpush1.bf16.msra.mxu1 %v14294_v23  ;;  %v14378_v23 = vld [vmem:[%s15775_s16 + $0x9f0] ss:$8 sps:$4 sm:$0xff]  }
 0x28d   : > { %10722 = vmatpush1.bf16.msra.mxu0 %v14297_v48  ;;  %9821 = vmatprep.subr.bf16.mxu1 %v14302_v33  ;;  %v14381_v48 = vld [vmem:[%s15775_s16 + $0x1ff0] ss:$8 sps:$4 sm:$0xff]   ;;  %v14386_v33 = vld [vmem:[%s15775_s16 + $0xa04] ss:$8 sps:$4 sm:$0xff]  }
 0x28e   : > { %10723 = vmatprep.subr.bf16.mxu0 %v14305_v19  ;;  %v14389_v19 = vld [vmem:[%s15775_s16 + $0x2004] ss:$8 sps:$4 sm:$0xff]  }
 0x290   : > { %9822 = vmatpush1.bf16.msra.mxu1 %v14300_v15  ;;  %v1895_v15 = vcombine.high %v16598_v47, %v16598_v47 }
 0x291   : > { %10724 = vmatpush1.bf16.msra.mxu0 %v14303_v49  ;;  %9823 = vmatprep.subr.bf16.mxu1 %v14308_v36  ;;  %v2188_v49 = vcombine.high %v16590_v16, %v16590_v16  ;;  %v1924_v36 = vcombine.high %v16521_v18, %v16521_v18 }
 0x292   : > { %10725 = vmatprep.subr.bf16.mxu0 %v14311_v51  ;;  %v2170_v51 = vcombine.high %v16525_v37, %v16525_v37  ;;  %v14390_v37 = vld [vmem:[%s15775_s16 + $0xa10] ss:$8 sps:$4 sm:$0xff]  }
 0x293   : > { %v16620_v18 = vrot.slane %v2188_v49, %v15826_v50  ;;  %v14473_v49 = vld [vmem:[%s15775_s16 + $0x20e4] ss:$8 sps:$4 sm:$0xff]  }
 0x294   : > { %9824 = vmatpush1.bf16.msra.mxu1 %v14306_v35  ;;  %v14384_v35 = vld [vmem:[%s15775_s16 + $0xa00] ss:$8 sps:$4 sm:$0xff]  }
 0x295   : > { %10726 = vmatpush1.bf16.msra.mxu0 %v14309_v42  ;;  %9825 = vmatprep.subr.bf16.mxu1 %v14314_v52  ;;  %v14387_v42 = vld [vmem:[%s15775_s16 + $0x2000] ss:$8 sps:$4 sm:$0xff]   ;;  %v14392_v52 = vld [vmem:[%s15775_s16 + $0xa14] ss:$8 sps:$4 sm:$0xff]  }
 0x296   : > { %10727 = vmatprep.subr.bf16.mxu0 %v14317_v54  ;;  %v14395_v54 = vld [vmem:[%s15775_s16 + $0x2014] ss:$8 sps:$4 sm:$0xff]  }
 0x298   : > { %9826 = vmatpush1.bf16.msra.mxu1 %v14312_v55  ;;  %v16617_v55 = vrot.slane %v1895_v15, %v15826_v50  ;;  %v14470_v15 = vld [vmem:[%s15775_s16 + $0xae4] ss:$8 sps:$4 sm:$0xff]  }
 0x299   : > { %10728 = vmatpush1.bf16.msra.mxu0 %v14315_v56  ;;  %9827 = vmatprep.subr.bf16.mxu1 %v14320_v57  ;;  %v14393_v56 = vld [vmem:[%s15775_s16 + $0x2010] ss:$8 sps:$4 sm:$0xff]   ;;  %v14398_v57 = vld [vmem:[%s15775_s16 + $0xa24] ss:$8 sps:$4 sm:$0xff]  }
 0x29a   : > { %10729 = vmatprep.subr.bf16.mxu0 %v14323_v58  ;;  %v14401_v58 = vld [vmem:[%s15775_s16 + $0x2024] ss:$8 sps:$4 sm:$0xff]  }
 0x29c   : > { %9828 = vmatpush1.bf16.msra.mxu1 %v14318_v43  ;;  %v14396_v43 = vld [vmem:[%s15775_s16 + $0xa20] ss:$8 sps:$4 sm:$0xff]  }
 0x29d   : > { %10730 = vmatpush1.bf16.msra.mxu0 %v14321_v63  ;;  %9829 = vmatprep.subr.bf16.mxu1 %v14326_v0  ;;  %v14399_v63 = vld [vmem:[%s15775_s16 + $0x2020] ss:$8 sps:$4 sm:$0xff]   ;;  %v14404_v0 = vld [vmem:[%s15775_s16 + $0xa34] ss:$8 sps:$4 sm:$0xff]  }
 0x29e   : > { %10731 = vmatprep.subr.bf16.mxu0 %v14329_v1  ;;  %v14407_v1 = vld [vmem:[%s15775_s16 + $0x2034] ss:$8 sps:$4 sm:$0xff]  }
 0x2a0   : > { %9830 = vmatpush1.bf16.msra.mxu1 %v14324_v2  ;;  %v14402_v2 = vld [vmem:[%s15775_s16 + $0xa30] ss:$8 sps:$4 sm:$0xff]  }
 0x2a1   : > { %10732 = vmatpush1.bf16.msra.mxu0 %v14327_v46  ;;  %9831 = vmatprep.subr.bf16.mxu1 %v14332_v24  ;;  %v14405_v46 = vld [vmem:[%s15775_s16 + $0x2030] ss:$8 sps:$4 sm:$0xff]   ;;  %v14410_v24 = vld [vmem:[%s15775_s16 + $0xa44] ss:$8 sps:$4 sm:$0xff]  }
 0x2a2   : > { %10733 = vmatprep.subr.bf16.mxu0 %v14335_v4  ;;  %v14413_v4 = vld [vmem:[%s15775_s16 + $0x2044] ss:$8 sps:$4 sm:$0xff]  }
 0x2a4   : > { %9832 = vmatpush1.bf16.msra.mxu1 %v14330_v59  ;;  %v14408_v59 = vld [vmem:[%s15775_s16 + $0xa40] ss:$8 sps:$4 sm:$0xff]  }
 0x2a5   : > { %10734 = vmatpush1.bf16.msra.mxu0 %v14333_v5  ;;  %9833 = vmatprep.subr.bf16.mxu1 %v14338_v60  ;;  %v14411_v5 = vld [vmem:[%s15775_s16 + $0x2040] ss:$8 sps:$4 sm:$0xff]   ;;  %v14416_v60 = vld [vmem:[%s15775_s16 + $0xa54] ss:$8 sps:$4 sm:$0xff]  }
 0x2a6   : > { %10735 = vmatprep.subr.bf16.mxu0 %v14341_v6  ;;  %v14419_v6 = vld [vmem:[%s15775_s16 + $0x2054] ss:$8 sps:$4 sm:$0xff]  }
 0x2a8   : > { %9834 = vmatpush1.bf16.msra.mxu1 %v14336_v7  ;;  %v14414_v7 = vld [vmem:[%s15775_s16 + $0xa50] ss:$8 sps:$4 sm:$0xff]  }
 0x2a9   : > { %10736 = vmatpush1.bf16.msra.mxu0 %v14339_v8  ;;  %9835 = vmatprep.subr.bf16.mxu1 %v14344_v9  ;;  %v14417_v8 = vld [vmem:[%s15775_s16 + $0x2050] ss:$8 sps:$4 sm:$0xff]   ;;  %v14422_v9 = vld [vmem:[%s15775_s16 + $0xa64] ss:$8 sps:$4 sm:$0xff]  }
 0x2aa   : > { %10737 = vmatprep.subr.bf16.mxu0 %v14347_v10  ;;  %v14425_v10 = vld [vmem:[%s15775_s16 + $0x2064] ss:$8 sps:$4 sm:$0xff]  }
 0x2ac   : > { %9836 = vmatpush1.bf16.msra.mxu1 %v14342_v11  ;;  %v14420_v11 = vld [vmem:[%s15775_s16 + $0xa60] ss:$8 sps:$4 sm:$0xff]  }
 0x2ad   : > { %10738 = vmatpush1.bf16.msra.mxu0 %v14345_v12  ;;  %9837 = vmatprep.subr.bf16.mxu1 %v14350_v14  ;;  %v14423_v12 = vld [vmem:[%s15775_s16 + $0x2060] ss:$8 sps:$4 sm:$0xff]   ;;  %v14428_v14 = vld [vmem:[%s15775_s16 + $0xa74] ss:$8 sps:$4 sm:$0xff]  }
 0x2ae   : > { %10739 = vmatprep.subr.bf16.mxu0 %v14353_v17  ;;  %v14431_v17 = vld [vmem:[%s15775_s16 + $0x2074] ss:$8 sps:$4 sm:$0xff]  }
 0x2b0   : > { %9838 = vmatpush1.bf16.msra.mxu1 %v14348_v20  ;;  %v14426_v20 = vld [vmem:[%s15775_s16 + $0xa70] ss:$8 sps:$4 sm:$0xff]  }
 0x2b1   : > { %10740 = vmatpush1.bf16.msra.mxu0 %v14351_v21  ;;  %9839 = vmatprep.subr.bf16.mxu1 %v14356_v22  ;;  %v14429_v21 = vld [vmem:[%s15775_s16 + $0x2070] ss:$8 sps:$4 sm:$0xff]   ;;  %v14434_v22 = vld [vmem:[%s15775_s16 + $0xa84] ss:$8 sps:$4 sm:$0xff]  }
 0x2b2   : > { %10741 = vmatprep.subr.bf16.mxu0 %v14359_v3  ;;  %v14437_v3 = vld [vmem:[%s15775_s16 + $0x2084] ss:$8 sps:$4 sm:$0xff]  }
 0x2b4   : > { %9840 = vmatpush1.bf16.msra.mxu1 %v14354_v41  ;;  %v14432_v41 = vld [vmem:[%s15775_s16 + $0xa80] ss:$8 sps:$4 sm:$0xff]  }
 0x2b5   : > { %10742 = vmatpush1.bf16.msra.mxu0 %v14357_v25  ;;  %9841 = vmatprep.subr.bf16.mxu1 %v14362_v13  ;;  %v14435_v25 = vld [vmem:[%s15775_s16 + $0x2080] ss:$8 sps:$4 sm:$0xff]   ;;  %v14440_v13 = vld [vmem:[%s15775_s16 + $0xa94] ss:$8 sps:$4 sm:$0xff]  }
 0x2b6   : > { %10743 = vmatprep.subr.bf16.mxu0 %v14365_v53  ;;  %v14443_v53 = vld [vmem:[%s15775_s16 + $0x2094] ss:$8 sps:$4 sm:$0xff]  }
 0x2b8   : > { %9842 = vmatpush1.bf16.msra.mxu1 %v14360_v61  ;;  %v14438_v61 = vld [vmem:[%s15775_s16 + $0xa90] ss:$8 sps:$4 sm:$0xff]  }
 0x2b9   : > { %10744 = vmatpush1.bf16.msra.mxu0 %v14363_v26  ;;  %9843 = vmatprep.subr.bf16.mxu1 %v14368_v27  ;;  %v14441_v26 = vld [vmem:[%s15775_s16 + $0x2090] ss:$8 sps:$4 sm:$0xff]   ;;  %v14446_v27 = vld [vmem:[%s15775_s16 + $0xaa4] ss:$8 sps:$4 sm:$0xff]  }
 0x2ba   : > { %10745 = vmatprep.subr.bf16.mxu0 %v14371_v28  ;;  %v14449_v28 = vld [vmem:[%s15775_s16 + $0x20a4] ss:$8 sps:$4 sm:$0xff]  }
 0x2bc   : > { %9844 = vmatpush1.bf16.msra.mxu1 %v14366_v29  ;;  %v14444_v29 = vld [vmem:[%s15775_s16 + $0xaa0] ss:$8 sps:$4 sm:$0xff]  }
 0x2bd   : > { %10746 = vmatpush1.bf16.msra.mxu0 %v14369_v30  ;;  %9845 = vmatprep.subr.bf16.mxu1 %v14374_v31  ;;  %v14447_v30 = vld [vmem:[%s15775_s16 + $0x20a0] ss:$8 sps:$4 sm:$0xff]   ;;  %v14452_v31 = vld [vmem:[%s15775_s16 + $0xab4] ss:$8 sps:$4 sm:$0xff]  }
 0x2be   : > { %10747 = vmatprep.subr.bf16.mxu0 %v14377_v32  ;;  %v14455_v32 = vld [vmem:[%s15775_s16 + $0x20b4] ss:$8 sps:$4 sm:$0xff]  }
 0x2c0   : > { %9846 = vmatpush1.bf16.msra.mxu1 %v14372_v39  ;;  %v14458_v39 = vld [vmem:[%s15775_s16 + $0xac4] ss:$8 sps:$4 sm:$0xff]  }
 0x2c1   : > { %10748 = vmatpush1.bf16.msra.mxu0 %v14375_v40  ;;  %9847 = vmatprep.subr.bf16.mxu1 %v14380_v45  ;;  %v14461_v40 = vld [vmem:[%s15775_s16 + $0x20c4] ss:$8 sps:$4 sm:$0xff]   ;;  %v14456_v45 = vld [vmem:[%s15775_s16 + $0xac0] ss:$8 sps:$4 sm:$0xff]  }
 0x2c2   : > { %10749 = vmatprep.subr.bf16.mxu0 %v14383_v62  ;;  %v14459_v62 = vld [vmem:[%s15775_s16 + $0x20c0] ss:$8 sps:$4 sm:$0xff]  }
 0x2c4   : > { %9848 = vmatpush1.bf16.msra.mxu1 %v14378_v23  ;;  %v14464_v23 = vld [vmem:[%s15775_s16 + $0xad4] ss:$8 sps:$4 sm:$0xff]  }
 0x2c5   : > { %10750 = vmatpush1.bf16.msra.mxu0 %v14381_v48  ;;  %9858 = vmatprep.subr.bf16.mxu1 %v14386_v33  ;;  %v14467_v48 = vld [vmem:[%s15775_s16 + $0x20d4] ss:$8 sps:$4 sm:$0xff]   ;;  %v14462_v33 = vld [vmem:[%s15775_s16 + $0xad0] ss:$8 sps:$4 sm:$0xff]  }
 0x2c6   : > { %10760 = vmatprep.subr.bf16.mxu0 %v14389_v19  ;;  %v14465_v19 = vld [vmem:[%s15775_s16 + $0x20d0] ss:$8 sps:$4 sm:$0xff]  }
 0x2c7   : > { %9850 = vmatmul.mubr.bf16.vlgmr.msra.gmra.mrb[0].mxu1 %v1924_v36  ;;  %v14468_v36 = vld [vmem:[%s15775_s16 + $0xae0] ss:$8 sps:$4 sm:$0xff]  }
 0x2c8   : > { %10752 = vmatmul.mubr.bf16.vlgmr.msra.gmra.mrb[0].mxu0 %v2170_v51  ;;  %9859 = vmatpush1.bf16.msra.mxu1 %v14384_v35  ;;  %v14471_v51 = vld [vmem:[%s15775_s16 + $0x20e0] ss:$8 sps:$4 sm:$0xff]   ;;  %v14476_v35 = vld [vmem:[%s15775_s16 + $0xaf4] ss:$8 sps:$4 sm:$0xff]  }
 0x2c9   : > { %10761 = vmatpush1.bf16.msra.mxu0 %v14387_v42  ;;  %9860 = vmatprep.subr.bf16.mxu1 %v14392_v52  ;;  %v14479_v42 = vld [vmem:[%s15775_s16 + $0x20f4] ss:$8 sps:$4 sm:$0xff]   ;;  %v14474_v52 = vld [vmem:[%s15775_s16 + $0xaf0] ss:$8 sps:$4 sm:$0xff]  }
 0x2ca   : > { %10762 = vmatprep.subr.bf16.mxu0 %v14395_v54  ;;  %9890 = vmatprep.mubr.bf16.mxu1 %v16617_v55  ;;  %v14477_v54 = vld [vmem:[%s15775_s16 + $0x20f0] ss:$8 sps:$4 sm:$0xff]  }
 0x2cb   : > { %10792 = vmatprep.mubr.bf16.mxu0 %v16620_v18 }
 0x2cc   : > { %9861 = vmatpush1.bf16.msra.mxu1 %v14390_v37  ;;  %v14483_v37 = vld [vmem:[%s15775_s16 + $0xb04] ss:$8 sps:$4 sm:$0xff]  }
 0x2cd   : > { %10763 = vmatpush1.bf16.msra.mxu0 %v14393_v56  ;;  %9862 = vmatprep.subr.bf16.mxu1 %v14398_v57  ;;  %v14486_v56 = vld [vmem:[%s15775_s16 + $0x2104] ss:$8 sps:$4 sm:$0xff]   ;;  %v16686_v57 = vrot.slane %v16598_v47, %v15826_v50  ;;  %v1927_v47 = vcombine.high %v16617_v55, %v16617_v55 }
 0x2ce   : > { %10764 = vmatprep.subr.bf16.mxu0 %v14401_v58  ;;  %v16690_v58 = vrot.slane %v16590_v16, %v15826_v50  ;;  %v14487_v16 = vld [vmem:[%s15775_s16 + $0xb10] ss:$8 sps:$4 sm:$0xff]   ;;  %v14495_v55 = vld [vmem:[%s15775_s16 + $0xb24] ss:$8 sps:$4 sm:$0xff]  }
 0x2d0   : > { %9863 = vmatpush1.bf16.msra.mxu1 %v14396_v43  ;;  %v14481_v43 = vld [vmem:[%s15775_s16 + $0xb00] ss:$8 sps:$4 sm:$0xff]  }
 0x2d1   : > { %10765 = vmatpush1.bf16.msra.mxu0 %v14399_v63  ;;  %9864 = vmatprep.subr.bf16.mxu1 %v14404_v0  ;;  %v14484_v63 = vld [vmem:[%s15775_s16 + $0x2100] ss:$8 sps:$4 sm:$0xff]   ;;  %v14489_v0 = vld [vmem:[%s15775_s16 + $0xb14] ss:$8 sps:$4 sm:$0xff]  }
 0x2d2   : > { %10766 = vmatprep.subr.bf16.mxu0 %v14407_v1  ;;  %v14492_v1 = vld [vmem:[%s15775_s16 + $0x2114] ss:$8 sps:$4 sm:$0xff]  }
 0x2d4   : > { %9865 = vmatpush1.bf16.msra.mxu1 %v14402_v2  ;;  %v2220_v2 = vcombine.high %v16620_v18, %v16620_v18  ;;  %v14493_v18 = vld [vmem:[%s15775_s16 + $0xb20] ss:$8 sps:$4 sm:$0xff]  }
 0x2d5   : > { %10767 = vmatpush1.bf16.msra.mxu0 %v14405_v46  ;;  %9866 = vmatprep.subr.bf16.mxu1 %v14410_v24  ;;  %v14490_v46 = vld [vmem:[%s15775_s16 + $0x2110] ss:$8 sps:$4 sm:$0xff]   ;;  %v14498_v24 = vld [vmem:[%s15775_s16 + $0x2124] ss:$8 sps:$4 sm:$0xff]  }
 0x2d6   : > { %10768 = vmatprep.subr.bf16.mxu0 %v14413_v4  ;;  %v14496_v4 = vld [vmem:[%s15775_s16 + $0x2120] ss:$8 sps:$4 sm:$0xff]  }
 0x2d8   : > { %9867 = vmatpush1.bf16.msra.mxu1 %v14408_v59  ;;  %v14501_v59 = vld [vmem:[%s15775_s16 + $0xb34] ss:$8 sps:$4 sm:$0xff]  }
 0x2d9   : > { %10769 = vmatpush1.bf16.msra.mxu0 %v14411_v5  ;;  %9868 = vmatprep.subr.bf16.mxu1 %v14416_v60  ;;  %v14504_v5 = vld [vmem:[%s15775_s16 + $0x2134] ss:$8 sps:$4 sm:$0xff]   ;;  %v14499_v60 = vld [vmem:[%s15775_s16 + $0xb30] ss:$8 sps:$4 sm:$0xff]  }
 0x2da   : > { %10770 = vmatprep.subr.bf16.mxu0 %v14419_v6  ;;  %v14502_v6 = vld [vmem:[%s15775_s16 + $0x2130] ss:$8 sps:$4 sm:$0xff]  }
 0x2dc   : > { %9869 = vmatpush1.bf16.msra.mxu1 %v14414_v7  ;;  %v14507_v7 = vld [vmem:[%s15775_s16 + $0xb44] ss:$8 sps:$4 sm:$0xff]  }
 0x2dd   : > { %10771 = vmatpush1.bf16.msra.mxu0 %v14417_v8  ;;  %9870 = vmatprep.subr.bf16.mxu1 %v14422_v9  ;;  %v14510_v8 = vld [vmem:[%s15775_s16 + $0x2144] ss:$8 sps:$4 sm:$0xff]   ;;  %v14505_v9 = vld [vmem:[%s15775_s16 + $0xb40] ss:$8 sps:$4 sm:$0xff]  }
 0x2de   : > { %10772 = vmatprep.subr.bf16.mxu0 %v14425_v10  ;;  %v14508_v10 = vld [vmem:[%s15775_s16 + $0x2140] ss:$8 sps:$4 sm:$0xff]  }
 0x2e0   : > { %9871 = vmatpush1.bf16.msra.mxu1 %v14420_v11  ;;  %v14513_v11 = vld [vmem:[%s15775_s16 + $0xb54] ss:$8 sps:$4 sm:$0xff]  }
 0x2e1   : > { %10773 = vmatpush1.bf16.msra.mxu0 %v14423_v12  ;;  %9872 = vmatprep.subr.bf16.mxu1 %v14428_v14  ;;  %v14516_v12 = vld [vmem:[%s15775_s16 + $0x2154] ss:$8 sps:$4 sm:$0xff]   ;;  %v14511_v14 = vld [vmem:[%s15775_s16 + $0xb50] ss:$8 sps:$4 sm:$0xff]  }
 0x2e2   : > { %10774 = vmatprep.subr.bf16.mxu0 %v14431_v17  ;;  %v14514_v17 = vld [vmem:[%s15775_s16 + $0x2150] ss:$8 sps:$4 sm:$0xff]  }
 0x2e4   : > { %9873 = vmatpush1.bf16.msra.mxu1 %v14426_v20  ;;  %v14519_v20 = vld [vmem:[%s15775_s16 + $0xb64] ss:$8 sps:$4 sm:$0xff]  }
 0x2e5   : > { %10775 = vmatpush1.bf16.msra.mxu0 %v14429_v21  ;;  %9874 = vmatprep.subr.bf16.mxu1 %v14434_v22  ;;  %v14522_v21 = vld [vmem:[%s15775_s16 + $0x2164] ss:$8 sps:$4 sm:$0xff]   ;;  %v14517_v22 = vld [vmem:[%s15775_s16 + $0xb60] ss:$8 sps:$4 sm:$0xff]  }
 0x2e6   : > { %10776 = vmatprep.subr.bf16.mxu0 %v14437_v3  ;;  %v14520_v3 = vld [vmem:[%s15775_s16 + $0x2160] ss:$8 sps:$4 sm:$0xff]  }
 0x2e8   : > { %9875 = vmatpush1.bf16.msra.mxu1 %v14432_v41  ;;  %v14525_v41 = vld [vmem:[%s15775_s16 + $0xb74] ss:$8 sps:$4 sm:$0xff]  }
 0x2e9   : > { %10777 = vmatpush1.bf16.msra.mxu0 %v14435_v25  ;;  %9876 = vmatprep.subr.bf16.mxu1 %v14440_v13  ;;  %v14528_v25 = vld [vmem:[%s15775_s16 + $0x2174] ss:$8 sps:$4 sm:$0xff]   ;;  %v14523_v13 = vld [vmem:[%s15775_s16 + $0xb70] ss:$8 sps:$4 sm:$0xff]  }
 0x2ea   : > { %10778 = vmatprep.subr.bf16.mxu0 %v14443_v53  ;;  %v14526_v53 = vld [vmem:[%s15775_s16 + $0x2170] ss:$8 sps:$4 sm:$0xff]  }
 0x2ec   : > { %9877 = vmatpush1.bf16.msra.mxu1 %v14438_v61  ;;  %v14531_v61 = vld [vmem:[%s15775_s16 + $0xb84] ss:$8 sps:$4 sm:$0xff]  }
 0x2ed   : > { %10779 = vmatpush1.bf16.msra.mxu0 %v14441_v26  ;;  %9878 = vmatprep.subr.bf16.mxu1 %v14446_v27  ;;  %v14534_v26 = vld [vmem:[%s15775_s16 + $0x2184] ss:$8 sps:$4 sm:$0xff]   ;;  %v14529_v27 = vld [vmem:[%s15775_s16 + $0xb80] ss:$8 sps:$4 sm:$0xff]  }
 0x2ee   : > { %10780 = vmatprep.subr.bf16.mxu0 %v14449_v28  ;;  %v14532_v28 = vld [vmem:[%s15775_s16 + $0x2180] ss:$8 sps:$4 sm:$0xff]  }
 0x2f0   : > { %9879 = vmatpush1.bf16.msra.mxu1 %v14444_v29  ;;  %v14537_v29 = vld [vmem:[%s15775_s16 + $0xb94] ss:$8 sps:$4 sm:$0xff]  }
 0x2f1   : > { %10781 = vmatpush1.bf16.msra.mxu0 %v14447_v30  ;;  %9880 = vmatprep.subr.bf16.mxu1 %v14452_v31  ;;  %v14540_v30 = vld [vmem:[%s15775_s16 + $0x2194] ss:$8 sps:$4 sm:$0xff]   ;;  %v14535_v31 = vld [vmem:[%s15775_s16 + $0xb90] ss:$8 sps:$4 sm:$0xff]  }
 0x2f2   : > { %10782 = vmatprep.subr.bf16.mxu0 %v14455_v32  ;;  %v14538_v32 = vld [vmem:[%s15775_s16 + $0x2190] ss:$8 sps:$4 sm:$0xff]  }
 0x2f4   : > { %9881 = vmatpush1.bf16.msra.mxu1 %v14450_v34  ;;  %v14543_v34 = vld [vmem:[%s15775_s16 + $0xba4] ss:$8 sps:$4 sm:$0xff]  }
 0x2f5   : > { %10783 = vmatpush1.bf16.msra.mxu0 %v14453_v38  ;;  %9882 = vmatprep.subr.bf16.mxu1 %v14458_v39  ;;  %v14546_v38 = vld [vmem:[%s15775_s16 + $0x21a4] ss:$8 sps:$4 sm:$0xff]   ;;  %v14541_v39 = vld [vmem:[%s15775_s16 + $0xba0] ss:$8 sps:$4 sm:$0xff]  }
 0x2f6   : > { %10784 = vmatprep.subr.bf16.mxu0 %v14461_v40  ;;  %v14544_v40 = vld [vmem:[%s15775_s16 + $0x21a0] ss:$8 sps:$4 sm:$0xff]  }
 0x2f8   : > { %9883 = vmatpush1.bf16.msra.mxu1 %v14456_v45  ;;  %v14549_v45 = vld [vmem:[%s15775_s16 + $0xbb4] ss:$8 sps:$4 sm:$0xff]  }
 0x2f9   : > { %10785 = vmatpush1.bf16.msra.mxu0 %v14459_v62  ;;  %9884 = vmatprep.subr.bf16.mxu1 %v14464_v23  ;;  %v14552_v62 = vld [vmem:[%s15775_s16 + $0x21b4] ss:$8 sps:$4 sm:$0xff]   ;;  %v14547_v23 = vld [vmem:[%s15775_s16 + $0xbb0] ss:$8 sps:$4 sm:$0xff]  }
 0x2fa   : > { %10786 = vmatprep.subr.bf16.mxu0 %v14467_v48  ;;  %v14550_v48 = vld [vmem:[%s15775_s16 + $0x21b0] ss:$8 sps:$4 sm:$0xff]  }
 0x2fc   : > { %9885 = vmatpush1.bf16.msra.mxu1 %v14462_v33  ;;  %v14555_v33 = vld [vmem:[%s15775_s16 + $0xbc4] ss:$8 sps:$4 sm:$0xff]  }
 0x2fd   : > { %10787 = vmatpush1.bf16.msra.mxu0 %v14465_v19  ;;  %9886 = vmatprep.subr.bf16.mxu1 %v14470_v15  ;;  %v14558_v19 = vld [vmem:[%s15775_s16 + $0x21c4] ss:$8 sps:$4 sm:$0xff]   ;;  %v14553_v15 = vld [vmem:[%s15775_s16 + $0xbc0] ss:$8 sps:$4 sm:$0xff]  }
 0x2fe   : > { %10788 = vmatprep.subr.bf16.mxu0 %v14473_v49  ;;  %v14556_v49 = vld [vmem:[%s15775_s16 + $0x21c0] ss:$8 sps:$4 sm:$0xff]  }
 0x300   : > { %9887 = vmatpush1.bf16.msra.mxu1 %v14468_v36  ;;  %v14561_v36 = vld [vmem:[%s15775_s16 + $0xbd4] ss:$8 sps:$4 sm:$0xff]  }
 0x301   : > { %10789 = vmatpush1.bf16.msra.mxu0 %v14471_v51  ;;  %9888 = vmatprep.subr.bf16.mxu1 %v14476_v35  ;;  %v14564_v51 = vld [vmem:[%s15775_s16 + $0x21d4] ss:$8 sps:$4 sm:$0xff]   ;;  %v14559_v35 = vld [vmem:[%s15775_s16 + $0xbd0] ss:$8 sps:$4 sm:$0xff]  }
 0x302   : > { %10790 = vmatprep.subr.bf16.mxu0 %v14479_v42  ;;  %v14562_v42 = vld [vmem:[%s15775_s16 + $0x21d0] ss:$8 sps:$4 sm:$0xff]  }
 0x304   : > { %9889 = vmatpush1.bf16.msra.mxu1 %v14474_v52  ;;  %v14567_v52 = vld [vmem:[%s15775_s16 + $0xbe4] ss:$8 sps:$4 sm:$0xff]  }
 0x305   : > { %10791 = vmatpush1.bf16.msra.mxu0 %v14477_v54  ;;  %9899 = vmatprep.subr.bf16.mxu1 %v14483_v37  ;;  %v14570_v54 = vld [vmem:[%s15775_s16 + $0x21e4] ss:$8 sps:$4 sm:$0xff]   ;;  %v16755_v37 = vld [vmem:[%s15770_s12 + $0x18] sm:$0xff] }
 0x306   : > { %10801 = vmatprep.subr.bf16.mxu0 %v14486_v56  ;;  %v15545_v56 = vld [vmem:[%s15770_s12 + $0x40] sm:$0xff] }
 0x307   : > { %9891 = vmatmul.mubr.bf16.vlgmr.msra.gmra.mrb[0].mxu1 %v16686_v57 }
 0x308   : > { %10793 = vmatmul.mubr.bf16.vlgmr.msra.gmra.mrb[0].mxu0 %v16690_v58  ;;  %9900 = vmatpush1.bf16.msra.mxu1 %v14481_v43  ;;  %v2173_v43 = vcombine.high %v15545_v56, %v15545_v56  ;;  %v14648_v56 = vld [vmem:[%s15775_s16 + $0x22b4] ss:$8 sps:$4 sm:$0xff]  }
 0x309   : > { %10802 = vmatpush1.bf16.msra.mxu0 %v14484_v63  ;;  %9901 = vmatprep.subr.bf16.mxu1 %v14489_v0  ;;  %v14565_v63 = vld [vmem:[%s15775_s16 + $0xbe0] ss:$8 sps:$4 sm:$0xff]  }
 0x30a   : > { %10803 = vmatprep.subr.bf16.mxu0 %v14492_v1  ;;  %9931 = vmatprep.mubr.bf16.mxu1 %v1927_v47  ;;  %v14568_v0 = vld [vmem:[%s15775_s16 + $0x21e0] ss:$8 sps:$4 sm:$0xff]   ;;  %v14573_v1 = vld [vmem:[%s15775_s16 + $0xbf4] ss:$8 sps:$4 sm:$0xff]  }
 0x30b   : > { %10833 = vmatprep.mubr.bf16.mxu0 %v2220_v2  ;;  %v14576_v47 = vld [vmem:[%s15775_s16 + $0x21f4] ss:$8 sps:$4 sm:$0xff]   ;;  %v16764_v2 = vrot.slane %v16755_v37, %v15826_v50 }
 0x30c   : > { %9902 = vmatpush1.bf16.msra.mxu1 %v14487_v16  ;;  %v16767_v16 = vrot.slane %v2173_v43, %v15826_v50  ;;  %v14643_v43 = vld [vmem:[%s15775_s16 + $0xcb0] ss:$8 sps:$4 sm:$0xff]  }
 0x30d   : > { %10804 = vmatpush1.bf16.msra.mxu0 %v14490_v46  ;;  %9903 = vmatprep.subr.bf16.mxu1 %v14495_v55  ;;  %v14571_v46 = vld [vmem:[%s15775_s16 + $0xbf0] ss:$8 sps:$4 sm:$0xff]  }
 0x30e   : > { %10805 = vmatprep.subr.bf16.mxu0 %v14498_v24  ;;  %v14574_v55 = vld [vmem:[%s15775_s16 + $0x21f0] ss:$8 sps:$4 sm:$0xff]   ;;  %v14579_v24 = vld [vmem:[%s15775_s16 + $0xc04] ss:$8 sps:$4 sm:$0xff]  }
 0x310   : > { %9904 = vmatpush1.bf16.msra.mxu1 %v14493_v18  ;;  %v14582_v18 = vld [vmem:[%s15775_s16 + $0x2204] ss:$8 sps:$4 sm:$0xff]  }
 0x311   : > { %10806 = vmatpush1.bf16.msra.mxu0 %v14496_v4  ;;  %9905 = vmatprep.subr.bf16.mxu1 %v14501_v59  ;;  %v1943_v4 = vcombine.high %v16764_v2, %v16764_v2  ;;  %v2189_v59 = vcombine.high %v16767_v16, %v16767_v16 }
 0x312   : > { %10807 = vmatprep.subr.bf16.mxu0 %v14504_v5  ;;  %v1925_v5 = vcombine.high %v16686_v57, %v16686_v57 }
 0x313   : > { %v16789_v57 = vrot.slane %v2189_v59, %v15826_v50  ;;  %v14663_v59 = vld [vmem:[%s15775_s16 + $0xce4] ss:$8 sps:$4 sm:$0xff]  }
 0x314   : > { %9906 = vmatpush1.bf16.msra.mxu1 %v14499_v60  ;;  %v2218_v60 = vcombine.high %v16690_v58, %v16690_v58  ;;  %v14583_v58 = vld [vmem:[%s15775_s16 + $0xc10] ss:$8 sps:$4 sm:$0xff]  }
 0x315   : > { %10808 = vmatpush1.bf16.msra.mxu0 %v14502_v6  ;;  %9907 = vmatprep.subr.bf16.mxu1 %v14507_v7  ;;  %v14577_v6 = vld [vmem:[%s15775_s16 + $0xc00] ss:$8 sps:$4 sm:$0xff]  }
 0x316   : > { %10809 = vmatprep.subr.bf16.mxu0 %v14510_v8  ;;  %v14580_v7 = vld [vmem:[%s15775_s16 + $0x2200] ss:$8 sps:$4 sm:$0xff]   ;;  %v14585_v8 = vld [vmem:[%s15775_s16 + $0xc14] ss:$8 sps:$4 sm:$0xff]  }
 0x318   : > { %9908 = vmatpush1.bf16.msra.mxu1 %v14505_v9  ;;  %v14588_v9 = vld [vmem:[%s15775_s16 + $0x2214] ss:$8 sps:$4 sm:$0xff]  }
 0x319   : > { %10810 = vmatpush1.bf16.msra.mxu0 %v14508_v10  ;;  %9909 = vmatprep.subr.bf16.mxu1 %v14513_v11  ;;  %v16786_v10 = vrot.slane %v1943_v4, %v15826_v50  ;;  %v14586_v11 = vld [vmem:[%s15775_s16 + $0x2210] ss:$8 sps:$4 sm:$0xff]  }
 0x31a   : > { %10811 = vmatprep.subr.bf16.mxu0 %v14516_v12  ;;  %v14591_v12 = vld [vmem:[%s15775_s16 + $0xc24] ss:$8 sps:$4 sm:$0xff]   ;;  %v14658_v4 = vld [vmem:[%s15775_s16 + $0x22d0] ss:$8 sps:$4 sm:$0xff]  }
 0x31c   : > { %9910 = vmatpush1.bf16.msra.mxu1 %v14511_v14  ;;  %v14594_v14 = vld [vmem:[%s15775_s16 + $0x2224] ss:$8 sps:$4 sm:$0xff]  }
 0x31d   : > { %10812 = vmatpush1.bf16.msra.mxu0 %v14514_v17  ;;  %9911 = vmatprep.subr.bf16.mxu1 %v14519_v20  ;;  %v14589_v17 = vld [vmem:[%s15775_s16 + $0xc20] ss:$8 sps:$4 sm:$0xff]  }
 0x31e   : > { %10813 = vmatprep.subr.bf16.mxu0 %v14522_v21  ;;  %v14592_v20 = vld [vmem:[%s15775_s16 + $0x2220] ss:$8 sps:$4 sm:$0xff]   ;;  %v14597_v21 = vld [vmem:[%s15775_s16 + $0xc34] ss:$8 sps:$4 sm:$0xff]  }
 0x320   : > { %9912 = vmatpush1.bf16.msra.mxu1 %v14517_v22  ;;  %v14600_v22 = vld [vmem:[%s15775_s16 + $0x2234] ss:$8 sps:$4 sm:$0xff]  }
 0x321   : > { %10814 = vmatpush1.bf16.msra.mxu0 %v14520_v3  ;;  %9913 = vmatprep.subr.bf16.mxu1 %v14525_v41  ;;  %v14595_v3 = vld [vmem:[%s15775_s16 + $0xc30] ss:$8 sps:$4 sm:$0xff]  }
 0x322   : > { %10815 = vmatprep.subr.bf16.mxu0 %v14528_v25  ;;  %v14598_v41 = vld [vmem:[%s15775_s16 + $0x2230] ss:$8 sps:$4 sm:$0xff]   ;;  %v14603_v25 = vld [vmem:[%s15775_s16 + $0xc44] ss:$8 sps:$4 sm:$0xff]  }
 0x324   : > { %9914 = vmatpush1.bf16.msra.mxu1 %v14523_v13  ;;  %v14606_v13 = vld [vmem:[%s15775_s16 + $0x2244] ss:$8 sps:$4 sm:$0xff]  }
 0x325   : > { %10816 = vmatpush1.bf16.msra.mxu0 %v14526_v53  ;;  %9915 = vmatprep.subr.bf16.mxu1 %v14531_v61  ;;  %v14601_v53 = vld [vmem:[%s15775_s16 + $0xc40] ss:$8 sps:$4 sm:$0xff]  }
 0x326   : > { %10817 = vmatprep.subr.bf16.mxu0 %v14534_v26  ;;  %v14604_v61 = vld [vmem:[%s15775_s16 + $0x2240] ss:$8 sps:$4 sm:$0xff]   ;;  %v14609_v26 = vld [vmem:[%s15775_s16 + $0xc54] ss:$8 sps:$4 sm:$0xff]  }
 0x328   : > { %9916 = vmatpush1.bf16.msra.mxu1 %v14529_v27  ;;  %v14612_v27 = vld [vmem:[%s15775_s16 + $0x2254] ss:$8 sps:$4 sm:$0xff]  }
 0x329   : > { %10818 = vmatpush1.bf16.msra.mxu0 %v14532_v28  ;;  %9917 = vmatprep.subr.bf16.mxu1 %v14537_v29  ;;  %v14607_v28 = vld [vmem:[%s15775_s16 + $0xc50] ss:$8 sps:$4 sm:$0xff]  }
 0x32a   : > { %10819 = vmatprep.subr.bf16.mxu0 %v14540_v30  ;;  %v14610_v29 = vld [vmem:[%s15775_s16 + $0x2250] ss:$8 sps:$4 sm:$0xff]   ;;  %v14615_v30 = vld [vmem:[%s15775_s16 + $0xc64] ss:$8 sps:$4 sm:$0xff]  }
 0x32c   : > { %9918 = vmatpush1.bf16.msra.mxu1 %v14535_v31  ;;  %v14618_v31 = vld [vmem:[%s15775_s16 + $0x2264] ss:$8 sps:$4 sm:$0xff]  }
 0x32d   : > { %10820 = vmatpush1.bf16.msra.mxu0 %v14538_v32  ;;  %9919 = vmatprep.subr.bf16.mxu1 %v14543_v34  ;;  %v14613_v32 = vld [vmem:[%s15775_s16 + $0xc60] ss:$8 sps:$4 sm:$0xff]  }
 0x32e   : > { %10821 = vmatprep.subr.bf16.mxu0 %v14546_v38  ;;  %v14616_v34 = vld [vmem:[%s15775_s16 + $0x2260] ss:$8 sps:$4 sm:$0xff]   ;;  %v14621_v38 = vld [vmem:[%s15775_s16 + $0xc74] ss:$8 sps:$4 sm:$0xff]  }
 0x330   : > { %9920 = vmatpush1.bf16.msra.mxu1 %v14541_v39  ;;  %v14624_v39 = vld [vmem:[%s15775_s16 + $0x2274] ss:$8 sps:$4 sm:$0xff]  }
 0x331   : > { %10822 = vmatpush1.bf16.msra.mxu0 %v14544_v40  ;;  %9921 = vmatprep.subr.bf16.mxu1 %v14549_v45  ;;  %v14619_v40 = vld [vmem:[%s15775_s16 + $0xc70] ss:$8 sps:$4 sm:$0xff]  }
 0x332   : > { %10823 = vmatprep.subr.bf16.mxu0 %v14552_v62  ;;  %v14622_v45 = vld [vmem:[%s15775_s16 + $0x2270] ss:$8 sps:$4 sm:$0xff]   ;;  %v14627_v62 = vld [vmem:[%s15775_s16 + $0xc84] ss:$8 sps:$4 sm:$0xff]  }
 0x334   : > { %9922 = vmatpush1.bf16.msra.mxu1 %v14547_v23  ;;  %v14630_v23 = vld [vmem:[%s15775_s16 + $0x2284] ss:$8 sps:$4 sm:$0xff]  }
 0x335   : > { %10824 = vmatpush1.bf16.msra.mxu0 %v14550_v48  ;;  %9923 = vmatprep.subr.bf16.mxu1 %v14555_v33  ;;  %v14625_v48 = vld [vmem:[%s15775_s16 + $0xc80] ss:$8 sps:$4 sm:$0xff]  }
 0x336   : > { %10825 = vmatprep.subr.bf16.mxu0 %v14558_v19  ;;  %v14628_v33 = vld [vmem:[%s15775_s16 + $0x2280] ss:$8 sps:$4 sm:$0xff]   ;;  %v14633_v19 = vld [vmem:[%s15775_s16 + $0xc94] ss:$8 sps:$4 sm:$0xff]  }
 0x338   : > { %9924 = vmatpush1.bf16.msra.mxu1 %v14553_v15  ;;  %v14636_v15 = vld [vmem:[%s15775_s16 + $0x2294] ss:$8 sps:$4 sm:$0xff]  }
 0x339   : > { %10826 = vmatpush1.bf16.msra.mxu0 %v14556_v49  ;;  %9925 = vmatprep.subr.bf16.mxu1 %v14561_v36  ;;  %v14631_v49 = vld [vmem:[%s15775_s16 + $0xc90] ss:$8 sps:$4 sm:$0xff]  }
 0x33a   : > { %10827 = vmatprep.subr.bf16.mxu0 %v14564_v51  ;;  %v14634_v36 = vld [vmem:[%s15775_s16 + $0x2290] ss:$8 sps:$4 sm:$0xff]   ;;  %v14639_v51 = vld [vmem:[%s15775_s16 + $0xca4] ss:$8 sps:$4 sm:$0xff]  }
 0x33c   : > { %9926 = vmatpush1.bf16.msra.mxu1 %v14559_v35  ;;  %v14642_v35 = vld [vmem:[%s15775_s16 + $0x22a4] ss:$8 sps:$4 sm:$0xff]  }
 0x33d   : > { %10828 = vmatpush1.bf16.msra.mxu0 %v14562_v42  ;;  %9927 = vmatprep.subr.bf16.mxu1 %v14567_v52  ;;  %v14637_v42 = vld [vmem:[%s15775_s16 + $0xca0] ss:$8 sps:$4 sm:$0xff]  }
 0x33e   : > { %10829 = vmatprep.subr.bf16.mxu0 %v14570_v54  ;;  %v14640_v52 = vld [vmem:[%s15775_s16 + $0x22a0] ss:$8 sps:$4 sm:$0xff]   ;;  %v14645_v54 = vld [vmem:[%s15775_s16 + $0xcb4] ss:$8 sps:$4 sm:$0xff]  }
 0x340   : > { %9928 = vmatpush1.bf16.msra.mxu1 %v14565_v63  ;;  %v14646_v63 = vld [vmem:[%s15775_s16 + $0x22b0] ss:$8 sps:$4 sm:$0xff]  }
 0x341   : > { %10830 = vmatpush1.bf16.msra.mxu0 %v14568_v0  ;;  %9929 = vmatprep.subr.bf16.mxu1 %v14573_v1  ;;  %v14651_v0 = vld [vmem:[%s15775_s16 + $0xcc4] ss:$8 sps:$4 sm:$0xff]  }
 0x342   : > { %10831 = vmatprep.subr.bf16.mxu0 %v14576_v47  ;;  %v14654_v1 = vld [vmem:[%s15775_s16 + $0x22c4] ss:$8 sps:$4 sm:$0xff]   ;;  %v14649_v47 = vld [vmem:[%s15775_s16 + $0xcc0] ss:$8 sps:$4 sm:$0xff]  }
 0x344   : > { %9930 = vmatpush1.bf16.msra.mxu1 %v14571_v46  ;;  %v14652_v46 = vld [vmem:[%s15775_s16 + $0x22c0] ss:$8 sps:$4 sm:$0xff]  }
 0x345   : > { %10832 = vmatpush1.bf16.msra.mxu0 %v14574_v55  ;;  %9940 = vmatprep.subr.bf16.mxu1 %v14579_v24  ;;  %v14657_v55 = vld [vmem:[%s15775_s16 + $0xcd4] ss:$8 sps:$4 sm:$0xff]  }
 0x346   : > { %10842 = vmatprep.subr.bf16.mxu0 %v14582_v18  ;;  %v14660_v24 = vld [vmem:[%s15775_s16 + $0x22d4] ss:$8 sps:$4 sm:$0xff]   ;;  %v14655_v18 = vld [vmem:[%s15775_s16 + $0xcd0] ss:$8 sps:$4 sm:$0xff]  }
 0x347   : > { %9932 = vmatmul.mubr.bf16.vlgmr.msra.gmra.mrb[0].mxu1 %v1925_v5  ;;  %v14666_v5 = vld [vmem:[%s15775_s16 + $0x22e4] ss:$8 sps:$4 sm:$0xff]  }
 0x348   : > { %10834 = vmatmul.mubr.bf16.vlgmr.msra.gmra.mrb[0].mxu0 %v2218_v60  ;;  %9941 = vmatpush1.bf16.msra.mxu1 %v14577_v6  ;;  %v14661_v60 = vld [vmem:[%s15775_s16 + $0xce0] ss:$8 sps:$4 sm:$0xff]  }
 0x349   : > { %10843 = vmatpush1.bf16.msra.mxu0 %v14580_v7  ;;  %9942 = vmatprep.subr.bf16.mxu1 %v14585_v8  ;;  %v14664_v6 = vld [vmem:[%s15775_s16 + $0x22e0] ss:$8 sps:$4 sm:$0xff]   ;;  %v14669_v7 = vld [vmem:[%s15775_s16 + $0xcf4] ss:$8 sps:$4 sm:$0xff]  }
 0x34a   : > { %10844 = vmatprep.subr.bf16.mxu0 %v14588_v9  ;;  %9972 = vmatprep.mubr.bf16.mxu1 %v16786_v10  ;;  %v14672_v8 = vld [vmem:[%s15775_s16 + $0x22f4] ss:$8 sps:$4 sm:$0xff]   ;;  %v14667_v9 = vld [vmem:[%s15775_s16 + $0xcf0] ss:$8 sps:$4 sm:$0xff]  }
 0x34b   : > { %10874 = vmatprep.mubr.bf16.mxu0 %v16789_v57 }
 0x34c   : > { %9943 = vmatpush1.bf16.msra.mxu1 %v14583_v58  ;;  %v14670_v58 = vld [vmem:[%s15775_s16 + $0x22f0] ss:$8 sps:$4 sm:$0xff]  }
 0x34d   : > { %10845 = vmatpush1.bf16.msra.mxu0 %v14586_v11  ;;  %9944 = vmatprep.subr.bf16.mxu1 %v14591_v12  ;;  %v14675_v11 = vld [vmem:[%s15775_s16 + $0xd04] ss:$8 sps:$4 sm:$0xff]  }
 0x34e   : > { %10846 = vmatprep.subr.bf16.mxu0 %v14594_v14  ;;  %v14679_v12 = vld [vmem:[%s15775_s16 + $0x2304] ss:$8 sps:$4 sm:$0xff]   ;;  %v16855_v14 = vrot.slane %v16764_v2, %v15826_v50  ;;  %v1975_v2 = vcombine.high %v16786_v10, %v16786_v10 }
 0x34f   : > { %v14688_v10 = vld [vmem:[%s15775_s16 + $0xd24] ss:$8 sps:$4 sm:$0xff]  }
 0x350   : > { %9945 = vmatpush1.bf16.msra.mxu1 %v14589_v17  ;;  %v16859_v17 = vrot.slane %v16767_v16, %v15826_v50  ;;  %v14680_v16 = vld [vmem:[%s15775_s16 + $0xd10] ss:$8 sps:$4 sm:$0xff]  }
 0x351   : > { %10847 = vmatpush1.bf16.msra.mxu0 %v14592_v20  ;;  %9946 = vmatprep.subr.bf16.mxu1 %v14597_v21  ;;  %v14673_v20 = vld [vmem:[%s15775_s16 + $0xd00] ss:$8 sps:$4 sm:$0xff]  }
 0x352   : > { %10848 = vmatprep.subr.bf16.mxu0 %v14600_v22  ;;  %v14677_v21 = vld [vmem:[%s15775_s16 + $0x2300] ss:$8 sps:$4 sm:$0xff]   ;;  %v14682_v22 = vld [vmem:[%s15775_s16 + $0xd14] ss:$8 sps:$4 sm:$0xff]  }
 0x354   : > { %9947 = vmatpush1.bf16.msra.mxu1 %v14595_v3  ;;  %v14685_v3 = vld [vmem:[%s15775_s16 + $0x2314] ss:$8 sps:$4 sm:$0xff]  }
 0x355   : > { %10849 = vmatpush1.bf16.msra.mxu0 %v14598_v41  ;;  %9948 = vmatprep.subr.bf16.mxu1 %v14603_v25  ;;  %v2221_v41 = vcombine.high %v16789_v57, %v16789_v57  ;;  %v14683_v25 = vld [vmem:[%s15775_s16 + $0x2310] ss:$8 sps:$4 sm:$0xff]   ;;  %v14686_v57 = vld [vmem:[%s15775_s16 + $0xd20] ss:$8 sps:$4 sm:$0xff]  }
 0x356   : > { %10850 = vmatprep.subr.bf16.mxu0 %v14606_v13  ;;  %v14691_v13 = vld [vmem:[%s15775_s16 + $0x2324] ss:$8 sps:$4 sm:$0xff]  }
 0x358   : > { %9949 = vmatpush1.bf16.msra.mxu1 %v14601_v53  ;;  %v14689_v53 = vld [vmem:[%s15775_s16 + $0x2320] ss:$8 sps:$4 sm:$0xff]  }
 0x359   : > { %10851 = vmatpush1.bf16.msra.mxu0 %v14604_v61  ;;  %9950 = vmatprep.subr.bf16.mxu1 %v14609_v26  ;;  %v14694_v61 = vld [vmem:[%s15775_s16 + $0xd34] ss:$8 sps:$4 sm:$0xff]  }
 0x35a   : > { %10852 = vmatprep.subr.bf16.mxu0 %v14612_v27  ;;  %v14697_v26 = vld [vmem:[%s15775_s16 + $0x2334] ss:$8 sps:$4 sm:$0xff]   ;;  %v14692_v27 = vld [vmem:[%s15775_s16 + $0xd30] ss:$8 sps:$4 sm:$0xff]  }
 0x35c   : > { %9951 = vmatpush1.bf16.msra.mxu1 %v14607_v28  ;;  %v14695_v28 = vld [vmem:[%s15775_s16 + $0x2330] ss:$8 sps:$4 sm:$0xff]  }
 0x35d   : > { %10853 = vmatpush1.bf16.msra.mxu0 %v14610_v29  ;;  %9952 = vmatprep.subr.bf16.mxu1 %v14615_v30  ;;  %v14700_v29 = vld [vmem:[%s15775_s16 + $0xd44] ss:$8 sps:$4 sm:$0xff]  }
 0x35e   : > { %10854 = vmatprep.subr.bf16.mxu0 %v14618_v31  ;;  %v14703_v30 = vld [vmem:[%s15775_s16 + $0x2344] ss:$8 sps:$4 sm:$0xff]   ;;  %v14698_v31 = vld [vmem:[%s15775_s16 + $0xd40] ss:$8 sps:$4 sm:$0xff]  }
 0x360   : > { %9953 = vmatpush1.bf16.msra.mxu1 %v14613_v32  ;;  %v14701_v32 = vld [vmem:[%s15775_s16 + $0x2340] ss:$8 sps:$4 sm:$0xff]  }
 0x361   : > { %10855 = vmatpush1.bf16.msra.mxu0 %v14616_v34  ;;  %9954 = vmatprep.subr.bf16.mxu1 %v14621_v38  ;;  %v14706_v34 = vld [vmem:[%s15775_s16 + $0xd54] ss:$8 sps:$4 sm:$0xff]  }
 0x362   : > { %10856 = vmatprep.subr.bf16.mxu0 %v14624_v39  ;;  %v14709_v38 = vld [vmem:[%s15775_s16 + $0x2354] ss:$8 sps:$4 sm:$0xff]   ;;  %v14704_v39 = vld [vmem:[%s15775_s16 + $0xd50] ss:$8 sps:$4 sm:$0xff]  }
 0x364   : > { %9955 = vmatpush1.bf16.msra.mxu1 %v14619_v40  ;;  %v14707_v40 = vld [vmem:[%s15775_s16 + $0x2350] ss:$8 sps:$4 sm:$0xff]  }
 0x365   : > { %10857 = vmatpush1.bf16.msra.mxu0 %v14622_v45  ;;  %9956 = vmatprep.subr.bf16.mxu1 %v14627_v62  ;;  %v14712_v45 = vld [vmem:[%s15775_s16 + $0xd64] ss:$8 sps:$4 sm:$0xff]  }
 0x366   : > { %10858 = vmatprep.subr.bf16.mxu0 %v14630_v23  ;;  %v14715_v62 = vld [vmem:[%s15775_s16 + $0x2364] ss:$8 sps:$4 sm:$0xff]   ;;  %v14710_v23 = vld [vmem:[%s15775_s16 + $0xd60] ss:$8 sps:$4 sm:$0xff]  }
 0x368   : > { %9957 = vmatpush1.bf16.msra.mxu1 %v14625_v48  ;;  %v14713_v48 = vld [vmem:[%s15775_s16 + $0x2360] ss:$8 sps:$4 sm:$0xff]  }
 0x369   : > { %10859 = vmatpush1.bf16.msra.mxu0 %v14628_v33  ;;  %9958 = vmatprep.subr.bf16.mxu1 %v14633_v19  ;;  %v14718_v33 = vld [vmem:[%s15775_s16 + $0xd74] ss:$8 sps:$4 sm:$0xff]  }
 0x36a   : > { %10860 = vmatprep.subr.bf16.mxu0 %v14636_v15  ;;  %v14721_v19 = vld [vmem:[%s15775_s16 + $0x2374] ss:$8 sps:$4 sm:$0xff]   ;;  %v14716_v15 = vld [vmem:[%s15775_s16 + $0xd70] ss:$8 sps:$4 sm:$0xff]  }
 0x36c   : > { %9959 = vmatpush1.bf16.msra.mxu1 %v14631_v49  ;;  %v14719_v49 = vld [vmem:[%s15775_s16 + $0x2370] ss:$8 sps:$4 sm:$0xff]  }
 0x36d   : > { %10861 = vmatpush1.bf16.msra.mxu0 %v14634_v36  ;;  %9960 = vmatprep.subr.bf16.mxu1 %v14639_v51  ;;  %v14724_v36 = vld [vmem:[%s15775_s16 + $0xd84] ss:$8 sps:$4 sm:$0xff]  }
 0x36e   : > { %10862 = vmatprep.subr.bf16.mxu0 %v14642_v35  ;;  %v14727_v51 = vld [vmem:[%s15775_s16 + $0x2384] ss:$8 sps:$4 sm:$0xff]   ;;  %v14722_v35 = vld [vmem:[%s15775_s16 + $0xd80] ss:$8 sps:$4 sm:$0xff]  }
 0x370   : > { %9961 = vmatpush1.bf16.msra.mxu1 %v14637_v42  ;;  %v14725_v42 = vld [vmem:[%s15775_s16 + $0x2380] ss:$8 sps:$4 sm:$0xff]  }
 0x371   : > { %10863 = vmatpush1.bf16.msra.mxu0 %v14640_v52  ;;  %9962 = vmatprep.subr.bf16.mxu1 %v14645_v54  ;;  %v14730_v52 = vld [vmem:[%s15775_s16 + $0xd94] ss:$8 sps:$4 sm:$0xff]  }
 0x372   : > { %10864 = vmatprep.subr.bf16.mxu0 %v14648_v56  ;;  %v14733_v54 = vld [vmem:[%s15775_s16 + $0x2394] ss:$8 sps:$4 sm:$0xff]   ;;  %v14728_v56 = vld [vmem:[%s15775_s16 + $0xd90] ss:$8 sps:$4 sm:$0xff]  }
 0x374   : > { %9963 = vmatpush1.bf16.msra.mxu1 %v14643_v43  ;;  %v14731_v43 = vld [vmem:[%s15775_s16 + $0x2390] ss:$8 sps:$4 sm:$0xff]  }
 0x375   : > { %10865 = vmatpush1.bf16.msra.mxu0 %v14646_v63  ;;  %9964 = vmatprep.subr.bf16.mxu1 %v14651_v0  ;;  %v14736_v63 = vld [vmem:[%s15775_s16 + $0xda4] ss:$8 sps:$4 sm:$0xff]  }
 0x376   : > { %10866 = vmatprep.subr.bf16.mxu0 %v14654_v1  ;;  %v14739_v0 = vld [vmem:[%s15775_s16 + $0x23a4] ss:$8 sps:$4 sm:$0xff]   ;;  %v14734_v1 = vld [vmem:[%s15775_s16 + $0xda0] ss:$8 sps:$4 sm:$0xff]  }
 0x378   : > { %9965 = vmatpush1.bf16.msra.mxu1 %v14649_v47  ;;  %v14737_v47 = vld [vmem:[%s15775_s16 + $0x23a0] ss:$8 sps:$4 sm:$0xff]  }
 0x379   : > { %10867 = vmatpush1.bf16.msra.mxu0 %v14652_v46  ;;  %9966 = vmatprep.subr.bf16.mxu1 %v14657_v55  ;;  %v14742_v46 = vld [vmem:[%s15775_s16 + $0xdb4] ss:$8 sps:$4 sm:$0xff]  }
 0x37a   : > { %10868 = vmatprep.subr.bf16.mxu0 %v14660_v24  ;;  %v14745_v55 = vld [vmem:[%s15775_s16 + $0x23b4] ss:$8 sps:$4 sm:$0xff]   ;;  %v14740_v24 = vld [vmem:[%s15775_s16 + $0xdb0] ss:$8 sps:$4 sm:$0xff]  }
 0x37c   : > { %9967 = vmatpush1.bf16.msra.mxu1 %v14655_v18  ;;  %v14743_v18 = vld [vmem:[%s15775_s16 + $0x23b0] ss:$8 sps:$4 sm:$0xff]  }
 0x37d   : > { %10869 = vmatpush1.bf16.msra.mxu0 %v14658_v4  ;;  %9968 = vmatprep.subr.bf16.mxu1 %v14663_v59  ;;  %v14748_v4 = vld [vmem:[%s15775_s16 + $0xdc4] ss:$8 sps:$4 sm:$0xff]  }
 0x37e   : > { %10870 = vmatprep.subr.bf16.mxu0 %v14666_v5  ;;  %v14751_v59 = vld [vmem:[%s15775_s16 + $0x23c4] ss:$8 sps:$4 sm:$0xff]   ;;  %v14746_v5 = vld [vmem:[%s15775_s16 + $0xdc0] ss:$8 sps:$4 sm:$0xff]  }
 0x380   : > { %9969 = vmatpush1.bf16.msra.mxu1 %v14661_v60  ;;  %v14749_v60 = vld [vmem:[%s15775_s16 + $0x23c0] ss:$8 sps:$4 sm:$0xff]  }
 0x381   : > { %10871 = vmatpush1.bf16.msra.mxu0 %v14664_v6  ;;  %9970 = vmatprep.subr.bf16.mxu1 %v14669_v7  ;;  %v14754_v6 = vld [vmem:[%s15775_s16 + $0xdd4] ss:$8 sps:$4 sm:$0xff]  }
 0x382   : > { %10872 = vmatprep.subr.bf16.mxu0 %v14672_v8  ;;  %v14757_v7 = vld [vmem:[%s15775_s16 + $0x23d4] ss:$8 sps:$4 sm:$0xff]   ;;  %v14752_v8 = vld [vmem:[%s15775_s16 + $0xdd0] ss:$8 sps:$4 sm:$0xff]  }
 0x384   : > { %9971 = vmatpush1.bf16.msra.mxu1 %v14667_v9  ;;  %v14755_v9 = vld [vmem:[%s15775_s16 + $0x23d0] ss:$8 sps:$4 sm:$0xff]  }
 0x385   : > { %10873 = vmatpush1.bf16.msra.mxu0 %v14670_v58  ;;  %9981 = vmatprep.subr.bf16.mxu1 %v14675_v11  ;;  %v14760_v58 = vld [vmem:[%s15775_s16 + $0xde4] ss:$8 sps:$4 sm:$0xff]  }
 0x386   : > { %10883 = vmatprep.subr.bf16.mxu0 %v14679_v12  ;;  %v14763_v11 = vld [vmem:[%s15775_s16 + $0x23e4] ss:$8 sps:$4 sm:$0xff]   ;;  %v1928_v12 = vcombine.high %v16755_v37, %v16755_v37  ;;  %v14764_v37 = vld [vmem:[%s15775_s16 + $0xdf0] ss:$8 sps:$4 sm:$0xff]  }
 0x387   : > { %9973 = vmatmul.mubr.bf16.vlgmr.msra.gmra.mrb[0].mxu1 %v16855_v14 }
 0x388   : > { %10875 = vmatmul.mubr.bf16.vlgmr.msra.gmra.mrb[0].mxu0 %v16859_v17  ;;  %9982 = vmatpush1.bf16.msra.mxu1 %v14673_v20  ;;  %v16926_v20 = vld [vmem:[%s15770_s12 + $0x48] sm:$0xff] }
 0x389   : > { %10884 = vmatpush1.bf16.msra.mxu0 %v14677_v21  ;;  %9983 = vmatprep.subr.bf16.mxu1 %v14682_v22  ;;  %v14758_v21 = vld [vmem:[%s15775_s16 + $0xde0] ss:$8 sps:$4 sm:$0xff]  }
 0x38a   : > { %10885 = vmatprep.subr.bf16.mxu0 %v14685_v3  ;;  %10013 = vmatprep.mubr.bf16.mxu1 %v1975_v2  ;;  %v14761_v22 = vld [vmem:[%s15775_s16 + $0x23e0] ss:$8 sps:$4 sm:$0xff]   ;;  %v14766_v3 = vld [vmem:[%s15775_s16 + $0xdf4] ss:$8 sps:$4 sm:$0xff]  }
 0x38b   : > { %10915 = vmatprep.mubr.bf16.mxu0 %v2221_v41  ;;  %v14769_v2 = vld [vmem:[%s15775_s16 + $0x23f4] ss:$8 sps:$4 sm:$0xff]   ;;  %v16933_v41 = vrot.slane %v1928_v12, %v15826_v50  ;;  %v14836_v12 = vld [vmem:[%s15775_s16 + $0xeb0] ss:$8 sps:$4 sm:$0xff]  }
 0x38c   : > { %9984 = vmatpush1.bf16.msra.mxu1 %v14680_v16  ;;  %v16937_v16 = vrot.slane %v16926_v20, %v15826_v50 }
 0x38d   : > { %10886 = vmatpush1.bf16.msra.mxu0 %v14683_v25  ;;  %9985 = vmatprep.subr.bf16.mxu1 %v14688_v10  ;;  %v14767_v25 = vld [vmem:[%s15775_s16 + $0x23f0] ss:$8 sps:$4 sm:$0xff]   ;;  %v14772_v10 = vld [vmem:[%s15775_s16 + $0xe04] ss:$8 sps:$4 sm:$0xff]  }
 0x38e   : > { %10887 = vmatprep.subr.bf16.mxu0 %v14691_v13  ;;  %v14775_v13 = vld [vmem:[%s15775_s16 + $0x2404] ss:$8 sps:$4 sm:$0xff]  }
 0x390   : > { %9986 = vmatpush1.bf16.msra.mxu1 %v14686_v57  ;;  %v1944_v57 = vcombine.high %v16933_v41, %v16933_v41 }
 0x391   : > { %10888 = vmatpush1.bf16.msra.mxu0 %v14689_v53  ;;  %9987 = vmatprep.subr.bf16.mxu1 %v14694_v61  ;;  %v2237_v53 = vcombine.high %v16937_v16, %v16937_v16  ;;  %v1973_v61 = vcombine.high %v16855_v14, %v16855_v14 }
 0x392   : > { %10889 = vmatprep.subr.bf16.mxu0 %v14697_v26  ;;  %v2219_v26 = vcombine.high %v16859_v17, %v16859_v17  ;;  %v14776_v17 = vld [vmem:[%s15775_s16 + $0xe10] ss:$8 sps:$4 sm:$0xff]  }
 0x393   : > { %v16959_v14 = vrot.slane %v2237_v53, %v15826_v50  ;;  %v14856_v53 = vld [vmem:[%s15775_s16 + $0xee4] ss:$8 sps:$4 sm:$0xff]  }
 0x394   : > { %9988 = vmatpush1.bf16.msra.mxu1 %v14692_v27  ;;  %v14770_v27 = vld [vmem:[%s15775_s16 + $0xe00] ss:$8 sps:$4 sm:$0xff]  }
 0x395   : > { %10890 = vmatpush1.bf16.msra.mxu0 %v14695_v28  ;;  %9989 = vmatprep.subr.bf16.mxu1 %v14700_v29  ;;  %v14773_v28 = vld [vmem:[%s15775_s16 + $0x2400] ss:$8 sps:$4 sm:$0xff]   ;;  %v14778_v29 = vld [vmem:[%s15775_s16 + $0xe14] ss:$8 sps:$4 sm:$0xff]  }
 0x396   : > { %10891 = vmatprep.subr.bf16.mxu0 %v14703_v30  ;;  %v14781_v30 = vld [vmem:[%s15775_s16 + $0x2414] ss:$8 sps:$4 sm:$0xff]  }
 0x398   : > { %9990 = vmatpush1.bf16.msra.mxu1 %v14698_v31  ;;  %v16956_v31 = vrot.slane %v1944_v57, %v15826_v50  ;;  %v14851_v57 = vld [vmem:[%s15775_s16 + $0x24d0] ss:$8 sps:$4 sm:$0xff]  }
 0x399   : > { %10892 = vmatpush1.bf16.msra.mxu0 %v14701_v32  ;;  %9991 = vmatprep.subr.bf16.mxu1 %v14706_v34  ;;  %v14779_v32 = vld [vmem:[%s15775_s16 + $0x2410] ss:$8 sps:$4 sm:$0xff]   ;;  %v14784_v34 = vld [vmem:[%s15775_s16 + $0xe24] ss:$8 sps:$4 sm:$0xff]  }
 0x39a   : > { %10893 = vmatprep.subr.bf16.mxu0 %v14709_v38  ;;  %v14787_v38 = vld [vmem:[%s15775_s16 + $0x2424] ss:$8 sps:$4 sm:$0xff]  }
 0x39c   : > { %9992 = vmatpush1.bf16.msra.mxu1 %v14704_v39  ;;  %v14782_v39 = vld [vmem:[%s15775_s16 + $0xe20] ss:$8 sps:$4 sm:$0xff]  }
 0x39d   : > { %10894 = vmatpush1.bf16.msra.mxu0 %v14707_v40  ;;  %9993 = vmatprep.subr.bf16.mxu1 %v14712_v45  ;;  %v14785_v40 = vld [vmem:[%s15775_s16 + $0x2420] ss:$8 sps:$4 sm:$0xff]   ;;  %v14790_v45 = vld [vmem:[%s15775_s16 + $0xe34] ss:$8 sps:$4 sm:$0xff]  }
 0x39e   : > { %10895 = vmatprep.subr.bf16.mxu0 %v14715_v62  ;;  %v14793_v62 = vld [vmem:[%s15775_s16 + $0x2434] ss:$8 sps:$4 sm:$0xff]  }
 0x3a0   : > { %9994 = vmatpush1.bf16.msra.mxu1 %v14710_v23  ;;  %v14788_v23 = vld [vmem:[%s15775_s16 + $0xe30] ss:$8 sps:$4 sm:$0xff]  }
 0x3a1   : > { %10896 = vmatpush1.bf16.msra.mxu0 %v14713_v48  ;;  %9995 = vmatprep.subr.bf16.mxu1 %v14718_v33  ;;  %v14791_v48 = vld [vmem:[%s15775_s16 + $0x2430] ss:$8 sps:$4 sm:$0xff]   ;;  %v14796_v33 = vld [vmem:[%s15775_s16 + $0xe44] ss:$8 sps:$4 sm:$0xff]  }
 0x3a2   : > { %10897 = vmatprep.subr.bf16.mxu0 %v14721_v19  ;;  %v14799_v19 = vld [vmem:[%s15775_s16 + $0x2444] ss:$8 sps:$4 sm:$0xff]  }
 0x3a4   : > { %9996 = vmatpush1.bf16.msra.mxu1 %v14716_v15  ;;  %v14794_v15 = vld [vmem:[%s15775_s16 + $0xe40] ss:$8 sps:$4 sm:$0xff]  }
 0x3a5   : > { %10898 = vmatpush1.bf16.msra.mxu0 %v14719_v49  ;;  %9997 = vmatprep.subr.bf16.mxu1 %v14724_v36  ;;  %v14797_v49 = vld [vmem:[%s15775_s16 + $0x2440] ss:$8 sps:$4 sm:$0xff]   ;;  %v14802_v36 = vld [vmem:[%s15775_s16 + $0xe54] ss:$8 sps:$4 sm:$0xff]  }
 0x3a6   : > { %10899 = vmatprep.subr.bf16.mxu0 %v14727_v51  ;;  %v14805_v51 = vld [vmem:[%s15775_s16 + $0x2454] ss:$8 sps:$4 sm:$0xff]  }
 0x3a8   : > { %9998 = vmatpush1.bf16.msra.mxu1 %v14722_v35  ;;  %v14800_v35 = vld [vmem:[%s15775_s16 + $0xe50] ss:$8 sps:$4 sm:$0xff]  }
 0x3a9   : > { %10900 = vmatpush1.bf16.msra.mxu0 %v14725_v42  ;;  %9999 = vmatprep.subr.bf16.mxu1 %v14730_v52  ;;  %v14803_v42 = vld [vmem:[%s15775_s16 + $0x2450] ss:$8 sps:$4 sm:$0xff]   ;;  %v14808_v52 = vld [vmem:[%s15775_s16 + $0xe64] ss:$8 sps:$4 sm:$0xff]  }
 0x3aa   : > { %10901 = vmatprep.subr.bf16.mxu0 %v14733_v54  ;;  %v14811_v54 = vld [vmem:[%s15775_s16 + $0x2464] ss:$8 sps:$4 sm:$0xff]  }
 0x3ac   : > { %10000 = vmatpush1.bf16.msra.mxu1 %v14728_v56  ;;  %v14806_v56 = vld [vmem:[%s15775_s16 + $0xe60] ss:$8 sps:$4 sm:$0xff]  }
 0x3ad   : > { %10902 = vmatpush1.bf16.msra.mxu0 %v14731_v43  ;;  %10001 = vmatprep.subr.bf16.mxu1 %v14736_v63  ;;  %v14809_v43 = vld [vmem:[%s15775_s16 + $0x2460] ss:$8 sps:$4 sm:$0xff]   ;;  %v14814_v63 = vld [vmem:[%s15775_s16 + $0xe74] ss:$8 sps:$4 sm:$0xff]  }
 0x3ae   : > { %10903 = vmatprep.subr.bf16.mxu0 %v14739_v0  ;;  %v14817_v0 = vld [vmem:[%s15775_s16 + $0x2474] ss:$8 sps:$4 sm:$0xff]  }
 0x3b0   : > { %10002 = vmatpush1.bf16.msra.mxu1 %v14734_v1  ;;  %v14812_v1 = vld [vmem:[%s15775_s16 + $0xe70] ss:$8 sps:$4 sm:$0xff]  }
 0x3b1   : > { %10904 = vmatpush1.bf16.msra.mxu0 %v14737_v47  ;;  %10003 = vmatprep.subr.bf16.mxu1 %v14742_v46  ;;  %v14815_v47 = vld [vmem:[%s15775_s16 + $0x2470] ss:$8 sps:$4 sm:$0xff]   ;;  %v14820_v46 = vld [vmem:[%s15775_s16 + $0xe84] ss:$8 sps:$4 sm:$0xff]  }
 0x3b2   : > { %10905 = vmatprep.subr.bf16.mxu0 %v14745_v55  ;;  %v14823_v55 = vld [vmem:[%s15775_s16 + $0x2484] ss:$8 sps:$4 sm:$0xff]  }
 0x3b4   : > { %10004 = vmatpush1.bf16.msra.mxu1 %v14740_v24  ;;  %v14818_v24 = vld [vmem:[%s15775_s16 + $0xe80] ss:$8 sps:$4 sm:$0xff]  }
 0x3b5   : > { %10906 = vmatpush1.bf16.msra.mxu0 %v14743_v18  ;;  %10005 = vmatprep.subr.bf16.mxu1 %v14748_v4  ;;  %v14821_v18 = vld [vmem:[%s15775_s16 + $0x2480] ss:$8 sps:$4 sm:$0xff]   ;;  %v14826_v4 = vld [vmem:[%s15775_s16 + $0xe94] ss:$8 sps:$4 sm:$0xff]  }
 0x3b6   : > { %10907 = vmatprep.subr.bf16.mxu0 %v14751_v59  ;;  %v14829_v59 = vld [vmem:[%s15775_s16 + $0x2494] ss:$8 sps:$4 sm:$0xff]  }
 0x3b8   : > { %10006 = vmatpush1.bf16.msra.mxu1 %v14746_v5  ;;  %v14824_v5 = vld [vmem:[%s15775_s16 + $0xe90] ss:$8 sps:$4 sm:$0xff]  }
 0x3b9   : > { %10908 = vmatpush1.bf16.msra.mxu0 %v14749_v60  ;;  %10007 = vmatprep.subr.bf16.mxu1 %v14754_v6  ;;  %v14827_v60 = vld [vmem:[%s15775_s16 + $0x2490] ss:$8 sps:$4 sm:$0xff]   ;;  %v14832_v6 = vld [vmem:[%s15775_s16 + $0xea4] ss:$8 sps:$4 sm:$0xff]  }
 0x3ba   : > { %10909 = vmatprep.subr.bf16.mxu0 %v14757_v7  ;;  %v14835_v7 = vld [vmem:[%s15775_s16 + $0x24a4] ss:$8 sps:$4 sm:$0xff]  }
 0x3bc   : > { %10008 = vmatpush1.bf16.msra.mxu1 %v14752_v8  ;;  %v14830_v8 = vld [vmem:[%s15775_s16 + $0xea0] ss:$8 sps:$4 sm:$0xff]  }
 0x3bd   : > { %10910 = vmatpush1.bf16.msra.mxu0 %v14755_v9  ;;  %10009 = vmatprep.subr.bf16.mxu1 %v14760_v58  ;;  %v14833_v9 = vld [vmem:[%s15775_s16 + $0x24a0] ss:$8 sps:$4 sm:$0xff]   ;;  %v14838_v58 = vld [vmem:[%s15775_s16 + $0xeb4] ss:$8 sps:$4 sm:$0xff]  }
 0x3be   : > { %10911 = vmatprep.subr.bf16.mxu0 %v14763_v11  ;;  %v14841_v11 = vld [vmem:[%s15775_s16 + $0x24b4] ss:$8 sps:$4 sm:$0xff]  }
 0x3c0   : > { %10010 = vmatpush1.bf16.msra.mxu1 %v14758_v21  ;;  %v14839_v21 = vld [vmem:[%s15775_s16 + $0x24b0] ss:$8 sps:$4 sm:$0xff]  }
 0x3c1   : > { %10912 = vmatpush1.bf16.msra.mxu0 %v14761_v22  ;;  %10011 = vmatprep.subr.bf16.mxu1 %v14766_v3  ;;  %v14844_v22 = vld [vmem:[%s15775_s16 + $0xec4] ss:$8 sps:$4 sm:$0xff]  }
 0x3c2   : > { %10913 = vmatprep.subr.bf16.mxu0 %v14769_v2  ;;  %v14847_v3 = vld [vmem:[%s15775_s16 + $0x24c4] ss:$8 sps:$4 sm:$0xff]   ;;  %v14842_v2 = vld [vmem:[%s15775_s16 + $0xec0] ss:$8 sps:$4 sm:$0xff]  }
 0x3c4   : > { %10012 = vmatpush1.bf16.msra.mxu1 %v14764_v37  ;;  %v14845_v37 = vld [vmem:[%s15775_s16 + $0x24c0] ss:$8 sps:$4 sm:$0xff]  }
 0x3c5   : > { %10914 = vmatpush1.bf16.msra.mxu0 %v14767_v25  ;;  %10022 = vmatprep.subr.bf16.mxu1 %v14772_v10  ;;  %v14850_v25 = vld [vmem:[%s15775_s16 + $0xed4] ss:$8 sps:$4 sm:$0xff]  }
 0x3c6   : > { %10924 = vmatprep.subr.bf16.mxu0 %v14775_v13  ;;  %v14853_v10 = vld [vmem:[%s15775_s16 + $0x24d4] ss:$8 sps:$4 sm:$0xff]   ;;  %v14848_v13 = vld [vmem:[%s15775_s16 + $0xed0] ss:$8 sps:$4 sm:$0xff]  }
 0x3c7   : > { %10014 = vmatmul.mubr.bf16.vlgmr.msra.gmra.mrb[0].mxu1 %v1973_v61  ;;  %v14859_v61 = vld [vmem:[%s15775_s16 + $0x24e4] ss:$8 sps:$4 sm:$0xff]  }
 0x3c8   : > { %10916 = vmatmul.mubr.bf16.vlgmr.msra.gmra.mrb[0].mxu0 %v2219_v26  ;;  %10023 = vmatpush1.bf16.msra.mxu1 %v14770_v27  ;;  %v14854_v26 = vld [vmem:[%s15775_s16 + $0xee0] ss:$8 sps:$4 sm:$0xff]  }
 0x3c9   : > { %10925 = vmatpush1.bf16.msra.mxu0 %v14773_v28  ;;  %10024 = vmatprep.subr.bf16.mxu1 %v14778_v29  ;;  %v14857_v27 = vld [vmem:[%s15775_s16 + $0x24e0] ss:$8 sps:$4 sm:$0xff]   ;;  %v14862_v28 = vld [vmem:[%s15775_s16 + $0xef4] ss:$8 sps:$4 sm:$0xff]  }
 0x3ca   : > { %10926 = vmatprep.subr.bf16.mxu0 %v14781_v30  ;;  %10054 = vmatprep.mubr.bf16.mxu1 %v16956_v31  ;;  %v14865_v29 = vld [vmem:[%s15775_s16 + $0x24f4] ss:$8 sps:$4 sm:$0xff]   ;;  %v14860_v30 = vld [vmem:[%s15775_s16 + $0xef0] ss:$8 sps:$4 sm:$0xff]  }
 0x3cb   : > { %10956 = vmatprep.mubr.bf16.mxu0 %v16959_v14 }
 0x3cc   : > { %10025 = vmatpush1.bf16.msra.mxu1 %v14776_v17  ;;  %v14863_v17 = vld [vmem:[%s15775_s16 + $0x24f0] ss:$8 sps:$4 sm:$0xff]  }
 0x3cd   : > { %10927 = vmatpush1.bf16.msra.mxu0 %v14779_v32  ;;  %10026 = vmatprep.subr.bf16.mxu1 %v14784_v34  ;;  %v14869_v32 = vld [vmem:[%s15775_s16 + $0xf04] ss:$8 sps:$4 sm:$0xff]  }
 0x3ce   : > { %10928 = vmatprep.subr.bf16.mxu0 %v14787_v38  ;;  %v14872_v34 = vld [vmem:[%s15775_s16 + $0x2504] ss:$8 sps:$4 sm:$0xff]   ;;  %v17025_v38 = vrot.slane %v16933_v41, %v15826_v50  ;;  %v1976_v41 = vcombine.high %v16956_v31, %v16956_v31 }
 0x3cf   : > { %v14881_v31 = vld [vmem:[%s15775_s16 + $0xf24] ss:$8 sps:$4 sm:$0xff]  }
 0x3d0   : > { %10027 = vmatpush1.bf16.msra.mxu1 %v14782_v39  ;;  %v17029_v39 = vrot.slane %v16937_v16, %v15826_v50  ;;  %v14873_v16 = vld [vmem:[%s15775_s16 + $0xf10] ss:$8 sps:$4 sm:$0xff]  }
 0x3d1   : > { %10929 = vmatpush1.bf16.msra.mxu0 %v14785_v40  ;;  %10028 = vmatprep.subr.bf16.mxu1 %v14790_v45  ;;  %v14867_v40 = vld [vmem:[%s15775_s16 + $0xf00] ss:$8 sps:$4 sm:$0xff]  }
 0x3d2   : > { %10930 = vmatprep.subr.bf16.mxu0 %v14793_v62  ;;  %v14870_v45 = vld [vmem:[%s15775_s16 + $0x2500] ss:$8 sps:$4 sm:$0xff]   ;;  %v14875_v62 = vld [vmem:[%s15775_s16 + $0xf14] ss:$8 sps:$4 sm:$0xff]  }
 0x3d4   : > { %10029 = vmatpush1.bf16.msra.mxu1 %v14788_v23  ;;  %v14878_v23 = vld [vmem:[%s15775_s16 + $0x2514] ss:$8 sps:$4 sm:$0xff]  }
 0x3d5   : > { %10931 = vmatpush1.bf16.msra.mxu0 %v14791_v48  ;;  %10030 = vmatprep.subr.bf16.mxu1 %v14796_v33  ;;  %v2269_v48 = vcombine.high %v16959_v14, %v16959_v14  ;;  %v14876_v33 = vld [vmem:[%s15775_s16 + $0x2510] ss:$8 sps:$4 sm:$0xff]   ;;  %v14879_v14 = vld [vmem:[%s15775_s16 + $0xf20] ss:$8 sps:$4 sm:$0xff]  }
 0x3d6   : > { %10932 = vmatprep.subr.bf16.mxu0 %v14799_v19  ;;  %v14884_v19 = vld [vmem:[%s15775_s16 + $0x2524] ss:$8 sps:$4 sm:$0xff]  }
 0x3d8   : > { %10031 = vmatpush1.bf16.msra.mxu1 %v14794_v15  ;;  %v14882_v15 = vld [vmem:[%s15775_s16 + $0x2520] ss:$8 sps:$4 sm:$0xff]  }
 0x3d9   : > { %10933 = vmatpush1.bf16.msra.mxu0 %v14797_v49  ;;  %10032 = vmatprep.subr.bf16.mxu1 %v14802_v36  ;;  %v14887_v49 = vld [vmem:[%s15775_s16 + $0xf34] ss:$8 sps:$4 sm:$0xff]  }
 0x3da   : > { %10934 = vmatprep.subr.bf16.mxu0 %v14805_v51  ;;  %v14890_v36 = vld [vmem:[%s15775_s16 + $0x2534] ss:$8 sps:$4 sm:$0xff]   ;;  %v14885_v51 = vld [vmem:[%s15775_s16 + $0xf30] ss:$8 sps:$4 sm:$0xff]  }
 0x3dc   : > { %10033 = vmatpush1.bf16.msra.mxu1 %v14800_v35  ;;  %v14888_v35 = vld [vmem:[%s15775_s16 + $0x2530] ss:$8 sps:$4 sm:$0xff]  }
 0x3dd   : > { %10935 = vmatpush1.bf16.msra.mxu0 %v14803_v42  ;;  %10034 = vmatprep.subr.bf16.mxu1 %v14808_v52  ;;  %v14893_v42 = vld [vmem:[%s15775_s16 + $0xf44] ss:$8 sps:$4 sm:$0xff]  }
 0x3de   : > { %10936 = vmatprep.subr.bf16.mxu0 %v14811_v54  ;;  %v14896_v52 = vld [vmem:[%s15775_s16 + $0x2544] ss:$8 sps:$4 sm:$0xff]   ;;  %v14891_v54 = vld [vmem:[%s15775_s16 + $0xf40] ss:$8 sps:$4 sm:$0xff]  }
 0x3e0   : > { %10035 = vmatpush1.bf16.msra.mxu1 %v14806_v56  ;;  %v14894_v56 = vld [vmem:[%s15775_s16 + $0x2540] ss:$8 sps:$4 sm:$0xff]  }
 0x3e1   : > { %10937 = vmatpush1.bf16.msra.mxu0 %v14809_v43  ;;  %10036 = vmatprep.subr.bf16.mxu1 %v14814_v63  ;;  %v14899_v43 = vld [vmem:[%s15775_s16 + $0xf54] ss:$8 sps:$4 sm:$0xff]  }
 0x3e2   : > { %10938 = vmatprep.subr.bf16.mxu0 %v14817_v0  ;;  %v14902_v63 = vld [vmem:[%s15775_s16 + $0x2554] ss:$8 sps:$4 sm:$0xff]   ;;  %v14897_v0 = vld [vmem:[%s15775_s16 + $0xf50] ss:$8 sps:$4 sm:$0xff]  }
 0x3e4   : > { %10037 = vmatpush1.bf16.msra.mxu1 %v14812_v1  ;;  %v14900_v1 = vld [vmem:[%s15775_s16 + $0x2550] ss:$8 sps:$4 sm:$0xff]  }
 0x3e5   : > { %10939 = vmatpush1.bf16.msra.mxu0 %v14815_v47  ;;  %10038 = vmatprep.subr.bf16.mxu1 %v14820_v46  ;;  %v14905_v47 = vld [vmem:[%s15775_s16 + $0xf64] ss:$8 sps:$4 sm:$0xff]  }
 0x3e6   : > { %10940 = vmatprep.subr.bf16.mxu0 %v14823_v55  ;;  %v14908_v46 = vld [vmem:[%s15775_s16 + $0x2564] ss:$8 sps:$4 sm:$0xff]   ;;  %v14903_v55 = vld [vmem:[%s15775_s16 + $0xf60] ss:$8 sps:$4 sm:$0xff]  }
 0x3e8   : > { %10039 = vmatpush1.bf16.msra.mxu1 %v14818_v24  ;;  %v14906_v24 = vld [vmem:[%s15775_s16 + $0x2560] ss:$8 sps:$4 sm:$0xff]  }
 0x3e9   : > { %10941 = vmatpush1.bf16.msra.mxu0 %v14821_v18  ;;  %10040 = vmatprep.subr.bf16.mxu1 %v14826_v4  ;;  %v14911_v18 = vld [vmem:[%s15775_s16 + $0xf74] ss:$8 sps:$4 sm:$0xff]  }
 0x3ea   : > { %10942 = vmatprep.subr.bf16.mxu0 %v14829_v59  ;;  %v14914_v4 = vld [vmem:[%s15775_s16 + $0x2574] ss:$8 sps:$4 sm:$0xff]   ;;  %v14909_v59 = vld [vmem:[%s15775_s16 + $0xf70] ss:$8 sps:$4 sm:$0xff]  }
 0x3ec   : > { %10041 = vmatpush1.bf16.msra.mxu1 %v14824_v5  ;;  %v14912_v5 = vld [vmem:[%s15775_s16 + $0x2570] ss:$8 sps:$4 sm:$0xff]  }
 0x3ed   : > { %10943 = vmatpush1.bf16.msra.mxu0 %v14827_v60  ;;  %10042 = vmatprep.subr.bf16.mxu1 %v14832_v6  ;;  %v14917_v60 = vld [vmem:[%s15775_s16 + $0xf84] ss:$8 sps:$4 sm:$0xff]  }
 0x3ee   : > { %10944 = vmatprep.subr.bf16.mxu0 %v14835_v7  ;;  %v14920_v6 = vld [vmem:[%s15775_s16 + $0x2584] ss:$8 sps:$4 sm:$0xff]   ;;  %v14915_v7 = vld [vmem:[%s15775_s16 + $0xf80] ss:$8 sps:$4 sm:$0xff]  }
 0x3f0   : > { %10043 = vmatpush1.bf16.msra.mxu1 %v14830_v8  ;;  %v14918_v8 = vld [vmem:[%s15775_s16 + $0x2580] ss:$8 sps:$4 sm:$0xff]  }
 0x3f1   : > { %10945 = vmatpush1.bf16.msra.mxu0 %v14833_v9  ;;  %10044 = vmatprep.subr.bf16.mxu1 %v14838_v58  ;;  %v14923_v9 = vld [vmem:[%s15775_s16 + $0xf94] ss:$8 sps:$4 sm:$0xff]  }
 0x3f2   : > { %10946 = vmatprep.subr.bf16.mxu0 %v14841_v11  ;;  %v14926_v58 = vld [vmem:[%s15775_s16 + $0x2594] ss:$8 sps:$4 sm:$0xff]   ;;  %v14921_v11 = vld [vmem:[%s15775_s16 + $0xf90] ss:$8 sps:$4 sm:$0xff]  }
 0x3f4   : > { %10045 = vmatpush1.bf16.msra.mxu1 %v14836_v12  ;;  %v14924_v12 = vld [vmem:[%s15775_s16 + $0x2590] ss:$8 sps:$4 sm:$0xff]  }
 0x3f5   : > { %10947 = vmatpush1.bf16.msra.mxu0 %v14839_v21  ;;  %10046 = vmatprep.subr.bf16.mxu1 %v14844_v22  ;;  %v14929_v21 = vld [vmem:[%s15775_s16 + $0xfa4] ss:$8 sps:$4 sm:$0xff]  }
 0x3f6   : > { %10948 = vmatprep.subr.bf16.mxu0 %v14847_v3  ;;  %v14932_v22 = vld [vmem:[%s15775_s16 + $0x25a4] ss:$8 sps:$4 sm:$0xff]   ;;  %v14927_v3 = vld [vmem:[%s15775_s16 + $0xfa0] ss:$8 sps:$4 sm:$0xff]  }
 0x3f8   : > { %10047 = vmatpush1.bf16.msra.mxu1 %v14842_v2  ;;  %v14930_v2 = vld [vmem:[%s15775_s16 + $0x25a0] ss:$8 sps:$4 sm:$0xff]  }
 0x3f9   : > { %10949 = vmatpush1.bf16.msra.mxu0 %v14845_v37  ;;  %10048 = vmatprep.subr.bf16.mxu1 %v14850_v25  ;;  %v14935_v37 = vld [vmem:[%s15775_s16 + $0xfb4] ss:$8 sps:$4 sm:$0xff]  }
 0x3fa   : > { %10950 = vmatprep.subr.bf16.mxu0 %v14853_v10  ;;  %v14938_v25 = vld [vmem:[%s15775_s16 + $0x25b4] ss:$8 sps:$4 sm:$0xff]   ;;  %v14933_v10 = vld [vmem:[%s15775_s16 + $0xfb0] ss:$8 sps:$4 sm:$0xff]  }
 0x3fc   : > { %10049 = vmatpush1.bf16.msra.mxu1 %v14848_v13  ;;  %v14936_v13 = vld [vmem:[%s15775_s16 + $0x25b0] ss:$8 sps:$4 sm:$0xff]  }
 0x3fd   : > { %10951 = vmatpush1.bf16.msra.mxu0 %v14851_v57  ;;  %10050 = vmatprep.subr.bf16.mxu1 %v14856_v53  ;;  %v14941_v57 = vld [vmem:[%s15775_s16 + $0xfc4] ss:$8 sps:$4 sm:$0xff]  }
 0x3fe   : > { %10952 = vmatprep.subr.bf16.mxu0 %v14859_v61  ;;  %v14944_v53 = vld [vmem:[%s15775_s16 + $0x25c4] ss:$8 sps:$4 sm:$0xff]   ;;  %v14939_v61 = vld [vmem:[%s15775_s16 + $0xfc0] ss:$8 sps:$4 sm:$0xff]  }
 0x400   : > { %10051 = vmatpush1.bf16.msra.mxu1 %v14854_v26  ;;  %v14942_v26 = vld [vmem:[%s15775_s16 + $0x25c0] ss:$8 sps:$4 sm:$0xff]  }
 0x401   : > { %10953 = vmatpush1.bf16.msra.mxu0 %v14857_v27  ;;  %10052 = vmatprep.subr.bf16.mxu1 %v14862_v28  ;;  %v14947_v27 = vld [vmem:[%s15775_s16 + $0xfd4] ss:$8 sps:$4 sm:$0xff]  }
 0x402   : > { %10954 = vmatprep.subr.bf16.mxu0 %v14865_v29  ;;  %v14950_v28 = vld [vmem:[%s15775_s16 + $0x25d4] ss:$8 sps:$4 sm:$0xff]   ;;  %v14945_v29 = vld [vmem:[%s15775_s16 + $0xfd0] ss:$8 sps:$4 sm:$0xff]  }
 0x404   : > { %10053 = vmatpush1.bf16.msra.mxu1 %v14860_v30  ;;  %v14948_v30 = vld [vmem:[%s15775_s16 + $0x25d0] ss:$8 sps:$4 sm:$0xff]  }
 0x405   : > { %10955 = vmatpush1.bf16.msra.mxu0 %v14863_v17  ;;  %10063 = vmatprep.subr.bf16.mxu1 %v14869_v32  ;;  %v14953_v17 = vld [vmem:[%s15775_s16 + $0xfe4] ss:$8 sps:$4 sm:$0xff]  }
 0x406   : > { %10965 = vmatprep.subr.bf16.mxu0 %v14872_v34  ;;  %v14956_v32 = vld [vmem:[%s15775_s16 + $0x25e4] ss:$8 sps:$4 sm:$0xff]   ;;  %v2222_v34 = vcombine.high %v16926_v20, %v16926_v20  ;;  %v14957_v20 = vld [vmem:[%s15775_s16 + $0xff0] ss:$8 sps:$4 sm:$0xff]  }
 0x407   : > { %10055 = vmatmul.mubr.bf16.vlgmr.msra.gmra.mrb[0].mxu1 %v17025_v38 }
 0x408   : > { %10957 = vmatmul.mubr.bf16.vlgmr.msra.gmra.mrb[0].mxu0 %v17029_v39  ;;  %10064 = vmatpush1.bf16.msra.mxu1 %v14867_v40  ;;  %v17096_v40 = vld [vmem:[%s15770_s12 + $0x20] sm:$0xff] }
 0x409   : > { %10966 = vmatpush1.bf16.msra.mxu0 %v14870_v45  ;;  %10065 = vmatprep.subr.bf16.mxu1 %v14875_v62  ;;  %v14951_v45 = vld [vmem:[%s15775_s16 + $0xfe0] ss:$8 sps:$4 sm:$0xff]  }
 0x40a   : > { %10967 = vmatprep.subr.bf16.mxu0 %v14878_v23  ;;  %10095 = vmatprep.mubr.bf16.mxu1 %v1976_v41  ;;  %v14954_v62 = vld [vmem:[%s15775_s16 + $0x25e0] ss:$8 sps:$4 sm:$0xff]   ;;  %v14959_v23 = vld [vmem:[%s15775_s16 + $0xff4] ss:$8 sps:$4 sm:$0xff]  }
 0x40b   : > { %10997 = vmatprep.mubr.bf16.mxu0 %v2269_v48  ;;  %v14962_v41 = vld [vmem:[%s15775_s16 + $0x25f4] ss:$8 sps:$4 sm:$0xff]   ;;  %v17104_v48 = vrot.slane %v17096_v40, %v15826_v50 }
 0x40c   : > { %10066 = vmatpush1.bf16.msra.mxu1 %v14873_v16  ;;  %v17107_v16 = vrot.slane %v2222_v34, %v15826_v50  ;;  %v15029_v34 = vld [vmem:[%s15775_s16 + $0x10b0] ss:$8 sps:$4 sm:$0xff]  }
 0x40d   : > { %10968 = vmatpush1.bf16.msra.mxu0 %v14876_v33  ;;  %10067 = vmatprep.subr.bf16.mxu1 %v14881_v31  ;;  %v14960_v33 = vld [vmem:[%s15775_s16 + $0x25f0] ss:$8 sps:$4 sm:$0xff]   ;;  %v14965_v31 = vld [vmem:[%s15775_s16 + $0x1004] ss:$8 sps:$4 sm:$0xff]  }
 0x40e   : > { %10969 = vmatprep.subr.bf16.mxu0 %v14884_v19  ;;  %v14968_v19 = vld [vmem:[%s15775_s16 + $0x2604] ss:$8 sps:$4 sm:$0xff]  }
 0x410   : > { %10068 = vmatpush1.bf16.msra.mxu1 %v14879_v14  ;;  %v1992_v14 = vcombine.high %v17104_v48, %v17104_v48 }
 0x411   : > { %10970 = vmatpush1.bf16.msra.mxu0 %v14882_v15  ;;  %10069 = vmatprep.subr.bf16.mxu1 %v14887_v49  ;;  %v2238_v15 = vcombine.high %v17107_v16, %v17107_v16  ;;  %v1974_v49 = vcombine.high %v17025_v38, %v17025_v38 }
 0x412   : > { %10971 = vmatprep.subr.bf16.mxu0 %v14890_v36  ;;  %v2267_v36 = vcombine.high %v17029_v39, %v17029_v39  ;;  %v14969_v39 = vld [vmem:[%s15775_s16 + $0x1010] ss:$8 sps:$4 sm:$0xff]  }
 0x413   : > { %v17129_v38 = vrot.slane %v2238_v15, %v15826_v50  ;;  %v15049_v15 = vld [vmem:[%s15775_s16 + $0x10e4] ss:$8 sps:$4 sm:$0xff]  }
 0x414   : > { %10070 = vmatpush1.bf16.msra.mxu1 %v14885_v51  ;;  %v14963_v51 = vld [vmem:[%s15775_s16 + $0x1000] ss:$8 sps:$4 sm:$0xff]  }
 0x415   : > { %10972 = vmatpush1.bf16.msra.mxu0 %v14888_v35  ;;  %10071 = vmatprep.subr.bf16.mxu1 %v14893_v42  ;;  %v14966_v35 = vld [vmem:[%s15775_s16 + $0x2600] ss:$8 sps:$4 sm:$0xff]   ;;  %v14971_v42 = vld [vmem:[%s15775_s16 + $0x1014] ss:$8 sps:$4 sm:$0xff]  }
 0x416   : > { %10973 = vmatprep.subr.bf16.mxu0 %v14896_v52  ;;  %v14974_v52 = vld [vmem:[%s15775_s16 + $0x2614] ss:$8 sps:$4 sm:$0xff]  }
 0x418   : > { %10072 = vmatpush1.bf16.msra.mxu1 %v14891_v54  ;;  %v17126_v54 = vrot.slane %v1992_v14, %v15826_v50  ;;  %v15044_v14 = vld [vmem:[%s15775_s16 + $0x26d0] ss:$8 sps:$4 sm:$0xff]  }
 0x419   : > { %10974 = vmatpush1.bf16.msra.mxu0 %v14894_v56  ;;  %10073 = vmatprep.subr.bf16.mxu1 %v14899_v43  ;;  %v14972_v56 = vld [vmem:[%s15775_s16 + $0x2610] ss:$8 sps:$4 sm:$0xff]   ;;  %v14977_v43 = vld [vmem:[%s15775_s16 + $0x1024] ss:$8 sps:$4 sm:$0xff]  }
 0x41a   : > { %10975 = vmatprep.subr.bf16.mxu0 %v14902_v63  ;;  %v14980_v63 = vld [vmem:[%s15775_s16 + $0x2624] ss:$8 sps:$4 sm:$0xff]  }
 0x41c   : > { %10074 = vmatpush1.bf16.msra.mxu1 %v14897_v0  ;;  %v14975_v0 = vld [vmem:[%s15775_s16 + $0x1020] ss:$8 sps:$4 sm:$0xff]  }
 0x41d   : > { %10976 = vmatpush1.bf16.msra.mxu0 %v14900_v1  ;;  %10075 = vmatprep.subr.bf16.mxu1 %v14905_v47  ;;  %v14978_v1 = vld [vmem:[%s15775_s16 + $0x2620] ss:$8 sps:$4 sm:$0xff]   ;;  %v14983_v47 = vld [vmem:[%s15775_s16 + $0x1034] ss:$8 sps:$4 sm:$0xff]  }
 0x41e   : > { %10977 = vmatprep.subr.bf16.mxu0 %v14908_v46  ;;  %v14986_v46 = vld [vmem:[%s15775_s16 + $0x2634] ss:$8 sps:$4 sm:$0xff]  }
 0x420   : > { %10076 = vmatpush1.bf16.msra.mxu1 %v14903_v55  ;;  %v14981_v55 = vld [vmem:[%s15775_s16 + $0x1030] ss:$8 sps:$4 sm:$0xff]  }
 0x421   : > { %10978 = vmatpush1.bf16.msra.mxu0 %v14906_v24  ;;  %10077 = vmatprep.subr.bf16.mxu1 %v14911_v18  ;;  %v14984_v24 = vld [vmem:[%s15775_s16 + $0x2630] ss:$8 sps:$4 sm:$0xff]   ;;  %v14989_v18 = vld [vmem:[%s15775_s16 + $0x1044] ss:$8 sps:$4 sm:$0xff]  }
 0x422   : > { %10979 = vmatprep.subr.bf16.mxu0 %v14914_v4  ;;  %v14992_v4 = vld [vmem:[%s15775_s16 + $0x2644] ss:$8 sps:$4 sm:$0xff]  }
 0x424   : > { %10078 = vmatpush1.bf16.msra.mxu1 %v14909_v59  ;;  %v14987_v59 = vld [vmem:[%s15775_s16 + $0x1040] ss:$8 sps:$4 sm:$0xff]  }
 0x425   : > { %10980 = vmatpush1.bf16.msra.mxu0 %v14912_v5  ;;  %10079 = vmatprep.subr.bf16.mxu1 %v14917_v60  ;;  %v14990_v5 = vld [vmem:[%s15775_s16 + $0x2640] ss:$8 sps:$4 sm:$0xff]   ;;  %v14995_v60 = vld [vmem:[%s15775_s16 + $0x1054] ss:$8 sps:$4 sm:$0xff]  }
 0x426   : > { %10981 = vmatprep.subr.bf16.mxu0 %v14920_v6  ;;  %v14998_v6 = vld [vmem:[%s15775_s16 + $0x2654] ss:$8 sps:$4 sm:$0xff]  }
 0x428   : > { %10080 = vmatpush1.bf16.msra.mxu1 %v14915_v7  ;;  %v14993_v7 = vld [vmem:[%s15775_s16 + $0x1050] ss:$8 sps:$4 sm:$0xff]  }
 0x429   : > { %10982 = vmatpush1.bf16.msra.mxu0 %v14918_v8  ;;  %10081 = vmatprep.subr.bf16.mxu1 %v14923_v9  ;;  %v14996_v8 = vld [vmem:[%s15775_s16 + $0x2650] ss:$8 sps:$4 sm:$0xff]   ;;  %v15001_v9 = vld [vmem:[%s15775_s16 + $0x1064] ss:$8 sps:$4 sm:$0xff]  }
 0x42a   : > { %10983 = vmatprep.subr.bf16.mxu0 %v14926_v58  ;;  %v15004_v58 = vld [vmem:[%s15775_s16 + $0x2664] ss:$8 sps:$4 sm:$0xff]  }
 0x42c   : > { %10082 = vmatpush1.bf16.msra.mxu1 %v14921_v11  ;;  %v14999_v11 = vld [vmem:[%s15775_s16 + $0x1060] ss:$8 sps:$4 sm:$0xff]  }
 0x42d   : > { %10984 = vmatpush1.bf16.msra.mxu0 %v14924_v12  ;;  %10083 = vmatprep.subr.bf16.mxu1 %v14929_v21  ;;  %v15002_v12 = vld [vmem:[%s15775_s16 + $0x2660] ss:$8 sps:$4 sm:$0xff]   ;;  %v15007_v21 = vld [vmem:[%s15775_s16 + $0x1074] ss:$8 sps:$4 sm:$0xff]  }
 0x42e   : > { %10985 = vmatprep.subr.bf16.mxu0 %v14932_v22  ;;  %v15010_v22 = vld [vmem:[%s15775_s16 + $0x2674] ss:$8 sps:$4 sm:$0xff]  }
 0x430   : > { %10084 = vmatpush1.bf16.msra.mxu1 %v14927_v3  ;;  %v15005_v3 = vld [vmem:[%s15775_s16 + $0x1070] ss:$8 sps:$4 sm:$0xff]  }
 0x431   : > { %10986 = vmatpush1.bf16.msra.mxu0 %v14930_v2  ;;  %10085 = vmatprep.subr.bf16.mxu1 %v14935_v37  ;;  %v15008_v2 = vld [vmem:[%s15775_s16 + $0x2670] ss:$8 sps:$4 sm:$0xff]   ;;  %v15013_v37 = vld [vmem:[%s15775_s16 + $0x1084] ss:$8 sps:$4 sm:$0xff]  }
 0x432   : > { %10987 = vmatprep.subr.bf16.mxu0 %v14938_v25  ;;  %v15016_v25 = vld [vmem:[%s15775_s16 + $0x2684] ss:$8 sps:$4 sm:$0xff]  }
 0x434   : > { %10086 = vmatpush1.bf16.msra.mxu1 %v14933_v10  ;;  %v15011_v10 = vld [vmem:[%s15775_s16 + $0x1080] ss:$8 sps:$4 sm:$0xff]  }
 0x435   : > { %10988 = vmatpush1.bf16.msra.mxu0 %v14936_v13  ;;  %10087 = vmatprep.subr.bf16.mxu1 %v14941_v57  ;;  %v15014_v13 = vld [vmem:[%s15775_s16 + $0x2680] ss:$8 sps:$4 sm:$0xff]   ;;  %v15019_v57 = vld [vmem:[%s15775_s16 + $0x1094] ss:$8 sps:$4 sm:$0xff]  }
 0x436   : > { %10989 = vmatprep.subr.bf16.mxu0 %v14944_v53  ;;  %v15022_v53 = vld [vmem:[%s15775_s16 + $0x2694] ss:$8 sps:$4 sm:$0xff]  }
 0x438   : > { %10088 = vmatpush1.bf16.msra.mxu1 %v14939_v61  ;;  %v15017_v61 = vld [vmem:[%s15775_s16 + $0x1090] ss:$8 sps:$4 sm:$0xff]  }
 0x439   : > { %10990 = vmatpush1.bf16.msra.mxu0 %v14942_v26  ;;  %10089 = vmatprep.subr.bf16.mxu1 %v14947_v27  ;;  %v15020_v26 = vld [vmem:[%s15775_s16 + $0x2690] ss:$8 sps:$4 sm:$0xff]   ;;  %v15025_v27 = vld [vmem:[%s15775_s16 + $0x10a4] ss:$8 sps:$4 sm:$0xff]  }
 0x43a   : > { %10991 = vmatprep.subr.bf16.mxu0 %v14950_v28  ;;  %v15028_v28 = vld [vmem:[%s15775_s16 + $0x26a4] ss:$8 sps:$4 sm:$0xff]  }
 0x43c   : > { %10090 = vmatpush1.bf16.msra.mxu1 %v14945_v29  ;;  %v15023_v29 = vld [vmem:[%s15775_s16 + $0x10a0] ss:$8 sps:$4 sm:$0xff]  }
 0x43d   : > { %10992 = vmatpush1.bf16.msra.mxu0 %v14948_v30  ;;  %10091 = vmatprep.subr.bf16.mxu1 %v14953_v17  ;;  %v15026_v30 = vld [vmem:[%s15775_s16 + $0x26a0] ss:$8 sps:$4 sm:$0xff]   ;;  %v15031_v17 = vld [vmem:[%s15775_s16 + $0x10b4] ss:$8 sps:$4 sm:$0xff]  }
 0x43e   : > { %10993 = vmatprep.subr.bf16.mxu0 %v14956_v32  ;;  %v15034_v32 = vld [vmem:[%s15775_s16 + $0x26b4] ss:$8 sps:$4 sm:$0xff]  }
 0x440   : > { %10092 = vmatpush1.bf16.msra.mxu1 %v14951_v45  ;;  %v15032_v45 = vld [vmem:[%s15775_s16 + $0x26b0] ss:$8 sps:$4 sm:$0xff]  }
 0x441   : > { %10994 = vmatpush1.bf16.msra.mxu0 %v14954_v62  ;;  %10093 = vmatprep.subr.bf16.mxu1 %v14959_v23  ;;  %v15037_v62 = vld [vmem:[%s15775_s16 + $0x10c4] ss:$8 sps:$4 sm:$0xff]  }
 0x442   : > { %10995 = vmatprep.subr.bf16.mxu0 %v14962_v41  ;;  %v15040_v23 = vld [vmem:[%s15775_s16 + $0x26c4] ss:$8 sps:$4 sm:$0xff]   ;;  %v15035_v41 = vld [vmem:[%s15775_s16 + $0x10c0] ss:$8 sps:$4 sm:$0xff]  }
 0x444   : > { %10094 = vmatpush1.bf16.msra.mxu1 %v14957_v20  ;;  %v15038_v20 = vld [vmem:[%s15775_s16 + $0x26c0] ss:$8 sps:$4 sm:$0xff]  }
 0x445   : > { %10996 = vmatpush1.bf16.msra.mxu0 %v14960_v33  ;;  %10104 = vmatprep.subr.bf16.mxu1 %v14965_v31  ;;  %v15043_v33 = vld [vmem:[%s15775_s16 + $0x10d4] ss:$8 sps:$4 sm:$0xff]  }
 0x446   : > { %11006 = vmatprep.subr.bf16.mxu0 %v14968_v19  ;;  %v15046_v31 = vld [vmem:[%s15775_s16 + $0x26d4] ss:$8 sps:$4 sm:$0xff]   ;;  %v15041_v19 = vld [vmem:[%s15775_s16 + $0x10d0] ss:$8 sps:$4 sm:$0xff]  }
 0x447   : > { %10096 = vmatmul.mubr.bf16.vlgmr.msra.gmra.mrb[0].mxu1 %v1974_v49  ;;  %v15052_v49 = vld [vmem:[%s15775_s16 + $0x26e4] ss:$8 sps:$4 sm:$0xff]  }
 0x448   : > { %10998 = vmatmul.mubr.bf16.vlgmr.msra.gmra.mrb[0].mxu0 %v2267_v36  ;;  %10105 = vmatpush1.bf16.msra.mxu1 %v14963_v51  ;;  %v15047_v36 = vld [vmem:[%s15775_s16 + $0x10e0] ss:$8 sps:$4 sm:$0xff]  }
 0x449   : > { %11007 = vmatpush1.bf16.msra.mxu0 %v14966_v35  ;;  %10106 = vmatprep.subr.bf16.mxu1 %v14971_v42  ;;  %v15050_v51 = vld [vmem:[%s15775_s16 + $0x26e0] ss:$8 sps:$4 sm:$0xff]   ;;  %v15055_v35 = vld [vmem:[%s15775_s16 + $0x10f4] ss:$8 sps:$4 sm:$0xff]  }
 0x44a   : > { %11008 = vmatprep.subr.bf16.mxu0 %v14974_v52  ;;  %10136 = vmatprep.mubr.bf16.mxu1 %v17126_v54  ;;  %v15058_v42 = vld [vmem:[%s15775_s16 + $0x26f4] ss:$8 sps:$4 sm:$0xff]   ;;  %v15053_v52 = vld [vmem:[%s15775_s16 + $0x10f0] ss:$8 sps:$4 sm:$0xff]  }
 0x44b   : > { %11038 = vmatprep.mubr.bf16.mxu0 %v17129_v38 }
 0x44c   : > { %10107 = vmatpush1.bf16.msra.mxu1 %v14969_v39  ;;  %v15056_v39 = vld [vmem:[%s15775_s16 + $0x26f0] ss:$8 sps:$4 sm:$0xff]  }
 0x44d   : > { %11009 = vmatpush1.bf16.msra.mxu0 %v14972_v56  ;;  %10108 = vmatprep.subr.bf16.mxu1 %v14977_v43  ;;  %v15061_v56 = vld [vmem:[%s15775_s16 + $0x1104] ss:$8 sps:$4 sm:$0xff]  }
 0x44e   : > { %11010 = vmatprep.subr.bf16.mxu0 %v14980_v63  ;;  %v15065_v43 = vld [vmem:[%s15775_s16 + $0x2704] ss:$8 sps:$4 sm:$0xff]   ;;  %v17195_v63 = vrot.slane %v17104_v48, %v15826_v50  ;;  %v2024_v48 = vcombine.high %v17126_v54, %v17126_v54 }
 0x44f   : > { %v15074_v54 = vld [vmem:[%s15775_s16 + $0x1124] ss:$8 sps:$4 sm:$0xff]  }
 0x450   : > { %10109 = vmatpush1.bf16.msra.mxu1 %v14975_v0  ;;  %v17199_v0 = vrot.slane %v17107_v16, %v15826_v50  ;;  %v15066_v16 = vld [vmem:[%s15775_s16 + $0x1110] ss:$8 sps:$4 sm:$0xff]  }
 0x451   : > { %11011 = vmatpush1.bf16.msra.mxu0 %v14978_v1  ;;  %10110 = vmatprep.subr.bf16.mxu1 %v14983_v47  ;;  %v15059_v1 = vld [vmem:[%s15775_s16 + $0x1100] ss:$8 sps:$4 sm:$0xff]  }
 0x452   : > { %11012 = vmatprep.subr.bf16.mxu0 %v14986_v46  ;;  %v15063_v47 = vld [vmem:[%s15775_s16 + $0x2700] ss:$8 sps:$4 sm:$0xff]   ;;  %v15068_v46 = vld [vmem:[%s15775_s16 + $0x1114] ss:$8 sps:$4 sm:$0xff]  }
 0x454   : > { %10111 = vmatpush1.bf16.msra.mxu1 %v14981_v55  ;;  %v15071_v55 = vld [vmem:[%s15775_s16 + $0x2714] ss:$8 sps:$4 sm:$0xff]  }
 0x455   : > { %11013 = vmatpush1.bf16.msra.mxu0 %v14984_v24  ;;  %10112 = vmatprep.subr.bf16.mxu1 %v14989_v18  ;;  %v2270_v24 = vcombine.high %v17129_v38, %v17129_v38  ;;  %v15069_v18 = vld [vmem:[%s15775_s16 + $0x2710] ss:$8 sps:$4 sm:$0xff]   ;;  %v15072_v38 = vld [vmem:[%s15775_s16 + $0x1120] ss:$8 sps:$4 sm:$0xff]  }
 0x456   : > { %11014 = vmatprep.subr.bf16.mxu0 %v14992_v4  ;;  %v15077_v4 = vld [vmem:[%s15775_s16 + $0x2724] ss:$8 sps:$4 sm:$0xff]  }
 0x458   : > { %10113 = vmatpush1.bf16.msra.mxu1 %v14987_v59  ;;  %v15075_v59 = vld [vmem:[%s15775_s16 + $0x2720] ss:$8 sps:$4 sm:$0xff]  }
 0x459   : > { %11015 = vmatpush1.bf16.msra.mxu0 %v14990_v5  ;;  %10114 = vmatprep.subr.bf16.mxu1 %v14995_v60  ;;  %v15080_v5 = vld [vmem:[%s15775_s16 + $0x1134] ss:$8 sps:$4 sm:$0xff]  }
 0x45a   : > { %11016 = vmatprep.subr.bf16.mxu0 %v14998_v6  ;;  %v15083_v60 = vld [vmem:[%s15775_s16 + $0x2734] ss:$8 sps:$4 sm:$0xff]   ;;  %v15078_v6 = vld [vmem:[%s15775_s16 + $0x1130] ss:$8 sps:$4 sm:$0xff]  }
 0x45c   : > { %10115 = vmatpush1.bf16.msra.mxu1 %v14993_v7  ;;  %v15081_v7 = vld [vmem:[%s15775_s16 + $0x2730] ss:$8 sps:$4 sm:$0xff]  }
 0x45d   : > { %11017 = vmatpush1.bf16.msra.mxu0 %v14996_v8  ;;  %10116 = vmatprep.subr.bf16.mxu1 %v15001_v9  ;;  %v15086_v8 = vld [vmem:[%s15775_s16 + $0x1144] ss:$8 sps:$4 sm:$0xff]  }
 0x45e   : > { %11018 = vmatprep.subr.bf16.mxu0 %v15004_v58  ;;  %v15089_v9 = vld [vmem:[%s15775_s16 + $0x2744] ss:$8 sps:$4 sm:$0xff]   ;;  %v15084_v58 = vld [vmem:[%s15775_s16 + $0x1140] ss:$8 sps:$4 sm:$0xff]  }
 0x460   : > { %10117 = vmatpush1.bf16.msra.mxu1 %v14999_v11  ;;  %v15087_v11 = vld [vmem:[%s15775_s16 + $0x2740] ss:$8 sps:$4 sm:$0xff]  }
 0x461   : > { %11019 = vmatpush1.bf16.msra.mxu0 %v15002_v12  ;;  %10118 = vmatprep.subr.bf16.mxu1 %v15007_v21  ;;  %v15092_v12 = vld [vmem:[%s15775_s16 + $0x1154] ss:$8 sps:$4 sm:$0xff]  }
 0x462   : > { %11020 = vmatprep.subr.bf16.mxu0 %v15010_v22  ;;  %v15095_v21 = vld [vmem:[%s15775_s16 + $0x2754] ss:$8 sps:$4 sm:$0xff]   ;;  %v15090_v22 = vld [vmem:[%s15775_s16 + $0x1150] ss:$8 sps:$4 sm:$0xff]  }
 0x464   : > { %10119 = vmatpush1.bf16.msra.mxu1 %v15005_v3  ;;  %v15093_v3 = vld [vmem:[%s15775_s16 + $0x2750] ss:$8 sps:$4 sm:$0xff]  }
 0x465   : > { %11021 = vmatpush1.bf16.msra.mxu0 %v15008_v2  ;;  %10120 = vmatprep.subr.bf16.mxu1 %v15013_v37  ;;  %v15098_v2 = vld [vmem:[%s15775_s16 + $0x1164] ss:$8 sps:$4 sm:$0xff]  }
 0x466   : > { %11022 = vmatprep.subr.bf16.mxu0 %v15016_v25  ;;  %v15101_v37 = vld [vmem:[%s15775_s16 + $0x2764] ss:$8 sps:$4 sm:$0xff]   ;;  %v15096_v25 = vld [vmem:[%s15775_s16 + $0x1160] ss:$8 sps:$4 sm:$0xff]  }
 0x468   : > { %10121 = vmatpush1.bf16.msra.mxu1 %v15011_v10  ;;  %v15099_v10 = vld [vmem:[%s15775_s16 + $0x2760] ss:$8 sps:$4 sm:$0xff]  }
 0x469   : > { %11023 = vmatpush1.bf16.msra.mxu0 %v15014_v13  ;;  %10122 = vmatprep.subr.bf16.mxu1 %v15019_v57  ;;  %v15104_v13 = vld [vmem:[%s15775_s16 + $0x1174] ss:$8 sps:$4 sm:$0xff]  }
 0x46a   : > { %11024 = vmatprep.subr.bf16.mxu0 %v15022_v53  ;;  %v15107_v57 = vld [vmem:[%s15775_s16 + $0x2774] ss:$8 sps:$4 sm:$0xff]   ;;  %v15102_v53 = vld [vmem:[%s15775_s16 + $0x1170] ss:$8 sps:$4 sm:$0xff]  }
 0x46c   : > { %10123 = vmatpush1.bf16.msra.mxu1 %v15017_v61  ;;  %v15105_v61 = vld [vmem:[%s15775_s16 + $0x2770] ss:$8 sps:$4 sm:$0xff]  }
 0x46d   : > { %11025 = vmatpush1.bf16.msra.mxu0 %v15020_v26  ;;  %10124 = vmatprep.subr.bf16.mxu1 %v15025_v27  ;;  %v15110_v26 = vld [vmem:[%s15775_s16 + $0x1184] ss:$8 sps:$4 sm:$0xff]  }
 0x46e   : > { %11026 = vmatprep.subr.bf16.mxu0 %v15028_v28  ;;  %v15113_v27 = vld [vmem:[%s15775_s16 + $0x2784] ss:$8 sps:$4 sm:$0xff]   ;;  %v15108_v28 = vld [vmem:[%s15775_s16 + $0x1180] ss:$8 sps:$4 sm:$0xff]  }
 0x470   : > { %10125 = vmatpush1.bf16.msra.mxu1 %v15023_v29  ;;  %v15111_v29 = vld [vmem:[%s15775_s16 + $0x2780] ss:$8 sps:$4 sm:$0xff]  }
 0x471   : > { %11027 = vmatpush1.bf16.msra.mxu0 %v15026_v30  ;;  %10126 = vmatprep.subr.bf16.mxu1 %v15031_v17  ;;  %v15116_v30 = vld [vmem:[%s15775_s16 + $0x1194] ss:$8 sps:$4 sm:$0xff]  }
 0x472   : > { %11028 = vmatprep.subr.bf16.mxu0 %v15034_v32  ;;  %v15119_v17 = vld [vmem:[%s15775_s16 + $0x2794] ss:$8 sps:$4 sm:$0xff]   ;;  %v15114_v32 = vld [vmem:[%s15775_s16 + $0x1190] ss:$8 sps:$4 sm:$0xff]  }
 0x474   : > { %10127 = vmatpush1.bf16.msra.mxu1 %v15029_v34  ;;  %v15117_v34 = vld [vmem:[%s15775_s16 + $0x2790] ss:$8 sps:$4 sm:$0xff]  }
 0x475   : > { %11029 = vmatpush1.bf16.msra.mxu0 %v15032_v45  ;;  %10128 = vmatprep.subr.bf16.mxu1 %v15037_v62  ;;  %v15122_v45 = vld [vmem:[%s15775_s16 + $0x11a4] ss:$8 sps:$4 sm:$0xff]  }
 0x476   : > { %11030 = vmatprep.subr.bf16.mxu0 %v15040_v23  ;;  %v15125_v62 = vld [vmem:[%s15775_s16 + $0x27a4] ss:$8 sps:$4 sm:$0xff]   ;;  %v15120_v23 = vld [vmem:[%s15775_s16 + $0x11a0] ss:$8 sps:$4 sm:$0xff]  }
 0x478   : > { %10129 = vmatpush1.bf16.msra.mxu1 %v15035_v41  ;;  %v15123_v41 = vld [vmem:[%s15775_s16 + $0x27a0] ss:$8 sps:$4 sm:$0xff]  }
 0x479   : > { %11031 = vmatpush1.bf16.msra.mxu0 %v15038_v20  ;;  %10130 = vmatprep.subr.bf16.mxu1 %v15043_v33  ;;  %v15128_v20 = vld [vmem:[%s15775_s16 + $0x11b4] ss:$8 sps:$4 sm:$0xff]  }
 0x47a   : > { %11032 = vmatprep.subr.bf16.mxu0 %v15046_v31  ;;  %v15131_v33 = vld [vmem:[%s15775_s16 + $0x27b4] ss:$8 sps:$4 sm:$0xff]   ;;  %v15126_v31 = vld [vmem:[%s15775_s16 + $0x11b0] ss:$8 sps:$4 sm:$0xff]  }
 0x47c   : > { %10131 = vmatpush1.bf16.msra.mxu1 %v15041_v19  ;;  %v15129_v19 = vld [vmem:[%s15775_s16 + $0x27b0] ss:$8 sps:$4 sm:$0xff]  }
 0x47d   : > { %11033 = vmatpush1.bf16.msra.mxu0 %v15044_v14  ;;  %10132 = vmatprep.subr.bf16.mxu1 %v15049_v15  ;;  %v15134_v14 = vld [vmem:[%s15775_s16 + $0x11c4] ss:$8 sps:$4 sm:$0xff]  }
 0x47e   : > { %11034 = vmatprep.subr.bf16.mxu0 %v15052_v49  ;;  %v15137_v15 = vld [vmem:[%s15775_s16 + $0x27c4] ss:$8 sps:$4 sm:$0xff]   ;;  %v15132_v49 = vld [vmem:[%s15775_s16 + $0x11c0] ss:$8 sps:$4 sm:$0xff]  }
 0x480   : > { %10133 = vmatpush1.bf16.msra.mxu1 %v15047_v36  ;;  %v15135_v36 = vld [vmem:[%s15775_s16 + $0x27c0] ss:$8 sps:$4 sm:$0xff]  }
 0x481   : > { %11035 = vmatpush1.bf16.msra.mxu0 %v15050_v51  ;;  %10134 = vmatprep.subr.bf16.mxu1 %v15055_v35  ;;  %v15140_v51 = vld [vmem:[%s15775_s16 + $0x11d4] ss:$8 sps:$4 sm:$0xff]  }
 0x482   : > { %11036 = vmatprep.subr.bf16.mxu0 %v15058_v42  ;;  %v15143_v35 = vld [vmem:[%s15775_s16 + $0x27d4] ss:$8 sps:$4 sm:$0xff]   ;;  %v15138_v42 = vld [vmem:[%s15775_s16 + $0x11d0] ss:$8 sps:$4 sm:$0xff]  }
 0x484   : > { %10135 = vmatpush1.bf16.msra.mxu1 %v15053_v52  ;;  %v15141_v52 = vld [vmem:[%s15775_s16 + $0x27d0] ss:$8 sps:$4 sm:$0xff]  }
 0x485   : > { %11037 = vmatpush1.bf16.msra.mxu0 %v15056_v39  ;;  %10145 = vmatprep.subr.bf16.mxu1 %v15061_v56  ;;  %v15146_v39 = vld [vmem:[%s15775_s16 + $0x11e4] ss:$8 sps:$4 sm:$0xff]  }
 0x486   : > { %11047 = vmatprep.subr.bf16.mxu0 %v15065_v43  ;;  %v15149_v56 = vld [vmem:[%s15775_s16 + $0x27e4] ss:$8 sps:$4 sm:$0xff]   ;;  %v1977_v43 = vcombine.high %v17096_v40, %v17096_v40  ;;  %v15150_v40 = vld [vmem:[%s15775_s16 + $0x11f0] ss:$8 sps:$4 sm:$0xff]  }
 0x487   : > { %10137 = vmatmul.mubr.bf16.vlgmr.msra.gmra.mrb[0].mxu1 %v17195_v63 }
 0x488   : > { %11039 = vmatmul.mubr.bf16.vlgmr.msra.gmra.mrb[0].mxu0 %v17199_v0  ;;  %10146 = vmatpush1.bf16.msra.mxu1 %v15059_v1  ;;  %v17266_v1 = vld [vmem:[%s15770_s12 + $0x50] sm:$0xff] }
 0x489   : > { %11048 = vmatpush1.bf16.msra.mxu0 %v15063_v47  ;;  %10147 = vmatprep.subr.bf16.mxu1 %v15068_v46  ;;  %v15144_v47 = vld [vmem:[%s15775_s16 + $0x11e0] ss:$8 sps:$4 sm:$0xff]  }
 0x48a   : > { %11049 = vmatprep.subr.bf16.mxu0 %v15071_v55  ;;  %10177 = vmatprep.mubr.bf16.mxu1 %v2024_v48  ;;  %v15147_v46 = vld [vmem:[%s15775_s16 + $0x27e0] ss:$8 sps:$4 sm:$0xff]   ;;  %v15152_v55 = vld [vmem:[%s15775_s16 + $0x11f4] ss:$8 sps:$4 sm:$0xff]  }
 0x48b   : > { %11079 = vmatprep.mubr.bf16.mxu0 %v2270_v24  ;;  %v15155_v48 = vld [vmem:[%s15775_s16 + $0x27f4] ss:$8 sps:$4 sm:$0xff]   ;;  %v17273_v24 = vrot.slane %v1977_v43, %v15826_v50  ;;  %v15222_v43 = vld [vmem:[%s15775_s16 + $0x12b0] ss:$8 sps:$4 sm:$0xff]  }
 0x48c   : > { %10148 = vmatpush1.bf16.msra.mxu1 %v15066_v16  ;;  %v17277_v16 = vrot.slane %v17266_v1, %v15826_v50 }
 0x48d   : > { %11050 = vmatpush1.bf16.msra.mxu0 %v15069_v18  ;;  %10149 = vmatprep.subr.bf16.mxu1 %v15074_v54  ;;  %v15153_v18 = vld [vmem:[%s15775_s16 + $0x27f0] ss:$8 sps:$4 sm:$0xff]   ;;  %v15158_v54 = vld [vmem:[%s15775_s16 + $0x1204] ss:$8 sps:$4 sm:$0xff]  }
 0x48e   : > { %11051 = vmatprep.subr.bf16.mxu0 %v15077_v4  ;;  %v15161_v4 = vld [vmem:[%s15775_s16 + $0x2804] ss:$8 sps:$4 sm:$0xff]  }
 0x490   : > { %10150 = vmatpush1.bf16.msra.mxu1 %v15072_v38  ;;  %v1993_v38 = vcombine.high %v17273_v24, %v17273_v24 }
 0x491   : > { %11052 = vmatpush1.bf16.msra.mxu0 %v15075_v59  ;;  %10151 = vmatprep.subr.bf16.mxu1 %v15080_v5  ;;  %v2286_v59 = vcombine.high %v17277_v16, %v17277_v16  ;;  %v2022_v5 = vcombine.high %v17195_v63, %v17195_v63 }
 0x492   : > { %11053 = vmatprep.subr.bf16.mxu0 %v15083_v60  ;;  %v2268_v60 = vcombine.high %v17199_v0, %v17199_v0  ;;  %v15162_v0 = vld [vmem:[%s15775_s16 + $0x1210] ss:$8 sps:$4 sm:$0xff]  }
 0x493   : > { %v17299_v63 = vrot.slane %v2286_v59, %v15826_v50  ;;  %v15242_v59 = vld [vmem:[%s15775_s16 + $0x12e4] ss:$8 sps:$4 sm:$0xff]  }
 0x494   : > { %10152 = vmatpush1.bf16.msra.mxu1 %v15078_v6  ;;  %v15156_v6 = vld [vmem:[%s15775_s16 + $0x1200] ss:$8 sps:$4 sm:$0xff]  }
 0x495   : > { %11054 = vmatpush1.bf16.msra.mxu0 %v15081_v7  ;;  %10153 = vmatprep.subr.bf16.mxu1 %v15086_v8  ;;  %v15159_v7 = vld [vmem:[%s15775_s16 + $0x2800] ss:$8 sps:$4 sm:$0xff]   ;;  %v15164_v8 = vld [vmem:[%s15775_s16 + $0x1214] ss:$8 sps:$4 sm:$0xff]  }
 0x496   : > { %11055 = vmatprep.subr.bf16.mxu0 %v15089_v9  ;;  %v15167_v9 = vld [vmem:[%s15775_s16 + $0x2814] ss:$8 sps:$4 sm:$0xff]  }
 0x498   : > { %10154 = vmatpush1.bf16.msra.mxu1 %v15084_v58  ;;  %v17296_v58 = vrot.slane %v1993_v38, %v15826_v50  ;;  %v15237_v38 = vld [vmem:[%s15775_s16 + $0x28d0] ss:$8 sps:$4 sm:$0xff]  }
 0x499   : > { %11056 = vmatpush1.bf16.msra.mxu0 %v15087_v11  ;;  %10155 = vmatprep.subr.bf16.mxu1 %v15092_v12  ;;  %v15165_v11 = vld [vmem:[%s15775_s16 + $0x2810] ss:$8 sps:$4 sm:$0xff]   ;;  %v15170_v12 = vld [vmem:[%s15775_s16 + $0x1224] ss:$8 sps:$4 sm:$0xff]  }
 0x49a   : > { %11057 = vmatprep.subr.bf16.mxu0 %v15095_v21  ;;  %v15173_v21 = vld [vmem:[%s15775_s16 + $0x2824] ss:$8 sps:$4 sm:$0xff]  }
 0x49c   : > { %10156 = vmatpush1.bf16.msra.mxu1 %v15090_v22  ;;  %v15168_v22 = vld [vmem:[%s15775_s16 + $0x1220] ss:$8 sps:$4 sm:$0xff]  }
 0x49d   : > { %11058 = vmatpush1.bf16.msra.mxu0 %v15093_v3  ;;  %10157 = vmatprep.subr.bf16.mxu1 %v15098_v2  ;;  %v15171_v3 = vld [vmem:[%s15775_s16 + $0x2820] ss:$8 sps:$4 sm:$0xff]   ;;  %v15176_v2 = vld [vmem:[%s15775_s16 + $0x1234] ss:$8 sps:$4 sm:$0xff]  }
 0x49e   : > { %11059 = vmatprep.subr.bf16.mxu0 %v15101_v37  ;;  %v15179_v37 = vld [vmem:[%s15775_s16 + $0x2834] ss:$8 sps:$4 sm:$0xff]  }
 0x4a0   : > { %10158 = vmatpush1.bf16.msra.mxu1 %v15096_v25  ;;  %v15174_v25 = vld [vmem:[%s15775_s16 + $0x1230] ss:$8 sps:$4 sm:$0xff]  }
 0x4a1   : > { %11060 = vmatpush1.bf16.msra.mxu0 %v15099_v10  ;;  %10159 = vmatprep.subr.bf16.mxu1 %v15104_v13  ;;  %v15177_v10 = vld [vmem:[%s15775_s16 + $0x2830] ss:$8 sps:$4 sm:$0xff]   ;;  %v15182_v13 = vld [vmem:[%s15775_s16 + $0x1244] ss:$8 sps:$4 sm:$0xff]  }
 0x4a2   : > { %11061 = vmatprep.subr.bf16.mxu0 %v15107_v57  ;;  %v15185_v57 = vld [vmem:[%s15775_s16 + $0x2844] ss:$8 sps:$4 sm:$0xff]  }
 0x4a4   : > { %10160 = vmatpush1.bf16.msra.mxu1 %v15102_v53  ;;  %v15180_v53 = vld [vmem:[%s15775_s16 + $0x1240] ss:$8 sps:$4 sm:$0xff]  }
 0x4a5   : > { %11062 = vmatpush1.bf16.msra.mxu0 %v15105_v61  ;;  %10161 = vmatprep.subr.bf16.mxu1 %v15110_v26  ;;  %v15183_v61 = vld [vmem:[%s15775_s16 + $0x2840] ss:$8 sps:$4 sm:$0xff]   ;;  %v15188_v26 = vld [vmem:[%s15775_s16 + $0x1254] ss:$8 sps:$4 sm:$0xff]  }
 0x4a6   : > { %11063 = vmatprep.subr.bf16.mxu0 %v15113_v27  ;;  %v15191_v27 = vld [vmem:[%s15775_s16 + $0x2854] ss:$8 sps:$4 sm:$0xff]  }
 0x4a8   : > { %10162 = vmatpush1.bf16.msra.mxu1 %v15108_v28  ;;  %v15186_v28 = vld [vmem:[%s15775_s16 + $0x1250] ss:$8 sps:$4 sm:$0xff]  }
 0x4a9   : > { %11064 = vmatpush1.bf16.msra.mxu0 %v15111_v29  ;;  %10163 = vmatprep.subr.bf16.mxu1 %v15116_v30  ;;  %v15189_v29 = vld [vmem:[%s15775_s16 + $0x2850] ss:$8 sps:$4 sm:$0xff]   ;;  %v15194_v30 = vld [vmem:[%s15775_s16 + $0x1264] ss:$8 sps:$4 sm:$0xff]  }
 0x4aa   : > { %11065 = vmatprep.subr.bf16.mxu0 %v15119_v17  ;;  %v15197_v17 = vld [vmem:[%s15775_s16 + $0x2864] ss:$8 sps:$4 sm:$0xff]  }
 0x4ac   : > { %10164 = vmatpush1.bf16.msra.mxu1 %v15114_v32  ;;  %v15192_v32 = vld [vmem:[%s15775_s16 + $0x1260] ss:$8 sps:$4 sm:$0xff]  }
 0x4ad   : > { %11066 = vmatpush1.bf16.msra.mxu0 %v15117_v34  ;;  %10165 = vmatprep.subr.bf16.mxu1 %v15122_v45  ;;  %v15195_v34 = vld [vmem:[%s15775_s16 + $0x2860] ss:$8 sps:$4 sm:$0xff]   ;;  %v15200_v45 = vld [vmem:[%s15775_s16 + $0x1274] ss:$8 sps:$4 sm:$0xff]  }
 0x4ae   : > { %11067 = vmatprep.subr.bf16.mxu0 %v15125_v62  ;;  %v15203_v62 = vld [vmem:[%s15775_s16 + $0x2874] ss:$8 sps:$4 sm:$0xff]  }
 0x4b0   : > { %10166 = vmatpush1.bf16.msra.mxu1 %v15120_v23  ;;  %v15198_v23 = vld [vmem:[%s15775_s16 + $0x1270] ss:$8 sps:$4 sm:$0xff]  }
 0x4b1   : > { %11068 = vmatpush1.bf16.msra.mxu0 %v15123_v41  ;;  %10167 = vmatprep.subr.bf16.mxu1 %v15128_v20  ;;  %v15201_v41 = vld [vmem:[%s15775_s16 + $0x2870] ss:$8 sps:$4 sm:$0xff]   ;;  %v15206_v20 = vld [vmem:[%s15775_s16 + $0x1284] ss:$8 sps:$4 sm:$0xff]  }
 0x4b2   : > { %11069 = vmatprep.subr.bf16.mxu0 %v15131_v33  ;;  %v15209_v33 = vld [vmem:[%s15775_s16 + $0x2884] ss:$8 sps:$4 sm:$0xff]  }
 0x4b4   : > { %10168 = vmatpush1.bf16.msra.mxu1 %v15126_v31  ;;  %v15204_v31 = vld [vmem:[%s15775_s16 + $0x1280] ss:$8 sps:$4 sm:$0xff]  }
 0x4b5   : > { %11070 = vmatpush1.bf16.msra.mxu0 %v15129_v19  ;;  %10169 = vmatprep.subr.bf16.mxu1 %v15134_v14  ;;  %v15207_v19 = vld [vmem:[%s15775_s16 + $0x2880] ss:$8 sps:$4 sm:$0xff]   ;;  %v15212_v14 = vld [vmem:[%s15775_s16 + $0x1294] ss:$8 sps:$4 sm:$0xff]  }
 0x4b6   : > { %11071 = vmatprep.subr.bf16.mxu0 %v15137_v15  ;;  %v15215_v15 = vld [vmem:[%s15775_s16 + $0x2894] ss:$8 sps:$4 sm:$0xff]  }
 0x4b8   : > { %10170 = vmatpush1.bf16.msra.mxu1 %v15132_v49  ;;  %v15210_v49 = vld [vmem:[%s15775_s16 + $0x1290] ss:$8 sps:$4 sm:$0xff]  }
 0x4b9   : > { %11072 = vmatpush1.bf16.msra.mxu0 %v15135_v36  ;;  %10171 = vmatprep.subr.bf16.mxu1 %v15140_v51  ;;  %v15213_v36 = vld [vmem:[%s15775_s16 + $0x2890] ss:$8 sps:$4 sm:$0xff]   ;;  %v15218_v51 = vld [vmem:[%s15775_s16 + $0x12a4] ss:$8 sps:$4 sm:$0xff]  }
 0x4ba   : > { %11073 = vmatprep.subr.bf16.mxu0 %v15143_v35  ;;  %v15221_v35 = vld [vmem:[%s15775_s16 + $0x28a4] ss:$8 sps:$4 sm:$0xff]  }
 0x4bc   : > { %10172 = vmatpush1.bf16.msra.mxu1 %v15138_v42  ;;  %v15216_v42 = vld [vmem:[%s15775_s16 + $0x12a0] ss:$8 sps:$4 sm:$0xff]  }
 0x4bd   : > { %11074 = vmatpush1.bf16.msra.mxu0 %v15141_v52  ;;  %10173 = vmatprep.subr.bf16.mxu1 %v15146_v39  ;;  %v15219_v52 = vld [vmem:[%s15775_s16 + $0x28a0] ss:$8 sps:$4 sm:$0xff]   ;;  %v15224_v39 = vld [vmem:[%s15775_s16 + $0x12b4] ss:$8 sps:$4 sm:$0xff]  }
 0x4be   : > { %11075 = vmatprep.subr.bf16.mxu0 %v15149_v56  ;;  %v15227_v56 = vld [vmem:[%s15775_s16 + $0x28b4] ss:$8 sps:$4 sm:$0xff]  }
 0x4c0   : > { %10174 = vmatpush1.bf16.msra.mxu1 %v15144_v47  ;;  %v15225_v47 = vld [vmem:[%s15775_s16 + $0x28b0] ss:$8 sps:$4 sm:$0xff]  }
 0x4c1   : > { %11076 = vmatpush1.bf16.msra.mxu0 %v15147_v46  ;;  %10175 = vmatprep.subr.bf16.mxu1 %v15152_v55  ;;  %v15230_v46 = vld [vmem:[%s15775_s16 + $0x12c4] ss:$8 sps:$4 sm:$0xff]  }
 0x4c2   : > { %11077 = vmatprep.subr.bf16.mxu0 %v15155_v48  ;;  %v15233_v55 = vld [vmem:[%s15775_s16 + $0x28c4] ss:$8 sps:$4 sm:$0xff]   ;;  %v15228_v48 = vld [vmem:[%s15775_s16 + $0x12c0] ss:$8 sps:$4 sm:$0xff]  }
 0x4c4   : > { %10176 = vmatpush1.bf16.msra.mxu1 %v15150_v40  ;;  %v15231_v40 = vld [vmem:[%s15775_s16 + $0x28c0] ss:$8 sps:$4 sm:$0xff]  }
 0x4c5   : > { %11078 = vmatpush1.bf16.msra.mxu0 %v15153_v18  ;;  %10186 = vmatprep.subr.bf16.mxu1 %v15158_v54  ;;  %v15236_v18 = vld [vmem:[%s15775_s16 + $0x12d4] ss:$8 sps:$4 sm:$0xff]  }
 0x4c6   : > { %11088 = vmatprep.subr.bf16.mxu0 %v15161_v4  ;;  %v15239_v54 = vld [vmem:[%s15775_s16 + $0x28d4] ss:$8 sps:$4 sm:$0xff]   ;;  %v15234_v4 = vld [vmem:[%s15775_s16 + $0x12d0] ss:$8 sps:$4 sm:$0xff]  }
 0x4c7   : > { %10178 = vmatmul.mubr.bf16.vlgmr.msra.gmra.mrb[0].mxu1 %v2022_v5  ;;  %v15245_v5 = vld [vmem:[%s15775_s16 + $0x28e4] ss:$8 sps:$4 sm:$0xff]  }
 0x4c8   : > { %11080 = vmatmul.mubr.bf16.vlgmr.msra.gmra.mrb[0].mxu0 %v2268_v60  ;;  %10187 = vmatpush1.bf16.msra.mxu1 %v15156_v6  ;;  %v15240_v60 = vld [vmem:[%s15775_s16 + $0x12e0] ss:$8 sps:$4 sm:$0xff]  }
 0x4c9   : > { %11089 = vmatpush1.bf16.msra.mxu0 %v15159_v7  ;;  %10188 = vmatprep.subr.bf16.mxu1 %v15164_v8  ;;  %v15243_v6 = vld [vmem:[%s15775_s16 + $0x28e0] ss:$8 sps:$4 sm:$0xff]   ;;  %v15248_v7 = vld [vmem:[%s15775_s16 + $0x12f4] ss:$8 sps:$4 sm:$0xff]  }
 0x4ca   : > { %11090 = vmatprep.subr.bf16.mxu0 %v15167_v9  ;;  %10218 = vmatprep.mubr.bf16.mxu1 %v17296_v58  ;;  %v15251_v8 = vld [vmem:[%s15775_s16 + $0x28f4] ss:$8 sps:$4 sm:$0xff]   ;;  %v15246_v9 = vld [vmem:[%s15775_s16 + $0x12f0] ss:$8 sps:$4 sm:$0xff]  }
 0x4cb   : > { %11120 = vmatprep.mubr.bf16.mxu0 %v17299_v63 }
 0x4cc   : > { %10189 = vmatpush1.bf16.msra.mxu1 %v15162_v0  ;;  %v15249_v0 = vld [vmem:[%s15775_s16 + $0x28f0] ss:$8 sps:$4 sm:$0xff]  }
 0x4cd   : > { %11091 = vmatpush1.bf16.msra.mxu0 %v15165_v11  ;;  %10190 = vmatprep.subr.bf16.mxu1 %v15170_v12  ;;  %v15255_v11 = vld [vmem:[%s15775_s16 + $0x1304] ss:$8 sps:$4 sm:$0xff]  }
 0x4ce   : > { %11092 = vmatprep.subr.bf16.mxu0 %v15173_v21  ;;  %v15258_v12 = vld [vmem:[%s15775_s16 + $0x2904] ss:$8 sps:$4 sm:$0xff]   ;;  %v17365_v21 = vrot.slane %v17273_v24, %v15826_v50  ;;  %v2025_v24 = vcombine.high %v17296_v58, %v17296_v58 }
 0x4cf   : > { %v15267_v58 = vld [vmem:[%s15775_s16 + $0x1324] ss:$8 sps:$4 sm:$0xff]  }
 0x4d0   : > { %10191 = vmatpush1.bf16.msra.mxu1 %v15168_v22  ;;  %v17369_v22 = vrot.slane %v17277_v16, %v15826_v50  ;;  %v15259_v16 = vld [vmem:[%s15775_s16 + $0x1310] ss:$8 sps:$4 sm:$0xff]  }
 0x4d1   : > { %11093 = vmatpush1.bf16.msra.mxu0 %v15171_v3  ;;  %10192 = vmatprep.subr.bf16.mxu1 %v15176_v2  ;;  %v15253_v3 = vld [vmem:[%s15775_s16 + $0x1300] ss:$8 sps:$4 sm:$0xff]  }
 0x4d2   : > { %11094 = vmatprep.subr.bf16.mxu0 %v15179_v37  ;;  %v15256_v2 = vld [vmem:[%s15775_s16 + $0x2900] ss:$8 sps:$4 sm:$0xff]   ;;  %v15261_v37 = vld [vmem:[%s15775_s16 + $0x1314] ss:$8 sps:$4 sm:$0xff]  }
 0x4d4   : > { %10193 = vmatpush1.bf16.msra.mxu1 %v15174_v25  ;;  %v15264_v25 = vld [vmem:[%s15775_s16 + $0x2914] ss:$8 sps:$4 sm:$0xff]  }
 0x4d5   : > { %11095 = vmatpush1.bf16.msra.mxu0 %v15177_v10  ;;  %10194 = vmatprep.subr.bf16.mxu1 %v15182_v13  ;;  %v2318_v10 = vcombine.high %v17299_v63, %v17299_v63  ;;  %v15262_v13 = vld [vmem:[%s15775_s16 + $0x2910] ss:$8 sps:$4 sm:$0xff]   ;;  %v15265_v63 = vld [vmem:[%s15775_s16 + $0x1320] ss:$8 sps:$4 sm:$0xff]  }
 0x4d6   : > { %11096 = vmatprep.subr.bf16.mxu0 %v15185_v57  ;;  %v15270_v57 = vld [vmem:[%s15775_s16 + $0x2924] ss:$8 sps:$4 sm:$0xff]  }
 0x4d8   : > { %10195 = vmatpush1.bf16.msra.mxu1 %v15180_v53  ;;  %v15268_v53 = vld [vmem:[%s15775_s16 + $0x2920] ss:$8 sps:$4 sm:$0xff]  }
 0x4d9   : > { %11097 = vmatpush1.bf16.msra.mxu0 %v15183_v61  ;;  %10196 = vmatprep.subr.bf16.mxu1 %v15188_v26  ;;  %v15273_v61 = vld [vmem:[%s15775_s16 + $0x1334] ss:$8 sps:$4 sm:$0xff]  }
 0x4da   : > { %11098 = vmatprep.subr.bf16.mxu0 %v15191_v27  ;;  %v15276_v26 = vld [vmem:[%s15775_s16 + $0x2934] ss:$8 sps:$4 sm:$0xff]   ;;  %v15271_v27 = vld [vmem:[%s15775_s16 + $0x1330] ss:$8 sps:$4 sm:$0xff]  }
 0x4dc   : > { %10197 = vmatpush1.bf16.msra.mxu1 %v15186_v28  ;;  %v15274_v28 = vld [vmem:[%s15775_s16 + $0x2930] ss:$8 sps:$4 sm:$0xff]  }
 0x4dd   : > { %11099 = vmatpush1.bf16.msra.mxu0 %v15189_v29  ;;  %10198 = vmatprep.subr.bf16.mxu1 %v15194_v30  ;;  %v15279_v29 = vld [vmem:[%s15775_s16 + $0x1344] ss:$8 sps:$4 sm:$0xff]  }
 0x4de   : > { %11100 = vmatprep.subr.bf16.mxu0 %v15197_v17  ;;  %v15282_v30 = vld [vmem:[%s15775_s16 + $0x2944] ss:$8 sps:$4 sm:$0xff]   ;;  %v15277_v17 = vld [vmem:[%s15775_s16 + $0x1340] ss:$8 sps:$4 sm:$0xff]  }
 0x4e0   : > { %10199 = vmatpush1.bf16.msra.mxu1 %v15192_v32  ;;  %v15280_v32 = vld [vmem:[%s15775_s16 + $0x2940] ss:$8 sps:$4 sm:$0xff]  }
 0x4e1   : > { %11101 = vmatpush1.bf16.msra.mxu0 %v15195_v34  ;;  %10200 = vmatprep.subr.bf16.mxu1 %v15200_v45  ;;  %v15285_v34 = vld [vmem:[%s15775_s16 + $0x1354] ss:$8 sps:$4 sm:$0xff]  }
 0x4e2   : > { %11102 = vmatprep.subr.bf16.mxu0 %v15203_v62  ;;  %v15288_v45 = vld [vmem:[%s15775_s16 + $0x2954] ss:$8 sps:$4 sm:$0xff]   ;;  %v15283_v62 = vld [vmem:[%s15775_s16 + $0x1350] ss:$8 sps:$4 sm:$0xff]  }
 0x4e4   : > { %10201 = vmatpush1.bf16.msra.mxu1 %v15198_v23  ;;  %v15286_v23 = vld [vmem:[%s15775_s16 + $0x2950] ss:$8 sps:$4 sm:$0xff]  }
 0x4e5   : > { %11103 = vmatpush1.bf16.msra.mxu0 %v15201_v41  ;;  %10202 = vmatprep.subr.bf16.mxu1 %v15206_v20  ;;  %v15291_v41 = vld [vmem:[%s15775_s16 + $0x1364] ss:$8 sps:$4 sm:$0xff]  }
 0x4e6   : > { %11104 = vmatprep.subr.bf16.mxu0 %v15209_v33  ;;  %v15294_v20 = vld [vmem:[%s15775_s16 + $0x2964] ss:$8 sps:$4 sm:$0xff]   ;;  %v15289_v33 = vld [vmem:[%s15775_s16 + $0x1360] ss:$8 sps:$4 sm:$0xff]  }
 0x4e8   : > { %10203 = vmatpush1.bf16.msra.mxu1 %v15204_v31  ;;  %v15292_v31 = vld [vmem:[%s15775_s16 + $0x2960] ss:$8 sps:$4 sm:$0xff]  }
 0x4e9   : > { %11105 = vmatpush1.bf16.msra.mxu0 %v15207_v19  ;;  %10204 = vmatprep.subr.bf16.mxu1 %v15212_v14  ;;  %v15297_v19 = vld [vmem:[%s15775_s16 + $0x1374] ss:$8 sps:$4 sm:$0xff]  }
 0x4ea   : > { %11106 = vmatprep.subr.bf16.mxu0 %v15215_v15  ;;  %v15300_v14 = vld [vmem:[%s15775_s16 + $0x2974] ss:$8 sps:$4 sm:$0xff]   ;;  %v15295_v15 = vld [vmem:[%s15775_s16 + $0x1370] ss:$8 sps:$4 sm:$0xff]  }
 0x4ec   : > { %10205 = vmatpush1.bf16.msra.mxu1 %v15210_v49  ;;  %v15298_v49 = vld [vmem:[%s15775_s16 + $0x2970] ss:$8 sps:$4 sm:$0xff]  }
 0x4ed   : > { %11107 = vmatpush1.bf16.msra.mxu0 %v15213_v36  ;;  %10206 = vmatprep.subr.bf16.mxu1 %v15218_v51  ;;  %v15303_v36 = vld [vmem:[%s15775_s16 + $0x1384] ss:$8 sps:$4 sm:$0xff]  }
 0x4ee   : > { %11108 = vmatprep.subr.bf16.mxu0 %v15221_v35  ;;  %v15306_v51 = vld [vmem:[%s15775_s16 + $0x2984] ss:$8 sps:$4 sm:$0xff]   ;;  %v15301_v35 = vld [vmem:[%s15775_s16 + $0x1380] ss:$8 sps:$4 sm:$0xff]  }
 0x4f0   : > { %10207 = vmatpush1.bf16.msra.mxu1 %v15216_v42  ;;  %v15304_v42 = vld [vmem:[%s15775_s16 + $0x2980] ss:$8 sps:$4 sm:$0xff]  }
 0x4f1   : > { %11109 = vmatpush1.bf16.msra.mxu0 %v15219_v52  ;;  %10208 = vmatprep.subr.bf16.mxu1 %v15224_v39  ;;  %v15309_v52 = vld [vmem:[%s15775_s16 + $0x1394] ss:$8 sps:$4 sm:$0xff]  }
 0x4f2   : > { %11110 = vmatprep.subr.bf16.mxu0 %v15227_v56  ;;  %v15312_v39 = vld [vmem:[%s15775_s16 + $0x2994] ss:$8 sps:$4 sm:$0xff]   ;;  %v15307_v56 = vld [vmem:[%s15775_s16 + $0x1390] ss:$8 sps:$4 sm:$0xff]  }
 0x4f4   : > { %10209 = vmatpush1.bf16.msra.mxu1 %v15222_v43  ;;  %v15310_v43 = vld [vmem:[%s15775_s16 + $0x2990] ss:$8 sps:$4 sm:$0xff]  }
 0x4f5   : > { %11111 = vmatpush1.bf16.msra.mxu0 %v15225_v47  ;;  %10210 = vmatprep.subr.bf16.mxu1 %v15230_v46  ;;  %v15315_v47 = vld [vmem:[%s15775_s16 + $0x13a4] ss:$8 sps:$4 sm:$0xff]  }
 0x4f6   : > { %11112 = vmatprep.subr.bf16.mxu0 %v15233_v55  ;;  %v15318_v46 = vld [vmem:[%s15775_s16 + $0x29a4] ss:$8 sps:$4 sm:$0xff]   ;;  %v15313_v55 = vld [vmem:[%s15775_s16 + $0x13a0] ss:$8 sps:$4 sm:$0xff]  }
 0x4f8   : > { %10211 = vmatpush1.bf16.msra.mxu1 %v15228_v48  ;;  %v15316_v48 = vld [vmem:[%s15775_s16 + $0x29a0] ss:$8 sps:$4 sm:$0xff]  }
 0x4f9   : > { %11113 = vmatpush1.bf16.msra.mxu0 %v15231_v40  ;;  %10212 = vmatprep.subr.bf16.mxu1 %v15236_v18  ;;  %v15321_v40 = vld [vmem:[%s15775_s16 + $0x13b4] ss:$8 sps:$4 sm:$0xff]  }
 0x4fa   : > { %11114 = vmatprep.subr.bf16.mxu0 %v15239_v54  ;;  %v15324_v18 = vld [vmem:[%s15775_s16 + $0x29b4] ss:$8 sps:$4 sm:$0xff]   ;;  %v15319_v54 = vld [vmem:[%s15775_s16 + $0x13b0] ss:$8 sps:$4 sm:$0xff]  }
 0x4fc   : > { %10213 = vmatpush1.bf16.msra.mxu1 %v15234_v4  ;;  %v15322_v4 = vld [vmem:[%s15775_s16 + $0x29b0] ss:$8 sps:$4 sm:$0xff]  }
 0x4fd   : > { %11115 = vmatpush1.bf16.msra.mxu0 %v15237_v38  ;;  %10214 = vmatprep.subr.bf16.mxu1 %v15242_v59  ;;  %v15327_v38 = vld [vmem:[%s15775_s16 + $0x13c4] ss:$8 sps:$4 sm:$0xff]  }
 0x4fe   : > { %11116 = vmatprep.subr.bf16.mxu0 %v15245_v5  ;;  %v15330_v59 = vld [vmem:[%s15775_s16 + $0x29c4] ss:$8 sps:$4 sm:$0xff]   ;;  %v15325_v5 = vld [vmem:[%s15775_s16 + $0x13c0] ss:$8 sps:$4 sm:$0xff]  }
 0x500   : > { %10215 = vmatpush1.bf16.msra.mxu1 %v15240_v60  ;;  %v15328_v60 = vld [vmem:[%s15775_s16 + $0x29c0] ss:$8 sps:$4 sm:$0xff]  }
 0x501   : > { %11117 = vmatpush1.bf16.msra.mxu0 %v15243_v6  ;;  %10216 = vmatprep.subr.bf16.mxu1 %v15248_v7  ;;  %v15333_v6 = vld [vmem:[%s15775_s16 + $0x13d4] ss:$8 sps:$4 sm:$0xff]  }
 0x502   : > { %11118 = vmatprep.subr.bf16.mxu0 %v15251_v8  ;;  %v15336_v7 = vld [vmem:[%s15775_s16 + $0x29d4] ss:$8 sps:$4 sm:$0xff]   ;;  %v15331_v8 = vld [vmem:[%s15775_s16 + $0x13d0] ss:$8 sps:$4 sm:$0xff]  }
 0x504   : > { %10217 = vmatpush1.bf16.msra.mxu1 %v15246_v9  ;;  %v15334_v9 = vld [vmem:[%s15775_s16 + $0x29d0] ss:$8 sps:$4 sm:$0xff]  }
 0x505   : > { %11119 = vmatpush1.bf16.msra.mxu0 %v15249_v0  ;;  %10227 = vmatprep.subr.bf16.mxu1 %v15255_v11  ;;  %v15339_v0 = vld [vmem:[%s15775_s16 + $0x13e4] ss:$8 sps:$4 sm:$0xff]  }
 0x506   : > { %11129 = vmatprep.subr.bf16.mxu0 %v15258_v12  ;;  %v15342_v11 = vld [vmem:[%s15775_s16 + $0x29e4] ss:$8 sps:$4 sm:$0xff]   ;;  %v2271_v12 = vcombine.high %v17266_v1, %v17266_v1  ;;  %v15343_v1 = vld [vmem:[%s15775_s16 + $0x13f0] ss:$8 sps:$4 sm:$0xff]  }
 0x507   : > { %10219 = vmatmul.mubr.bf16.vlgmr.msra.gmra.mrb[0].mxu1 %v17365_v21 }
 0x508   : > { %11121 = vmatmul.mubr.bf16.vlgmr.msra.gmra.mrb[0].mxu0 %v17369_v22  ;;  %10228 = vmatpush1.bf16.msra.mxu1 %v15253_v3  ;;  %v15337_v3 = vld [vmem:[%s15775_s16 + $0x13e0] ss:$8 sps:$4 sm:$0xff]  }
 0x509   : > { %11130 = vmatpush1.bf16.msra.mxu0 %v15256_v2  ;;  %10229 = vmatprep.subr.bf16.mxu1 %v15261_v37  ;;  %v15340_v2 = vld [vmem:[%s15775_s16 + $0x29e0] ss:$8 sps:$4 sm:$0xff]   ;;  %v15345_v37 = vld [vmem:[%s15775_s16 + $0x13f4] ss:$8 sps:$4 sm:$0xff]  }
 0x50a   : > { %11131 = vmatprep.subr.bf16.mxu0 %v15264_v25  ;;  %10259 = vmatprep.mubr.bf16.mxu1 %v2025_v24  ;;  %v15348_v25 = vld [vmem:[%s15775_s16 + $0x29f4] ss:$8 sps:$4 sm:$0xff]   ;;  %v17440_v24 = vld.sshfl [vmem:[%s15770_s12 + $0x28] sm:$0xff pattern:$0x75316420] }
 0x50b   : > { %11161 = vmatprep.mubr.bf16.mxu0 %v2318_v10  ;;  %v17443_v10 = vrot.slane %v2271_v12, %v15826_v50  ;;  %v15418_v12 = vld [vmem:[%s15775_s16 + $0x2ab0] ss:$8 sps:$4 sm:$0xff]  }
 0x50c   : > { %10230 = vmatpush1.bf16.msra.mxu1 %v15259_v16  ;;  %v15346_v16 = vld [vmem:[%s15775_s16 + $0x29f0] ss:$8 sps:$4 sm:$0xff]  }
 0x50d   : > { %11132 = vmatpush1.bf16.msra.mxu0 %v15262_v13  ;;  %10231 = vmatprep.subr.bf16.mxu1 %v15267_v58  ;;  %v15351_v13 = vld [vmem:[%s15775_s16 + $0x1404] ss:$8 sps:$4 sm:$0xff]  }
 0x50e   : > { %11133 = vmatprep.subr.bf16.mxu0 %v15270_v57  ;;  %v15354_v58 = vld [vmem:[%s15775_s16 + $0x2a04] ss:$8 sps:$4 sm:$0xff]   ;;  %v2041_v57 = vcombine.high %v17440_v24, %v17440_v24 }
 0x510   : > { %10232 = vmatpush1.bf16.msra.mxu1 %v15265_v63  ;;  %v2287_v63 = vcombine.high %v17443_v10, %v17443_v10 }
 0x511   : > { %11134 = vmatpush1.bf16.msra.mxu0 %v15268_v53  ;;  %10233 = vmatprep.subr.bf16.mxu1 %v15273_v61  ;;  %v2023_v53 = vcombine.high %v17365_v21, %v17365_v21  ;;  %v2316_v61 = vcombine.high %v17369_v22, %v17369_v22  ;;  %v15355_v22 = vld [vmem:[%s15775_s16 + $0x1410] ss:$8 sps:$4 sm:$0xff]  }
 0x512   : > { %11135 = vmatprep.subr.bf16.mxu0 %v15276_v26  ;;  %v15349_v26 = vld [vmem:[%s15775_s16 + $0x1400] ss:$8 sps:$4 sm:$0xff]   ;;  %v17465_v21 = vrot.slane %v2287_v63, %v15826_v50  ;;  %v15438_v63 = vld [vmem:[%s15775_s16 + $0x2ae4] ss:$8 sps:$4 sm:$0xff]  }
 0x514   : > { %10234 = vmatpush1.bf16.msra.mxu1 %v15271_v27  ;;  %v15352_v27 = vld [vmem:[%s15775_s16 + $0x2a00] ss:$8 sps:$4 sm:$0xff]  }
 0x515   : > { %11136 = vmatpush1.bf16.msra.mxu0 %v15274_v28  ;;  %10235 = vmatprep.subr.bf16.mxu1 %v15279_v29  ;;  %v15357_v28 = vld [vmem:[%s15775_s16 + $0x1414] ss:$8 sps:$4 sm:$0xff]  }
 0x516   : > { %11137 = vmatprep.subr.bf16.mxu0 %v15282_v30  ;;  %v15360_v29 = vld [vmem:[%s15775_s16 + $0x2a14] ss:$8 sps:$4 sm:$0xff]   ;;  %v17462_v30 = vrot.slane %v2041_v57, %v15826_v50  ;;  %v15435_v57 = vld [vmem:[%s15775_s16 + $0x14e4] ss:$8 sps:$4 sm:$0xff]  }
 0x518   : > { %10236 = vmatpush1.bf16.msra.mxu1 %v15277_v17  ;;  %v15358_v17 = vld [vmem:[%s15775_s16 + $0x2a10] ss:$8 sps:$4 sm:$0xff]  }
 0x519   : > { %11138 = vmatpush1.bf16.msra.mxu0 %v15280_v32  ;;  %10237 = vmatprep.subr.bf16.mxu1 %v15285_v34  ;;  %v15363_v32 = vld [vmem:[%s15775_s16 + $0x1424] ss:$8 sps:$4 sm:$0xff]  }
 0x51a   : > { %11139 = vmatprep.subr.bf16.mxu0 %v15288_v45  ;;  %v15366_v34 = vld [vmem:[%s15775_s16 + $0x2a24] ss:$8 sps:$4 sm:$0xff]   ;;  %v15361_v45 = vld [vmem:[%s15775_s16 + $0x1420] ss:$8 sps:$4 sm:$0xff]  }
 0x51c   : > { %10238 = vmatpush1.bf16.msra.mxu1 %v15283_v62  ;;  %v15364_v62 = vld [vmem:[%s15775_s16 + $0x2a20] ss:$8 sps:$4 sm:$0xff]  }
 0x51d   : > { %11140 = vmatpush1.bf16.msra.mxu0 %v15286_v23  ;;  %10239 = vmatprep.subr.bf16.mxu1 %v15291_v41  ;;  %v15369_v23 = vld [vmem:[%s15775_s16 + $0x1434] ss:$8 sps:$4 sm:$0xff]  }
 0x51e   : > { %11141 = vmatprep.subr.bf16.mxu0 %v15294_v20  ;;  %v15372_v41 = vld [vmem:[%s15775_s16 + $0x2a34] ss:$8 sps:$4 sm:$0xff]   ;;  %v15367_v20 = vld [vmem:[%s15775_s16 + $0x1430] ss:$8 sps:$4 sm:$0xff]  }
 0x520   : > { %10240 = vmatpush1.bf16.msra.mxu1 %v15289_v33  ;;  %v15370_v33 = vld [vmem:[%s15775_s16 + $0x2a30] ss:$8 sps:$4 sm:$0xff]  }
 0x521   : > { %11142 = vmatpush1.bf16.msra.mxu0 %v15292_v31  ;;  %10241 = vmatprep.subr.bf16.mxu1 %v15297_v19  ;;  %v15375_v31 = vld [vmem:[%s15775_s16 + $0x1444] ss:$8 sps:$4 sm:$0xff]  }
 0x522   : > { %11143 = vmatprep.subr.bf16.mxu0 %v15300_v14  ;;  %v15378_v19 = vld [vmem:[%s15775_s16 + $0x2a44] ss:$8 sps:$4 sm:$0xff]   ;;  %v15373_v14 = vld [vmem:[%s15775_s16 + $0x1440] ss:$8 sps:$4 sm:$0xff]  }
 0x524   : > { %10242 = vmatpush1.bf16.msra.mxu1 %v15295_v15  ;;  %v15376_v15 = vld [vmem:[%s15775_s16 + $0x2a40] ss:$8 sps:$4 sm:$0xff]  }
 0x525   : > { %11144 = vmatpush1.bf16.msra.mxu0 %v15298_v49  ;;  %10243 = vmatprep.subr.bf16.mxu1 %v15303_v36  ;;  %v15381_v49 = vld [vmem:[%s15775_s16 + $0x1454] ss:$8 sps:$4 sm:$0xff]  }
 0x526   : > { %11145 = vmatprep.subr.bf16.mxu0 %v15306_v51  ;;  %v15384_v36 = vld [vmem:[%s15775_s16 + $0x2a54] ss:$8 sps:$4 sm:$0xff]   ;;  %v15379_v51 = vld [vmem:[%s15775_s16 + $0x1450] ss:$8 sps:$4 sm:$0xff]  }
 0x528   : > { %10244 = vmatpush1.bf16.msra.mxu1 %v15301_v35  ;;  %v15382_v35 = vld [vmem:[%s15775_s16 + $0x2a50] ss:$8 sps:$4 sm:$0xff]  }
 0x529   : > { %11146 = vmatpush1.bf16.msra.mxu0 %v15304_v42  ;;  %10245 = vmatprep.subr.bf16.mxu1 %v15309_v52  ;;  %v15387_v42 = vld [vmem:[%s15775_s16 + $0x1464] ss:$8 sps:$4 sm:$0xff]  }
 0x52a   : > { %11147 = vmatprep.subr.bf16.mxu0 %v15312_v39  ;;  %v15390_v52 = vld [vmem:[%s15775_s16 + $0x2a64] ss:$8 sps:$4 sm:$0xff]   ;;  %v15385_v39 = vld [vmem:[%s15775_s16 + $0x1460] ss:$8 sps:$4 sm:$0xff]  }
 0x52c   : > { %10246 = vmatpush1.bf16.msra.mxu1 %v15307_v56  ;;  %v15388_v56 = vld [vmem:[%s15775_s16 + $0x2a60] ss:$8 sps:$4 sm:$0xff]  }
 0x52d   : > { %11148 = vmatpush1.bf16.msra.mxu0 %v15310_v43  ;;  %10247 = vmatprep.subr.bf16.mxu1 %v15315_v47  ;;  %v15393_v43 = vld [vmem:[%s15775_s16 + $0x1474] ss:$8 sps:$4 sm:$0xff]  }
 0x52e   : > { %11149 = vmatprep.subr.bf16.mxu0 %v15318_v46  ;;  %v15396_v47 = vld [vmem:[%s15775_s16 + $0x2a74] ss:$8 sps:$4 sm:$0xff]   ;;  %v15391_v46 = vld [vmem:[%s15775_s16 + $0x1470] ss:$8 sps:$4 sm:$0xff]  }
 0x530   : > { %10248 = vmatpush1.bf16.msra.mxu1 %v15313_v55  ;;  %v15394_v55 = vld [vmem:[%s15775_s16 + $0x2a70] ss:$8 sps:$4 sm:$0xff]  }
 0x531   : > { %11150 = vmatpush1.bf16.msra.mxu0 %v15316_v48  ;;  %10249 = vmatprep.subr.bf16.mxu1 %v15321_v40  ;;  %v15399_v48 = vld [vmem:[%s15775_s16 + $0x1484] ss:$8 sps:$4 sm:$0xff]  }
 0x532   : > { %11151 = vmatprep.subr.bf16.mxu0 %v15324_v18  ;;  %v15402_v40 = vld [vmem:[%s15775_s16 + $0x2a84] ss:$8 sps:$4 sm:$0xff]   ;;  %v15397_v18 = vld [vmem:[%s15775_s16 + $0x1480] ss:$8 sps:$4 sm:$0xff]  }
 0x534   : > { %10250 = vmatpush1.bf16.msra.mxu1 %v15319_v54  ;;  %v15400_v54 = vld [vmem:[%s15775_s16 + $0x2a80] ss:$8 sps:$4 sm:$0xff]  }
 0x535   : > { %11152 = vmatpush1.bf16.msra.mxu0 %v15322_v4  ;;  %10251 = vmatprep.subr.bf16.mxu1 %v15327_v38  ;;  %v15405_v4 = vld [vmem:[%s15775_s16 + $0x1494] ss:$8 sps:$4 sm:$0xff]  }
 0x536   : > { %11153 = vmatprep.subr.bf16.mxu0 %v15330_v59  ;;  %v15408_v38 = vld [vmem:[%s15775_s16 + $0x2a94] ss:$8 sps:$4 sm:$0xff]   ;;  %v15403_v59 = vld [vmem:[%s15775_s16 + $0x1490] ss:$8 sps:$4 sm:$0xff]  }
 0x538   : > { %10252 = vmatpush1.bf16.msra.mxu1 %v15325_v5  ;;  %v15406_v5 = vld [vmem:[%s15775_s16 + $0x2a90] ss:$8 sps:$4 sm:$0xff]  }
 0x539   : > { %11154 = vmatpush1.bf16.msra.mxu0 %v15328_v60  ;;  %10253 = vmatprep.subr.bf16.mxu1 %v15333_v6  ;;  %v15411_v60 = vld [vmem:[%s15775_s16 + $0x14a4] ss:$8 sps:$4 sm:$0xff]  }
 0x53a   : > { %11155 = vmatprep.subr.bf16.mxu0 %v15336_v7  ;;  %v15414_v6 = vld [vmem:[%s15775_s16 + $0x2aa4] ss:$8 sps:$4 sm:$0xff]   ;;  %v15409_v7 = vld [vmem:[%s15775_s16 + $0x14a0] ss:$8 sps:$4 sm:$0xff]  }
 0x53c   : > { %10254 = vmatpush1.bf16.msra.mxu1 %v15331_v8  ;;  %v15412_v8 = vld [vmem:[%s15775_s16 + $0x2aa0] ss:$8 sps:$4 sm:$0xff]  }
 0x53d   : > { %11156 = vmatpush1.bf16.msra.mxu0 %v15334_v9  ;;  %10255 = vmatprep.subr.bf16.mxu1 %v15339_v0  ;;  %v15417_v9 = vld [vmem:[%s15775_s16 + $0x14b4] ss:$8 sps:$4 sm:$0xff]  }
 0x53e   : > { %11157 = vmatprep.subr.bf16.mxu0 %v15342_v11  ;;  %v15420_v0 = vld [vmem:[%s15775_s16 + $0x2ab4] ss:$8 sps:$4 sm:$0xff]   ;;  %v15415_v11 = vld [vmem:[%s15775_s16 + $0x14b0] ss:$8 sps:$4 sm:$0xff]  }
 0x540   : > { %10256 = vmatpush1.bf16.msra.mxu1 %v15337_v3  ;;  %v15423_v3 = vld [vmem:[%s15775_s16 + $0x14c4] ss:$8 sps:$4 sm:$0xff]  }
 0x541   : > { %11158 = vmatpush1.bf16.msra.mxu0 %v15340_v2  ;;  %10257 = vmatprep.subr.bf16.mxu1 %v15345_v37  ;;  %v15426_v2 = vld [vmem:[%s15775_s16 + $0x2ac4] ss:$8 sps:$4 sm:$0xff]   ;;  %v15421_v37 = vld [vmem:[%s15775_s16 + $0x14c0] ss:$8 sps:$4 sm:$0xff]  }
 0x542   : > { %11159 = vmatprep.subr.bf16.mxu0 %v15348_v25  ;;  %v15424_v25 = vld [vmem:[%s15775_s16 + $0x2ac0] ss:$8 sps:$4 sm:$0xff]  }
 0x544   : > { %10258 = vmatpush1.bf16.msra.mxu1 %v15343_v1  ;;  %v15429_v1 = vld [vmem:[%s15775_s16 + $0x14d4] ss:$8 sps:$4 sm:$0xff]  }
 0x545   : > { %11160 = vmatpush1.bf16.msra.mxu0 %v15346_v16  ;;  %10268 = vmatprep.subr.bf16.mxu1 %v15351_v13  ;;  %v15432_v16 = vld [vmem:[%s15775_s16 + $0x2ad4] ss:$8 sps:$4 sm:$0xff]   ;;  %v15427_v13 = vld [vmem:[%s15775_s16 + $0x14d0] ss:$8 sps:$4 sm:$0xff]  }
 0x546   : > { %11170 = vmatprep.subr.bf16.mxu0 %v15354_v58  ;;  %v15430_v58 = vld [vmem:[%s15775_s16 + $0x2ad0] ss:$8 sps:$4 sm:$0xff]  }
 0x547   : > { %10260 = vmatmul.mubr.bf16.vlgmr.msra.gmra.mrb[0].mxu1 %v2023_v53  ;;  %v15433_v53 = vld [vmem:[%s15775_s16 + $0x14e0] ss:$8 sps:$4 sm:$0xff]  }
 0x548   : > { %11162 = vmatmul.mubr.bf16.vlgmr.msra.gmra.mrb[0].mxu0 %v2316_v61  ;;  %10269 = vmatpush1.bf16.msra.mxu1 %v15349_v26  ;;  %v15436_v61 = vld [vmem:[%s15775_s16 + $0x2ae0] ss:$8 sps:$4 sm:$0xff]   ;;  %v15441_v26 = vld [vmem:[%s15775_s16 + $0x14f4] ss:$8 sps:$4 sm:$0xff]  }
 0x549   : > { %11171 = vmatpush1.bf16.msra.mxu0 %v15352_v27  ;;  %10270 = vmatprep.subr.bf16.mxu1 %v15357_v28  ;;  %v15444_v27 = vld [vmem:[%s15775_s16 + $0x2af4] ss:$8 sps:$4 sm:$0xff]   ;;  %v15439_v28 = vld [vmem:[%s15775_s16 + $0x14f0] ss:$8 sps:$4 sm:$0xff]  }
 0x54a   : > { %11172 = vmatprep.subr.bf16.mxu0 %v15360_v29  ;;  %10300 = vmatprep.mubr.bf16.mxu1 %v17462_v30  ;;  %v15442_v29 = vld [vmem:[%s15775_s16 + $0x2af0] ss:$8 sps:$4 sm:$0xff]  }
 0x54b   : > { %11202 = vmatprep.mubr.bf16.mxu0 %v17465_v21 }
 0x54c   : > { %10271 = vmatpush1.bf16.msra.mxu1 %v15355_v22  ;;  %v15447_v22 = vld [vmem:[%s15775_s16 + $0x1504] ss:$8 sps:$4 sm:$0xff]  }
 0x54d   : > { %11173 = vmatpush1.bf16.msra.mxu0 %v15358_v17  ;;  %10272 = vmatprep.subr.bf16.mxu1 %v15363_v32  ;;  %v15451_v17 = vld [vmem:[%s15775_s16 + $0x2b04] ss:$8 sps:$4 sm:$0xff]   ;;  %v17531_v32 = vrot.slane %v17440_v24, %v15826_v50  ;;  %v2073_v24 = vcombine.high %v17462_v30, %v17462_v30 }
 0x54e   : > { %11174 = vmatprep.subr.bf16.mxu0 %v15366_v34  ;;  %v17535_v34 = vrot.slane %v17443_v10, %v15826_v50  ;;  %v15452_v50 = vld [vmem:[%s15775_s16 + $0x1510] ss:$8 sps:$4 sm:$0xff]   ;;  %v15460_v30 = vld [vmem:[%s15775_s16 + $0x1524] ss:$8 sps:$4 sm:$0xff]  }
 0x54f   : > { %v15455_v10 = vld [vmem:[%s15775_s16 + $0x2b10] ss:$8 sps:$4 sm:$0xff]  }
 0x550   : > { %10273 = vmatpush1.bf16.msra.mxu1 %v15361_v45  ;;  %v15445_v45 = vld [vmem:[%s15775_s16 + $0x1500] ss:$8 sps:$4 sm:$0xff]  }
 0x551   : > { %11175 = vmatpush1.bf16.msra.mxu0 %v15364_v62  ;;  %10274 = vmatprep.subr.bf16.mxu1 %v15369_v23  ;;  %v15449_v62 = vld [vmem:[%s15775_s16 + $0x2b00] ss:$8 sps:$4 sm:$0xff]   ;;  %v15454_v23 = vld [vmem:[%s15775_s16 + $0x1514] ss:$8 sps:$4 sm:$0xff]  }
 0x552   : > { %11176 = vmatprep.subr.bf16.mxu0 %v15372_v41  ;;  %v15457_v41 = vld [vmem:[%s15775_s16 + $0x2b14] ss:$8 sps:$4 sm:$0xff]  }
 0x554   : > { %10275 = vmatpush1.bf16.msra.mxu1 %v15367_v20  ;;  %v2319_v20 = vcombine.high %v17465_v21, %v17465_v21  ;;  %v15458_v21 = vld [vmem:[%s15775_s16 + $0x1520] ss:$8 sps:$4 sm:$0xff]  }
 0x555   : > { %11177 = vmatpush1.bf16.msra.mxu0 %v15370_v33  ;;  %10276 = vmatprep.subr.bf16.mxu1 %v15375_v31  ;;  %v15463_v33 = vld [vmem:[%s15775_s16 + $0x2b24] ss:$8 sps:$4 sm:$0xff]   ;;  %v15461_v31 = vld [vmem:[%s15775_s16 + $0x2b20] ss:$8 sps:$4 sm:$0xff]  }
 0x556   : > { %11178 = vmatprep.subr.bf16.mxu0 %v15378_v19  ;;  %v15466_v19 = vld [vmem:[%s15775_s16 + $0x1534] ss:$8 sps:$4 sm:$0xff]  }
 0x558   : > { %10277 = vmatpush1.bf16.msra.mxu1 %v15373_v14  ;;  %v15469_v14 = vld [vmem:[%s15775_s16 + $0x2b34] ss:$8 sps:$4 sm:$0xff]  }
 0x559   : > { %11179 = vmatpush1.bf16.msra.mxu0 %v15376_v15  ;;  %10278 = vmatprep.subr.bf16.mxu1 %v15381_v49  ;;  %v15464_v15 = vld [vmem:[%s15775_s16 + $0x1530] ss:$8 sps:$4 sm:$0xff]  }
 0x55a   : > { %11180 = vmatprep.subr.bf16.mxu0 %v15384_v36  ;;  %v15467_v49 = vld [vmem:[%s15775_s16 + $0x2b30] ss:$8 sps:$4 sm:$0xff]   ;;  %v15472_v36 = vld [vmem:[%s15775_s16 + $0x1544] ss:$8 sps:$4 sm:$0xff]  }
 0x55c   : > { %10279 = vmatpush1.bf16.msra.mxu1 %v15379_v51  ;;  %v15475_v51 = vld [vmem:[%s15775_s16 + $0x2b44] ss:$8 sps:$4 sm:$0xff]  }
 0x55d   : > { %11181 = vmatpush1.bf16.msra.mxu0 %v15382_v35  ;;  %10280 = vmatprep.subr.bf16.mxu1 %v15387_v42  ;;  %v15470_v35 = vld [vmem:[%s15775_s16 + $0x1540] ss:$8 sps:$4 sm:$0xff]  }
 0x55e   : > { %11182 = vmatprep.subr.bf16.mxu0 %v15390_v52  ;;  %v15473_v42 = vld [vmem:[%s15775_s16 + $0x2b40] ss:$8 sps:$4 sm:$0xff]   ;;  %v15478_v52 = vld [vmem:[%s15775_s16 + $0x1554] ss:$8 sps:$4 sm:$0xff]  }
 0x560   : > { %10281 = vmatpush1.bf16.msra.mxu1 %v15385_v39  ;;  %v15481_v39 = vld [vmem:[%s15775_s16 + $0x2b54] ss:$8 sps:$4 sm:$0xff]  }
 0x561   : > { %11183 = vmatpush1.bf16.msra.mxu0 %v15388_v56  ;;  %10282 = vmatprep.subr.bf16.mxu1 %v15393_v43  ;;  %v15476_v56 = vld [vmem:[%s15775_s16 + $0x1550] ss:$8 sps:$4 sm:$0xff]  }
 0x562   : > { %11184 = vmatprep.subr.bf16.mxu0 %v15396_v47  ;;  %v15479_v43 = vld [vmem:[%s15775_s16 + $0x2b50] ss:$8 sps:$4 sm:$0xff]   ;;  %v15484_v47 = vld [vmem:[%s15775_s16 + $0x1564] ss:$8 sps:$4 sm:$0xff]  }
 0x564   : > { %10283 = vmatpush1.bf16.msra.mxu1 %v15391_v46  ;;  %v15487_v46 = vld [vmem:[%s15775_s16 + $0x2b64] ss:$8 sps:$4 sm:$0xff]  }
 0x565   : > { %11185 = vmatpush1.bf16.msra.mxu0 %v15394_v55  ;;  %10284 = vmatprep.subr.bf16.mxu1 %v15399_v48  ;;  %v15482_v55 = vld [vmem:[%s15775_s16 + $0x1560] ss:$8 sps:$4 sm:$0xff]  }
 0x566   : > { %11186 = vmatprep.subr.bf16.mxu0 %v15402_v40  ;;  %v15485_v48 = vld [vmem:[%s15775_s16 + $0x2b60] ss:$8 sps:$4 sm:$0xff]   ;;  %v15490_v40 = vld [vmem:[%s15775_s16 + $0x1574] ss:$8 sps:$4 sm:$0xff]  }
 0x568   : > { %10285 = vmatpush1.bf16.msra.mxu1 %v15397_v18  ;;  %v15493_v18 = vld [vmem:[%s15775_s16 + $0x2b74] ss:$8 sps:$4 sm:$0xff]  }
 0x569   : > { %11187 = vmatpush1.bf16.msra.mxu0 %v15400_v54  ;;  %10286 = vmatprep.subr.bf16.mxu1 %v15405_v4  ;;  %v15488_v54 = vld [vmem:[%s15775_s16 + $0x1570] ss:$8 sps:$4 sm:$0xff]  }
 0x56a   : > { %11188 = vmatprep.subr.bf16.mxu0 %v15408_v38  ;;  %v15491_v4 = vld [vmem:[%s15775_s16 + $0x2b70] ss:$8 sps:$4 sm:$0xff]   ;;  %v15496_v38 = vld [vmem:[%s15775_s16 + $0x1584] ss:$8 sps:$4 sm:$0xff]  }
 0x56c   : > { %10287 = vmatpush1.bf16.msra.mxu1 %v15403_v59  ;;  %v15499_v59 = vld [vmem:[%s15775_s16 + $0x2b84] ss:$8 sps:$4 sm:$0xff]  }
 0x56d   : > { %11189 = vmatpush1.bf16.msra.mxu0 %v15406_v5  ;;  %10288 = vmatprep.subr.bf16.mxu1 %v15411_v60  ;;  %v15494_v5 = vld [vmem:[%s15775_s16 + $0x1580] ss:$8 sps:$4 sm:$0xff]  }
 0x56e   : > { %11190 = vmatprep.subr.bf16.mxu0 %v15414_v6  ;;  %v15497_v60 = vld [vmem:[%s15775_s16 + $0x2b80] ss:$8 sps:$4 sm:$0xff]   ;;  %v15502_v6 = vld [vmem:[%s15775_s16 + $0x1594] ss:$8 sps:$4 sm:$0xff]  }
 0x570   : > { %10289 = vmatpush1.bf16.msra.mxu1 %v15409_v7  ;;  %v15505_v7 = vld [vmem:[%s15775_s16 + $0x2b94] ss:$8 sps:$4 sm:$0xff]  }
 0x571   : > { %11191 = vmatpush1.bf16.msra.mxu0 %v15412_v8  ;;  %10290 = vmatprep.subr.bf16.mxu1 %v15417_v9  ;;  %v15500_v8 = vld [vmem:[%s15775_s16 + $0x1590] ss:$8 sps:$4 sm:$0xff]  }
 0x572   : > { %11192 = vmatprep.subr.bf16.mxu0 %v15420_v0  ;;  %v15503_v9 = vld [vmem:[%s15775_s16 + $0x2b90] ss:$8 sps:$4 sm:$0xff]   ;;  %v15508_v0 = vld [vmem:[%s15775_s16 + $0x15a4] ss:$8 sps:$4 sm:$0xff]  }
 0x574   : > { %10291 = vmatpush1.bf16.msra.mxu1 %v15415_v11  ;;  %v15511_v11 = vld [vmem:[%s15775_s16 + $0x2ba4] ss:$8 sps:$4 sm:$0xff]  }
 0x575   : > { %11193 = vmatpush1.bf16.msra.mxu0 %v15418_v12  ;;  %10292 = vmatprep.subr.bf16.mxu1 %v15423_v3  ;;  %v15506_v12 = vld [vmem:[%s15775_s16 + $0x15a0] ss:$8 sps:$4 sm:$0xff]  }
 0x576   : > { %11194 = vmatprep.subr.bf16.mxu0 %v15426_v2  ;;  %v15509_v3 = vld [vmem:[%s15775_s16 + $0x2ba0] ss:$8 sps:$4 sm:$0xff]   ;;  %v15514_v2 = vld [vmem:[%s15775_s16 + $0x15b4] ss:$8 sps:$4 sm:$0xff]  }
 0x578   : > { %10293 = vmatpush1.bf16.msra.mxu1 %v15421_v37  ;;  %v15517_v37 = vld [vmem:[%s15775_s16 + $0x2bb4] ss:$8 sps:$4 sm:$0xff]  }
 0x579   : > { %11195 = vmatpush1.bf16.msra.mxu0 %v15424_v25  ;;  %10294 = vmatprep.subr.bf16.mxu1 %v15429_v1  ;;  %v15512_v25 = vld [vmem:[%s15775_s16 + $0x15b0] ss:$8 sps:$4 sm:$0xff]  }
 0x57a   : > { %11196 = vmatprep.subr.bf16.mxu0 %v15432_v16  ;;  %v15515_v1 = vld [vmem:[%s15775_s16 + $0x2bb0] ss:$8 sps:$4 sm:$0xff]   ;;  %v15520_v16 = vld [vmem:[%s15775_s16 + $0x15c4] ss:$8 sps:$4 sm:$0xff]  }
 0x57c   : > { %10295 = vmatpush1.bf16.msra.mxu1 %v15427_v13  ;;  %v15523_v13 = vld [vmem:[%s15775_s16 + $0x2bc4] ss:$8 sps:$4 sm:$0xff]  }
 0x57d   : > { %11197 = vmatpush1.bf16.msra.mxu0 %v15430_v58  ;;  %10296 = vmatprep.subr.bf16.mxu1 %v15435_v57  ;;  %v15518_v58 = vld [vmem:[%s15775_s16 + $0x15c0] ss:$8 sps:$4 sm:$0xff]  }
 0x57e   : > { %11198 = vmatprep.subr.bf16.mxu0 %v15438_v63  ;;  %v15521_v57 = vld [vmem:[%s15775_s16 + $0x2bc0] ss:$8 sps:$4 sm:$0xff]   ;;  %v15526_v63 = vld [vmem:[%s15775_s16 + $0x15d4] ss:$8 sps:$4 sm:$0xff]  }
 0x580   : > { %10297 = vmatpush1.bf16.msra.mxu1 %v15433_v53  ;;  %v15529_v53 = vld [vmem:[%s15775_s16 + $0x2bd4] ss:$8 sps:$4 sm:$0xff]  }
 0x581   : > { %11199 = vmatpush1.bf16.msra.mxu0 %v15436_v61  ;;  %10298 = vmatprep.subr.bf16.mxu1 %v15441_v26  ;;  %v15524_v61 = vld [vmem:[%s15775_s16 + $0x15d0] ss:$8 sps:$4 sm:$0xff]  }
 0x582   : > { %11200 = vmatprep.subr.bf16.mxu0 %v15444_v27  ;;  %v15527_v26 = vld [vmem:[%s15775_s16 + $0x2bd0] ss:$8 sps:$4 sm:$0xff]   ;;  %v15532_v27 = vld [vmem:[%s15775_s16 + $0x15e4] ss:$8 sps:$4 sm:$0xff]  }
 0x584   : > { %10299 = vmatpush1.bf16.msra.mxu1 %v15439_v28  ;;  %v15535_v28 = vld [vmem:[%s15775_s16 + $0x2be4] ss:$8 sps:$4 sm:$0xff]  }
 0x585   : > { %11201 = vmatpush1.bf16.msra.mxu0 %v15442_v29  ;;  %10309 = vmatprep.subr.bf16.mxu1 %v15447_v22  ;;  %v15530_v29 = vld [vmem:[%s15775_s16 + $0x15e0] ss:$8 sps:$4 sm:$0xff]  }
 0x586   : > { %11211 = vmatprep.subr.bf16.mxu0 %v15451_v17  ;;  %v15533_v22 = vld [vmem:[%s15775_s16 + $0x2be0] ss:$8 sps:$4 sm:$0xff]   ;;  %v15538_v17 = vld [vmem:[%s15775_s16 + $0x15f4] ss:$8 sps:$4 sm:$0xff]  }
 0x587   : > { %10301 = vmatmul.mubr.bf16.vlgmr.msra.gmra.mrb[0].mxu1 %v17531_v32 }
 0x588   : > { %11203 = vmatmul.mubr.bf16.vlgmr.msra.gmra.mrb[0].mxu0 %v17535_v34  ;;  %10310 = vmatpush1.bf16.msra.mxu1 %v15445_v45  ;;  %v15541_v45 = vld [vmem:[%s15775_s16 + $0x2bf4] ss:$8 sps:$4 sm:$0xff]  }
 0x589   : > { %11212 = vmatpush1.bf16.msra.mxu0 %v15449_v62  ;;  %10311 = vmatprep.subr.bf16.mxu1 %v15454_v23  ;;  %v15536_v62 = vld [vmem:[%s15775_s16 + $0x15f0] ss:$8 sps:$4 sm:$0xff]  }
 0x58a   : > { %11213 = vmatprep.subr.bf16.mxu0 %v15457_v41  ;;  %10341 = vmatprep.mubr.bf16.mxu1 %v2073_v24  ;;  %v15539_v23 = vld [vmem:[%s15775_s16 + $0x2bf0] ss:$8 sps:$4 sm:$0xff]   ;;  %v2071_v41 = vcombine.high %v17531_v32, %v17531_v32  ;;  %v2317_v24 = vcombine.high %v17535_v34, %v17535_v34 }
 0x58b   : > { %11243 = vmatprep.mubr.bf16.mxu0 %v2319_v20  ;;  %v15647_v20 = vmov 1983009808  }
 0x58c   : > { %10312 = vmatpush1.bf16.msra.mxu1 %v15452_v50  ;;  %v11256_v50 = vunpack.c.l.s4 %v15647_v20  ;;  %v11270_v20 = vld [vmem:[%s17767_s2] sm:$0x3] (!%p13069_p9) }
 0x58d   : > { %11214 = vmatpush1.bf16.msra.mxu0 %v15455_v10  ;;  %10313 = vmatprep.subr.bf16.mxu1 %v15460_v30 }
 0x58e   : > { %11215 = vmatprep.subr.bf16.mxu0 %v15463_v33  ;;  %v11257_v10 = vunpack.c.0.s8 %v11256_v50 }
 0x590   : > { %10314 = vmatpush1.bf16.msra.mxu1 %v15458_v21 }
 0x591   : > { %11216 = vmatpush1.bf16.msra.mxu0 %v15461_v31  ;;  %10315 = vmatprep.subr.bf16.mxu1 %v15466_v19 }
 0x592   : > { %11217 = vmatprep.subr.bf16.mxu0 %v15469_v14 }
 0x594   : > { %10316 = vmatpush1.bf16.msra.mxu1 %v15464_v15  ;;  %v17610_v15 = vsub.s32 %v11257_v10, %v15818_v44 }
 0x595   : > { %11218 = vmatpush1.bf16.msra.mxu0 %v15467_v49  ;;  %10317 = vmatprep.subr.bf16.mxu1 %v15472_v36 }
 0x596   : > { %11219 = vmatprep.subr.bf16.mxu0 %v15475_v51 }
 0x598   : > { %10318 = vmatpush1.bf16.msra.mxu1 %v15470_v35  ;;  %v350_v35 = vld [vmem:[#allocation2] sm:$0xf] }
 0x599   : > { %11220 = vmatpush1.bf16.msra.mxu0 %v15473_v42  ;;  %10319 = vmatprep.subr.bf16.mxu1 %v15478_v52 }
 0x59a   : > { %11221 = vmatprep.subr.bf16.mxu0 %v15481_v39  ;;  %v11296_v39 = vld [vmem:[#allocation3 + $0x8] sm:$0xff] (!%p13069_p9) }
 0x59c   : > { %10320 = vmatpush1.bf16.msra.mxu1 %v15476_v56  ;;  %v11298_v56 = vld [vmem:[#allocation3 + $0x18] sm:$0xff] (!%p13069_p9) }
 0x59d   : > { %11222 = vmatpush1.bf16.msra.mxu0 %v15479_v43  ;;  %10321 = vmatprep.subr.bf16.mxu1 %v15484_v47  ;;  %v11295_v43 = vld [vmem:[#allocation3] sm:$0xff] (!%p13069_p9)  ;;  %v13112_v47 = vpack.c.bf16 (!%p13069_p9), %v11298_v56, %v11296_v39 }
 0x59e   : > { %11223 = vmatprep.subr.bf16.mxu0 %v15487_v46  ;;  %v11297_v46 = vld [vmem:[#allocation3 + $0x10] sm:$0xff] (!%p13069_p9)  ;;  %v11481_v39 = vld [vmem:[%s17770_s5 + $0xa0] sm:$0xff] (!%p13069_p9) }
 0x5a0   : > { %10322 = vmatpush1.bf16.msra.mxu1 %v15482_v55  ;;  %v11300_v55 = vld [vmem:[#allocation3 + $0x28] sm:$0xff] (!%p13069_p9) }
 0x5a1   : > { %11224 = vmatpush1.bf16.msra.mxu0 %v15485_v48  ;;  %10323 = vmatprep.subr.bf16.mxu1 %v15490_v40  ;;  %v11302_v48 = vld [vmem:[#allocation3 + $0x38] sm:$0xff] (!%p13069_p9)  ;;  %v13114_v40 = vpack.c.bf16 (!%p13069_p9), %v11297_v46, %v11295_v43  ;;  %v11325_v43 = vld [vmem:[#allocation3 + $0xf0] sm:$0xff] (!%p13069_p9)  ;;  %v11482_v46 = vld [vmem:[%s17770_s5 + $0xa8] sm:$0xff] (!%p13069_p9) }
 0x5a2   : > { %11225 = vmatprep.subr.bf16.mxu0 %v15493_v18  ;;  %v13116_v18 = vpack.c.bf16 (!%p13069_p9), %v11302_v48, %v11300_v55  ;;  %v11328_v55 = vld [vmem:[#allocation3 + $0x108] sm:$0xff] (!%p13069_p9)  ;;  %v11330_v48 = vld [vmem:[#allocation3 + $0x118] sm:$0xff] (!%p13069_p9) }
 0x5a4   : > { %10324 = vmatpush1.bf16.msra.mxu1 %v15488_v54  ;;  %v11299_v54 = vld [vmem:[#allocation3 + $0x20] sm:$0xff] (!%p13069_p9) }
 0x5a5   : > { %11226 = vmatpush1.bf16.msra.mxu0 %v15491_v4  ;;  %10325 = vmatprep.subr.bf16.mxu1 %v15496_v38  ;;  %v11301_v4 = vld [vmem:[#allocation3 + $0x30] sm:$0xff] (!%p13069_p9)  ;;  %v11304_v38 = vld [vmem:[#allocation3 + $0x48] sm:$0xff] (!%p13069_p9) }
 0x5a6   : > { %11227 = vmatprep.subr.bf16.mxu0 %v15499_v59  ;;  %v11306_v59 = vld [vmem:[#allocation3 + $0x58] sm:$0xff] (!%p13069_p9) }
 0x5a8   : > { %10326 = vmatpush1.bf16.msra.mxu1 %v15494_v5  ;;  %v13118_v5 = vpack.c.bf16 (!%p13069_p9), %v11301_v4, %v11299_v54  ;;  %v11292_v54 = vstv (!%p13069_p9), %s17616_s17  ;;  %v13184_v4 = vpack.c.bf16 (!%p13069_p9), %v11482_v46, %v11481_v39  ;;  %v11348_v46 = vld [vmem:[#allocation3 + $0x1a8] sm:$0xff] (!%p13069_p9) }
 0x5a9   : > { %11228 = vmatpush1.bf16.msra.mxu0 %v15497_v60  ;;  %10327 = vmatprep.subr.bf16.mxu1 %v15502_v6  ;;  %v13120_v60 = vpack.c.bf16 (!%p13069_p9), %v11306_v59, %v11304_v38  ;;  %v11303_v6 = vld [vmem:[#allocation3 + $0x40] sm:$0xff] (!%p13069_p9) }
 0x5aa   : > { %11229 = vmatprep.subr.bf16.mxu0 %v15505_v7  ;;  %v11305_v7 = vld [vmem:[#allocation3 + $0x50] sm:$0xff] (!%p13069_p9)  ;;  %v11465_v38 = vld [vmem:[%s17770_s5 + $0x20] sm:$0xff] (!%p13069_p9)  ;;  %v11466_v59 = vld [vmem:[%s17770_s5 + $0x28] sm:$0xff] (!%p13069_p9) }
 0x5ac   : > { %10328 = vmatpush1.bf16.msra.mxu1 %v15500_v8  ;;  %v11308_v8 = vld [vmem:[#allocation3 + $0x68] sm:$0xff] (!%p13069_p9) }
 0x5ad   : > { %11230 = vmatpush1.bf16.msra.mxu0 %v15503_v9  ;;  %10329 = vmatprep.subr.bf16.mxu1 %v15508_v0  ;;  %v11310_v9 = vld [vmem:[#allocation3 + $0x78] sm:$0xff] (!%p13069_p9)  ;;  %v13122_v0 = vpack.c.bf16 (!%p13069_p9), %v11305_v7, %v11303_v6  ;;  %v11483_v6 = vld [vmem:[%s17770_s5 + $0xb0] sm:$0xff] (!%p13069_p9) }
 0x5ae   : > { %11231 = vmatprep.subr.bf16.mxu0 %v15511_v11  ;;  %v13124_v11 = vpack.c.bf16 (!%p13069_p9), %v11310_v9, %v11308_v8  ;;  %v11484_v7 = vld [vmem:[%s17770_s5 + $0xb8] sm:$0xff] (!%p13069_p9)  ;;  %v13144_v8 = vpack.c.bf16 (!%p13069_p9), %v11330_v48, %v11328_v55  ;;  %v11327_v9 = vld [vmem:[#allocation3 + $0x100] sm:$0xff] (!%p13069_p9) }
 0x5af   : > { %v11350_v55 = vld [vmem:[#allocation3 + $0x1b8] sm:$0xff] (!%p13069_p9) }
 0x5b0   : > { %10330 = vmatpush1.bf16.msra.mxu1 %v15506_v12  ;;  %v11307_v12 = vld [vmem:[#allocation3 + $0x60] sm:$0xff] (!%p13069_p9) }
 0x5b1   : > { %11232 = vmatpush1.bf16.msra.mxu0 %v15509_v3  ;;  %10331 = vmatprep.subr.bf16.mxu1 %v15514_v2  ;;  %v11309_v3 = vld [vmem:[#allocation3 + $0x70] sm:$0xff] (!%p13069_p9)  ;;  %v11312_v2 = vld [vmem:[#allocation3 + $0x88] sm:$0xff] (!%p13069_p9) }
 0x5b2   : > { %11233 = vmatprep.subr.bf16.mxu0 %v15517_v37  ;;  %v11314_v37 = vld [vmem:[#allocation3 + $0x98] sm:$0xff] (!%p13069_p9) }
 0x5b4   : > { %10332 = vmatpush1.bf16.msra.mxu1 %v15512_v25  ;;  %v13126_v25 = vpack.c.bf16 (!%p13069_p9), %v11309_v3, %v11307_v12  ;;  %v11334_v12 = vld [vmem:[#allocation3 + $0x138] sm:$0xff] (!%p13069_p9) }
 0x5b5   : > { %11234 = vmatpush1.bf16.msra.mxu0 %v15515_v1  ;;  %10333 = vmatprep.subr.bf16.mxu1 %v15520_v16  ;;  %v13128_v1 = vpack.c.bf16 (!%p13069_p9), %v11314_v37, %v11312_v2  ;;  %v11311_v16 = vld [vmem:[#allocation3 + $0x80] sm:$0xff] (!%p13069_p9)  ;;  %v13186_v2 = vpack.c.bf16 (!%p13069_p9), %v11466_v59, %v11465_v38  ;;  %v13188_v37 = vpack.c.bf16 (!%p13069_p9), %v11484_v7, %v11483_v6  ;;  %v11354_v38 = vld [vmem:[#allocation3 + $0x1d8] sm:$0xff] (!%p13069_p9)  ;;  %v11353_v6 = vld [vmem:[#allocation3 + $0x1d0] sm:$0xff] (!%p13069_p9) }
 0x5b6   : > { %11235 = vmatprep.subr.bf16.mxu0 %v15523_v13  ;;  %v11313_v13 = vld [vmem:[#allocation3 + $0x90] sm:$0xff] (!%p13069_p9)  ;;  %v11356_v7 = vld [vmem:[#allocation3 + $0x1e8] sm:$0xff] (!%p13069_p9) }
 0x5b8   : > { %10334 = vmatpush1.bf16.msra.mxu1 %v15518_v58  ;;  %v11316_v58 = vld [vmem:[#allocation3 + $0xa8] sm:$0xff] (!%p13069_p9) }
 0x5b9   : > { %11236 = vmatpush1.bf16.msra.mxu0 %v15521_v57  ;;  %10335 = vmatprep.subr.bf16.mxu1 %v15526_v63  ;;  %v11318_v57 = vld [vmem:[#allocation3 + $0xb8] sm:$0xff] (!%p13069_p9)  ;;  %v13130_v63 = vpack.c.bf16 (!%p13069_p9), %v11313_v13, %v11311_v16 }
 0x5ba   : > { %11237 = vmatprep.subr.bf16.mxu0 %v15529_v53  ;;  %v13132_v53 = vpack.c.bf16 (!%p13069_p9), %v11318_v57, %v11316_v58  ;;  %v11485_v58 = vld [vmem:[%s17770_s5 + $0xc0] sm:$0xff] (!%p13069_p9)  ;;  %v11486_v57 = vld [vmem:[%s17770_s5 + $0xc8] sm:$0xff] (!%p13069_p9) }
 0x5bc   : > { %10336 = vmatpush1.bf16.msra.mxu1 %v15524_v61  ;;  %v11315_v61 = vld [vmem:[#allocation3 + $0xa0] sm:$0xff] (!%p13069_p9) }
 0x5bd   : > { %11238 = vmatpush1.bf16.msra.mxu0 %v15527_v26  ;;  %10337 = vmatprep.subr.bf16.mxu1 %v15532_v27  ;;  %v11317_v26 = vld [vmem:[#allocation3 + $0xb0] sm:$0xff] (!%p13069_p9)  ;;  %v11320_v27 = vld [vmem:[#allocation3 + $0xc8] sm:$0xff] (!%p13069_p9) }
 0x5be   : > { %11239 = vmatprep.subr.bf16.mxu0 %v15535_v28  ;;  %v11322_v28 = vld [vmem:[#allocation3 + $0xd8] sm:$0xff] (!%p13069_p9) }
 0x5c0   : > { %10338 = vmatpush1.bf16.msra.mxu1 %v15530_v29  ;;  %v11274_v29 = vsub.s32 (!%p13069_p9), 0, %v15818_v44 }
 0x5c1   : > { %11240 = vmatpush1.bf16.msra.mxu0 %v15533_v22  ;;  %10339 = vmatprep.subr.bf16.mxu1 %v15538_v17  ;;  %v11278_v22 = vsub.s32 (!%p13069_p9), 1, %v15818_v44  ;;  %v13134_v17 = vpack.c.bf16 (!%p13069_p9), %v11317_v26, %v11315_v61  ;;  %v11333_v61 = vld [vmem:[#allocation3 + $0x130] sm:$0xff] (!%p13069_p9) }
 0x5c2   : > { %11241 = vmatprep.subr.bf16.mxu0 %v15541_v45  ;;  %v11319_v45 = vld [vmem:[#allocation3 + $0xc0] sm:$0xff] (!%p13069_p9)  ;;  %v11275_v50 = vrot.slane (!%p13069_p9), %v11270_v20, %v11274_v29 }
 0x5c3   : > { %v11279_v10 = vrot.slane (!%p13069_p9), %v11270_v20, %v11278_v22  ;;  %v11488_v20 = vld [vmem:[%s17770_s5 + $0xd8] sm:$0xff] (!%p13069_p9) }
 0x5c4   : > { %10340 = vmatpush1.bf16.msra.mxu1 %v15536_v62  ;;  %v11321_v62 = vld [vmem:[#allocation3 + $0xd0] sm:$0xff] (!%p13069_p9) }
 0x5c5   : > { %11242 = vmatpush1.bf16.msra.mxu0 %v15539_v23  ;;  %v13136_v23 = vpack.c.bf16 (!%p13069_p9), %v11322_v28, %v11320_v27  ;;  %v11336_v27 = vld [vmem:[#allocation3 + $0x148] sm:$0xff] (!%p13069_p9)  ;;  %v11338_v28 = vld [vmem:[#allocation3 + $0x158] sm:$0xff] (!%p13069_p9) }
 0x5c6   : > { %13113 = vmatprep.subr.bf16.mxu0 (!%p13069_p9), %v13112_v47 }
 0x5c7   : > { %10342 = vmatmul.mubr.bf16.vlgmr.msra.gmra.mrb[0].mxu1 %v2071_v41  ;;  %v11324_v41 = vld [vmem:[#allocation3 + $0xe8] sm:$0xff] (!%p13069_p9) }
 0x5c8   : > { %11244 = vmatmul.mubr.bf16.vlgmr.msra.gmra.mrb[0].mxu0 %v2317_v24  ;;  %v11326_v24 = vld [vmem:[#allocation3 + $0xf8] sm:$0xff] (!%p13069_p9) }
 0x5c9   : > { %13115 = vmatpush1.bf16.msra.mxu0 (!%p13069_p9), %v13114_v40  ;;  %v13140_v56 = vpack.c.bf16 (!%p13069_p9), %v11326_v24, %v11324_v41  ;;  %v11470_v41 = vld [vmem:[%s17770_s5 + $0x48] sm:$0xff] (!%p13069_p9)  ;;  %v11487_v24 = vld [vmem:[%s17770_s5 + $0xd0] sm:$0xff] (!%p13069_p9) }
 0x5ca   : > { %13117 = vmatprep.subr.bf16.mxu0 (!%p13069_p9), %v13116_v18 }
 0x5cd   : > { %13119 = vmatpush1.bf16.msra.mxu0 (!%p13069_p9), %v13118_v5 }
 0x5ce   : > { %13121 = vmatprep.subr.bf16.mxu0 (!%p13069_p9), %v13120_v60 }
 0x5d1   : > { %13123 = vmatpush1.bf16.msra.mxu0 (!%p13069_p9), %v13122_v0  ;;  %v11329_v0 = vld [vmem:[#allocation3 + $0x110] sm:$0xff] (!%p13069_p9) }
 0x5d2   : > { %13125 = vmatprep.subr.bf16.mxu0 (!%p13069_p9), %v13124_v11  ;;  %v11332_v11 = vld [vmem:[#allocation3 + $0x128] sm:$0xff] (!%p13069_p9)  ;;  %v13146_v16 = vpack.c.bf16 (!%p13069_p9), %v11329_v0, %v11327_v9 }
 0x5d5   : > { %13127 = vmatpush1.bf16.msra.mxu0 (!%p13069_p9), %v13126_v25  ;;  %v11467_v25 = vld [vmem:[%s17770_s5 + $0x30] sm:$0xff] (!%p13069_p9) }
 0x5d6   : > { %13129 = vmatprep.subr.bf16.mxu0 (!%p13069_p9), %v13128_v1  ;;  %v11468_v1 = vld [vmem:[%s17770_s5 + $0x38] sm:$0xff] (!%p13069_p9) }
 0x5d9   : > { %13131 = vmatpush1.bf16.msra.mxu0 (!%p13069_p9), %v13130_v63  ;;  %v13148_v63 = vpack.c.bf16 (!%p13069_p9), %v11334_v12, %v11332_v11  ;;  %v11355_v11 = vld [vmem:[#allocation3 + $0x1e0] sm:$0xff] (!%p13069_p9)  ;;  %v11357_v12 = vld [vmem:[#allocation3 + $0x1f0] sm:$0xff] (!%p13069_p9) }
 0x5da   : > { %13133 = vmatprep.subr.bf16.mxu0 (!%p13069_p9), %v13132_v53  ;;  %v11331_v53 = vld [vmem:[#allocation3 + $0x120] sm:$0xff] (!%p13069_p9) }
 0x5dd   : > { %13135 = vmatpush1.bf16.msra.mxu0 (!%p13069_p9), %v13134_v17  ;;  %v13190_v17 = vpack.c.bf16 (!%p13069_p9), %v11468_v1, %v11467_v25  ;;  %v11473_v1 = vld [vmem:[%s17770_s5 + $0x60] sm:$0xff] (!%p13069_p9) }
 0x5de   : > { %13137 = vmatprep.subr.bf16.mxu0 (!%p13069_p9), %v13136_v23  ;;  %v11469_v23 = vld [vmem:[%s17770_s5 + $0x40] sm:$0xff] (!%p13069_p9) }
 0x69a   : > { %v10343_v30 = vpop.f32.mrb[0].mxu1 }
 0x69b   : > { %v11245_v33 = vpop.f32.mrb[0].mxu0  ;;  %v10345_v31 = vpop.f32.mrb[1].mxu1 }
 0x69c   : > { %v13208_v21 = vadd.f32 %v11245_v33, %v10343_v30  ;;  %v11247_v19 = vpop.f32.mrb[1].mxu0  ;;  %v10347_v32 = vpop.f32.mrb[2].mxu1  ;;  %v11477_v30 = vld [vmem:[%s17770_s5 + $0x80] sm:$0xff] (!%p13069_p9)  ;;  %v11478_v33 = vld [vmem:[%s17770_s5 + $0x88] sm:$0xff] (!%p13069_p9) }
 0x69d   : > { %v13209_v14 = vadd.f32 %v11247_v19, %v10345_v31  ;;  %v11249_v49 = vpop.f32.mrb[2].mxu0  ;;  %v10348_v36 = vpop.f32.mrb[3].mxu1  ;;  %v11323_v31 = vld [vmem:[#allocation3 + $0xe0] sm:$0xff] (!%p13069_p9)  ;;  %v13176_v19 = vpack.c.bf16 (!%p13069_p9), %v11478_v33, %v11477_v30  ;;  %v11479_v32 = vld [vmem:[%s17770_s5 + $0x90] sm:$0xff] (!%p13069_p9) }
 0x69e   : > { %v11250_v34 = vpop.f32.mrb[3].mxu0  ;;  %v11480_v49 = vld [vmem:[%s17770_s5 + $0x98] sm:$0xff] (!%p13069_p9)  ;;  %v13138_v36 = vpack.c.bf16 (!%p13069_p9), %v11321_v62, %v11319_v45  ;;  %v13142_v5 = vpack.c.bf16 (!%p13069_p9), %v11325_v43, %v11323_v31  ;;  %v13192_v62 = vpack.c.bf16 (!%p13069_p9), %v11486_v57, %v11485_v58  ;;  %v11340_v33 = vld [vmem:[#allocation3 + $0x168] sm:$0xff] (!%p13069_p9)  ;;  %v13194_v31 = vpack.c.bf16 (!%p13069_p9), %v11470_v41, %v11469_v23  ;;  %v11343_v43 = vld [vmem:[#allocation3 + $0x180] sm:$0xff] (!%p13069_p9) }
 0x69f   : > { %v11254_v51 = vcombine.low %v13208_v21, %v13209_v14  ;;  %11268 = sbr.rel (%p13069_p9) target bundleno = 2180 (0x884), region = 68  ;;  %v11461_v21 = vld [vmem:[%s17770_s5] sm:$0xff] (!%p13069_p9)  ;;  %v11462_v14 = vld [vmem:[%s17770_s5 + $0x8] sm:$0xff] (!%p13069_p9)  ;;  %v11280_v34 = vcombine.low (!%p13069_p9), %v11275_v50, %v11279_v10  ;;  %13177 = vmatprep.subr.bf16.mxu1 (!%p13069_p9), %v13176_v19  ;;  %v13152_v50 = vpack.c.bf16 (!%p13069_p9), %v11338_v28, %v11336_v27  ;;  %v11337_v30 = vld [vmem:[#allocation3 + $0x150] sm:$0xff] (!%p13069_p9)  ;;  %v13196_v19 = vpack.c.bf16 (!%p13069_p9), %v11488_v20, %v11487_v24 }
 0x6a0   : > { %13139 = vmatpush1.bf16.msra.mxu0 (!%p13069_p9), %v13138_v36  ;;  %v11335_v10 = vld [vmem:[#allocation3 + $0x140] sm:$0xff] (!%p13069_p9)  ;;  %v11491_v58 = vld [vmem:[%s17770_s5 + $0xf0] sm:$0xff] (!%p13069_p9)  ;;  %v11492_v57 = vld [vmem:[%s17770_s5 + $0xf8] sm:$0xff] (!%p13069_p9) }
 0x6a1   : > { %v11261_v42 = vrot.slane %v11254_v51, %v17610_v15  ;;  %v13178_v51 = vpack.c.bf16 (!%p13069_p9), %v11462_v14, %v11461_v21  ;;  %v11287_v40 = vrot.slane (!%p13069_p9), %v11280_v34, %v17610_v15  ;;  %13141 = vmatprep.subr.bf16.mxu0 (!%p13069_p9), %v13140_v56  ;;  %v11342_v21 = vld [vmem:[#allocation3 + $0x178] sm:$0xff] (!%p13069_p9)  ;;  %v11471_v14 = vld [vmem:[%s17770_s5 + $0x50] sm:$0xff] (!%p13069_p9)  ;;  %v11339_v34 = vld [vmem:[#allocation3 + $0x160] sm:$0xff] (!%p13069_p9) }
 0x6a2   : > { %v13156_v36 = vpack.c.bf16 (!%p13069_p9), %v11342_v21, %v11340_v33  ;;  %v11359_v27 = vld [vmem:[%s17769_s4] sm:$0x3] (!%p13069_p9) }
 0x6a3   : > { %v11263_v52 = vadd.f32 %v11261_v42, %v350_v35  ;;  %v13180_v35 = vpack.c.bf16 (!%p13069_p9), %v11480_v49, %v11479_v32  ;;  %v11463_v42 = vld [vmem:[%s17770_s5 + $0x10] sm:$0xff] (!%p13069_p9)  ;;  %13179 = vmatpush3.bf16.msra.mxu1 (!%p13069_p9), %v13178_v51  ;;  %v11472_v32 = vld [vmem:[%s17770_s5 + $0x58] sm:$0xff] (!%p13069_p9)  ;;  %v13154_v49 = vpack.c.bf16 (!%p13069_p9), %v11337_v30, %v11335_v10  ;;  %v11364_v28 = vrot.slane (!%p13069_p9), %v11359_v27, %v11274_v29  ;;  %v13071_v29 = vld [vmem:[%s17771_s6] ss:$0 sm:$0xff] (!%p13069_p9) }
 0x6a4   : > { %13143 = vmatpush1.bf16.msra.mxu0 (!%p13069_p9), %v13142_v5  ;;  %v11341_v51 = vld [vmem:[#allocation3 + $0x170] sm:$0xff] (!%p13069_p9) }
 0x6a5   : > { %11264 = vst [vmem:[#allocation2] sm:$0xf] %v11263_v52  ;;  %v11464_v52 = vld [vmem:[%s17770_s5 + $0x18] sm:$0xff] (!%p13069_p9)  ;;  %13181 = vmatprep.subr.bf16.mxu1 (!%p13069_p9), %v13180_v35  ;;  %13145 = vmatprep.subr.bf16.mxu0 (!%p13069_p9), %v13144_v8  ;;  %v11344_v35 = vld [vmem:[#allocation3 + $0x188] sm:$0xff] (!%p13069_p9)  ;;  %v13158_v39 = vpack.c.bf16 (!%p13069_p9), %v11341_v51, %v11339_v34 }
 0x6a6   : > { %v13182_v18 = vpack.c.bf16 %v11464_v52, %v11463_v42  ;;  %v11346_v42 = vld [vmem:[#allocation3 + $0x198] sm:$0xff]  ;;  %v13198_v52 = vpack.c.bf16 %v11472_v32, %v11471_v14 }
 0x6a7   : > { %v13160_v56 = vpack.c.bf16 %v11346_v42, %v11344_v35  ;;  %v11358_v8 = vld [vmem:[#allocation3 + $0x1f8] sm:$0xff] }
 0x6a8   : > { %13183 = vmatpush3.bf16.msra.mxu1 %v13182_v18  ;;  %13147 = vmatpush1.bf16.msra.mxu0 %v13146_v16  ;;  %v11347_v18 = vld [vmem:[#allocation3 + $0x1a0] sm:$0xff]  ;;  %v13172_v0 = vpack.c.bf16 %v11358_v8, %v11356_v7 }
 0x6a9   : > { %13185 = vmatprep.subr.bf16.mxu1 %v13184_v4  ;;  %13149 = vmatprep.subr.bf16.mxu0 %v13148_v63  ;;  %v11352_v4 = vld [vmem:[#allocation3 + $0x1c8] sm:$0xff]  ;;  %v13204_v63 = vpack.c.bf16 %v11492_v57, %v11491_v58 }
 0x6aa   : > { %v13168_v5 = vpack.c.bf16 %v11354_v38, %v11352_v4  ;;  %v11474_v16 = vld [vmem:[%s17770_s5 + $0x68] sm:$0xff] }
 0x6ac   : > { %v11269_v47 = vld [vmem:[#allocation2] sm:$0xf]  ;;  %13187 = vmatpush3.bf16.msra.mxu1 %v13186_v2 }
 0x6ad   : > { %v11289_v60 = vadd.f32 %v11287_v40, %v11269_v47  ;;  %13189 = vmatprep.subr.bf16.mxu1 %v13188_v37  ;;  %v11345_v47 = vld [vmem:[#allocation3 + $0x190] sm:$0xff]  ;;  %v13164_v40 = vpack.c.bf16 %v11350_v55, %v11348_v46  ;;  %v11489_v2 = vld [vmem:[%s17770_s5 + $0xe0] sm:$0xff]  ;;  %v11490_v37 = vld [vmem:[%s17770_s5 + $0xe8] sm:$0xff] }
 0x6ae   : > { %v13162_v48 = vpack.c.bf16 %v11345_v47, %v11343_v43  ;;  %v13200_v25 = vpack.c.bf16 %v11490_v37, %v11489_v2 }
 0x6af   : > { %vm11290_vm0 = vcmp.ge.f32.partialorder %v11289_v60, 0.0  ;;  %v11293_v3 = vmul.f32 %v11292_v54, %v11289_v60  ;;  %v11349_v54 = vld [vmem:[#allocation3 + $0x1b0] sm:$0xff] }
 0x6b0   : > { %13191 = vmatpush3.bf16.msra.mxu1 %v13190_v17  ;;  %v13166_v59 = vpack.c.bf16 %v11349_v54, %v11347_v18  ;;  %v11368_v17 = vrot.slane %v11359_v27, %v11278_v22 }
 0x6b1   : > { %v11294_v13 = vsel %vm11290_vm0, %v11289_v60, %v11293_v3  ;;  %13193 = vmatprep.subr.bf16.mxu1 %v13192_v62  ;;  %v11351_v60 = vld [vmem:[#allocation3 + $0x1c0] sm:$0xff]  ;;  %v13174_v3 = vpack.c.bf16 %v11357_v12, %v11355_v11  ;;  %v11456_v62 = vstv %s13070_s25 }
 0x6b2   : > { %v17682_v26 = vrot.slane %v11294_v13, %v17610_v15  ;;  %v13150_v15 = vpack.c.bf16 %v11333_v61, %v11331_v53  ;;  %v13170_v9 = vpack.c.bf16 %v11353_v6, %v11351_v60  ;;  %v13202_v13 = vpack.c.bf16 %v11474_v16, %v11473_v1  ;;  %v11475_v53 = vld [vmem:[%s17770_s5 + $0x70] sm:$0xff]  ;;  %v11476_v61 = vld [vmem:[%s17770_s5 + $0x78] sm:$0xff] }
 0x6b4   : > { %v11379_v45 = vcombine.high %v17682_v26, %v17682_v26  ;;  %13151 = vmatpush1.bf16.msra.mxu0 %v13150_v15  ;;  %13195 = vmatpush3.bf16.msra.mxu1 %v13194_v31 }
 0x6b5   : > { %13153 = vmatprep.subr.bf16.mxu0 %v13152_v50  ;;  %13197 = vmatprep.subr.bf16.mxu1 %v13196_v19 }
 0x6b6   : > { %11446 = vmatprep.mubr.f32.mxu0 %v11379_v45 }
 0x6b8   : > { %13155 = vmatpush1.bf16.msra.mxu0 %v13154_v49  ;;  %13199 = vmatpush3.bf16.msra.mxu1 %v13198_v52 }
 0x6b9   : > { %13157 = vmatprep.subr.bf16.mxu0 %v13156_v36  ;;  %13201 = vmatprep.subr.bf16.mxu1 %v13200_v25 }
 0x6bc   : > { %13159 = vmatpush1.bf16.msra.mxu0 %v13158_v39  ;;  %13203 = vmatpush3.bf16.msra.mxu1 %v13202_v13 }
 0x6bd   : > { %13161 = vmatprep.subr.bf16.mxu0 %v13160_v56  ;;  %13205 = vmatprep.subr.bf16.mxu1 %v13204_v63 }
 0x6c0   : > { %13163 = vmatpush1.bf16.msra.mxu0 %v13162_v48 }
 0x6c1   : > { %13165 = vmatprep.subr.bf16.mxu0 %v13164_v40 }
 0x6c4   : > { %13167 = vmatpush1.bf16.msra.mxu0 %v13166_v59 }
 0x6c5   : > { %13169 = vmatprep.subr.bf16.mxu0 %v13168_v5 }
 0x6c8   : > { %13171 = vmatpush1.bf16.msra.mxu0 %v13170_v9 }
 0x6c9   : > { %13173 = vmatprep.subr.bf16.mxu0 %v13172_v0 }
 0x6cc   : > { %13175 = vmatpush1.bf16.msra.mxu0 %v13174_v3 }
 0x6cf   : > { %11447 = vmatmul.mubr.f32.vlgmr.msra.gmra.mrb[0].mxu0 %v17682_v26  ;;  %v13206_v26 = vpack.c.bf16 %v11476_v61, %v11475_v53 }
 0x6d1   : > { %13207 = vmatpush3.bf16.msra.mxu1 %v13206_v26 }
 0x7a2   : > { %v11448_v45 = vpop.f32.mrb[0].mxu0 }
 0x7a3   : > { %v11449_v23 = vadd.f32 %v11448_v45, %v11364_v28  ;;  %v11450_v41 = vpop.f32.mrb[1].mxu0 }
 0x7a4   : > { %v11451_v15 = vadd.f32 %v11450_v41, %v11368_v17 }
 0x7a5   : > { %v11457_v24 = vmul.f32 %v11456_v62, %v11449_v23  ;;  %vm11453_vm2 = vcmp.ge.f32.partialorder %v11449_v23, 0.0 }
 0x7a6   : > { %vm11454_vm1 = vcmp.ge.f32.partialorder %v11451_v15, 0.0  ;;  %v11458_v20 = vmul.f32 %v11456_v62, %v11451_v15 }
 0x7a7   : > { %v11459_v10 = vsel %vm11453_vm2, %v11449_v23, %v11457_v24 }
 0x7a8   : > { %v11460_v50 = vsel %vm11454_vm1, %v11451_v15, %v11458_v20 }
 0x7a9   : > { %11564 = vmatprep.mubr.f32.mxu1 %v11460_v50 }
 0x7aa   : > { %11565 = vmatmul.mubr.f32.vlgmr.msra.gmra.mrb[0].mxu1 %v11459_v10 }
 0x87d   : > { %v13109_v30 = vpop.f32.mrb[0].mxu1 }
 0x87e   : > { %v13110_v44 = vpop.f32.mrb[1].mxu1 }
 0x87f   : > { %v13111_v22 = vadd.f32 %v13110_v44, %v13109_v30 }
 0x881   : > { %v11567_v33 = vadd.f32 %v13111_v22, %v13071_v29 }
 0x883   : > { %11570 = vst [vmem:[#allocation8] sm:$0x3] %v11567_v33 }
 0x884 PF: > { %p13401_p2 = scmp.eq.s32.totalorder %s15700_s28, 3  ;;  %s15648_s10 = smov [#allocation8]  }
 0x885   : > { %s11578_s9 = sshll.u32 %s15648_s10, 4  ;;  %s11579_s9 = int_to_ptr.vmem [resolvable:$true] %s11578_s9 }
 0x886   : > { %s15595_s11 = scalar_lea.vmem %s11579_s9, 32  ;;  %p15602_p11 = scmp.lt.s32.totalorder %s11579_s9, %s11579_s9 }
 0x887   : > { %p15596_p3 = scmp.ne.s32.totalorder %s11579_s9, %s15595_s11  ;;  %p15603_p12 = scmp.lt.s32.totalorder %s15595_s11, %s15595_s11 }
 0x889   : > { %p15597_p4 = pnand %p15596_p3, %p13401_p2  ;;  %p15604_p13 = por %p15603_p12, %p15602_p11 }
 0x88b   : > { %p15598_p10 = pneg %p15597_p4 }
 0x88d   : > { %p15605_p8 = pnand %p15604_p13, %p15598_p10 }
 0x88f   : > { %15608 = shalt.err (!%p15605_p8)
}
 0x890   : > { %s15609_s14 = scalar_lea.hbm %s17773_s8, 32 }
 0x891   : > { %p15610_p0 = scmp.ne.s32.totalorder %s17773_s8, %s15609_s14  ;;  %p15615_p5 = scmp.lt.u32.totalorder %s15609_s14, %s17773_s8 }
 0x893   : > { %p15611_p1 = pnand %p15610_p0, %p13401_p2 }
 0x895   : > { %p15612_p6 = pneg %p15611_p1 }
 0x897   : > { %p15617_p7 = pnand %p15615_p5, %p15612_p6 }
 0x899   : > { %15620 = shalt.err (!%p15617_p7)
}
 0x89a   : > { %13387 = dma.vmem_to_hbm [thread:$0]  (%p13401_p2), %s11579_s9, 32, %s17773_s8, [#allocation5]  }
 0x89b   : > { %15634 = dma.done.wait (%p13401_p2), [#allocation5], 32  }
 0x89c   : > { %15636 = vsyncadd (%p13401_p2), [#allocation5], 4294967264 }
 0x89d PF: > { %s21_s27 = sadd.s32 1, %s15639_s27  }
 0x89e   : > { %p18_p9 = scmp.ge.s32.totalorder %s21_s27, 6  }
 0x8a0   :  { %20 = sbr.rel (!%p18_p9) target bundleno = 3 (0x3), region = 100 }
 0x8a7   :  { %11591 = vsyncpa [#allocation4], 1 }
 0x8a8   :  { %11593 = vsyncpa [#allocation4 + $0x1], 1 }
 0x8a9   :  { %11594 = vsyncpa [#allocation5], 1 }
 0x8aa   :  { %11596 = vsyncpa [#allocation5 + $0x1], 1 }
 0x8ab   :  { %11597 = vsyncpa [#allocation6], 1 }
 0x8ac   :  { %11599 = vsyncpa [#allocation6 + $0x1], 1 }

</bundles_post_ra>
